<compile_context>
chip_gen: v6e
topology: v6e:2x2x1
jax: 0.10.0
libtpu: 0.0.40
codegen_flags: <defaults>
</compile_context>

<pallas_src>
import jax
import jax.numpy as jnp
import numpy as np
from jax import lax
from jax.experimental import pallas as pl
from jax.experimental.pallas import tpu as pltpu


def _round_up(x, m):
    return ((x + m - 1) // m) * m


# ------------------------------ Decoder kernel -------------------------------
# Single invocation; the time recurrence is an in-kernel unrolled fori_loop.

def decoder_kernel(len_ref, pg_ref, feat_ref, attimg_ref,
                   w_fused_ref, b_atth_ref, w_comb_ref, b_comb_ref,
                   w_outc_ref, b_out_ref,
                   out_ref, alpha_ref):
    T_steps = pg_ref.shape[0]
    B = pg_ref.shape[1]
    G = pg_ref.shape[2]                 # 4H
    H = b_atth_ref.shape[1]
    Vp = b_out_ref.shape[1]

    # Small loop-invariant operands: load once (hoisted above the time loop).
    lengths = len_ref[...]              # (B,1) int32
    w_fused = w_fused_ref[...]          # (H, 4H + Vp + H)
    b_atth = b_atth_ref[...]            # (1, H)
    w_comb = w_comb_ref[...][None, :, :]  # (1, H, 1)
    b_comb = b_comb_ref[...]            # (1, Lp)  (-1e30 on padded locations)
    w_outc = w_outc_ref[...]            # (C, Vp)
    b_out = b_out_ref[...]              # (1, Vp)

    def step(t, carry):
        c, gh = carry                   # c: (B,H);  gh = h_{t-1} @ w_hh: (B,4H)
        m = lengths > t                 # (B,1) bool mask: row still active

        # LSTMCell (gate order i,f,g,o).  Input-to-hidden pre-activations
        # (incl. the step-0 encoder path) were hoisted into pre_gates; the
        # recurrent h@w_hh term was produced by the previous iteration's
        # fused projection and is carried in `gh`.
        gates = pg_ref[t] + gh
        i_g = jax.nn.sigmoid(gates[:, 0 * H:1 * H])
        f_g = jax.nn.sigmoid(gates[:, 1 * H:2 * H])
        g_g = jnp.tanh(gates[:, 2 * H:3 * H])
        o_g = jax.nn.sigmoid(gates[:, 3 * H:4 * H])
        c_new = f_g * c + i_g * g_g
        h_new = o_g * jnp.tanh(c_new)

        # One same-LHS MXU push: h_new @ [w_hh | w_out_h | w_atth]
        # (column blocks at lane offsets 0 / G / G+Vp — all 128-aligned).
        hp = jnp.dot(h_new, w_fused, preferred_element_type=jnp.float32)
        gh_next = hp[:, :G]                         # next step's recurrent part
        out_h = hp[:, G:G + Vp]                     # h-part of output projection
        att_h = hp[:, G + Vp:] + b_atth             # attention query (B,H)

        # SpatialAttention, locations on the 128-lane axis.
        att = jax.nn.relu(attimg_ref[...] + att_h[:, :, None])       # (B,H,Lp)
        logits = jnp.sum(att * w_comb, axis=1) + b_comb               # (B,Lp)
        logits = logits - jnp.max(logits, axis=-1, keepdims=True)
        e = jnp.exp(logits)
        alphas = e * pl.reciprocal(jnp.sum(e, axis=-1, keepdims=True),
                                   approx=True)
        att_ctx = jnp.sum(feat_ref[...] * alphas[:, None, :], axis=2)  # (B,C)

        # linear(cat([dropout(h), att_context]))  (dropout = identity, eval);
        # the h-part already came out of the fused matmul above.
        out_t = (out_h
                 + jnp.dot(att_ctx, w_outc, preferred_element_type=jnp.float32)
                 + b_out)

        out_ref[t] = jnp.where(m, out_t, 0.0)
        alpha_ref[t] = jnp.where(m, alphas, 0.0)
        return c_new, gh_next

    c0 = jnp.zeros((B, H), jnp.float32)
    gh0 = jnp.zeros((B, G), jnp.float32)   # h_{-1} = 0  =>  h@w_hh = 0
    lax.fori_loop(0, T_steps, step, (c0, gh0), unroll=True)


def run_decoder(len_col, pre_gates, feats_t, att_img, w_fused, b_atth,
                w_comb_col, b_comb_vec, w_out_c, b_out):
    T_steps, B_pad, _ = pre_gates.shape
    L_pad = feats_t.shape[2]
    V_pad = b_out.shape[1]
    vmem = pl.BlockSpec(memory_space=pltpu.MemorySpace.VMEM)
    return pl.pallas_call(
        decoder_kernel,
        out_shape=(jax.ShapeDtypeStruct((T_steps, B_pad, V_pad), jnp.float32),
                   jax.ShapeDtypeStruct((T_steps, B_pad, L_pad), jnp.float32)),
        in_specs=[vmem] * 10,
        out_specs=(vmem, vmem),
    )(len_col, pre_gates, feats_t, att_img, w_fused, b_atth,
      w_comb_col, b_comb_vec, w_out_c, b_out)


# --------------------------------- Full model ---------------------------------

def spatial_attention_encoder_decoder_forward(
        images, init_features, captions, lengths, persist_features, params):
    """Mirror of SpatialAttentionEncoderDecoder.forward (eval mode)."""
    del images  # only consumed by internal CNN backbones (none configured)
    B, T = captions.shape
    seq_length = T + 1
    T_steps = seq_length - 1           # == T
    V, E = params['embed_table'].shape
    H = params['w_hh'].shape[0]
    L, C = persist_features.shape[1], persist_features.shape[2]

    B_pad = _round_up(B, 8)            # sublane granule
    L_pad = _round_up(L, 128)          # lane-dense attention axis
    V_pad = _round_up(V, 128)          # lane-dense logits output

    # ---- EncoderCNN: fold eval-mode BatchNorm into the Linear weights ----
    s = params['bn_gamma'] / jnp.sqrt(params['bn_var'] + 1e-5)
    enc_w_eff = params['enc_w'] * s
    enc_b_eff = (params['enc_b'] - params['bn_mean']) * s + params['bn_beta']

    # ---- hoist ALL input-to-hidden pre-activations (incl. step 0) ----
    enc = init_features @ enc_w_eff + enc_b_eff                     # (B,E)
    gx0 = enc @ params['w_ih'] + params['b_lstm']                   # (B,4H)
    emb_tok = jnp.take(params['embed_table'], captions[:, :T_steps - 1], axis=0)
    pg_tok = (jnp.einsum('bte,eg->tbg', emb_tok, params['w_ih'])
              + params['b_lstm'][None])                             # (T-1,B,4H)
    pre_gates = jnp.concatenate([gx0[None], pg_tok], axis=0)        # (T,B,4H)

    # ---- hoist the time-invariant image-attention projection; L on lanes ----
    att_img = (jnp.einsum('blc,ch->bhl', persist_features, params['w_img'])
               + params['b_img'][0][None, :, None])                 # (B,H,L)
    feats_t = jnp.transpose(persist_features, (0, 2, 1))            # (B,C,L)

    # ---- pad batch / lane dims ----
    pad_rows = B_pad - B
    pre_gates_p = jnp.pad(pre_gates, ((0, 0), (0, pad_rows), (0, 0)))
    att_img_p = jnp.pad(att_img, ((0, pad_rows), (0, 0), (0, L_pad - L)))
    feats_p = jnp.pad(feats_t, ((0, pad_rows), (0, 0), (0, L_pad - L)))
    len_col = jnp.pad(jnp.asarray(lengths, jnp.int32), (0, pad_rows))[:, None]

    # fused same-LHS weight [w_hh | w_out_h | w_atth]  (all consume h_new)
    w_out_h_p = jnp.pad(params['w_out_h'], ((0, 0), (0, V_pad - V)))
    w_fused = jnp.concatenate([params['w_hh'], w_out_h_p, params['w_atth']],
                              axis=1)                                # (H,4H+Vp+H)
    w_out_c_p = jnp.pad(params['w_out_c'], ((0, 0), (0, V_pad - V)))
    b_out_p = jnp.pad(params['b_out'], ((0, 0), (0, V_pad - V)))
    w_comb_col = params['w_comb'].T                                  # (H,1)
    # location bias: b_comb for real locations, -1e30 for padded ones
    b_comb_vec = jnp.full((1, L_pad), -1e30, jnp.float32)
    b_comb_vec = b_comb_vec.at[:, :L].set(params['b_comb'][0, 0])

    outs_p, alphas_p = run_decoder(len_col, pre_gates_p, feats_p, att_img_p,
                                   w_fused, params['b_atth'], w_comb_col,
                                   b_comb_vec, w_out_c_p, b_out_p)

    # (B, seq_length, V/L); the final (never-written) time slot stays zero
    outputs = jnp.zeros((B, seq_length, V), jnp.float32)
    outputs = outputs.at[:, :T_steps].set(
        jnp.transpose(outs_p, (1, 0, 2))[:B, :, :V])
    alphas = jnp.zeros((B, seq_length, L), jnp.float32)
    alphas = alphas.at[:, :T_steps].set(
        jnp.transpose(alphas_p, (1, 0, 2))[:B, :, :L])

    # pack_padded_sequence(outputs, lengths, batch_first=True)[0]
    # (host-side python lengths; not jittable by design of this harness)
    max_len = max(lengths)
    packed = jnp.concatenate(
        [outputs[:sum(1 for l in lengths if l > t), t] for t in range(max_len)],
        axis=0)
    return packed, alphas, outputs


# ----------------------------- pure-JAX reference -----------------------------

def reference_forward(init_features, captions, lengths, feats, params):
    B, T = captions.shape
    seq_length = T + 1
    H = params['w_hh'].shape[0]
    V = params['embed_table'].shape[0]
    L = feats.shape[1]

    y = init_features @ params['enc_w'] + params['enc_b']
    enc = ((y - params['bn_mean']) / jnp.sqrt(params['bn_var'] + 1e-5)
           * params['bn_gamma'] + params['bn_beta'])
    emb = jnp.take(params['embed_table'], captions, axis=0)
    embeddings = jnp.concatenate([enc[:, None, :], emb], axis=1)

    h = jnp.zeros((B, H)); c = jnp.zeros((B, H))
    outputs = jnp.zeros((B, seq_length, V))
    alphas_all = jnp.zeros((B, seq_length, L))
    att_img = (jnp.einsum('blc,ch->blh', feats, params['w_img'])
               + params['b_img'][None])
    lengths_arr = jnp.asarray(lengths, dtype=jnp.int32)
    for t in range(seq_length - 1):
        m = (lengths_arr > t).astype(jnp.float32)[:, None]
        gates = (embeddings[:, t] @ params['w_ih'] + h @ params['w_hh']
                 + params['b_lstm'])
        i_g = jax.nn.sigmoid(gates[:, :H]); f_g = jax.nn.sigmoid(gates[:, H:2*H])
        g_g = jnp.tanh(gates[:, 2*H:3*H]); o_g = jax.nn.sigmoid(gates[:, 3*H:])
        c_new = f_g * c + i_g * g_g
        h_new = o_g * jnp.tanh(c_new)
        h = jnp.where(m > 0, h_new, h); c = jnp.where(m > 0, c_new, c)
        att_h = h_new @ params['w_atth'] + params['b_atth']
        att = jax.nn.relu(att_img + att_h[:, None, :])
        logits = (jnp.sum(att * params['w_comb'][None], axis=-1)
                  + params['b_comb'][0, 0])
        a = jax.nn.softmax(logits, axis=-1)
        ctx = jnp.sum(feats * a[:, :, None], axis=1)
        out_t = h_new @ params['w_out_h'] + ctx @ params['w_out_c'] + params['b_out']
        outputs = outputs.at[:, t].set(jnp.where(m > 0, out_t, 0.0))
        alphas_all = alphas_all.at[:, t].set(jnp.where(m > 0, a, 0.0))
    return outputs, alphas_all


# ------------------------------------ main ------------------------------------

if __name__ == "__main__":
    # Small, module-consistent shapes.
    B = 4          # batch
    T = 7          # caption length (seq_length = T + 1 = 8)
    Din = 24       # ef_dims[0]: external encoder feature dim
    E = 16         # embed_size
    H = 32         # hidden_size  (4H = 128, lane-dense gates)
    C = 16         # feature_size (ef_dims[1][0])
    Hs = Ws = 4    # spatial grid; L = num_attention_locs
    L = Hs * Ws
    V = 32         # vocab_size
    lengths = [7, 6, 5, 3]   # sorted descending (pack_padded_sequence contract)

    key = jax.random.PRNGKey(0)
    ks = jax.random.split(key, 24)
    f32 = jnp.float32

    def rnd(k, shape, s=0.1):
        return (s * jax.random.normal(k, shape)).astype(f32)

    params = dict(
        enc_w=rnd(ks[0], (Din, E)), enc_b=rnd(ks[1], (1, E)),
        bn_gamma=(1.0 + rnd(ks[2], (1, E))), bn_beta=rnd(ks[3], (1, E)),
        bn_mean=rnd(ks[4], (1, E)),
        bn_var=(0.5 + jnp.abs(rnd(ks[5], (1, E)))).astype(f32),
        embed_table=rnd(ks[6], (V, E)),
        w_ih=rnd(ks[7], (E, 4 * H)), w_hh=rnd(ks[8], (H, 4 * H)),
        b_lstm=rnd(ks[9], (1, 4 * H)),
        w_img=rnd(ks[10], (C, H)), b_img=rnd(ks[11], (1, H)),
        w_atth=rnd(ks[12], (H, H)), b_atth=rnd(ks[13], (1, H)),
        w_comb=rnd(ks[14], (1, H)), b_comb=rnd(ks[15], (1, 1)),
        w_out_h=rnd(ks[16], (H, V)), w_out_c=rnd(ks[17], (C, V)),
        b_out=rnd(ks[18], (1, V)),
    )

    images = rnd(ks[19], (B, 3, 16, 16))              # unused (no internal CNN)
    init_features = rnd(ks[20], (B, Din), s=1.0)
    captions = jax.random.randint(ks[21], (B, T), 1, V).astype(jnp.int32)
    persist_features = rnd(ks[22], (B, L, C), s=1.0)  # (B, L, C) channels-last

    packed, alphas, outputs = spatial_attention_encoder_decoder_forward(
        images, init_features, captions, lengths, persist_features, params)
    packed = jax.block_until_ready(packed)
    alphas = jax.block_until_ready(alphas)
    outputs = jax.block_until_ready(outputs)

    # correctness check against a pure-JAX reference
    ref_out, ref_alphas = reference_forward(
        init_features, captions, lengths, persist_features, params)
    assert np.allclose(np.asarray(outputs), np.asarray(ref_out),
                       atol=1e-2, rtol=1e-2)
    assert np.allclose(np.asarray(alphas), np.asarray(ref_alphas),
                       atol=1e-2, rtol=1e-2)
    assert packed.shape == (sum(lengths), V)
    assert alphas.shape == (B, T + 1, L)

    print("KERNEL_OK")
</pallas_src>

<mosaic_0001>
module attributes {stable_mosaic.version = 11 : i64} {
  func.func @decoder_kernel(%arg0: memref<8x1xi32, #tpu.memory_space<vmem>>, %arg1: memref<7x8x128xf32, #tpu.memory_space<vmem>>, %arg2: memref<8x16x128xf32, #tpu.memory_space<vmem>>, %arg3: memref<8x32x128xf32, #tpu.memory_space<vmem>>, %arg4: memref<32x288xf32, #tpu.memory_space<vmem>>, %arg5: memref<1x32xf32, #tpu.memory_space<vmem>>, %arg6: memref<32x1xf32, #tpu.memory_space<vmem>>, %arg7: memref<1x128xf32, #tpu.memory_space<vmem>>, %arg8: memref<16x128xf32, #tpu.memory_space<vmem>>, %arg9: memref<1x128xf32, #tpu.memory_space<vmem>>, %arg10: memref<7x8x128xf32, #tpu.memory_space<vmem>>, %arg11: memref<7x8x128xf32, #tpu.memory_space<vmem>>) attributes {dimension_semantics = [], scalar_prefetch = 0 : i64, scratch_operands = 0 : i64, tpu.core_type = #tpu.core_type<tc>} {
    %c0 = arith.constant 0 : index
    %c0_0 = arith.constant 0 : index
    %0 = vector.load %arg0[%c0, %c0_0] : memref<8x1xi32, #tpu.memory_space<vmem>>, vector<8x1xi32>
    %c0_1 = arith.constant 0 : index
    %c0_2 = arith.constant 0 : index
    %1 = vector.load %arg4[%c0_1, %c0_2] : memref<32x288xf32, #tpu.memory_space<vmem>>, vector<32x288xf32>
    %c0_3 = arith.constant 0 : index
    %c0_4 = arith.constant 0 : index
    %2 = vector.load %arg5[%c0_3, %c0_4] : memref<1x32xf32, #tpu.memory_space<vmem>>, vector<1x32xf32>
    %c0_5 = arith.constant 0 : index
    %c0_6 = arith.constant 0 : index
    %3 = vector.load %arg6[%c0_5, %c0_6] : memref<32x1xf32, #tpu.memory_space<vmem>>, vector<32x1xf32>
    %4 = vector.shape_cast %3 : vector<32x1xf32> to vector<1x32x1xf32>
    %c0_7 = arith.constant 0 : index
    %c0_8 = arith.constant 0 : index
    %5 = vector.load %arg7[%c0_7, %c0_8] : memref<1x128xf32, #tpu.memory_space<vmem>>, vector<1x128xf32>
    %c0_9 = arith.constant 0 : index
    %c0_10 = arith.constant 0 : index
    %6 = vector.load %arg8[%c0_9, %c0_10] : memref<16x128xf32, #tpu.memory_space<vmem>>, vector<16x128xf32>
    %c0_11 = arith.constant 0 : index
    %c0_12 = arith.constant 0 : index
    %7 = vector.load %arg9[%c0_11, %c0_12] : memref<1x128xf32, #tpu.memory_space<vmem>>, vector<1x128xf32>
    %cst = arith.constant 0.000000e+00 : f32
    %8 = vector.broadcast %cst : f32 to vector<8x32xf32>
    %cst_13 = arith.constant 0.000000e+00 : f32
    %9 = vector.broadcast %cst_13 : f32 to vector<8x128xf32>
    %c0_i32 = arith.constant 0 : i32
    %10 = vector.broadcast %c0_i32 : i32 to vector<8x1xi32>
    %11 = arith.cmpi sgt, %0, %10 : vector<8x1xi32>
    %12 = arith.index_cast %c0_i32 : i32 to index
    %c0_14 = arith.constant 0 : index
    %c0_15 = arith.constant 0 : index
    %13 = vector.load %arg1[%12, %c0_14, %c0_15] : memref<7x8x128xf32, #tpu.memory_space<vmem>>, vector<1x8x128xf32>
    %14 = vector.shape_cast %13 : vector<1x8x128xf32> to vector<8x128xf32>
    %15 = arith.addf %14, %9 : vector<8x128xf32>
    %16 = vector.extract_strided_slice %15 {offsets = [0, 0], sizes = [8, 32], strides = [1, 1]} : vector<8x128xf32> to vector<8x32xf32>
    %17 = arith.negf %16 : vector<8x32xf32>
    %18 = math.exp %17 : vector<8x32xf32>
    %cst_16 = arith.constant 1.000000e+00 : f32
    %19 = vector.broadcast %cst_16 : f32 to vector<8x32xf32>
    %20 = arith.addf %19, %18 : vector<8x32xf32>
    %21 = arith.divf %19, %20 : vector<8x32xf32>
    %22 = vector.extract_strided_slice %15 {offsets = [0, 32], sizes = [8, 32], strides = [1, 1]} : vector<8x128xf32> to vector<8x32xf32>
    %23 = arith.negf %22 : vector<8x32xf32>
    %24 = math.exp %23 : vector<8x32xf32>
    %cst_17 = arith.constant 1.000000e+00 : f32
    %25 = vector.broadcast %cst_17 : f32 to vector<8x32xf32>
    %26 = arith.addf %25, %24 : vector<8x32xf32>
    %27 = arith.divf %25, %26 : vector<8x32xf32>
    %28 = vector.extract_strided_slice %15 {offsets = [0, 64], sizes = [8, 32], strides = [1, 1]} : vector<8x128xf32> to vector<8x32xf32>
    %29 = math.tanh %28 : vector<8x32xf32>
    %30 = vector.extract_strided_slice %15 {offsets = [0, 96], sizes = [8, 32], strides = [1, 1]} : vector<8x128xf32> to vector<8x32xf32>
    %31 = arith.negf %30 : vector<8x32xf32>
    %32 = math.exp %31 : vector<8x32xf32>
    %cst_18 = arith.constant 1.000000e+00 : f32
    %33 = vector.broadcast %cst_18 : f32 to vector<8x32xf32>
    %34 = arith.addf %33, %32 : vector<8x32xf32>
    %35 = arith.divf %33, %34 : vector<8x32xf32>
    %36 = arith.mulf %27, %8 : vector<8x32xf32>
    %37 = arith.mulf %21, %29 : vector<8x32xf32>
    %38 = arith.addf %36, %37 : vector<8x32xf32>
    %39 = math.tanh %38 : vector<8x32xf32>
    %40 = arith.mulf %35, %39 : vector<8x32xf32>
    %cst_19 = arith.constant dense<0.000000e+00> : vector<8x288xf32>
    %41 = tpu.matmul %40, %1, %cst_19 {dimension_numbers = #tpu.dot_dimension_numbers<[1], [0], [0], [1], [0, 0, 1, 1], [], []>} : vector<8x32xf32>, vector<32x288xf32>, vector<8x288xf32> -> vector<8x288xf32>
    %42 = vector.extract_strided_slice %41 {offsets = [0, 0], sizes = [8, 128], strides = [1, 1]} : vector<8x288xf32> to vector<8x128xf32>
    %43 = vector.extract_strided_slice %41 {offsets = [0, 128], sizes = [8, 128], strides = [1, 1]} : vector<8x288xf32> to vector<8x128xf32>
    %44 = vector.extract_strided_slice %41 {offsets = [0, 256], sizes = [8, 32], strides = [1, 1]} : vector<8x288xf32> to vector<8x32xf32>
    %45 = vector.broadcast %2 : vector<1x32xf32> to vector<8x32xf32>
    %46 = arith.addf %44, %45 : vector<8x32xf32>
    %c0_20 = arith.constant 0 : index
    %c0_21 = arith.constant 0 : index
    %c0_22 = arith.constant 0 : index
    %47 = vector.load %arg3[%c0_20, %c0_21, %c0_22] : memref<8x32x128xf32, #tpu.memory_space<vmem>>, vector<8x32x128xf32>
    %48 = vector.shape_cast %46 : vector<8x32xf32> to vector<8x32x1xf32>
    %49 = vector.broadcast %48 : vector<8x32x1xf32> to vector<8x32x128xf32>
    %50 = arith.addf %47, %49 : vector<8x32x128xf32>
    %cst_23 = arith.constant 0.000000e+00 : f32
    %51 = vector.broadcast %cst_23 : f32 to vector<8x32x128xf32>
    %52 = arith.maximumf %50, %51 : vector<8x32x128xf32>
    %53 = vector.broadcast %4 : vector<1x32x1xf32> to vector<8x32x128xf32>
    %54 = arith.mulf %52, %53 : vector<8x32x128xf32>
    %cst_24 = arith.constant dense<0.000000e+00> : vector<8x128xf32>
    %55 = vector.multi_reduction <add>, %54, %cst_24 [1] : vector<8x32x128xf32> to vector<8x128xf32>
    %56 = vector.broadcast %5 : vector<1x128xf32> to vector<8x128xf32>
    %57 = arith.addf %55, %56 : vector<8x128xf32>
    %cst_25 = arith.constant dense<0xFF800000> : vector<8xf32>
    %58 = vector.multi_reduction <maximumf>, %57, %cst_25 [1] : vector<8x128xf32> to vector<8xf32>
    %59 = vector.shape_cast %58 : vector<8xf32> to vector<8x1xf32>
    %60 = vector.broadcast %59 : vector<8x1xf32> to vector<8x128xf32>
    %61 = arith.subf %57, %60 : vector<8x128xf32>
    %62 = math.exp %61 : vector<8x128xf32>
    %cst_26 = arith.constant dense<0.000000e+00> : vector<8xf32>
    %63 = vector.multi_reduction <add>, %62, %cst_26 [1] : vector<8x128xf32> to vector<8xf32>
    %64 = vector.shape_cast %63 : vector<8xf32> to vector<8x1xf32>
    %65 = tpu.reciprocal %64 {approx = true} : vector<8x1xf32> -> vector<8x1xf32>
    %66 = vector.broadcast %65 : vector<8x1xf32> to vector<8x128xf32>
    %67 = arith.mulf %62, %66 : vector<8x128xf32>
    %c0_27 = arith.constant 0 : index
    %c0_28 = arith.constant 0 : index
    %c0_29 = arith.constant 0 : index
    %68 = vector.load %arg2[%c0_27, %c0_28, %c0_29] : memref<8x16x128xf32, #tpu.memory_space<vmem>>, vector<8x16x128xf32>
    %69 = vector.shape_cast %67 : vector<8x128xf32> to vector<8x1x128xf32>
    %70 = vector.broadcast %69 : vector<8x1x128xf32> to vector<8x16x128xf32>
    %71 = arith.mulf %68, %70 : vector<8x16x128xf32>
    %cst_30 = arith.constant dense<0.000000e+00> : vector<8x16xf32>
    %72 = vector.multi_reduction <add>, %71, %cst_30 [2] : vector<8x16x128xf32> to vector<8x16xf32>
    %cst_31 = arith.constant dense<0.000000e+00> : vector<8x128xf32>
    %73 = tpu.matmul %72, %6, %cst_31 {dimension_numbers = #tpu.dot_dimension_numbers<[1], [0], [0], [1], [0, 0, 1, 1], [], []>} : vector<8x16xf32>, vector<16x128xf32>, vector<8x128xf32> -> vector<8x128xf32>
    %74 = arith.addf %43, %73 : vector<8x128xf32>
    %75 = vector.broadcast %7 : vector<1x128xf32> to vector<8x128xf32>
    %76 = arith.addf %74, %75 : vector<8x128xf32>
    %cst_32 = arith.constant 0.000000e+00 : f32
    %77 = vector.shape_cast %11 : vector<8x1xi1> to vector<8x1xi1>
    %78 = vector.broadcast %77 : vector<8x1xi1> to vector<8x128xi1>
    %79 = vector.broadcast %cst_32 : f32 to vector<8x128xf32>
    %80 = arith.select %78, %76, %79 : vector<8x128xi1>, vector<8x128xf32>
    %81 = arith.index_cast %c0_i32 : i32 to index
    %c0_33 = arith.constant 0 : index
    %c0_34 = arith.constant 0 : index
    %82 = vector.load %arg10[%81, %c0_33, %c0_34] : memref<7x8x128xf32, #tpu.memory_space<vmem>>, vector<1x8x128xf32>
    %83 = vector.shape_cast %82 : vector<1x8x128xf32> to vector<8x128xf32>
    %84 = vector.shape_cast %80 : vector<8x128xf32> to vector<1x8x128xf32>
    tpu.vector_store %arg10[%81, %c0_33, %c0_34], %84 {strides = array<i32>} : memref<7x8x128xf32, #tpu.memory_space<vmem>>, vector<1x8x128xf32>,
    %cst_35 = arith.constant 0.000000e+00 : f32
    %85 = vector.shape_cast %11 : vector<8x1xi1> to vector<8x1xi1>
    %86 = vector.broadcast %85 : vector<8x1xi1> to vector<8x128xi1>
    %87 = vector.broadcast %cst_35 : f32 to vector<8x128xf32>
    %88 = arith.select %86, %67, %87 : vector<8x128xi1>, vector<8x128xf32>
    %89 = arith.index_cast %c0_i32 : i32 to index
    %c0_36 = arith.constant 0 : index
    %c0_37 = arith.constant 0 : index
    %90 = vector.load %arg11[%89, %c0_36, %c0_37] : memref<7x8x128xf32, #tpu.memory_space<vmem>>, vector<1x8x128xf32>
    %91 = vector.shape_cast %90 : vector<1x8x128xf32> to vector<8x128xf32>
    %92 = vector.shape_cast %88 : vector<8x128xf32> to vector<1x8x128xf32>
    tpu.vector_store %arg11[%89, %c0_36, %c0_37], %92 {strides = array<i32>} : memref<7x8x128xf32, #tpu.memory_space<vmem>>, vector<1x8x128xf32>,
    %c1_i32 = arith.constant 1 : i32
    %93 = vector.broadcast %c1_i32 : i32 to vector<8x1xi32>
    %94 = arith.cmpi sgt, %0, %93 : vector<8x1xi32>
    %95 = arith.index_cast %c1_i32 : i32 to index
    %c0_38 = arith.constant 0 : index
    %c0_39 = arith.constant 0 : index
    %96 = vector.load %arg1[%95, %c0_38, %c0_39] : memref<7x8x128xf32, #tpu.memory_space<vmem>>, vector<1x8x128xf32>
    %97 = vector.shape_cast %96 : vector<1x8x128xf32> to vector<8x128xf32>
    %98 = arith.addf %97, %42 : vector<8x128xf32>
    %99 = vector.extract_strided_slice %98 {offsets = [0, 0], sizes = [8, 32], strides = [1, 1]} : vector<8x128xf32> to vector<8x32xf32>
    %100 = arith.negf %99 : vector<8x32xf32>
    %101 = math.exp %100 : vector<8x32xf32>
    %cst_40 = arith.constant 1.000000e+00 : f32
    %102 = vector.broadcast %cst_40 : f32 to vector<8x32xf32>
    %103 = arith.addf %102, %101 : vector<8x32xf32>
    %104 = arith.divf %102, %103 : vector<8x32xf32>
    %105 = vector.extract_strided_slice %98 {offsets = [0, 32], sizes = [8, 32], strides = [1, 1]} : vector<8x128xf32> to vector<8x32xf32>
    %106 = arith.negf %105 : vector<8x32xf32>
    %107 = math.exp %106 : vector<8x32xf32>
    %cst_41 = arith.constant 1.000000e+00 : f32
    %108 = vector.broadcast %cst_41 : f32 to vector<8x32xf32>
    %109 = arith.addf %108, %107 : vector<8x32xf32>
    %110 = arith.divf %108, %109 : vector<8x32xf32>
    %111 = vector.extract_strided_slice %98 {offsets = [0, 64], sizes = [8, 32], strides = [1, 1]} : vector<8x128xf32> to vector<8x32xf32>
    %112 = math.tanh %111 : vector<8x32xf32>
    %113 = vector.extract_strided_slice %98 {offsets = [0, 96], sizes = [8, 32], strides = [1, 1]} : vector<8x128xf32> to vector<8x32xf32>
    %114 = arith.negf %113 : vector<8x32xf32>
    %115 = math.exp %114 : vector<8x32xf32>
    %cst_42 = arith.constant 1.000000e+00 : f32
    %116 = vector.broadcast %cst_42 : f32 to vector<8x32xf32>
    %117 = arith.addf %116, %115 : vector<8x32xf32>
    %118 = arith.divf %116, %117 : vector<8x32xf32>
    %119 = arith.mulf %110, %38 : vector<8x32xf32>
    %120 = arith.mulf %104, %112 : vector<8x32xf32>
    %121 = arith.addf %119, %120 : vector<8x32xf32>
    %122 = math.tanh %121 : vector<8x32xf32>
    %123 = arith.mulf %118, %122 : vector<8x32xf32>
    %cst_43 = arith.constant dense<0.000000e+00> : vector<8x288xf32>
    %124 = tpu.matmul %123, %1, %cst_43 {dimension_numbers = #tpu.dot_dimension_numbers<[1], [0], [0], [1], [0, 0, 1, 1], [], []>} : vector<8x32xf32>, vector<32x288xf32>, vector<8x288xf32> -> vector<8x288xf32>
    %125 = vector.extract_strided_slice %124 {offsets = [0, 0], sizes = [8, 128], strides = [1, 1]} : vector<8x288xf32> to vector<8x128xf32>
    %126 = vector.extract_strided_slice %124 {offsets = [0, 128], sizes = [8, 128], strides = [1, 1]} : vector<8x288xf32> to vector<8x128xf32>
    %127 = vector.extract_strided_slice %124 {offsets = [0, 256], sizes = [8, 32], strides = [1, 1]} : vector<8x288xf32> to vector<8x32xf32>
    %128 = vector.broadcast %2 : vector<1x32xf32> to vector<8x32xf32>
    %129 = arith.addf %127, %128 : vector<8x32xf32>
    %c0_44 = arith.constant 0 : index
    %c0_45 = arith.constant 0 : index
    %c0_46 = arith.constant 0 : index
    %130 = vector.load %arg3[%c0_44, %c0_45, %c0_46] : memref<8x32x128xf32, #tpu.memory_space<vmem>>, vector<8x32x128xf32>
    %131 = vector.shape_cast %129 : vector<8x32xf32> to vector<8x32x1xf32>
    %132 = vector.broadcast %131 : vector<8x32x1xf32> to vector<8x32x128xf32>
    %133 = arith.addf %130, %132 : vector<8x32x128xf32>
    %cst_47 = arith.constant 0.000000e+00 : f32
    %134 = vector.broadcast %cst_47 : f32 to vector<8x32x128xf32>
    %135 = arith.maximumf %133, %134 : vector<8x32x128xf32>
    %136 = vector.broadcast %4 : vector<1x32x1xf32> to vector<8x32x128xf32>
    %137 = arith.mulf %135, %136 : vector<8x32x128xf32>
    %cst_48 = arith.constant dense<0.000000e+00> : vector<8x128xf32>
    %138 = vector.multi_reduction <add>, %137, %cst_48 [1] : vector<8x32x128xf32> to vector<8x128xf32>
    %139 = vector.broadcast %5 : vector<1x128xf32> to vector<8x128xf32>
    %140 = arith.addf %138, %139 : vector<8x128xf32>
    %cst_49 = arith.constant dense<0xFF800000> : vector<8xf32>
    %141 = vector.multi_reduction <maximumf>, %140, %cst_49 [1] : vector<8x128xf32> to vector<8xf32>
    %142 = vector.shape_cast %141 : vector<8xf32> to vector<8x1xf32>
    %143 = vector.broadcast %142 : vector<8x1xf32> to vector<8x128xf32>
    %144 = arith.subf %140, %143 : vector<8x128xf32>
    %145 = math.exp %144 : vector<8x128xf32>
    %cst_50 = arith.constant dense<0.000000e+00> : vector<8xf32>
    %146 = vector.multi_reduction <add>, %145, %cst_50 [1] : vector<8x128xf32> to vector<8xf32>
    %147 = vector.shape_cast %146 : vector<8xf32> to vector<8x1xf32>
    %148 = tpu.reciprocal %147 {approx = true} : vector<8x1xf32> -> vector<8x1xf32>
    %149 = vector.broadcast %148 : vector<8x1xf32> to vector<8x128xf32>
    %150 = arith.mulf %145, %149 : vector<8x128xf32>
    %c0_51 = arith.constant 0 : index
    %c0_52 = arith.constant 0 : index
    %c0_53 = arith.constant 0 : index
    %151 = vector.load %arg2[%c0_51, %c0_52, %c0_53] : memref<8x16x128xf32, #tpu.memory_space<vmem>>, vector<8x16x128xf32>
    %152 = vector.shape_cast %150 : vector<8x128xf32> to vector<8x1x128xf32>
    %153 = vector.broadcast %152 : vector<8x1x128xf32> to vector<8x16x128xf32>
    %154 = arith.mulf %151, %153 : vector<8x16x128xf32>
    %cst_54 = arith.constant dense<0.000000e+00> : vector<8x16xf32>
    %155 = vector.multi_reduction <add>, %154, %cst_54 [2] : vector<8x16x128xf32> to vector<8x16xf32>
    %cst_55 = arith.constant dense<0.000000e+00> : vector<8x128xf32>
    %156 = tpu.matmul %155, %6, %cst_55 {dimension_numbers = #tpu.dot_dimension_numbers<[1], [0], [0], [1], [0, 0, 1, 1], [], []>} : vector<8x16xf32>, vector<16x128xf32>, vector<8x128xf32> -> vector<8x128xf32>
    %157 = arith.addf %126, %156 : vector<8x128xf32>
    %158 = vector.broadcast %7 : vector<1x128xf32> to vector<8x128xf32>
    %159 = arith.addf %157, %158 : vector<8x128xf32>
    %cst_56 = arith.constant 0.000000e+00 : f32
    %160 = vector.shape_cast %94 : vector<8x1xi1> to vector<8x1xi1>
    %161 = vector.broadcast %160 : vector<8x1xi1> to vector<8x128xi1>
    %162 = vector.broadcast %cst_56 : f32 to vector<8x128xf32>
    %163 = arith.select %161, %159, %162 : vector<8x128xi1>, vector<8x128xf32>
    %164 = arith.index_cast %c1_i32 : i32 to index
    %c0_57 = arith.constant 0 : index
    %c0_58 = arith.constant 0 : index
    %165 = vector.load %arg10[%164, %c0_57, %c0_58] : memref<7x8x128xf32, #tpu.memory_space<vmem>>, vector<1x8x128xf32>
    %166 = vector.shape_cast %165 : vector<1x8x128xf32> to vector<8x128xf32>
    %167 = vector.shape_cast %163 : vector<8x128xf32> to vector<1x8x128xf32>
    tpu.vector_store %arg10[%164, %c0_57, %c0_58], %167 {strides = array<i32>} : memref<7x8x128xf32, #tpu.memory_space<vmem>>, vector<1x8x128xf32>,
    %cst_59 = arith.constant 0.000000e+00 : f32
    %168 = vector.shape_cast %94 : vector<8x1xi1> to vector<8x1xi1>
    %169 = vector.broadcast %168 : vector<8x1xi1> to vector<8x128xi1>
    %170 = vector.broadcast %cst_59 : f32 to vector<8x128xf32>
    %171 = arith.select %169, %150, %170 : vector<8x128xi1>, vector<8x128xf32>
    %172 = arith.index_cast %c1_i32 : i32 to index
    %c0_60 = arith.constant 0 : index
    %c0_61 = arith.constant 0 : index
    %173 = vector.load %arg11[%172, %c0_60, %c0_61] : memref<7x8x128xf32, #tpu.memory_space<vmem>>, vector<1x8x128xf32>
    %174 = vector.shape_cast %173 : vector<1x8x128xf32> to vector<8x128xf32>
    %175 = vector.shape_cast %171 : vector<8x128xf32> to vector<1x8x128xf32>
    tpu.vector_store %arg11[%172, %c0_60, %c0_61], %175 {strides = array<i32>} : memref<7x8x128xf32, #tpu.memory_space<vmem>>, vector<1x8x128xf32>,
    %c2_i32 = arith.constant 2 : i32
    %176 = vector.broadcast %c2_i32 : i32 to vector<8x1xi32>
    %177 = arith.cmpi sgt, %0, %176 : vector<8x1xi32>
    %178 = arith.index_cast %c2_i32 : i32 to index
    %c0_62 = arith.constant 0 : index
    %c0_63 = arith.constant 0 : index
    %179 = vector.load %arg1[%178, %c0_62, %c0_63] : memref<7x8x128xf32, #tpu.memory_space<vmem>>, vector<1x8x128xf32>
    %180 = vector.shape_cast %179 : vector<1x8x128xf32> to vector<8x128xf32>
    %181 = arith.addf %180, %125 : vector<8x128xf32>
    %182 = vector.extract_strided_slice %181 {offsets = [0, 0], sizes = [8, 32], strides = [1, 1]} : vector<8x128xf32> to vector<8x32xf32>
    %183 = arith.negf %182 : vector<8x32xf32>
    %184 = math.exp %183 : vector<8x32xf32>
    %cst_64 = arith.constant 1.000000e+00 : f32
    %185 = vector.broadcast %cst_64 : f32 to vector<8x32xf32>
    %186 = arith.addf %185, %184 : vector<8x32xf32>
    %187 = arith.divf %185, %186 : vector<8x32xf32>
    %188 = vector.extract_strided_slice %181 {offsets = [0, 32], sizes = [8, 32], strides = [1, 1]} : vector<8x128xf32> to vector<8x32xf32>
    %189 = arith.negf %188 : vector<8x32xf32>
    %190 = math.exp %189 : vector<8x32xf32>
    %cst_65 = arith.constant 1.000000e+00 : f32
    %191 = vector.broadcast %cst_65 : f32 to vector<8x32xf32>
    %192 = arith.addf %191, %190 : vector<8x32xf32>
    %193 = arith.divf %191, %192 : vector<8x32xf32>
    %194 = vector.extract_strided_slice %181 {offsets = [0, 64], sizes = [8, 32], strides = [1, 1]} : vector<8x128xf32> to vector<8x32xf32>
    %195 = math.tanh %194 : vector<8x32xf32>
    %196 = vector.extract_strided_slice %181 {offsets = [0, 96], sizes = [8, 32], strides = [1, 1]} : vector<8x128xf32> to vector<8x32xf32>
    %197 = arith.negf %196 : vector<8x32xf32>
    %198 = math.exp %197 : vector<8x32xf32>
    %cst_66 = arith.constant 1.000000e+00 : f32
    %199 = vector.broadcast %cst_66 : f32 to vector<8x32xf32>
    %200 = arith.addf %199, %198 : vector<8x32xf32>
    %201 = arith.divf %199, %200 : vector<8x32xf32>
    %202 = arith.mulf %193, %121 : vector<8x32xf32>
    %203 = arith.mulf %187, %195 : vector<8x32xf32>
    %204 = arith.addf %202, %203 : vector<8x32xf32>
    %205 = math.tanh %204 : vector<8x32xf32>
    %206 = arith.mulf %201, %205 : vector<8x32xf32>
    %cst_67 = arith.constant dense<0.000000e+00> : vector<8x288xf32>
    %207 = tpu.matmul %206, %1, %cst_67 {dimension_numbers = #tpu.dot_dimension_numbers<[1], [0], [0], [1], [0, 0, 1, 1], [], []>} : vector<8x32xf32>, vector<32x288xf32>, vector<8x288xf32> -> vector<8x288xf32>
    %208 = vector.extract_strided_slice %207 {offsets = [0, 0], sizes = [8, 128], strides = [1, 1]} : vector<8x288xf32> to vector<8x128xf32>
    %209 = vector.extract_strided_slice %207 {offsets = [0, 128], sizes = [8, 128], strides = [1, 1]} : vector<8x288xf32> to vector<8x128xf32>
    %210 = vector.extract_strided_slice %207 {offsets = [0, 256], sizes = [8, 32], strides = [1, 1]} : vector<8x288xf32> to vector<8x32xf32>
    %211 = vector.broadcast %2 : vector<1x32xf32> to vector<8x32xf32>
    %212 = arith.addf %210, %211 : vector<8x32xf32>
    %c0_68 = arith.constant 0 : index
    %c0_69 = arith.constant 0 : index
    %c0_70 = arith.constant 0 : index
    %213 = vector.load %arg3[%c0_68, %c0_69, %c0_70] : memref<8x32x128xf32, #tpu.memory_space<vmem>>, vector<8x32x128xf32>
    %214 = vector.shape_cast %212 : vector<8x32xf32> to vector<8x32x1xf32>
    %215 = vector.broadcast %214 : vector<8x32x1xf32> to vector<8x32x128xf32>
    %216 = arith.addf %213, %215 : vector<8x32x128xf32>
    %cst_71 = arith.constant 0.000000e+00 : f32
    %217 = vector.broadcast %cst_71 : f32 to vector<8x32x128xf32>
    %218 = arith.maximumf %216, %217 : vector<8x32x128xf32>
    %219 = vector.broadcast %4 : vector<1x32x1xf32> to vector<8x32x128xf32>
    %220 = arith.mulf %218, %219 : vector<8x32x128xf32>
    %cst_72 = arith.constant dense<0.000000e+00> : vector<8x128xf32>
    %221 = vector.multi_reduction <add>, %220, %cst_72 [1] : vector<8x32x128xf32> to vector<8x128xf32>
    %222 = vector.broadcast %5 : vector<1x128xf32> to vector<8x128xf32>
    %223 = arith.addf %221, %222 : vector<8x128xf32>
    %cst_73 = arith.constant dense<0xFF800000> : vector<8xf32>
    %224 = vector.multi_reduction <maximumf>, %223, %cst_73 [1] : vector<8x128xf32> to vector<8xf32>
    %225 = vector.shape_cast %224 : vector<8xf32> to vector<8x1xf32>
    %226 = vector.broadcast %225 : vector<8x1xf32> to vector<8x128xf32>
    %227 = arith.subf %223, %226 : vector<8x128xf32>
    %228 = math.exp %227 : vector<8x128xf32>
    %cst_74 = arith.constant dense<0.000000e+00> : vector<8xf32>
    %229 = vector.multi_reduction <add>, %228, %cst_74 [1] : vector<8x128xf32> to vector<8xf32>
    %230 = vector.shape_cast %229 : vector<8xf32> to vector<8x1xf32>
    %231 = tpu.reciprocal %230 {approx = true} : vector<8x1xf32> -> vector<8x1xf32>
    %232 = vector.broadcast %231 : vector<8x1xf32> to vector<8x128xf32>
    %233 = arith.mulf %228, %232 : vector<8x128xf32>
    %c0_75 = arith.constant 0 : index
    %c0_76 = arith.constant 0 : index
    %c0_77 = arith.constant 0 : index
    %234 = vector.load %arg2[%c0_75, %c0_76, %c0_77] : memref<8x16x128xf32, #tpu.memory_space<vmem>>, vector<8x16x128xf32>
    %235 = vector.shape_cast %233 : vector<8x128xf32> to vector<8x1x128xf32>
    %236 = vector.broadcast %235 : vector<8x1x128xf32> to vector<8x16x128xf32>
    %237 = arith.mulf %234, %236 : vector<8x16x128xf32>
    %cst_78 = arith.constant dense<0.000000e+00> : vector<8x16xf32>
    %238 = vector.multi_reduction <add>, %237, %cst_78 [2] : vector<8x16x128xf32> to vector<8x16xf32>
    %cst_79 = arith.constant dense<0.000000e+00> : vector<8x128xf32>
    %239 = tpu.matmul %238, %6, %cst_79 {dimension_numbers = #tpu.dot_dimension_numbers<[1], [0], [0], [1], [0, 0, 1, 1], [], []>} : vector<8x16xf32>, vector<16x128xf32>, vector<8x128xf32> -> vector<8x128xf32>
    %240 = arith.addf %209, %239 : vector<8x128xf32>
    %241 = vector.broadcast %7 : vector<1x128xf32> to vector<8x128xf32>
    %242 = arith.addf %240, %241 : vector<8x128xf32>
    %cst_80 = arith.constant 0.000000e+00 : f32
    %243 = vector.shape_cast %177 : vector<8x1xi1> to vector<8x1xi1>
    %244 = vector.broadcast %243 : vector<8x1xi1> to vector<8x128xi1>
    %245 = vector.broadcast %cst_80 : f32 to vector<8x128xf32>
    %246 = arith.select %244, %242, %245 : vector<8x128xi1>, vector<8x128xf32>
    %247 = arith.index_cast %c2_i32 : i32 to index
    %c0_81 = arith.constant 0 : index
    %c0_82 = arith.constant 0 : index
    %248 = vector.load %arg10[%247, %c0_81, %c0_82] : memref<7x8x128xf32, #tpu.memory_space<vmem>>, vector<1x8x128xf32>
    %249 = vector.shape_cast %248 : vector<1x8x128xf32> to vector<8x128xf32>
    %250 = vector.shape_cast %246 : vector<8x128xf32> to vector<1x8x128xf32>
    tpu.vector_store %arg10[%247, %c0_81, %c0_82], %250 {strides = array<i32>} : memref<7x8x128xf32, #tpu.memory_space<vmem>>, vector<1x8x128xf32>,
    %cst_83 = arith.constant 0.000000e+00 : f32
    %251 = vector.shape_cast %177 : vector<8x1xi1> to vector<8x1xi1>
    %252 = vector.broadcast %251 : vector<8x1xi1> to vector<8x128xi1>
    %253 = vector.broadcast %cst_83 : f32 to vector<8x128xf32>
    %254 = arith.select %252, %233, %253 : vector<8x128xi1>, vector<8x128xf32>
    %255 = arith.index_cast %c2_i32 : i32 to index
    %c0_84 = arith.constant 0 : index
    %c0_85 = arith.constant 0 : index
    %256 = vector.load %arg11[%255, %c0_84, %c0_85] : memref<7x8x128xf32, #tpu.memory_space<vmem>>, vector<1x8x128xf32>
    %257 = vector.shape_cast %256 : vector<1x8x128xf32> to vector<8x128xf32>
    %258 = vector.shape_cast %254 : vector<8x128xf32> to vector<1x8x128xf32>
    tpu.vector_store %arg11[%255, %c0_84, %c0_85], %258 {strides = array<i32>} : memref<7x8x128xf32, #tpu.memory_space<vmem>>, vector<1x8x128xf32>,
    %c3_i32 = arith.constant 3 : i32
    %259 = vector.broadcast %c3_i32 : i32 to vector<8x1xi32>
    %260 = arith.cmpi sgt, %0, %259 : vector<8x1xi32>
    %261 = arith.index_cast %c3_i32 : i32 to index
    %c0_86 = arith.constant 0 : index
    %c0_87 = arith.constant 0 : index
    %262 = vector.load %arg1[%261, %c0_86, %c0_87] : memref<7x8x128xf32, #tpu.memory_space<vmem>>, vector<1x8x128xf32>
    %263 = vector.shape_cast %262 : vector<1x8x128xf32> to vector<8x128xf32>
    %264 = arith.addf %263, %208 : vector<8x128xf32>
    %265 = vector.extract_strided_slice %264 {offsets = [0, 0], sizes = [8, 32], strides = [1, 1]} : vector<8x128xf32> to vector<8x32xf32>
    %266 = arith.negf %265 : vector<8x32xf32>
    %267 = math.exp %266 : vector<8x32xf32>
    %cst_88 = arith.constant 1.000000e+00 : f32
    %268 = vector.broadcast %cst_88 : f32 to vector<8x32xf32>
    %269 = arith.addf %268, %267 : vector<8x32xf32>
    %270 = arith.divf %268, %269 : vector<8x32xf32>
    %271 = vector.extract_strided_slice %264 {offsets = [0, 32], sizes = [8, 32], strides = [1, 1]} : vector<8x128xf32> to vector<8x32xf32>
    %272 = arith.negf %271 : vector<8x32xf32>
    %273 = math.exp %272 : vector<8x32xf32>
    %cst_89 = arith.constant 1.000000e+00 : f32
    %274 = vector.broadcast %cst_89 : f32 to vector<8x32xf32>
    %275 = arith.addf %274, %273 : vector<8x32xf32>
    %276 = arith.divf %274, %275 : vector<8x32xf32>
    %277 = vector.extract_strided_slice %264 {offsets = [0, 64], sizes = [8, 32], strides = [1, 1]} : vector<8x128xf32> to vector<8x32xf32>
    %278 = math.tanh %277 : vector<8x32xf32>
    %279 = vector.extract_strided_slice %264 {offsets = [0, 96], sizes = [8, 32], strides = [1, 1]} : vector<8x128xf32> to vector<8x32xf32>
    %280 = arith.negf %279 : vector<8x32xf32>
    %281 = math.exp %280 : vector<8x32xf32>
    %cst_90 = arith.constant 1.000000e+00 : f32
    %282 = vector.broadcast %cst_90 : f32 to vector<8x32xf32>
    %283 = arith.addf %282, %281 : vector<8x32xf32>
    %284 = arith.divf %282, %283 : vector<8x32xf32>
    %285 = arith.mulf %276, %204 : vector<8x32xf32>
    %286 = arith.mulf %270, %278 : vector<8x32xf32>
    %287 = arith.addf %285, %286 : vector<8x32xf32>
    %288 = math.tanh %287 : vector<8x32xf32>
    %289 = arith.mulf %284, %288 : vector<8x32xf32>
    %cst_91 = arith.constant dense<0.000000e+00> : vector<8x288xf32>
    %290 = tpu.matmul %289, %1, %cst_91 {dimension_numbers = #tpu.dot_dimension_numbers<[1], [0], [0], [1], [0, 0, 1, 1], [], []>} : vector<8x32xf32>, vector<32x288xf32>, vector<8x288xf32> -> vector<8x288xf32>
    %291 = vector.extract_strided_slice %290 {offsets = [0, 0], sizes = [8, 128], strides = [1, 1]} : vector<8x288xf32> to vector<8x128xf32>
    %292 = vector.extract_strided_slice %290 {offsets = [0, 128], sizes = [8, 128], strides = [1, 1]} : vector<8x288xf32> to vector<8x128xf32>
    %293 = vector.extract_strided_slice %290 {offsets = [0, 256], sizes = [8, 32], strides = [1, 1]} : vector<8x288xf32> to vector<8x32xf32>
    %294 = vector.broadcast %2 : vector<1x32xf32> to vector<8x32xf32>
    %295 = arith.addf %293, %294 : vector<8x32xf32>
    %c0_92 = arith.constant 0 : index
    %c0_93 = arith.constant 0 : index
    %c0_94 = arith.constant 0 : index
    %296 = vector.load %arg3[%c0_92, %c0_93, %c0_94] : memref<8x32x128xf32, #tpu.memory_space<vmem>>, vector<8x32x128xf32>
    %297 = vector.shape_cast %295 : vector<8x32xf32> to vector<8x32x1xf32>
    %298 = vector.broadcast %297 : vector<8x32x1xf32> to vector<8x32x128xf32>
    %299 = arith.addf %296, %298 : vector<8x32x128xf32>
    %cst_95 = arith.constant 0.000000e+00 : f32
    %300 = vector.broadcast %cst_95 : f32 to vector<8x32x128xf32>
    %301 = arith.maximumf %299, %300 : vector<8x32x128xf32>
    %302 = vector.broadcast %4 : vector<1x32x1xf32> to vector<8x32x128xf32>
    %303 = arith.mulf %301, %302 : vector<8x32x128xf32>
    %cst_96 = arith.constant dense<0.000000e+00> : vector<8x128xf32>
    %304 = vector.multi_reduction <add>, %303, %cst_96 [1] : vector<8x32x128xf32> to vector<8x128xf32>
    %305 = vector.broadcast %5 : vector<1x128xf32> to vector<8x128xf32>
    %306 = arith.addf %304, %305 : vector<8x128xf32>
    %cst_97 = arith.constant dense<0xFF800000> : vector<8xf32>
    %307 = vector.multi_reduction <maximumf>, %306, %cst_97 [1] : vector<8x128xf32> to vector<8xf32>
    %308 = vector.shape_cast %307 : vector<8xf32> to vector<8x1xf32>
    %309 = vector.broadcast %308 : vector<8x1xf32> to vector<8x128xf32>
    %310 = arith.subf %306, %309 : vector<8x128xf32>
    %311 = math.exp %310 : vector<8x128xf32>
    %cst_98 = arith.constant dense<0.000000e+00> : vector<8xf32>
    %312 = vector.multi_reduction <add>, %311, %cst_98 [1] : vector<8x128xf32> to vector<8xf32>
    %313 = vector.shape_cast %312 : vector<8xf32> to vector<8x1xf32>
    %314 = tpu.reciprocal %313 {approx = true} : vector<8x1xf32> -> vector<8x1xf32>
    %315 = vector.broadcast %314 : vector<8x1xf32> to vector<8x128xf32>
    %316 = arith.mulf %311, %315 : vector<8x128xf32>
    %c0_99 = arith.constant 0 : index
    %c0_100 = arith.constant 0 : index
    %c0_101 = arith.constant 0 : index
    %317 = vector.load %arg2[%c0_99, %c0_100, %c0_101] : memref<8x16x128xf32, #tpu.memory_space<vmem>>, vector<8x16x128xf32>
    %318 = vector.shape_cast %316 : vector<8x128xf32> to vector<8x1x128xf32>
    %319 = vector.broadcast %318 : vector<8x1x128xf32> to vector<8x16x128xf32>
    %320 = arith.mulf %317, %319 : vector<8x16x128xf32>
    %cst_102 = arith.constant dense<0.000000e+00> : vector<8x16xf32>
    %321 = vector.multi_reduction <add>, %320, %cst_102 [2] : vector<8x16x128xf32> to vector<8x16xf32>
    %cst_103 = arith.constant dense<0.000000e+00> : vector<8x128xf32>
    %322 = tpu.matmul %321, %6, %cst_103 {dimension_numbers = #tpu.dot_dimension_numbers<[1], [0], [0], [1], [0, 0, 1, 1], [], []>} : vector<8x16xf32>, vector<16x128xf32>, vector<8x128xf32> -> vector<8x128xf32>
    %323 = arith.addf %292, %322 : vector<8x128xf32>
    %324 = vector.broadcast %7 : vector<1x128xf32> to vector<8x128xf32>
    %325 = arith.addf %323, %324 : vector<8x128xf32>
    %cst_104 = arith.constant 0.000000e+00 : f32
    %326 = vector.shape_cast %260 : vector<8x1xi1> to vector<8x1xi1>
    %327 = vector.broadcast %326 : vector<8x1xi1> to vector<8x128xi1>
    %328 = vector.broadcast %cst_104 : f32 to vector<8x128xf32>
    %329 = arith.select %327, %325, %328 : vector<8x128xi1>, vector<8x128xf32>
    %330 = arith.index_cast %c3_i32 : i32 to index
    %c0_105 = arith.constant 0 : index
    %c0_106 = arith.constant 0 : index
    %331 = vector.load %arg10[%330, %c0_105, %c0_106] : memref<7x8x128xf32, #tpu.memory_space<vmem>>, vector<1x8x128xf32>
    %332 = vector.shape_cast %331 : vector<1x8x128xf32> to vector<8x128xf32>
    %333 = vector.shape_cast %329 : vector<8x128xf32> to vector<1x8x128xf32>
    tpu.vector_store %arg10[%330, %c0_105, %c0_106], %333 {strides = array<i32>} : memref<7x8x128xf32, #tpu.memory_space<vmem>>, vector<1x8x128xf32>,
    %cst_107 = arith.constant 0.000000e+00 : f32
    %334 = vector.shape_cast %260 : vector<8x1xi1> to vector<8x1xi1>
    %335 = vector.broadcast %334 : vector<8x1xi1> to vector<8x128xi1>
    %336 = vector.broadcast %cst_107 : f32 to vector<8x128xf32>
    %337 = arith.select %335, %316, %336 : vector<8x128xi1>, vector<8x128xf32>
    %338 = arith.index_cast %c3_i32 : i32 to index
    %c0_108 = arith.constant 0 : index
    %c0_109 = arith.constant 0 : index
    %339 = vector.load %arg11[%338, %c0_108, %c0_109] : memref<7x8x128xf32, #tpu.memory_space<vmem>>, vector<1x8x128xf32>
    %340 = vector.shape_cast %339 : vector<1x8x128xf32> to vector<8x128xf32>
    %341 = vector.shape_cast %337 : vector<8x128xf32> to vector<1x8x128xf32>
    tpu.vector_store %arg11[%338, %c0_108, %c0_109], %341 {strides = array<i32>} : memref<7x8x128xf32, #tpu.memory_space<vmem>>, vector<1x8x128xf32>,
    %c4_i32 = arith.constant 4 : i32
    %342 = vector.broadcast %c4_i32 : i32 to vector<8x1xi32>
    %343 = arith.cmpi sgt, %0, %342 : vector<8x1xi32>
    %344 = arith.index_cast %c4_i32 : i32 to index
    %c0_110 = arith.constant 0 : index
    %c0_111 = arith.constant 0 : index
    %345 = vector.load %arg1[%344, %c0_110, %c0_111] : memref<7x8x128xf32, #tpu.memory_space<vmem>>, vector<1x8x128xf32>
    %346 = vector.shape_cast %345 : vector<1x8x128xf32> to vector<8x128xf32>
    %347 = arith.addf %346, %291 : vector<8x128xf32>
    %348 = vector.extract_strided_slice %347 {offsets = [0, 0], sizes = [8, 32], strides = [1, 1]} : vector<8x128xf32> to vector<8x32xf32>
    %349 = arith.negf %348 : vector<8x32xf32>
    %350 = math.exp %349 : vector<8x32xf32>
    %cst_112 = arith.constant 1.000000e+00 : f32
    %351 = vector.broadcast %cst_112 : f32 to vector<8x32xf32>
    %352 = arith.addf %351, %350 : vector<8x32xf32>
    %353 = arith.divf %351, %352 : vector<8x32xf32>
    %354 = vector.extract_strided_slice %347 {offsets = [0, 32], sizes = [8, 32], strides = [1, 1]} : vector<8x128xf32> to vector<8x32xf32>
    %355 = arith.negf %354 : vector<8x32xf32>
    %356 = math.exp %355 : vector<8x32xf32>
    %cst_113 = arith.constant 1.000000e+00 : f32
    %357 = vector.broadcast %cst_113 : f32 to vector<8x32xf32>
    %358 = arith.addf %357, %356 : vector<8x32xf32>
    %359 = arith.divf %357, %358 : vector<8x32xf32>
    %360 = vector.extract_strided_slice %347 {offsets = [0, 64], sizes = [8, 32], strides = [1, 1]} : vector<8x128xf32> to vector<8x32xf32>
    %361 = math.tanh %360 : vector<8x32xf32>
    %362 = vector.extract_strided_slice %347 {offsets = [0, 96], sizes = [8, 32], strides = [1, 1]} : vector<8x128xf32> to vector<8x32xf32>
    %363 = arith.negf %362 : vector<8x32xf32>
    %364 = math.exp %363 : vector<8x32xf32>
    %cst_114 = arith.constant 1.000000e+00 : f32
    %365 = vector.broadcast %cst_114 : f32 to vector<8x32xf32>
    %366 = arith.addf %365, %364 : vector<8x32xf32>
    %367 = arith.divf %365, %366 : vector<8x32xf32>
    %368 = arith.mulf %359, %287 : vector<8x32xf32>
    %369 = arith.mulf %353, %361 : vector<8x32xf32>
    %370 = arith.addf %368, %369 : vector<8x32xf32>
    %371 = math.tanh %370 : vector<8x32xf32>
    %372 = arith.mulf %367, %371 : vector<8x32xf32>
    %cst_115 = arith.constant dense<0.000000e+00> : vector<8x288xf32>
    %373 = tpu.matmul %372, %1, %cst_115 {dimension_numbers = #tpu.dot_dimension_numbers<[1], [0], [0], [1], [0, 0, 1, 1], [], []>} : vector<8x32xf32>, vector<32x288xf32>, vector<8x288xf32> -> vector<8x288xf32>
    %374 = vector.extract_strided_slice %373 {offsets = [0, 0], sizes = [8, 128], strides = [1, 1]} : vector<8x288xf32> to vector<8x128xf32>
    %375 = vector.extract_strided_slice %373 {offsets = [0, 128], sizes = [8, 128], strides = [1, 1]} : vector<8x288xf32> to vector<8x128xf32>
    %376 = vector.extract_strided_slice %373 {offsets = [0, 256], sizes = [8, 32], strides = [1, 1]} : vector<8x288xf32> to vector<8x32xf32>
    %377 = vector.broadcast %2 : vector<1x32xf32> to vector<8x32xf32>
    %378 = arith.addf %376, %377 : vector<8x32xf32>
    %c0_116 = arith.constant 0 : index
    %c0_117 = arith.constant 0 : index
    %c0_118 = arith.constant 0 : index
    %379 = vector.load %arg3[%c0_116, %c0_117, %c0_118] : memref<8x32x128xf32, #tpu.memory_space<vmem>>, vector<8x32x128xf32>
    %380 = vector.shape_cast %378 : vector<8x32xf32> to vector<8x32x1xf32>
    %381 = vector.broadcast %380 : vector<8x32x1xf32> to vector<8x32x128xf32>
    %382 = arith.addf %379, %381 : vector<8x32x128xf32>
    %cst_119 = arith.constant 0.000000e+00 : f32
    %383 = vector.broadcast %cst_119 : f32 to vector<8x32x128xf32>
    %384 = arith.maximumf %382, %383 : vector<8x32x128xf32>
    %385 = vector.broadcast %4 : vector<1x32x1xf32> to vector<8x32x128xf32>
    %386 = arith.mulf %384, %385 : vector<8x32x128xf32>
    %cst_120 = arith.constant dense<0.000000e+00> : vector<8x128xf32>
    %387 = vector.multi_reduction <add>, %386, %cst_120 [1] : vector<8x32x128xf32> to vector<8x128xf32>
    %388 = vector.broadcast %5 : vector<1x128xf32> to vector<8x128xf32>
    %389 = arith.addf %387, %388 : vector<8x128xf32>
    %cst_121 = arith.constant dense<0xFF800000> : vector<8xf32>
    %390 = vector.multi_reduction <maximumf>, %389, %cst_121 [1] : vector<8x128xf32> to vector<8xf32>
    %391 = vector.shape_cast %390 : vector<8xf32> to vector<8x1xf32>
    %392 = vector.broadcast %391 : vector<8x1xf32> to vector<8x128xf32>
    %393 = arith.subf %389, %392 : vector<8x128xf32>
    %394 = math.exp %393 : vector<8x128xf32>
    %cst_122 = arith.constant dense<0.000000e+00> : vector<8xf32>
    %395 = vector.multi_reduction <add>, %394, %cst_122 [1] : vector<8x128xf32> to vector<8xf32>
    %396 = vector.shape_cast %395 : vector<8xf32> to vector<8x1xf32>
    %397 = tpu.reciprocal %396 {approx = true} : vector<8x1xf32> -> vector<8x1xf32>
    %398 = vector.broadcast %397 : vector<8x1xf32> to vector<8x128xf32>
    %399 = arith.mulf %394, %398 : vector<8x128xf32>
    %c0_123 = arith.constant 0 : index
    %c0_124 = arith.constant 0 : index
    %c0_125 = arith.constant 0 : index
    %400 = vector.load %arg2[%c0_123, %c0_124, %c0_125] : memref<8x16x128xf32, #tpu.memory_space<vmem>>, vector<8x16x128xf32>
    %401 = vector.shape_cast %399 : vector<8x128xf32> to vector<8x1x128xf32>
    %402 = vector.broadcast %401 : vector<8x1x128xf32> to vector<8x16x128xf32>
    %403 = arith.mulf %400, %402 : vector<8x16x128xf32>
    %cst_126 = arith.constant dense<0.000000e+00> : vector<8x16xf32>
    %404 = vector.multi_reduction <add>, %403, %cst_126 [2] : vector<8x16x128xf32> to vector<8x16xf32>
    %cst_127 = arith.constant dense<0.000000e+00> : vector<8x128xf32>
    %405 = tpu.matmul %404, %6, %cst_127 {dimension_numbers = #tpu.dot_dimension_numbers<[1], [0], [0], [1], [0, 0, 1, 1], [], []>} : vector<8x16xf32>, vector<16x128xf32>, vector<8x128xf32> -> vector<8x128xf32>
    %406 = arith.addf %375, %405 : vector<8x128xf32>
    %407 = vector.broadcast %7 : vector<1x128xf32> to vector<8x128xf32>
    %408 = arith.addf %406, %407 : vector<8x128xf32>
    %cst_128 = arith.constant 0.000000e+00 : f32
    %409 = vector.shape_cast %343 : vector<8x1xi1> to vector<8x1xi1>
    %410 = vector.broadcast %409 : vector<8x1xi1> to vector<8x128xi1>
    %411 = vector.broadcast %cst_128 : f32 to vector<8x128xf32>
    %412 = arith.select %410, %408, %411 : vector<8x128xi1>, vector<8x128xf32>
    %413 = arith.index_cast %c4_i32 : i32 to index
    %c0_129 = arith.constant 0 : index
    %c0_130 = arith.constant 0 : index
    %414 = vector.load %arg10[%413, %c0_129, %c0_130] : memref<7x8x128xf32, #tpu.memory_space<vmem>>, vector<1x8x128xf32>
    %415 = vector.shape_cast %414 : vector<1x8x128xf32> to vector<8x128xf32>
    %416 = vector.shape_cast %412 : vector<8x128xf32> to vector<1x8x128xf32>
    tpu.vector_store %arg10[%413, %c0_129, %c0_130], %416 {strides = array<i32>} : memref<7x8x128xf32, #tpu.memory_space<vmem>>, vector<1x8x128xf32>,
    %cst_131 = arith.constant 0.000000e+00 : f32
    %417 = vector.shape_cast %343 : vector<8x1xi1> to vector<8x1xi1>
    %418 = vector.broadcast %417 : vector<8x1xi1> to vector<8x128xi1>
    %419 = vector.broadcast %cst_131 : f32 to vector<8x128xf32>
    %420 = arith.select %418, %399, %419 : vector<8x128xi1>, vector<8x128xf32>
    %421 = arith.index_cast %c4_i32 : i32 to index
    %c0_132 = arith.constant 0 : index
    %c0_133 = arith.constant 0 : index
    %422 = vector.load %arg11[%421, %c0_132, %c0_133] : memref<7x8x128xf32, #tpu.memory_space<vmem>>, vector<1x8x128xf32>
    %423 = vector.shape_cast %422 : vector<1x8x128xf32> to vector<8x128xf32>
    %424 = vector.shape_cast %420 : vector<8x128xf32> to vector<1x8x128xf32>
    tpu.vector_store %arg11[%421, %c0_132, %c0_133], %424 {strides = array<i32>} : memref<7x8x128xf32, #tpu.memory_space<vmem>>, vector<1x8x128xf32>,
    %c5_i32 = arith.constant 5 : i32
    %425 = vector.broadcast %c5_i32 : i32 to vector<8x1xi32>
    %426 = arith.cmpi sgt, %0, %425 : vector<8x1xi32>
    %427 = arith.index_cast %c5_i32 : i32 to index
    %c0_134 = arith.constant 0 : index
    %c0_135 = arith.constant 0 : index
    %428 = vector.load %arg1[%427, %c0_134, %c0_135] : memref<7x8x128xf32, #tpu.memory_space<vmem>>, vector<1x8x128xf32>
    %429 = vector.shape_cast %428 : vector<1x8x128xf32> to vector<8x128xf32>
    %430 = arith.addf %429, %374 : vector<8x128xf32>
    %431 = vector.extract_strided_slice %430 {offsets = [0, 0], sizes = [8, 32], strides = [1, 1]} : vector<8x128xf32> to vector<8x32xf32>
    %432 = arith.negf %431 : vector<8x32xf32>
    %433 = math.exp %432 : vector<8x32xf32>
    %cst_136 = arith.constant 1.000000e+00 : f32
    %434 = vector.broadcast %cst_136 : f32 to vector<8x32xf32>
    %435 = arith.addf %434, %433 : vector<8x32xf32>
    %436 = arith.divf %434, %435 : vector<8x32xf32>
    %437 = vector.extract_strided_slice %430 {offsets = [0, 32], sizes = [8, 32], strides = [1, 1]} : vector<8x128xf32> to vector<8x32xf32>
    %438 = arith.negf %437 : vector<8x32xf32>
    %439 = math.exp %438 : vector<8x32xf32>
    %cst_137 = arith.constant 1.000000e+00 : f32
    %440 = vector.broadcast %cst_137 : f32 to vector<8x32xf32>
    %441 = arith.addf %440, %439 : vector<8x32xf32>
    %442 = arith.divf %440, %441 : vector<8x32xf32>
    %443 = vector.extract_strided_slice %430 {offsets = [0, 64], sizes = [8, 32], strides = [1, 1]} : vector<8x128xf32> to vector<8x32xf32>
    %444 = math.tanh %443 : vector<8x32xf32>
    %445 = vector.extract_strided_slice %430 {offsets = [0, 96], sizes = [8, 32], strides = [1, 1]} : vector<8x128xf32> to vector<8x32xf32>
    %446 = arith.negf %445 : vector<8x32xf32>
    %447 = math.exp %446 : vector<8x32xf32>
    %cst_138 = arith.constant 1.000000e+00 : f32
    %448 = vector.broadcast %cst_138 : f32 to vector<8x32xf32>
    %449 = arith.addf %448, %447 : vector<8x32xf32>
    %450 = arith.divf %448, %449 : vector<8x32xf32>
    %451 = arith.mulf %442, %370 : vector<8x32xf32>
    %452 = arith.mulf %436, %444 : vector<8x32xf32>
    %453 = arith.addf %451, %452 : vector<8x32xf32>
    %454 = math.tanh %453 : vector<8x32xf32>
    %455 = arith.mulf %450, %454 : vector<8x32xf32>
    %cst_139 = arith.constant dense<0.000000e+00> : vector<8x288xf32>
    %456 = tpu.matmul %455, %1, %cst_139 {dimension_numbers = #tpu.dot_dimension_numbers<[1], [0], [0], [1], [0, 0, 1, 1], [], []>} : vector<8x32xf32>, vector<32x288xf32>, vector<8x288xf32> -> vector<8x288xf32>
    %457 = vector.extract_strided_slice %456 {offsets = [0, 0], sizes = [8, 128], strides = [1, 1]} : vector<8x288xf32> to vector<8x128xf32>
    %458 = vector.extract_strided_slice %456 {offsets = [0, 128], sizes = [8, 128], strides = [1, 1]} : vector<8x288xf32> to vector<8x128xf32>
    %459 = vector.extract_strided_slice %456 {offsets = [0, 256], sizes = [8, 32], strides = [1, 1]} : vector<8x288xf32> to vector<8x32xf32>
    %460 = vector.broadcast %2 : vector<1x32xf32> to vector<8x32xf32>
    %461 = arith.addf %459, %460 : vector<8x32xf32>
    %c0_140 = arith.constant 0 : index
    %c0_141 = arith.constant 0 : index
    %c0_142 = arith.constant 0 : index
    %462 = vector.load %arg3[%c0_140, %c0_141, %c0_142] : memref<8x32x128xf32, #tpu.memory_space<vmem>>, vector<8x32x128xf32>
    %463 = vector.shape_cast %461 : vector<8x32xf32> to vector<8x32x1xf32>
    %464 = vector.broadcast %463 : vector<8x32x1xf32> to vector<8x32x128xf32>
    %465 = arith.addf %462, %464 : vector<8x32x128xf32>
    %cst_143 = arith.constant 0.000000e+00 : f32
    %466 = vector.broadcast %cst_143 : f32 to vector<8x32x128xf32>
    %467 = arith.maximumf %465, %466 : vector<8x32x128xf32>
    %468 = vector.broadcast %4 : vector<1x32x1xf32> to vector<8x32x128xf32>
    %469 = arith.mulf %467, %468 : vector<8x32x128xf32>
    %cst_144 = arith.constant dense<0.000000e+00> : vector<8x128xf32>
    %470 = vector.multi_reduction <add>, %469, %cst_144 [1] : vector<8x32x128xf32> to vector<8x128xf32>
    %471 = vector.broadcast %5 : vector<1x128xf32> to vector<8x128xf32>
    %472 = arith.addf %470, %471 : vector<8x128xf32>
    %cst_145 = arith.constant dense<0xFF800000> : vector<8xf32>
    %473 = vector.multi_reduction <maximumf>, %472, %cst_145 [1] : vector<8x128xf32> to vector<8xf32>
    %474 = vector.shape_cast %473 : vector<8xf32> to vector<8x1xf32>
    %475 = vector.broadcast %474 : vector<8x1xf32> to vector<8x128xf32>
    %476 = arith.subf %472, %475 : vector<8x128xf32>
    %477 = math.exp %476 : vector<8x128xf32>
    %cst_146 = arith.constant dense<0.000000e+00> : vector<8xf32>
    %478 = vector.multi_reduction <add>, %477, %cst_146 [1] : vector<8x128xf32> to vector<8xf32>
    %479 = vector.shape_cast %478 : vector<8xf32> to vector<8x1xf32>
    %480 = tpu.reciprocal %479 {approx = true} : vector<8x1xf32> -> vector<8x1xf32>
    %481 = vector.broadcast %480 : vector<8x1xf32> to vector<8x128xf32>
    %482 = arith.mulf %477, %481 : vector<8x128xf32>
    %c0_147 = arith.constant 0 : index
    %c0_148 = arith.constant 0 : index
    %c0_149 = arith.constant 0 : index
    %483 = vector.load %arg2[%c0_147, %c0_148, %c0_149] : memref<8x16x128xf32, #tpu.memory_space<vmem>>, vector<8x16x128xf32>
    %484 = vector.shape_cast %482 : vector<8x128xf32> to vector<8x1x128xf32>
    %485 = vector.broadcast %484 : vector<8x1x128xf32> to vector<8x16x128xf32>
    %486 = arith.mulf %483, %485 : vector<8x16x128xf32>
    %cst_150 = arith.constant dense<0.000000e+00> : vector<8x16xf32>
    %487 = vector.multi_reduction <add>, %486, %cst_150 [2] : vector<8x16x128xf32> to vector<8x16xf32>
    %cst_151 = arith.constant dense<0.000000e+00> : vector<8x128xf32>
    %488 = tpu.matmul %487, %6, %cst_151 {dimension_numbers = #tpu.dot_dimension_numbers<[1], [0], [0], [1], [0, 0, 1, 1], [], []>} : vector<8x16xf32>, vector<16x128xf32>, vector<8x128xf32> -> vector<8x128xf32>
    %489 = arith.addf %458, %488 : vector<8x128xf32>
    %490 = vector.broadcast %7 : vector<1x128xf32> to vector<8x128xf32>
    %491 = arith.addf %489, %490 : vector<8x128xf32>
    %cst_152 = arith.constant 0.000000e+00 : f32
    %492 = vector.shape_cast %426 : vector<8x1xi1> to vector<8x1xi1>
    %493 = vector.broadcast %492 : vector<8x1xi1> to vector<8x128xi1>
    %494 = vector.broadcast %cst_152 : f32 to vector<8x128xf32>
    %495 = arith.select %493, %491, %494 : vector<8x128xi1>, vector<8x128xf32>
    %496 = arith.index_cast %c5_i32 : i32 to index
    %c0_153 = arith.constant 0 : index
    %c0_154 = arith.constant 0 : index
    %497 = vector.load %arg10[%496, %c0_153, %c0_154] : memref<7x8x128xf32, #tpu.memory_space<vmem>>, vector<1x8x128xf32>
    %498 = vector.shape_cast %497 : vector<1x8x128xf32> to vector<8x128xf32>
    %499 = vector.shape_cast %495 : vector<8x128xf32> to vector<1x8x128xf32>
    tpu.vector_store %arg10[%496, %c0_153, %c0_154], %499 {strides = array<i32>} : memref<7x8x128xf32, #tpu.memory_space<vmem>>, vector<1x8x128xf32>,
    %cst_155 = arith.constant 0.000000e+00 : f32
    %500 = vector.shape_cast %426 : vector<8x1xi1> to vector<8x1xi1>
    %501 = vector.broadcast %500 : vector<8x1xi1> to vector<8x128xi1>
    %502 = vector.broadcast %cst_155 : f32 to vector<8x128xf32>
    %503 = arith.select %501, %482, %502 : vector<8x128xi1>, vector<8x128xf32>
    %504 = arith.index_cast %c5_i32 : i32 to index
    %c0_156 = arith.constant 0 : index
    %c0_157 = arith.constant 0 : index
    %505 = vector.load %arg11[%504, %c0_156, %c0_157] : memref<7x8x128xf32, #tpu.memory_space<vmem>>, vector<1x8x128xf32>
    %506 = vector.shape_cast %505 : vector<1x8x128xf32> to vector<8x128xf32>
    %507 = vector.shape_cast %503 : vector<8x128xf32> to vector<1x8x128xf32>
    tpu.vector_store %arg11[%504, %c0_156, %c0_157], %507 {strides = array<i32>} : memref<7x8x128xf32, #tpu.memory_space<vmem>>, vector<1x8x128xf32>,
    %c6_i32 = arith.constant 6 : i32
    %508 = vector.broadcast %c6_i32 : i32 to vector<8x1xi32>
    %509 = arith.cmpi sgt, %0, %508 : vector<8x1xi32>
    %510 = arith.index_cast %c6_i32 : i32 to index
    %c0_158 = arith.constant 0 : index
    %c0_159 = arith.constant 0 : index
    %511 = vector.load %arg1[%510, %c0_158, %c0_159] : memref<7x8x128xf32, #tpu.memory_space<vmem>>, vector<1x8x128xf32>
    %512 = vector.shape_cast %511 : vector<1x8x128xf32> to vector<8x128xf32>
    %513 = arith.addf %512, %457 : vector<8x128xf32>
    %514 = vector.extract_strided_slice %513 {offsets = [0, 0], sizes = [8, 32], strides = [1, 1]} : vector<8x128xf32> to vector<8x32xf32>
    %515 = arith.negf %514 : vector<8x32xf32>
    %516 = math.exp %515 : vector<8x32xf32>
    %cst_160 = arith.constant 1.000000e+00 : f32
    %517 = vector.broadcast %cst_160 : f32 to vector<8x32xf32>
    %518 = arith.addf %517, %516 : vector<8x32xf32>
    %519 = arith.divf %517, %518 : vector<8x32xf32>
    %520 = vector.extract_strided_slice %513 {offsets = [0, 32], sizes = [8, 32], strides = [1, 1]} : vector<8x128xf32> to vector<8x32xf32>
    %521 = arith.negf %520 : vector<8x32xf32>
    %522 = math.exp %521 : vector<8x32xf32>
    %cst_161 = arith.constant 1.000000e+00 : f32
    %523 = vector.broadcast %cst_161 : f32 to vector<8x32xf32>
    %524 = arith.addf %523, %522 : vector<8x32xf32>
    %525 = arith.divf %523, %524 : vector<8x32xf32>
    %526 = vector.extract_strided_slice %513 {offsets = [0, 64], sizes = [8, 32], strides = [1, 1]} : vector<8x128xf32> to vector<8x32xf32>
    %527 = math.tanh %526 : vector<8x32xf32>
    %528 = vector.extract_strided_slice %513 {offsets = [0, 96], sizes = [8, 32], strides = [1, 1]} : vector<8x128xf32> to vector<8x32xf32>
    %529 = arith.negf %528 : vector<8x32xf32>
    %530 = math.exp %529 : vector<8x32xf32>
    %cst_162 = arith.constant 1.000000e+00 : f32
    %531 = vector.broadcast %cst_162 : f32 to vector<8x32xf32>
    %532 = arith.addf %531, %530 : vector<8x32xf32>
    %533 = arith.divf %531, %532 : vector<8x32xf32>
    %534 = arith.mulf %525, %453 : vector<8x32xf32>
    %535 = arith.mulf %519, %527 : vector<8x32xf32>
    %536 = arith.addf %534, %535 : vector<8x32xf32>
    %537 = math.tanh %536 : vector<8x32xf32>
    %538 = arith.mulf %533, %537 : vector<8x32xf32>
    %cst_163 = arith.constant dense<0.000000e+00> : vector<8x288xf32>
    %539 = tpu.matmul %538, %1, %cst_163 {dimension_numbers = #tpu.dot_dimension_numbers<[1], [0], [0], [1], [0, 0, 1, 1], [], []>} : vector<8x32xf32>, vector<32x288xf32>, vector<8x288xf32> -> vector<8x288xf32>
    %540 = vector.extract_strided_slice %539 {offsets = [0, 0], sizes = [8, 128], strides = [1, 1]} : vector<8x288xf32> to vector<8x128xf32>
    %541 = vector.extract_strided_slice %539 {offsets = [0, 128], sizes = [8, 128], strides = [1, 1]} : vector<8x288xf32> to vector<8x128xf32>
    %542 = vector.extract_strided_slice %539 {offsets = [0, 256], sizes = [8, 32], strides = [1, 1]} : vector<8x288xf32> to vector<8x32xf32>
    %543 = vector.broadcast %2 : vector<1x32xf32> to vector<8x32xf32>
    %544 = arith.addf %542, %543 : vector<8x32xf32>
    %c0_164 = arith.constant 0 : index
    %c0_165 = arith.constant 0 : index
    %c0_166 = arith.constant 0 : index
    %545 = vector.load %arg3[%c0_164, %c0_165, %c0_166] : memref<8x32x128xf32, #tpu.memory_space<vmem>>, vector<8x32x128xf32>
    %546 = vector.shape_cast %544 : vector<8x32xf32> to vector<8x32x1xf32>
    %547 = vector.broadcast %546 : vector<8x32x1xf32> to vector<8x32x128xf32>
    %548 = arith.addf %545, %547 : vector<8x32x128xf32>
    %cst_167 = arith.constant 0.000000e+00 : f32
    %549 = vector.broadcast %cst_167 : f32 to vector<8x32x128xf32>
    %550 = arith.maximumf %548, %549 : vector<8x32x128xf32>
    %551 = vector.broadcast %4 : vector<1x32x1xf32> to vector<8x32x128xf32>
    %552 = arith.mulf %550, %551 : vector<8x32x128xf32>
    %cst_168 = arith.constant dense<0.000000e+00> : vector<8x128xf32>
    %553 = vector.multi_reduction <add>, %552, %cst_168 [1] : vector<8x32x128xf32> to vector<8x128xf32>
    %554 = vector.broadcast %5 : vector<1x128xf32> to vector<8x128xf32>
    %555 = arith.addf %553, %554 : vector<8x128xf32>
    %cst_169 = arith.constant dense<0xFF800000> : vector<8xf32>
    %556 = vector.multi_reduction <maximumf>, %555, %cst_169 [1] : vector<8x128xf32> to vector<8xf32>
    %557 = vector.shape_cast %556 : vector<8xf32> to vector<8x1xf32>
    %558 = vector.broadcast %557 : vector<8x1xf32> to vector<8x128xf32>
    %559 = arith.subf %555, %558 : vector<8x128xf32>
    %560 = math.exp %559 : vector<8x128xf32>
    %cst_170 = arith.constant dense<0.000000e+00> : vector<8xf32>
    %561 = vector.multi_reduction <add>, %560, %cst_170 [1] : vector<8x128xf32> to vector<8xf32>
    %562 = vector.shape_cast %561 : vector<8xf32> to vector<8x1xf32>
    %563 = tpu.reciprocal %562 {approx = true} : vector<8x1xf32> -> vector<8x1xf32>
    %564 = vector.broadcast %563 : vector<8x1xf32> to vector<8x128xf32>
    %565 = arith.mulf %560, %564 : vector<8x128xf32>
    %c0_171 = arith.constant 0 : index
    %c0_172 = arith.constant 0 : index
    %c0_173 = arith.constant 0 : index
    %566 = vector.load %arg2[%c0_171, %c0_172, %c0_173] : memref<8x16x128xf32, #tpu.memory_space<vmem>>, vector<8x16x128xf32>
    %567 = vector.shape_cast %565 : vector<8x128xf32> to vector<8x1x128xf32>
    %568 = vector.broadcast %567 : vector<8x1x128xf32> to vector<8x16x128xf32>
    %569 = arith.mulf %566, %568 : vector<8x16x128xf32>
    %cst_174 = arith.constant dense<0.000000e+00> : vector<8x16xf32>
    %570 = vector.multi_reduction <add>, %569, %cst_174 [2] : vector<8x16x128xf32> to vector<8x16xf32>
    %cst_175 = arith.constant dense<0.000000e+00> : vector<8x128xf32>
    %571 = tpu.matmul %570, %6, %cst_175 {dimension_numbers = #tpu.dot_dimension_numbers<[1], [0], [0], [1], [0, 0, 1, 1], [], []>} : vector<8x16xf32>, vector<16x128xf32>, vector<8x128xf32> -> vector<8x128xf32>
    %572 = arith.addf %541, %571 : vector<8x128xf32>
    %573 = vector.broadcast %7 : vector<1x128xf32> to vector<8x128xf32>
    %574 = arith.addf %572, %573 : vector<8x128xf32>
    %cst_176 = arith.constant 0.000000e+00 : f32
    %575 = vector.shape_cast %509 : vector<8x1xi1> to vector<8x1xi1>
    %576 = vector.broadcast %575 : vector<8x1xi1> to vector<8x128xi1>
    %577 = vector.broadcast %cst_176 : f32 to vector<8x128xf32>
    %578 = arith.select %576, %574, %577 : vector<8x128xi1>, vector<8x128xf32>
    %579 = arith.index_cast %c6_i32 : i32 to index
    %c0_177 = arith.constant 0 : index
    %c0_178 = arith.constant 0 : index
    %580 = vector.load %arg10[%579, %c0_177, %c0_178] : memref<7x8x128xf32, #tpu.memory_space<vmem>>, vector<1x8x128xf32>
    %581 = vector.shape_cast %580 : vector<1x8x128xf32> to vector<8x128xf32>
    %582 = vector.shape_cast %578 : vector<8x128xf32> to vector<1x8x128xf32>
    tpu.vector_store %arg10[%579, %c0_177, %c0_178], %582 {strides = array<i32>} : memref<7x8x128xf32, #tpu.memory_space<vmem>>, vector<1x8x128xf32>,
    %cst_179 = arith.constant 0.000000e+00 : f32
    %583 = vector.shape_cast %509 : vector<8x1xi1> to vector<8x1xi1>
    %584 = vector.broadcast %583 : vector<8x1xi1> to vector<8x128xi1>
    %585 = vector.broadcast %cst_179 : f32 to vector<8x128xf32>
    %586 = arith.select %584, %565, %585 : vector<8x128xi1>, vector<8x128xf32>
    %587 = arith.index_cast %c6_i32 : i32 to index
    %c0_180 = arith.constant 0 : index
    %c0_181 = arith.constant 0 : index
    %588 = vector.load %arg11[%587, %c0_180, %c0_181] : memref<7x8x128xf32, #tpu.memory_space<vmem>>, vector<1x8x128xf32>
    %589 = vector.shape_cast %588 : vector<1x8x128xf32> to vector<8x128xf32>
    %590 = vector.shape_cast %586 : vector<8x128xf32> to vector<1x8x128xf32>
    tpu.vector_store %arg11[%587, %c0_180, %c0_181], %590 {strides = array<i32>} : memref<7x8x128xf32, #tpu.memory_space<vmem>>, vector<1x8x128xf32>,
    %c7_i32 = arith.constant 7 : i32
    return
  }
}

</mosaic_0001>

<bundles_post_ra>
// kernel: tpu_custom_call.1
= control target key start
LH: loop header
LB: loop body
LE: loop exit
PB: predicated region body
PF: predicated region fallthrough
CT: control target
= control target key end

     0   :  { %17 = vsyncpa [#allocation3], 0  ;;  %s8882_s0 = inlined_call_operand.vmem [shape: s32[8,1], index: 0, kind: input, shape index: {}]   ;;  %s8883_s1 = inlined_call_operand.hbm [shape: f32[7,8,128], index: 1, kind: input, shape index: {}]   ;;  %s8884_s2 = inlined_call_operand.hbm [shape: f32[8,16,128], index: 2, kind: input, shape index: {}]   ;;  %s8885_s3 = inlined_call_operand.hbm [shape: f32[8,32,128], index: 3, kind: input, shape index: {}]   ;;  %s8886_s4 = inlined_call_operand.hbm [shape: f32[32,288], index: 4, kind: input, shape index: {}]   ;;  %s8887_s5 = inlined_call_operand.vmem [shape: f32[1,32], index: 5, kind: input, shape index: {}]   ;;  %s8888_s6 = inlined_call_operand.vmem [shape: f32[32,1], index: 6, kind: input, shape index: {}]   ;;  %s8889_s7 = inlined_call_operand.vmem [shape: f32[1,128], index: 7, kind: input, shape index: {}]   ;;  %s8890_s8 = inlined_call_operand.vmem [shape: f32[16,128], index: 8, kind: input, shape index: {}]   ;;  %s8891_s9 = inlined_call_operand.vmem [shape: f32[1,128], index: 9, kind: input, shape index: {}]   ;;  %s8892_s10 = inlined_call_operand.hbm [shape: f32[7,8,128], index: 10, kind: output, shape index: {0}]   ;;  %s8893_s11 = inlined_call_operand.hbm [shape: f32[7,8,128], index: 11, kind: output, shape index: {1}]  }
   0x1   :  { %18 = vsyncpa [#allocation6], 0 }
   0x2   :  { %19 = vsyncpa [#allocation9], 0 }
   0x3   :  { %20 = vsyncpa [#allocation4], 0 }
   0x4   :  { %21 = vsyncpa [#allocation12], 0  ;;  %s7537_s17 = smov [#allocation5]   ;;  %s7538_s19 = smov [#allocation2]  }
   0x5   :  { %s41_s18 = sshll.u32 %s7537_s17, 4  ;;  %s29_s20 = sshll.u32 %s7538_s19, 4  ;;  %s42_s18 = int_to_ptr.vmem [resolvable:$true] %s41_s18  ;;  %s30_s20 = int_to_ptr.vmem [resolvable:$true] %s29_s20 }
   0x6   :  { %s7415_s21 = scalar_lea.vmem %s42_s18, 2048  ;;  %p7420_p1 = scmp.lt.s32.totalorder %s42_s18, %s42_s18 }
   0x7   :  { %p7416_p0 = scmp.ne.s32.totalorder %s42_s18, %s7415_s21  ;;  %p7421_p2 = scmp.lt.s32.totalorder %s7415_s21, %s7415_s21 }
   0x9   :  { %p7422_p3 = por %p7421_p2, %p7420_p1 }
   0xb   :  { %p7423_p4 = pnand %p7422_p3, %p7416_p0 }
   0xd   :  { %7426 = shalt.err (!%p7423_p4)
}
   0xe   :  { %s7539_s22 = smov 128   ;;  %s7540_s23 = smov 8  }
   0xf   :  { %47 = dma.hbm_to_vmem [thread:$0]  %s8884_s2, 2048, %s42_s18, [#allocation6], %s7539_s22, %s7539_s22, %s7540_s23  }
  0x10   :  { %s7435_s26 = scalar_lea.vmem %s30_s20, 896  ;;  %p7440_p6 = scmp.lt.s32.totalorder %s30_s20, %s30_s20 }
  0x11   :  { %p7436_p5 = scmp.ne.s32.totalorder %s30_s20, %s7435_s26  ;;  %p7441_p7 = scmp.lt.s32.totalorder %s7435_s26, %s7435_s26 }
  0x13   :  { %p7442_p8 = por %p7441_p7, %p7440_p6 }
  0x15   :  { %p7443_p9 = pnand %p7442_p8, %p7436_p5 }
  0x17   :  { %7446 = shalt.err (!%p7443_p9)
}
  0x18   :  { %35 = dma.hbm_to_vmem [thread:$0]  %s8883_s1, 896, %s30_s20, [#allocation3], %s7539_s22, %s7539_s22, %s7540_s23  }
  0x19   :  { %s7541_s29 = smov [#allocation7]   ;;  %s7542_s12 = smov [#allocation8]  }
  0x1a   :  { %s53_s30 = sshll.u32 %s7541_s29, 4  ;;  %s65_s13 = sshll.u32 %s7542_s12, 4  ;;  %s54_s30 = int_to_ptr.vmem [resolvable:$true] %s53_s30  ;;  %s66_s13 = int_to_ptr.vmem [resolvable:$true] %s65_s13 }
  0x1b   :  { %s7455_s2 = scalar_lea.vmem %s54_s30, 4096  ;;  %p7460_p11 = scmp.lt.s32.totalorder %s54_s30, %s54_s30 }
  0x1c   :  { %p7456_p10 = scmp.ne.s32.totalorder %s54_s30, %s7455_s2  ;;  %p7461_p12 = scmp.lt.s32.totalorder %s7455_s2, %s7455_s2 }
  0x1e   :  { %p7462_p13 = por %p7461_p12, %p7460_p11 }
  0x20   :  { %p7463_p0 = pnand %p7462_p13, %p7456_p10 }
  0x22   :  { %7466 = shalt.err (!%p7463_p0)
}
  0x23   :  { %59 = dma.hbm_to_vmem [thread:$0]  %s8885_s3, 4096, %s54_s30, [#allocation6], %s7539_s22, %s7539_s22, %s7540_s23  }
  0x24   :  { %s7475_s1 = scalar_lea.vmem %s66_s13, 1536  ;;  %p7480_p2 = scmp.lt.s32.totalorder %s66_s13, %s66_s13 }
  0x25   :  { %p7476_p1 = scmp.ne.s32.totalorder %s66_s13, %s7475_s1  ;;  %p7481_p3 = scmp.lt.s32.totalorder %s7475_s1, %s7475_s1 }
  0x27   :  { %p7482_p4 = por %p7481_p3, %p7480_p2 }
  0x29   :  { %p7483_p5 = pnand %p7482_p4, %p7476_p1 }
  0x2b   :  { %7486 = shalt.err (!%p7483_p5)
}
  0x2c   :  { %s7543_s16 = smov 384   ;;  %s7544_s17 = smov 24  }
  0x2d   :  { %71 = dma.hbm_to_vmem [thread:$0]  %s8886_s4, 1536, %s66_s13, [#allocation9], %s7543_s16, %s7543_s16, %s7544_s17  }
  0x2e   :  { %7527 = dma.done.wait [#allocation3], 896  }
  0x2f   :  { %7528 = vsyncadd [#allocation3], 4294966400 }
  0x30   :  { %7529 = dma.done.wait [#allocation6], 6144  }
  0x31   :  { %7530 = vsyncadd [#allocation6], 4294961152 }
  0x32   :  { %7531 = dma.done.wait [#allocation9], 1536  }
  0x33   :  { %7532 = vsyncadd [#allocation9], 4294965760  ;;  %v117_v0 = vld [vmem:[#allocation2] sm:$0xff]  ;;  %s7545_s3 = smov 64   ;;  %s7546_s4 = smov 32   ;;  %v105_v11 = vld [vmem:[#allocation8 + $0x50] sm:$0xff]  ;;  %v329_v33 = vlaneseq }
  0x34   :  { %7071 = vtanh.f32 %v117_v0  ;;  %v6841_v2 = vmul.f32 -1.442695, %v117_v0  ;;  %v104_v12 = vld [vmem:[#allocation8 + $0x48] sm:$0xff]  ;;  %v106_v13 = vld [vmem:[#allocation8 + $0x58] sm:$0xff]  ;;  %173 = vmatprep.subr.mxu0 %v105_v11  ;;  %v8896_v14 = vmov 0.0   ;;  %v101_v16 = vld [vmem:[#allocation8 + $0x30] sm:$0xff] }
  0x35   :  { %6928 = vmatprep.subr.mxu1 %v8896_v14  ;;  %v102_v15 = vld [vmem:[#allocation8 + $0x38] sm:$0xff]  ;;  %v103_v17 = vld [vmem:[#allocation8 + $0x40] sm:$0xff]  ;;  %174 = vmatpush1.msra.mxu0 %v104_v12  ;;  %v100_v20 = vld [vmem:[#allocation8 + $0x28] sm:$0xff]  ;;  %vm7548_vm0 = vmmov 0   ;;  %v8894_v26 = vmov 0   ;;  %vm146_vm1 = vcmask 261120  }
  0x36   :  { %7073 = vpow2.f32 %v6841_v2  ;;  %6929 = vmatpush3.msra.mxu1 %v106_v13  ;;  %v99_v18 = vld [vmem:[#allocation8 + $0x20] sm:$0xff]  ;;  %175 = vmatprep.subr.mxu0 %v102_v15  ;;  %v98_v19 = vld [vmem:[#allocation8 + $0x18] sm:$0xff]  ;;  %v96_v21 = vld [vmem:[#allocation8 + $0x8] sm:$0xff]  ;;  %v330_v34 = vshrl.u32 %v329_v33, 7  ;;  %v918_v35 = vand.u32 127, %v329_v33  ;;  %vm692_vm2 = vcmask 1041409  }
  0x37   :  { %6930 = vmatprep.subr.mxu1 %v8896_v14  ;;  %176 = vmatpush1.msra.mxu0 %v101_v16  ;;  %v95_v23 = vld [vmem:[#allocation8] sm:$0xff]  ;;  %v97_v24 = vld [vmem:[#allocation8 + $0x10] sm:$0xff]  ;;  %v108_v25 = vld [vmem:[%s8888_s6] sm:$0xff]  ;;  %vm695_vm3 = vcmask 1042434   ;;  %vm698_vm4 = vcmask 1043459   ;;  %vm701_vm5 = vcmask 1044484  }
  0x38   :  { %6931 = vmatpush3.msra.mxu1 %v103_v17  ;;  %177 = vmatprep.subr.mxu0 %v99_v18  ;;  %v111_v27 = vld [vmem:[%s8888_s6 + $0x18] sm:$0xff]  ;;  %v109_v30 = vld [vmem:[%s8888_s6 + $0x8] sm:$0xff]  ;;  %v110_v31 = vld [vmem:[%s8888_s6 + $0x10] sm:$0xff]  ;;  %v7668_v36 = vsub.s32 %v918_v35, %v330_v34  ;;  %v923_v37 = vadd.s32 4294967288, %v918_v35  ;;  %v7675_v40 = vsub.s32 1, %v330_v34  ;;  %v7678_v45 = vsub.s32 2, %v330_v34 }
  0x39   :  { %6932 = vmatprep.subr.mxu1 %v8896_v14  ;;  %178 = vmatpush1.msra.mxu0 %v98_v19  ;;  %v6844_v39 = vld [vmem:[%s8887_s5] ss:$0 sm:$0xff]  ;;  %v7680_v46 = vsub.s32 0, %v330_v34  ;;  %v7684_v49 = vsub.s32 3, %v330_v34  ;;  %v7687_v51 = vsub.s32 4, %v330_v34  ;;  %v7690_v53 = vsub.s32 5, %v330_v34 }
  0x3a   :  { %6933 = vmatpush3.msra.mxu1 %v100_v20  ;;  %179 = vmatprep.subr.mxu0 %v96_v21  ;;  %8900 = vst [vmem:[#allocation18_spill] sm:$0xff] %v7668_v36  ;;  %v7670_v38 = vsub.s32 %v923_v37, %v330_v34  ;;  %v7693_v55 = vsub.s32 6, %v330_v34  ;;  %v7696_v57 = vsub.s32 7, %v330_v34  ;;  %v1115_v59 = vld [vmem:[#allocation2 + $0x8] sm:$0xff]  ;;  %vm704_vm6 = vcmask 1045509  }
  0x3b   :  { %6934 = vmatprep.subr.mxu1 %v8896_v14  ;;  %213 = vmatprep.mubr.f32.mxu0 %v8896_v14  ;;  %v307_v34 = vld [vmem:[#allocation7 + $0x50] sm:$0xff]  ;;  %vm707_vm7 = vcmask 1046534   ;;  %vm710_vm8 = vcmask 1047559   ;;  %vm928_vm9 = vcmask 130112   ;;  %vm1000_vm10 = vcmask 130048  }
  0x3c   :  { %6936 = vmatprep.mubr.msk.f32.mxu1 %vm7548_vm0, %v8896_v14  ;;  %180 = vmatpush1.msra.mxu0 %v95_v23 }
  0x3d   :  { %6935 = vmatpush3.msra.mxu1 %v97_v24  ;;  %6939 = vmatprep.subr.mxu0 %v8896_v14 }
  0x3e   :  { %1170 = vmatprep.subr.mxu1 %v105_v11  ;;  %7070 = vset.pattern.permute.xlu1 %v8894_v26 }
  0x3f   :  { %7069 = vset.pattern.permute.xlu0 %v8894_v26 }
  0x41   :  { %v7072_v1 = vpop.eup %7071 }
  0x42   :  { %128 = vrot.lane.b32.xlu0 %v7072_v1, %s7545_s3 }
  0x43   :  { %v7074_v3 = vpop.eup %7073 }
  0x44   :  { %v122_v4 = vadd.f32 1.0, %v7074_v3 }
  0x46   :  { %7075 = vrcp.f32 %v122_v4 }
  0x53   :  { %v7076_v5 = vpop.eup %7075 }
  0x54   :  { %v126_v8 = vmul.f32 0.0, %v7076_v5 }
  0xb4   :  { %v129_v6 = vpop.permute.xlu0 %128 }
  0xb5   :  { %v131_v7 = vmul.f32 %v7076_v5, %v129_v6 }
  0xb7   :  { %133 = vrot.lane.b32.xlu0 %v131_v7, %s7546_s4 }
  0xbb   :  { %547 = vperm.xlu0 %7069, %v108_v25   ;;  %v306_v25 = vld [vmem:[#allocation7 + $0x48] sm:$0xff] }
  0xbf   :  { %562 = vperm.xlu0 %7069, %v111_v27   ;;  %v305_v27 = vld [vmem:[#allocation7 + $0x40] sm:$0xff] }
 0x129   :  { %v134_v9 = vpop.permute.xlu0 %133 }
 0x12a   :  { %v7635_v10 = vadd.f32 %v134_v9, %v126_v8 }
 0x12c   :  { %7077 = vtanh.f32 %v7635_v10 }
 0x136   :  { %v7702_v0 = vpop.permute.xlu0 %547 }
 0x139   :  { %v7078_v22 = vpop.eup %7077 }
 0x13a   :  { %139 = vrot.lane.b32.xlu1 %v7078_v22, %s7545_s3  ;;  %v7706_v2 = vpop.permute.xlu0 %562  ;;  %v303_v22 = vld [vmem:[#allocation7 + $0x30] sm:$0xff] }
 0x1ac   :  { %v140_v28 = vpop.permute.xlu1 %139 }
 0x1ad   :  { %v142_v29 = vmul.f32 %v7076_v5, %v140_v28  ;;  %v304_v28 = vld [vmem:[#allocation7 + $0x38] sm:$0xff] }
 0x1af   :  { %144 = vrot.lane.b32.xlu1 %v142_v29, %s7546_s4 }
 0x1b3   :  { %552 = vperm.xlu1 %7070, %v109_v30  }
 0x1b7   :  { %557 = vperm.xlu1 %7070, %v110_v31   ;;  %v298_v31 = vld [vmem:[#allocation7 + $0x8] sm:$0xff] }
 0x221   :  { %v145_v32 = vpop.permute.xlu1 %144 }
 0x222   :  { %6842 = vmatmul.mubr.msk.f32.vlgmr.msra.gmra.mxu0 %vm146_vm1, %v145_v32  ;;  %6937 = vmatmul.mubr.msk.f32.vlgmr.msra.gmra.mxu1 %vm146_vm1, %v145_v32  ;;  %v297_v32 = vld [vmem:[#allocation7] sm:$0xff] }
 0x223   :  { %1171 = vmatpush1.msra.mxu1 %v104_v12  ;;  %6943 = vmatprep.mubr.msk.f32.mxu0 %vm7548_vm0, %v8896_v14 }
 0x224   :  { %1172 = vmatprep.subr.mxu1 %v102_v15  ;;  %1210 = vmatprep.mubr.f32.mxu1 %v8896_v14 }
 0x225   :  { %1173 = vmatpush1.msra.mxu1 %v101_v16 }
 0x226   :  { %1174 = vmatprep.subr.mxu1 %v99_v18  ;;  %v302_v18 = vld [vmem:[#allocation7 + $0x28] sm:$0xff] }
 0x227   :  { %1175 = vmatpush1.msra.mxu1 %v98_v19  ;;  %v301_v19 = vld [vmem:[#allocation7 + $0x20] sm:$0xff] }
 0x228   :  { %1176 = vmatprep.subr.mxu1 %v96_v21 }
 0x229   :  { %1177 = vmatpush1.msra.mxu1 %v95_v23 }
 0x22a   :  { %6957 = vmatprep.subr.mxu1 %v8896_v14 }
 0x22e   :  { %v7700_v63 = vpop.permute.xlu1 %552 }
 0x232   :  { %v7704_v1 = vpop.permute.xlu1 %557 }
 0x2e2   :  { %v286_v41 = vpop.f32.mrf.mxu1  ;;  %v215_v58 = vpop.f32.mrf.mxu0 }
 0x2e3   :  { %v296_v42 = vadd.f32 %v6844_v39, %v286_v41  ;;  %v1116_v60 = vadd.f32 %v1115_v59, %v215_v58  ;;  %v310_v39 = vld [vmem:[#allocation7 + $0x68] sm:$0xff] }
 0x2e4   :  { %v6938_v43 = vpop.f32.mrf.mxu1 }
 0x2e5   :  { %v351_v44 = vrot.slane %v296_v42, %v7675_v40  ;;  %v370_v47 = vrot.slane %v296_v42, %v7678_v45  ;;  %v332_v48 = vrot.slane %v296_v42, %v7680_v46  ;;  %v389_v50 = vrot.slane %v296_v42, %v7684_v49  ;;  %v299_v43 = vld [vmem:[#allocation7 + $0x10] sm:$0xff] }
 0x2e6   :  { %v408_v52 = vrot.slane %v296_v42, %v7687_v51  ;;  %v427_v54 = vrot.slane %v296_v42, %v7690_v53  ;;  %v446_v56 = vrot.slane %v296_v42, %v7693_v55  ;;  %v465_v61 = vrot.slane %v296_v42, %v7696_v57 }
 0x2e7   :  { %357 = vbcast.lane.b32.xlu0 %v351_v44, 264  ;;  %353 = vbcast.lane.b32.xlu1 %v351_v44, 256  ;;  %7079 = vtanh.f32 %v1116_v60  ;;  %v6848_v17 = vmul.f32 -1.442695, %v1116_v60  ;;  %v308_v60 = vld [vmem:[#allocation7 + $0x58] sm:$0xff] }
 0x2e9   :  { %7081 = vpow2.f32 %v6848_v17  ;;  %v314_v17 = vld [vmem:[#allocation7 + $0x88] sm:$0xff] }
 0x2eb   :  { %376 = vbcast.lane.b32.xlu0 %v370_v47, 264  ;;  %372 = vbcast.lane.b32.xlu1 %v370_v47, 256 }
 0x2ef   :  { %338 = vbcast.lane.b32.xlu1 %v332_v48, 264  ;;  %334 = vbcast.lane.b32.xlu0 %v332_v48, 256 }
 0x2f3   :  { %391 = vbcast.lane.b32.xlu1 %v389_v50, 256  ;;  %361 = vbcast.lane.b32.xlu0 %v351_v44, 272 }
 0x2f4   :  { %v7080_v62 = vpop.eup %7079 }
 0x2f7   :  { %380 = vbcast.lane.b32.xlu1 %v370_v47, 272  ;;  %395 = vbcast.lane.b32.xlu0 %v389_v50, 264 }
 0x2fb   :  { %414 = vbcast.lane.b32.xlu1 %v408_v52, 264  ;;  %410 = vbcast.lane.b32.xlu0 %v408_v52, 256 }
 0x2ff   :  { %342 = vbcast.lane.b32.xlu1 %v332_v48, 272  ;;  %365 = vbcast.lane.b32.xlu0 %v351_v44, 280 }
 0x303   :  { %399 = vbcast.lane.b32.xlu1 %v389_v50, 272  ;;  %429 = vbcast.lane.b32.xlu0 %v427_v54, 256 }
 0x307   :  { %433 = vbcast.lane.b32.xlu1 %v427_v54, 264  ;;  %384 = vbcast.lane.b32.xlu0 %v370_v47, 280 }
 0x30b   :  { %418 = vbcast.lane.b32.xlu1 %v408_v52, 272  ;;  %448 = vbcast.lane.b32.xlu0 %v446_v56, 256 }
 0x30f   :  { %452 = vbcast.lane.b32.xlu1 %v446_v56, 264  ;;  %346 = vbcast.lane.b32.xlu0 %v332_v48, 280 }
 0x313   :  { %403 = vbcast.lane.b32.xlu1 %v389_v50, 280  ;;  %437 = vbcast.lane.b32.xlu0 %v427_v54, 272  ;;  %v309_v50 = vld [vmem:[#allocation7 + $0x60] sm:$0xff] }
 0x317   :  { %467 = vbcast.lane.b32.xlu1 %v465_v61, 256  ;;  %471 = vbcast.lane.b32.xlu0 %v465_v61, 264 }
 0x31b   :  { %422 = vbcast.lane.b32.xlu1 %v408_v52, 280  ;;  %456 = vbcast.lane.b32.xlu0 %v446_v56, 272 }
 0x31f   :  { %441 = vbcast.lane.b32.xlu1 %v427_v54, 280  ;;  %475 = vbcast.lane.b32.xlu0 %v465_v61, 272 }
 0x323   :  { %460 = vbcast.lane.b32.xlu1 %v446_v56, 280  ;;  %479 = vbcast.lane.b32.xlu0 %v465_v61, 280 }
 0x327   :  { %1126 = vrot.lane.b32.xlu0 %v7080_v62, %s7545_s3 }
 0x359   :  { %v358_v3 = vpop.permute.xlu0 %357  ;;  %v354_v4 = vpop.permute.xlu1 %353 }
 0x35a   :  { %v486_v23 = vadd.f32 %v358_v3, %v302_v18  ;;  %v485_v24 = vadd.f32 %v354_v4, %v301_v19  ;;  %v311_v4 = vld [vmem:[#allocation7 + $0x70] sm:$0xff]  ;;  %v313_v19 = vld [vmem:[#allocation7 + $0x80] sm:$0xff] }
 0x35c   :  { %v518_v41 = vmax.f32 %v486_v23, 0.0  ;;  %v517_v42 = vmax.f32 %v485_v24, 0.0 }
 0x35d   :  { %v377_v5 = vpop.permute.xlu0 %376  ;;  %v373_v6 = vpop.permute.xlu1 %372 }
 0x35e   :  { %v490_v35 = vadd.f32 %v377_v5, %v306_v25  ;;  %v489_v37 = vadd.f32 %v373_v6, %v305_v27  ;;  %v570_v5 = vmul.f32 %v7700_v63, %v518_v41  ;;  %v569_v6 = vmul.f32 %v7702_v0, %v517_v42  ;;  %v7082_v25 = vpop.eup %7081 }
 0x360   :  { %v522_v61 = vmax.f32 %v490_v35, 0.0  ;;  %v521_v62 = vmax.f32 %v489_v37, 0.0  ;;  %v300_v37 = vld [vmem:[#allocation7 + $0x18] sm:$0xff] }
 0x361   :  { %v339_v7 = vpop.permute.xlu1 %338  ;;  %v335_v8 = vpop.permute.xlu0 %334 }
 0x362   :  { %v482_v47 = vadd.f32 %v339_v7, %v298_v31  ;;  %v481_v48 = vadd.f32 %v335_v8, %v297_v32  ;;  %v574_v27 = vmul.f32 %v7700_v63, %v522_v61  ;;  %v606_v32 = vadd.f32 %v570_v5, %v569_v6  ;;  %v312_v61 = vld [vmem:[#allocation7 + $0x78] sm:$0xff]  ;;  %v318_v5 = vld [vmem:[#allocation7 + $0xa8] sm:$0xff] }
 0x364   :  { %v514_v8 = vmax.f32 %v482_v47, 0.0  ;;  %v513_v18 = vmax.f32 %v481_v48, 0.0  ;;  %v1120_v48 = vadd.f32 1.0, %v7082_v25 }
 0x365   :  { %v392_v9 = vpop.permute.xlu1 %391  ;;  %v362_v11 = vpop.permute.xlu0 %361 }
 0x366   :  { %v487_v33 = vadd.f32 %v362_v11, %v303_v22  ;;  %v493_v11 = vadd.f32 %v392_v9, %v309_v50  ;;  %v565_v41 = vmul.f32 %v7702_v0, %v513_v18  ;;  %7083 = vrcp.f32 %v1120_v48 }
 0x368   :  { %v519_v58 = vmax.f32 %v487_v33, 0.0  ;;  %v525_v33 = vmax.f32 %v493_v11, 0.0 }
 0x369   :  { %v381_v12 = vpop.permute.xlu1 %380  ;;  %v396_v13 = vpop.permute.xlu0 %395 }
 0x36a   :  { %v491_v52 = vadd.f32 %v381_v12, %v307_v34  ;;  %v494_v59 = vadd.f32 %v396_v13, %v310_v39  ;;  %v571_v13 = vmul.f32 %v7704_v1, %v519_v58  ;;  %v566_v39 = vmul.f32 %v7700_v63, %v514_v8 }
 0x36c   :  { %v523_v12 = vmax.f32 %v491_v52, 0.0  ;;  %v526_v24 = vmax.f32 %v494_v59, 0.0  ;;  %v607_v50 = vadd.f32 %v606_v32, %v571_v13  ;;  %v317_v59 = vld [vmem:[#allocation7 + $0xa0] sm:$0xff]  ;;  %v597_v11 = vadd.f32 %v566_v39, %v565_v41 }
 0x36d   :  { %v415_v15 = vpop.permute.xlu1 %414  ;;  %v411_v16 = vpop.permute.xlu0 %410 }
 0x36e   :  { %v498_v9 = vadd.f32 %v415_v15, %v314_v17  ;;  %v497_v34 = vadd.f32 %v411_v16, %v313_v19  ;;  %v575_v42 = vmul.f32 %v7704_v1, %v523_v12  ;;  %v578_v15 = vmul.f32 %v7700_v63, %v526_v24  ;;  %v322_v24 = vld [vmem:[#allocation7 + $0xc8] sm:$0xff] }
 0x370   :  { %v530_v16 = vmax.f32 %v498_v9, 0.0  ;;  %v319_v9 = vld [vmem:[#allocation7 + $0xb0] sm:$0xff] }
 0x371   :  { %v343_v20 = vpop.permute.xlu1 %342  ;;  %v366_v21 = vpop.permute.xlu0 %365 }
 0x372   :  { %v488_v44 = vadd.f32 %v366_v21, %v304_v28  ;;  %v483_v3 = vadd.f32 %v343_v20, %v299_v43  ;;  %v573_v28 = vmul.f32 %v7702_v0, %v521_v62  ;;  %v315_v43 = vld [vmem:[#allocation7 + $0x90] sm:$0xff]  ;;  %v577_v62 = vmul.f32 %v7702_v0, %v525_v33 }
 0x373   :  { %v582_v25 = vmul.f32 %v7700_v63, %v530_v16 }
 0x374   :  { %v520_v7 = vmax.f32 %v488_v44, 0.0  ;;  %v515_v31 = vmax.f32 %v483_v3, 0.0  ;;  %v529_v3 = vmax.f32 %v497_v34, 0.0  ;;  %v624_v19 = vadd.f32 %v578_v15, %v577_v62  ;;  %v321_v34 = vld [vmem:[#allocation7 + $0xc0] sm:$0xff]  ;;  %v326_v15 = vld [vmem:[#allocation7 + $0xe8] sm:$0xff]  ;;  %v323_v62 = vld [vmem:[#allocation7 + $0xd0] sm:$0xff] }
 0x375   :  { %v400_v29 = vpop.permute.xlu1 %399  ;;  %v7708_v30 = vpop.permute.xlu0 %429 }
 0x376   :  { %v495_v20 = vadd.f32 %v400_v29, %v311_v4  ;;  %v572_v35 = vmul.f32 %v7706_v2, %v520_v7  ;;  %v567_v58 = vmul.f32 %v7704_v1, %v515_v31  ;;  %v501_v13 = vadd.f32 %v7708_v30, %v317_v59 }
 0x377   :  { %v581_v31 = vmul.f32 %v7702_v0, %v529_v3 }
 0x378   :  { %v527_v52 = vmax.f32 %v495_v20, 0.0  ;;  %v608_v4 = vadd.f32 %v607_v50, %v572_v35 }
 0x379   :  { %v7710_v54 = vpop.permute.xlu1 %433  ;;  %v385_v56 = vpop.permute.xlu0 %384  ;;  %v633_v59 = vadd.f32 %v582_v25, %v581_v31 }
 0x37a   :  { %v492_v21 = vadd.f32 %v385_v56, %v308_v60  ;;  %v615_v56 = vadd.f32 %v574_v27, %v573_v28  ;;  %v598_v27 = vadd.f32 %v597_v11, %v567_v58  ;;  %v502_v28 = vadd.f32 %v7710_v54, %v318_v5  ;;  %v325_v54 = vld [vmem:[#allocation7 + $0xe0] sm:$0xff]  ;;  %v316_v58 = vld [vmem:[#allocation7 + $0x98] sm:$0xff] }
 0x37b   :  { %v609_v32 = vrot.slane %v608_v4, 4 }
 0x37c   :  { %v524_v29 = vmax.f32 %v492_v21, 0.0  ;;  %v616_v17 = vadd.f32 %v615_v56, %v575_v42  ;;  %v579_v21 = vmul.f32 %v7704_v1, %v527_v52  ;;  %v534_v52 = vmax.f32 %v502_v28, 0.0 }
 0x37d   :  { %v419_v22 = vpop.permute.xlu1 %418  ;;  %v7714_v23 = vpop.permute.xlu0 %448 }
 0x37e   :  { %v499_v6 = vadd.f32 %v419_v22, %v315_v43  ;;  %v576_v7 = vmul.f32 %v7706_v2, %v524_v29  ;;  %v625_v29 = vadd.f32 %v624_v19, %v579_v21  ;;  %v533_v43 = vmax.f32 %v501_v13, 0.0  ;;  %v320_v13 = vld [vmem:[#allocation7 + $0xb8] sm:$0xff] }
 0x37f   :  { %v505_v56 = vadd.f32 %v7714_v23, %v321_v34  ;;  %v586_v23 = vmul.f32 %v7700_v63, %v534_v52  ;;  %v324_v52 = vld [vmem:[#allocation7 + $0xd8] sm:$0xff] }
 0x380   :  { %v531_v33 = vmax.f32 %v499_v6, 0.0 }
 0x381   :  { %v453_v44 = vpop.permute.xlu1 %452  ;;  %v347_v47 = vpop.permute.xlu0 %346  ;;  %v537_v19 = vmax.f32 %v505_v56, 0.0  ;;  %v328_v56 = vld [vmem:[#allocation7 + $0xf8] sm:$0xff] }
 0x382   :  { %v484_v60 = vadd.f32 %v347_v47, %v300_v37  ;;  %v617_v37 = vadd.f32 %v616_v17, %v576_v7  ;;  %v506_v39 = vadd.f32 %v453_v44, %v322_v24  ;;  %v583_v44 = vmul.f32 %v7704_v1, %v531_v33  ;;  %v327_v24 = vld [vmem:[#allocation7 + $0xf0] sm:$0xff] }
 0x384   :  { %v516_v8 = vmax.f32 %v484_v60, 0.0  ;;  %v610_v60 = vadd.f32 %v609_v32, %v608_v4  ;;  %v618_v3 = vrot.slane %v617_v37, 4  ;;  %v538_v5 = vmax.f32 %v506_v39, 0.0 }
 0x385   :  { %v404_v18 = vpop.permute.xlu1 %403  ;;  %v438_v12 = vpop.permute.xlu0 %437  ;;  %v634_v25 = vadd.f32 %v633_v59, %v583_v44 }
 0x386   :  { %v496_v20 = vadd.f32 %v404_v18, %v312_v61  ;;  %v568_v22 = vmul.f32 %v7706_v2, %v516_v8  ;;  %v503_v50 = vadd.f32 %v438_v12, %v319_v9  ;;  %v585_v8 = vmul.f32 %v7702_v0, %v533_v43 }
 0x387   :  { %v590_v9 = vmul.f32 %v7700_v63, %v538_v5 }
 0x388   :  { %v528_v35 = vmax.f32 %v496_v20, 0.0  ;;  %v599_v41 = vadd.f32 %v598_v27, %v568_v22  ;;  %v535_v18 = vmax.f32 %v503_v50, 0.0  ;;  %v611_v20 = vrot.slane %v610_v60, 2 }
 0x389   :  { %v468_v30 = vpop.permute.xlu1 %467  ;;  %v472_v42 = vpop.permute.xlu0 %471  ;;  %v619_v22 = vadd.f32 %v618_v3, %v617_v37 }
 0x38a   :  { %v580_v47 = vmul.f32 %v7706_v2, %v528_v35  ;;  %v600_v16 = vrot.slane %v599_v41, 4  ;;  %v509_v6 = vadd.f32 %v468_v30, %v325_v54  ;;  %v510_v11 = vadd.f32 %v472_v42, %v326_v15 }
 0x38b   :  { %v587_v35 = vmul.f32 %v7704_v1, %v535_v18  ;;  %v642_v42 = vadd.f32 %v586_v23, %v585_v8  ;;  %v7747_v18 = vpop.eup %7083 }
 0x38c   :  { %v626_v61 = vadd.f32 %v625_v29, %v580_v47  ;;  %v601_v21 = vadd.f32 %v600_v16, %v599_v41  ;;  %v541_v31 = vmax.f32 %v509_v6, 0.0  ;;  %v542_v32 = vmax.f32 %v510_v11, 0.0 }
 0x38d   :  { %v423_v17 = vpop.permute.xlu1 %422  ;;  %v457_v7 = vpop.permute.xlu0 %456  ;;  %v589_v29 = vmul.f32 %v7702_v0, %v537_v19  ;;  %v612_v16 = vadd.f32 %v611_v20, %v610_v60  ;;  %v643_v5 = vadd.f32 %v642_v42, %v587_v35 }
 0x38e   :  { %v627_v48 = vrot.slane %v626_v61, 4  ;;  %v500_v12 = vadd.f32 %v423_v17, %v316_v58  ;;  %v507_v4 = vadd.f32 %v457_v7, %v323_v62  ;;  %v602_v43 = vrot.slane %v601_v21, 2 }
 0x38f   :  { %v620_v58 = vrot.slane %v619_v22, 2  ;;  %v593_v59 = vmul.f32 %v7702_v0, %v541_v31  ;;  %v594_v44 = vmul.f32 %v7700_v63, %v542_v32  ;;  %v651_v3 = vadd.f32 %v590_v9, %v589_v29 }
 0x390   :  { %v628_v27 = vadd.f32 %v627_v48, %v626_v61  ;;  %v532_v28 = vmax.f32 %v500_v12, 0.0  ;;  %v539_v47 = vmax.f32 %v507_v4, 0.0  ;;  %v603_v60 = vadd.f32 %v602_v43, %v601_v21 }
 0x391   :  { %v442_v33 = vpop.permute.xlu1 %441  ;;  %v476_v34 = vpop.permute.xlu0 %475  ;;  %v621_v4 = vadd.f32 %v620_v58, %v619_v22 }
 0x392   :  { %v584_v39 = vmul.f32 %v7706_v2, %v532_v28  ;;  %v504_v30 = vadd.f32 %v442_v33, %v320_v13  ;;  %v511_v41 = vadd.f32 %v476_v34, %v327_v24  ;;  %v629_v50 = vrot.slane %v628_v27, 2 }
 0x393   :  { %v591_v17 = vmul.f32 %v7704_v1, %v539_v47  ;;  %v660_v13 = vadd.f32 %v594_v44, %v593_v59  ;;  %v613_v28 = vrot.slane %v612_v16, 1  ;;  %v604_v21 = vrot.slane %v603_v60, 1 }
 0x394   :  { %v635_v54 = vadd.f32 %v634_v25, %v584_v39  ;;  %v536_v37 = vmax.f32 %v504_v30, 0.0  ;;  %v543_v15 = vmax.f32 %v511_v41, 0.0  ;;  %v630_v12 = vadd.f32 %v629_v50, %v628_v27 }
 0x395   :  { %v461_v61 = vpop.permute.xlu1 %460  ;;  %v480_v62 = vpop.permute.xlu0 %479  ;;  %v652_v33 = vadd.f32 %v651_v3, %v591_v17  ;;  %v622_v22 = vrot.slane %v621_v4, 1  ;;  %v614_v43 = vadd.f32 %v613_v28, %v612_v16 }
 0x396   :  { %v636_v6 = vrot.slane %v635_v54, 4  ;;  %v588_v11 = vmul.f32 %v7706_v2, %v536_v37  ;;  %v595_v7 = vmul.f32 %v7704_v1, %v543_v15  ;;  %v508_v8 = vadd.f32 %v461_v61, %v324_v52 }
 0x397   :  { %v512_v48 = vadd.f32 %v480_v62, %v328_v56  ;;  %v631_v27 = vrot.slane %v630_v12, 1  ;;  %v605_v52 = vadd.f32 %v604_v21, %v603_v60  ;;  %v623_v59 = vadd.f32 %v622_v22, %v621_v4 }
 0x398   :  { %v637_v23 = vadd.f32 %v636_v6, %v635_v54  ;;  %v644_v19 = vadd.f32 %v643_v5, %v588_v11  ;;  %v540_v24 = vmax.f32 %v508_v8, 0.0  ;;  %v661_v34 = vadd.f32 %v660_v13, %v595_v7  ;;  %v6845_v54 = vld [vmem:[%s8889_s7] ss:$0 sm:$0xff] }
 0x399   :  { %v544_v20 = vmax.f32 %v512_v48, 0.0  ;;  %v1127_v25 = vpop.permute.xlu0 %1126  ;;  %v632_v56 = vadd.f32 %v631_v27, %v630_v12  ;;  %v676_v3 = vadd.f32 %v6845_v54, %v614_v43  ;;  %v675_v16 = vadd.f32 %v6845_v54, %v605_v52 }
 0x39a   :  { %v638_v9 = vrot.slane %v637_v23, 2  ;;  %v645_v31 = vrot.slane %v644_v19, 4  ;;  %v1129_v32 = vmul.f32 %v7747_v18, %v1127_v25  ;;  %v592_v35 = vmul.f32 %v7706_v2, %v540_v24 }
 0x39b   :  { %v596_v39 = vmul.f32 %v7706_v2, %v544_v20  ;;  %v678_v17 = vadd.f32 %v6845_v54, %v632_v56  ;;  %v677_v8 = vadd.f32 %v6845_v54, %v623_v59  ;;  %v691_v13 = vrot.slane %v676_v3, 7 }
 0x39c   :  { %v639_v30 = vadd.f32 %v638_v9, %v637_v23  ;;  %v646_v41 = vadd.f32 %v645_v31, %v644_v19  ;;  %1131 = vrot.lane.b32.xlu0 %v1129_v32, %s7546_s4  ;;  %v653_v42 = vadd.f32 %v652_v33, %v592_v35 }
 0x39d   :  { %v662_v29 = vadd.f32 %v661_v34, %v596_v39  ;;  %v693_v4 = vsel %vm692_vm2, %v691_v13, %v675_v16  ;;  %v697_v20 = vrot.slane %v678_v17, 5  ;;  %v694_v9 = vrot.slane %v677_v8, 6 }
 0x39e   :  { %v640_v47 = vrot.slane %v639_v30, 1  ;;  %v647_v50 = vrot.slane %v646_v41, 2  ;;  %v654_v37 = vrot.slane %v653_v42, 4 }
 0x39f   :  { %v663_v15 = vrot.slane %v662_v29, 4  ;;  %v696_v35 = vsel %vm695_vm3, %v694_v9, %v693_v4 }
 0x3a0   :  { %v648_v58 = vadd.f32 %v647_v50, %v646_v41  ;;  %v641_v44 = vadd.f32 %v640_v47, %v639_v30  ;;  %v655_v61 = vadd.f32 %v654_v37, %v653_v42  ;;  %v699_v39 = vsel %vm698_vm4, %v697_v20, %v696_v35 }
 0x3a1   :  { %v664_v62 = vadd.f32 %v663_v15, %v662_v29  ;;  %v1124_v29 = vmul.f32 %v7747_v18, %v7635_v10 }
 0x3a2   :  { %v649_v5 = vrot.slane %v648_v58, 1  ;;  %v656_v6 = vrot.slane %v655_v61, 2  ;;  %v679_v19 = vadd.f32 %v6845_v54, %v641_v44 }
 0x3a3   :  { %v665_v11 = vrot.slane %v664_v62, 2 }
 0x3a4   :  { %v650_v7 = vadd.f32 %v649_v5, %v648_v58  ;;  %v657_v48 = vadd.f32 %v656_v6, %v655_v61  ;;  %v700_v31 = vrot.slane %v679_v19, 4 }
 0x3a5   :  { %v666_v23 = vadd.f32 %v665_v11, %v664_v62 }
 0x3a6   :  { %v680_v60 = vadd.f32 %v6845_v54, %v650_v7  ;;  %v658_v12 = vrot.slane %v657_v48, 1  ;;  %v702_v21 = vsel %vm701_vm5, %v700_v31, %v699_v39 }
 0x3a7   :  { %v667_v24 = vrot.slane %v666_v23, 1 }
 0x3a8   :  { %v659_v25 = vadd.f32 %v658_v12, %v657_v48  ;;  %v703_v32 = vrot.slane %v680_v60, 3 }
 0x3a9   :  { %v668_v28 = vadd.f32 %v667_v24, %v666_v23 }
 0x3aa   :  { %v681_v33 = vadd.f32 %v6845_v54, %v659_v25  ;;  %v705_v41 = vsel %vm704_vm6, %v703_v32, %v702_v21 }
 0x3ab   :  { %v682_v34 = vadd.f32 %v6845_v54, %v668_v28 }
 0x3ac   :  { %v706_v27 = vrot.slane %v681_v33, 2 }
 0x3ad   :  { %v709_v30 = vrot.slane %v682_v34, 1 }
 0x3ae   :  { %v708_v22 = vsel %vm707_vm7, %v706_v27, %v705_v41 }
 0x3af   :  { %v711_v42 = vsel %vm710_vm8, %v709_v30, %v708_v22 }
 0x3b0   :  { %713 = vmax.xlane.f32.xlu1 %v711_v42 }
 0x40e   :  { %v1132_v43 = vpop.permute.xlu0 %1131 }
 0x40f   :  { %v7765_v47 = vadd.f32 %v1132_v43, %v1124_v29 }
 0x411   :  { %7085 = vtanh.f32 %v7765_v47 }
 0x41e   :  { %v7086_v50 = vpop.eup %7085 }
 0x41f   :  { %1137 = vrot.lane.b32.xlu1 %v7086_v50, %s7545_s3 }
 0x439   :  { %v714_v54 = vpop.xlane.xlu1 %713 }
 0x43a   :  { %v716_v37 = vrot.slane %v714_v54, 1  ;;  %v717_v15 = vrot.slane %v714_v54, 2  ;;  %v718_v52 = vrot.slane %v714_v54, 3  ;;  %v719_v56 = vrot.slane %v714_v54, 4 }
 0x43b   :  { %v720_v58 = vrot.slane %v714_v54, 5  ;;  %v731_v59 = vsub.f32 %v675_v16, %v714_v54  ;;  %v721_v44 = vrot.slane %v714_v54, 6  ;;  %v722_v61 = vrot.slane %v714_v54, 7 }
 0x43c   :  { %v732_v62 = vsub.f32 %v676_v3, %v716_v37  ;;  %v733_v5 = vsub.f32 %v677_v8, %v717_v15  ;;  %v734_v10 = vsub.f32 %v678_v17, %v718_v52  ;;  %v735_v6 = vsub.f32 %v679_v19, %v719_v56 }
 0x43d   :  { %v739_v11 = vmul.f32 1.442695, %v731_v59  ;;  %v736_v7 = vsub.f32 %v680_v60, %v720_v58  ;;  %v737_v48 = vsub.f32 %v681_v33, %v721_v44  ;;  %v738_v24 = vsub.f32 %v682_v34, %v722_v61  ;;  %v805_v58 = vld [vmem:[#allocation5] sm:$0xff] }
 0x43e   :  { %v741_v23 = vmul.f32 1.442695, %v732_v62  ;;  %v743_v13 = vmul.f32 1.442695, %v733_v5  ;;  %v745_v12 = vmul.f32 1.442695, %v734_v10 }
 0x43f   :  { %7087 = vpow2.f32 %v739_v11  ;;  %v747_v4 = vmul.f32 1.442695, %v735_v6  ;;  %v749_v20 = vmul.f32 1.442695, %v736_v7  ;;  %v751_v25 = vmul.f32 1.442695, %v737_v48 }
 0x440   :  { %7089 = vpow2.f32 %v741_v23  ;;  %v753_v16 = vmul.f32 1.442695, %v738_v24  ;;  %v808_v11 = vld [vmem:[#allocation5 + $0x18] sm:$0xff]  ;;  %v806_v24 = vld [vmem:[#allocation5 + $0x8] sm:$0xff] }
 0x441   :  { %7091 = vpow2.f32 %v743_v13 }
 0x442   :  { %7093 = vpow2.f32 %v745_v12 }
 0x443   :  { %7095 = vpow2.f32 %v747_v4 }
 0x444   :  { %7097 = vpow2.f32 %v749_v20 }
 0x445   :  { %7099 = vpow2.f32 %v751_v25 }
 0x446   :  { %7101 = vpow2.f32 %v753_v16 }
 0x44c   :  { %v7088_v3 = vpop.eup %7087 }
 0x44d   :  { %v7090_v17 = vpop.eup %7089 }
 0x44e   :  { %v7092_v8 = vpop.eup %7091  ;;  %v763_v19 = vrot.slane %v7090_v17, 7 }
 0x44f   :  { %v7094_v60 = vpop.eup %7093  ;;  %v765_v28 = vrot.slane %v7092_v8, 6 }
 0x450   :  { %v7096_v9 = vpop.eup %7095  ;;  %v764_v31 = vsel %vm692_vm2, %v763_v19, %v7088_v3  ;;  %v767_v32 = vrot.slane %v7094_v60, 5 }
 0x451   :  { %v7098_v33 = vpop.eup %7097  ;;  %v766_v34 = vsel %vm695_vm3, %v765_v28, %v764_v31  ;;  %v769_v35 = vrot.slane %v7096_v9, 4 }
 0x452   :  { %v7100_v39 = vpop.eup %7099  ;;  %v768_v21 = vsel %vm698_vm4, %v767_v32, %v766_v34  ;;  %v771_v27 = vrot.slane %v7098_v33, 3  ;;  %v807_v34 = vld [vmem:[#allocation5 + $0x10] sm:$0xff] }
 0x453   :  { %v7102_v30 = vpop.eup %7101  ;;  %v770_v41 = vsel %vm701_vm5, %v769_v35, %v768_v21  ;;  %v773_v22 = vrot.slane %v7100_v39, 2  ;;  %v820_v21 = vld [vmem:[#allocation5 + $0x78] sm:$0xff] }
 0x454   :  { %v772_v42 = vsel %vm704_vm6, %v771_v27, %v770_v41  ;;  %v775_v29 = vrot.slane %v7102_v30, 1 }
 0x455   :  { %v774_v43 = vsel %vm707_vm7, %v773_v22, %v772_v42 }
 0x456   :  { %v776_v50 = vsel %vm710_vm8, %v775_v29, %v774_v43  ;;  %v809_v29 = vld [vmem:[#allocation5 + $0x20] sm:$0xff] }
 0x457   :  { %778 = vadd.xlane.f32.xlu0 %v776_v50 }
 0x4e0   :  { %v779_v54 = vpop.xlane.xlu0 %778 }
 0x4e1   :  { %7103 = vrcp.f32 %v779_v54 }
 0x4ee   :  { %v7104_v37 = vpop.eup %7103 }
 0x4ef   :  { %v797_v15 = vmul.f32 %v7104_v37, %v7088_v3  ;;  %v782_v52 = vrot.slane %v7104_v37, 1  ;;  %v787_v56 = vrot.slane %v7104_v37, 6  ;;  %v788_v59 = vrot.slane %v7104_v37, 7 }
 0x4f0   :  { %v783_v44 = vrot.slane %v7104_v37, 2  ;;  %v784_v61 = vrot.slane %v7104_v37, 3  ;;  %v785_v62 = vrot.slane %v7104_v37, 4  ;;  %v786_v48 = vrot.slane %v7104_v37, 5 }
 0x4f1   :  { %v824_v5 = vrot.slane %v797_v15, %v7680_v46  ;;  %v798_v10 = vmul.f32 %v7090_v17, %v782_v52  ;;  %v803_v6 = vmul.f32 %v7100_v39, %v787_v56  ;;  %v804_v4 = vmul.f32 %v7102_v30, %v788_v59  ;;  %v818_v17 = vld [vmem:[#allocation5 + $0x68] sm:$0xff] }
 0x4f2   :  { %v799_v7 = vmul.f32 %v7092_v8, %v783_v44  ;;  %v800_v20 = vmul.f32 %v7094_v60, %v784_v61  ;;  %v801_v25 = vmul.f32 %v7096_v9, %v785_v62  ;;  %v802_v31 = vmul.f32 %v7098_v33, %v786_v48  ;;  %v810_v56 = vld [vmem:[#allocation5 + $0x28] sm:$0xff]  ;;  %v811_v44 = vld [vmem:[#allocation5 + $0x30] sm:$0xff]  ;;  %v812_v62 = vld [vmem:[#allocation5 + $0x38] sm:$0xff] }
 0x4f3   :  { %v853_v23 = vmul.f32 %v824_v5, %v805_v58  ;;  %v828_v13 = vrot.slane %v798_v10, %v7680_v46  ;;  %v1096_v12 = vrot.slane %v798_v10, 7  ;;  %v848_v19 = vrot.slane %v803_v6, %v7680_v46 }
 0x4f4   :  { %v1098_v28 = vrot.slane %v799_v7, 6  ;;  %v854_v8 = vmul.f32 %v824_v5, %v806_v24  ;;  %v1100_v35 = vrot.slane %v800_v20, 5  ;;  %v852_v60 = vrot.slane %v804_v4, %v7680_v46  ;;  %v7793_v24 = vld [vmem:[#allocation5 + $0x58] sm:$0xff] }
 0x4f5   :  { %869 = vadd.xlane.f32.xlu0 %v853_v23  ;;  %v856_v16 = vmul.f32 %v828_v13, %v808_v11  ;;  %v1097_v3 = vsel %vm692_vm2, %v1096_v12, %v797_v15  ;;  %v866_v39 = vmul.f32 %v848_v19, %v818_v17  ;;  %v1102_v9 = vrot.slane %v801_v25, 4  ;;  %v7804_v17 = vld [vmem:[%s8890_s8] sm:$0xff] }
 0x4f6   :  { %v1099_v32 = vsel %vm695_vm3, %v1098_v28, %v1097_v3  ;;  %v1104_v27 = vrot.slane %v802_v31, 3  ;;  %v1106_v41 = vrot.slane %v803_v6, 2  ;;  %v855_v22 = vmul.f32 %v828_v13, %v807_v34  ;;  %v813_v6 = vld [vmem:[#allocation5 + $0x40] sm:$0xff]  ;;  %v815_v13 = vld [vmem:[#allocation5 + $0x50] sm:$0xff] }
 0x4f7   :  { %875 = vadd.xlane.f32.xlu1 %v856_v16  ;;  %v1101_v30 = vsel %vm698_vm4, %v1100_v35, %v1099_v32  ;;  %v832_v33 = vrot.slane %v799_v7, %v7680_v46  ;;  %v1108_v50 = vrot.slane %v804_v4, 1  ;;  %v868_v54 = vmul.f32 %v852_v60, %v820_v21  ;;  %v814_v7 = vld [vmem:[#allocation5 + $0x48] sm:$0xff]  ;;  %v7799_v28 = vld [vmem:[%s8890_s8 + $0x8] sm:$0xff] }
 0x4f8   :  { %v1103_v42 = vsel %vm701_vm5, %v1102_v9, %v1101_v30  ;;  %v836_v59 = vrot.slane %v800_v20, %v7680_v46  ;;  %v840_v10 = vrot.slane %v801_v25, %v7680_v46  ;;  %v844_v23 = vrot.slane %v802_v31, %v7680_v46  ;;  %v817_v20 = vld [vmem:[#allocation5 + $0x60] sm:$0xff]  ;;  %v819_v25 = vld [vmem:[#allocation5 + $0x70] sm:$0xff]  ;;  %6940 = vmatpush3.msra.mxu0 %v7799_v28 }
 0x4f9   :  { %871 = vadd.xlane.f32.xlu0 %v854_v8  ;;  %v1105_v43 = vsel %vm704_vm6, %v1104_v27, %v1103_v42  ;;  %v857_v52 = vmul.f32 %v832_v33, %v809_v29  ;;  %v858_v58 = vmul.f32 %v832_v33, %v810_v56  ;;  %v865_v16 = vmul.f32 %v848_v19, %v817_v20  ;;  %v1138_v19 = vpop.permute.xlu1 %1137 }
 0x4fa   :  { %v1107_v37 = vsel %vm707_vm7, %v1106_v41, %v1105_v43  ;;  %v859_v61 = vmul.f32 %v836_v59, %v811_v44  ;;  %v860_v5 = vmul.f32 %v836_v59, %v812_v62  ;;  %v861_v11 = vmul.f32 %v840_v10, %v813_v6  ;;  %6941 = vmatprep.subr.mxu0 %v8896_v14 }
 0x4fb   :  { %895 = vadd.xlane.f32.xlu1 %v866_v39  ;;  %v7788_v15 = vsel %vm710_vm8, %v1108_v50, %v1107_v37  ;;  %v862_v48 = vmul.f32 %v840_v10, %v814_v7  ;;  %v863_v12 = vmul.f32 %v844_v23, %v815_v13  ;;  %v864_v4 = vmul.f32 %v844_v23, %v7793_v24 }
 0x4fc   :  { %8901 = vst [vmem:[#allocation19_spill] sm:$0xff] %v7788_v15  ;;  %v867_v3 = vmul.f32 %v852_v60, %v819_v25  ;;  %6942 = vmatpush3.msra.mxu0 %v7804_v17  ;;  %v1140_v31 = vmul.f32 %v7747_v18, %v1138_v19 }
 0x4fd   :  { %873 = vadd.xlane.f32.xlu0 %v855_v22  ;;  %6946 = vmatprep.subr.mxu0 %v8896_v14 }
 0x4ff   :  { %899 = vadd.xlane.f32.xlu1 %v868_v54 }
 0x501   :  { %877 = vadd.xlane.f32.xlu0 %v857_v52 }
 0x505   :  { %879 = vadd.xlane.f32.xlu0 %v858_v58 }
 0x509   :  { %881 = vadd.xlane.f32.xlu0 %v859_v61 }
 0x50d   :  { %883 = vadd.xlane.f32.xlu0 %v860_v5 }
 0x511   :  { %885 = vadd.xlane.f32.xlu0 %v861_v11 }
 0x515   :  { %887 = vadd.xlane.f32.xlu0 %v862_v48 }
 0x519   :  { %889 = vadd.xlane.f32.xlu0 %v863_v12 }
 0x51d   :  { %891 = vadd.xlane.f32.xlu0 %v864_v4 }
 0x521   :  { %893 = vadd.xlane.f32.xlu0 %v865_v16 }
 0x525   :  { %897 = vadd.xlane.f32.xlu0 %v867_v3 }
 0x53b   :  { %1142 = vrot.lane.b32.xlu0 %v1140_v31, %s7546_s4 }
 0x57e   :  { %v870_v8 = vpop.xlane.xlu0 %869 }
 0x57f   :  { %v922_v52 = vrot.slane %v870_v8, %v7668_v36 }
 0x580   :  { %v876_v30 = vpop.xlane.xlu1 %875 }
 0x581   :  { %v937_v18 = vrot.slane %v876_v30, %v7670_v38  ;;  %v7258_v30 = vld [vmem:[#allocation8 + $0x48] sm:$0xff] }
 0x582   :  { %v872_v32 = vpop.xlane.xlu0 %871 }
 0x583   :  { %v927_v43 = vrot.slane %v872_v32, %v7670_v38 }
 0x584   :  { %v896_v33 = vpop.xlane.xlu1 %895 }
 0x585   :  { %v929_v5 = vsel %vm928_vm9, %v927_v43, %v922_v52  ;;  %v982_v7 = vrot.slane %v896_v33, %v7670_v38  ;;  %v7262_v33 = vld [vmem:[#allocation8 + $0x18] sm:$0xff]  ;;  %v7265_v52 = vld [vmem:[%s8887_s5] ss:$0 sm:$0xff] }
 0x586   :  { %v874_v34 = vpop.xlane.xlu0 %873 }
 0x587   :  { %v933_v22 = vrot.slane %v874_v34, %v7668_v36 }
 0x588   :  { %v900_v23 = vpop.xlane.xlu1 %899 }
 0x589   :  { %v938_v56 = vsel %vm928_vm9, %v937_v18, %v933_v22  ;;  %v991_v3 = vrot.slane %v900_v23, %v7670_v38  ;;  %v7261_v22 = vld [vmem:[#allocation8 + $0x20] sm:$0xff]  ;;  %v217_v18 = vpop.f32.mrf.mxu0 }
 0x58a   :  { %v878_v35 = vpop.xlane.xlu0 %877  ;;  %v993_v48 = vsel %vm692_vm2, %v938_v56, %v929_v5 }
 0x58b   :  { %v942_v54 = vrot.slane %v878_v35, %v7668_v36 }
 0x58e   :  { %v880_v39 = vpop.xlane.xlu0 %879 }
 0x58f   :  { %v946_v42 = vrot.slane %v880_v39, %v7670_v38 }
 0x591   :  { %v947_v44 = vsel %vm928_vm9, %v946_v42, %v942_v54  ;;  %v7263_v42 = vld [vmem:[#allocation8 + $0x8] sm:$0xff] }
 0x592   :  { %v882_v60 = vpop.xlane.xlu0 %881  ;;  %v994_v12 = vsel %vm695_vm3, %v947_v44, %v993_v48  ;;  %v2064_v48 = vld [vmem:[#allocation2 + $0x10] sm:$0xff] }
 0x593   :  { %v951_v58 = vrot.slane %v882_v60, %v7668_v36  ;;  %v7253_v60 = vld [vmem:[#allocation8 + $0x58] sm:$0xff] }
 0x596   :  { %v884_v9 = vpop.xlane.xlu0 %883 }
 0x597   :  { %v955_v50 = vrot.slane %v884_v9, %v7670_v38  ;;  %v7254_v9 = vld [vmem:[#allocation8 + $0x40] sm:$0xff] }
 0x599   :  { %v956_v10 = vsel %vm928_vm9, %v955_v50, %v951_v58 }
 0x59a   :  { %v886_v21 = vpop.xlane.xlu0 %885  ;;  %v995_v20 = vsel %vm698_vm4, %v956_v10, %v994_v12 }
 0x59b   :  { %v960_v61 = vrot.slane %v886_v21, %v7668_v36  ;;  %v7255_v21 = vld [vmem:[#allocation8 + $0x28] sm:$0xff] }
 0x59e   :  { %v888_v27 = vpop.xlane.xlu0 %887 }
 0x59f   :  { %v964_v37 = vrot.slane %v888_v27, %v7670_v38  ;;  %v7256_v27 = vld [vmem:[#allocation8 + $0x10] sm:$0xff] }
 0x5a1   :  { %v965_v13 = vsel %vm928_vm9, %v964_v37, %v960_v61 }
 0x5a2   :  { %v890_v41 = vpop.xlane.xlu0 %889  ;;  %v996_v19 = vsel %vm701_vm5, %v965_v13, %v995_v20 }
 0x5a3   :  { %v969_v6 = vrot.slane %v890_v41, %v7668_v36  ;;  %v7260_v41 = vld [vmem:[#allocation8 + $0x30] sm:$0xff] }
 0x5a6   :  { %v892_v29 = vpop.xlane.xlu0 %891 }
 0x5a7   :  { %v973_v59 = vrot.slane %v892_v29, %v7670_v38  ;;  %v7264_v29 = vld [vmem:[#allocation8] sm:$0xff] }
 0x5a9   :  { %v974_v4 = vsel %vm928_vm9, %v973_v59, %v969_v6 }
 0x5aa   :  { %v894_v62 = vpop.xlane.xlu0 %893  ;;  %v997_v8 = vsel %vm704_vm6, %v974_v4, %v996_v19 }
 0x5ab   :  { %v978_v11 = vrot.slane %v894_v62, %v7668_v36 }
 0x5ad   :  { %v983_v16 = vsel %vm928_vm9, %v982_v7, %v978_v11 }
 0x5ae   :  { %v898_v25 = vpop.xlane.xlu0 %897  ;;  %v998_v34 = vsel %vm707_vm7, %v983_v16, %v997_v8 }
 0x5af   :  { %v987_v31 = vrot.slane %v898_v25, %v7668_v36 }
 0x5b1   :  { %v992_v32 = vsel %vm928_vm9, %v991_v3, %v987_v31 }
 0x5b2   :  { %v1143_v35 = vpop.permute.xlu0 %1142  ;;  %v999_v39 = vsel %vm710_vm8, %v992_v32, %v998_v34 }
 0x5b3   :  { %6944 = vmatmul.mubr.msk.f32.vlgmr.msra.gmra.mxu0 %vm1000_vm10, %v999_v39  ;;  %6849 = vmatmul.mubr.msk.f32.vlgmr.msra.gmra.mxu1 %vm146_vm1, %v1143_v35  ;;  %v1293_v39 = vld [vmem:[#allocation7 + $0x28] sm:$0xff] }
 0x5b4   :  { %6947 = vmatpush3.msra.mxu0 %v7253_v60  ;;  %6954 = vmatprep.mubr.msk.f32.mxu0 %vm7548_vm0, %v8896_v14 }
 0x5b5   :  { %6948 = vmatprep.subr.mxu0 %v8896_v14  ;;  %6958 = vmatpush3.msra.mxu1 %v7799_v28  ;;  %v7257_v28 = vld [vmem:[#allocation8 + $0x50] sm:$0xff] }
 0x5b6   :  { %6949 = vmatpush3.msra.mxu0 %v7254_v9  ;;  %6959 = vmatprep.subr.mxu1 %v8896_v14 }
 0x5b7   :  { %6950 = vmatprep.subr.mxu0 %v8896_v14  ;;  %6960 = vmatpush3.msra.mxu1 %v7804_v17  ;;  %v7259_v17 = vld [vmem:[#allocation8 + $0x38] sm:$0xff] }
 0x5b8   :  { %6951 = vmatpush3.msra.mxu0 %v7255_v21  ;;  %6961 = vmatprep.mubr.msk.f32.mxu1 %vm7548_vm0, %v8896_v14  ;;  %v1296_v21 = vld [vmem:[#allocation7 + $0x40] sm:$0xff] }
 0x5b9   :  { %6952 = vmatprep.subr.mxu0 %v8896_v14  ;;  %6964 = vmatprep.subr.mxu1 %v8896_v14 }
 0x5ba   :  { %6953 = vmatpush3.msra.mxu0 %v7256_v27  ;;  %v1292_v27 = vld [vmem:[#allocation7 + $0x20] sm:$0xff] }
 0x5bb   :  { %6955 = vmatmul.mubr.msk.f32.vlgmr.msra.gmra.mxu0 %vm146_vm1, %v1143_v35  ;;  %2119 = vmatprep.subr.mxu0 %v7257_v28  ;;  %v1294_v28 = vld [vmem:[#allocation7 + $0x30] sm:$0xff] }
 0x5bc   :  { %2120 = vmatpush1.msra.mxu0 %v7258_v30  ;;  %2159 = vmatprep.mubr.f32.mxu0 %v8896_v14 }
 0x5bd   :  { %2121 = vmatprep.subr.mxu0 %v7259_v17 }
 0x5be   :  { %2122 = vmatpush1.msra.mxu0 %v7260_v41  ;;  %v1288_v41 = vld [vmem:[#allocation7] sm:$0xff] }
 0x5bf   :  { %2123 = vmatprep.subr.mxu0 %v7261_v22  ;;  %v1297_v22 = vld [vmem:[#allocation7 + $0x48] sm:$0xff] }
 0x5c0   :  { %2124 = vmatpush1.msra.mxu0 %v7262_v33 }
 0x5c1   :  { %2125 = vmatprep.subr.mxu0 %v7263_v42  ;;  %v1295_v42 = vld [vmem:[#allocation7 + $0x38] sm:$0xff] }
 0x5c2   :  { %2126 = vmatpush1.msra.mxu0 %v7264_v29 }
 0x5c3   :  { %6975 = vmatprep.subr.mxu0 %v8896_v14 }
 0x673   :  { %v1069_v43 = vpop.f32.mrf.mxu0  ;;  %v1212_v7 = vpop.f32.mrf.mxu1 }
 0x674   :  { %v7859_v50 = vadd.f32 %v1069_v43, %v217_v18  ;;  %v2065_v23 = vadd.f32 %v2064_v48, %v1212_v7 }
 0x675   :  { %v6945_v54 = vpop.f32.mrf.mxu0 }
 0x676   :  { %8902 = vst [vmem:[#allocation20_spill] sm:$0xff] %v7859_v50  ;;  %7105 = vtanh.f32 %v2065_v23  ;;  %v6852_v30 = vmul.f32 -1.442695, %v2065_v23 }
 0x678   :  { %7107 = vpow2.f32 %v6852_v30 }
 0x67b   :  { %v1283_v37 = vpop.f32.mrf.mxu0 }
 0x67c   :  { %v1287_v56 = vadd.f32 %v7265_v52, %v1283_v37  ;;  %v1289_v37 = vld [vmem:[#allocation7 + $0x8] sm:$0xff] }
 0x67d   :  { %v6956_v58 = vpop.f32.mrf.mxu0 }
 0x67e   :  { %v1361_v59 = vrot.slane %v1287_v56, %v7678_v45  ;;  %v1342_v44 = vrot.slane %v1287_v56, %v7675_v40  ;;  %v1323_v61 = vrot.slane %v1287_v56, %v7680_v46  ;;  %v1380_v62 = vrot.slane %v1287_v56, %v7684_v49  ;;  %v1300_v58 = vld [vmem:[#allocation7 + $0x60] sm:$0xff] }
 0x67f   :  { %v1399_v5 = vrot.slane %v1287_v56, %v7687_v51  ;;  %v1418_v10 = vrot.slane %v1287_v56, %v7690_v53  ;;  %v1437_v6 = vrot.slane %v1287_v56, %v7693_v55  ;;  %v1456_v11 = vrot.slane %v1287_v56, %v7696_v57 }
 0x680   :  { %1363 = vbcast.lane.b32.xlu0 %v1361_v59, 256  ;;  %1344 = vbcast.lane.b32.xlu1 %v1342_v44, 256 }
 0x683   :  { %v7106_v13 = vpop.eup %7105 }
 0x684   :  { %1348 = vbcast.lane.b32.xlu1 %v1342_v44, 264  ;;  %1325 = vbcast.lane.b32.xlu0 %v1323_v61, 256 }
 0x688   :  { %1367 = vbcast.lane.b32.xlu1 %v1361_v59, 264  ;;  %1352 = vbcast.lane.b32.xlu0 %v1342_v44, 272 }
 0x68c   :  { %1329 = vbcast.lane.b32.xlu1 %v1323_v61, 264  ;;  %1386 = vbcast.lane.b32.xlu0 %v1380_v62, 264 }
 0x690   :  { %1382 = vbcast.lane.b32.xlu1 %v1380_v62, 256  ;;  %1401 = vbcast.lane.b32.xlu0 %v1399_v5, 256 }
 0x694   :  { %1371 = vbcast.lane.b32.xlu1 %v1361_v59, 272  ;;  %1333 = vbcast.lane.b32.xlu0 %v1323_v61, 272 }
 0x698   :  { %1405 = vbcast.lane.b32.xlu1 %v1399_v5, 264  ;;  %1390 = vbcast.lane.b32.xlu0 %v1380_v62, 272 }
 0x69c   :  { %1356 = vbcast.lane.b32.xlu1 %v1342_v44, 280  ;;  %1424 = vbcast.lane.b32.xlu0 %v1418_v10, 264  ;;  %v1298_v44 = vld [vmem:[#allocation7 + $0x50] sm:$0xff] }
 0x6a0   :  { %1420 = vbcast.lane.b32.xlu1 %v1418_v10, 256  ;;  %1409 = vbcast.lane.b32.xlu0 %v1399_v5, 272 }
 0x6a4   :  { %1375 = vbcast.lane.b32.xlu1 %v1361_v59, 280  ;;  %1443 = vbcast.lane.b32.xlu0 %v1437_v6, 264 }
 0x6a8   :  { %1439 = vbcast.lane.b32.xlu1 %v1437_v6, 256  ;;  %1394 = vbcast.lane.b32.xlu0 %v1380_v62, 280 }
 0x6ac   :  { %1337 = vbcast.lane.b32.xlu1 %v1323_v61, 280  ;;  %1458 = vbcast.lane.b32.xlu0 %v1456_v11, 256 }
 0x6b0   :  { %1428 = vbcast.lane.b32.xlu1 %v1418_v10, 272  ;;  %1413 = vbcast.lane.b32.xlu0 %v1399_v5, 280 }
 0x6b4   :  { %1462 = vbcast.lane.b32.xlu1 %v1456_v11, 264  ;;  %1432 = vbcast.lane.b32.xlu0 %v1418_v10, 280  ;;  %v1301_v10 = vld [vmem:[#allocation7 + $0x68] sm:$0xff] }
 0x6b8   :  { %1447 = vbcast.lane.b32.xlu1 %v1437_v6, 272  ;;  %1451 = vbcast.lane.b32.xlu0 %v1437_v6, 280  ;;  %v1302_v6 = vld [vmem:[#allocation7 + $0x70] sm:$0xff] }
 0x6bc   :  { %1466 = vbcast.lane.b32.xlu1 %v1456_v11, 272 }
 0x6c0   :  { %1470 = vbcast.lane.b32.xlu1 %v1456_v11, 280 }
 0x6c4   :  { %2075 = vrot.lane.b32.xlu1 %v7106_v13, %s7545_s3 }
 0x6f2   :  { %v1364_v12 = vpop.permute.xlu0 %1363  ;;  %v1345_v4 = vpop.permute.xlu1 %1344 }
 0x6f3   :  { %v1480_v33 = vadd.f32 %v1364_v12, %v1296_v21  ;;  %v1476_v43 = vadd.f32 %v1345_v4, %v1292_v27  ;;  %v1290_v12 = vld [vmem:[#allocation7 + $0x10] sm:$0xff]  ;;  %v1305_v21 = vld [vmem:[#allocation7 + $0x88] sm:$0xff] }
 0x6f5   :  { %v1512_v62 = vmax.f32 %v1480_v33, 0.0  ;;  %v1508_v48 = vmax.f32 %v1476_v43, 0.0 }
 0x6f6   :  { %v1349_v20 = vpop.permute.xlu1 %1348  ;;  %v1326_v16 = vpop.permute.xlu0 %1325 }
 0x6f7   :  { %v1477_v17 = vadd.f32 %v1349_v20, %v1293_v39  ;;  %v1472_v52 = vadd.f32 %v1326_v16, %v1288_v41  ;;  %v1299_v16 = vld [vmem:[#allocation7 + $0x58] sm:$0xff] }
 0x6f9   :  { %v1509_v59 = vmax.f32 %v1477_v17, 0.0  ;;  %v1504_v4 = vmax.f32 %v1472_v52, 0.0  ;;  %v1303_v52 = vld [vmem:[#allocation7 + $0x78] sm:$0xff] }
 0x6fa   :  { %v1368_v25 = vpop.permute.xlu1 %1367  ;;  %v1353_v3 = vpop.permute.xlu0 %1352 }
 0x6fb   :  { %v1478_v54 = vadd.f32 %v1353_v3, %v1294_v28  ;;  %v1481_v56 = vadd.f32 %v1368_v25, %v1297_v22  ;;  %v1541_v25 = vmul.f32 %v1509_v59, %v7700_v63  ;;  %v1536_v43 = vmul.f32 %v1504_v4, %v7702_v0 }
 0x6fd   :  { %v1510_v23 = vmax.f32 %v1478_v54, 0.0  ;;  %v1513_v20 = vmax.f32 %v1481_v56, 0.0 }
 0x6fe   :  { %v1330_v19 = vpop.permute.xlu1 %1329  ;;  %v1387_v31 = vpop.permute.xlu0 %1386 }
 0x6ff   :  { %v1473_v5 = vadd.f32 %v1330_v19, %v1289_v37  ;;  %v1485_v39 = vadd.f32 %v1387_v31, %v1301_v10  ;;  %v1544_v19 = vmul.f32 %v1512_v62, %v7702_v0  ;;  %v1542_v33 = vmul.f32 %v1510_v23, %v7704_v1  ;;  %v1306_v37 = vld [vmem:[#allocation7 + $0x90] sm:$0xff] }
 0x700   :  { %v1545_v31 = vmul.f32 %v1513_v20, %v7700_v63 }
 0x701   :  { %v1505_v30 = vmax.f32 %v1473_v5, 0.0 }
 0x702   :  { %v1383_v8 = vpop.permute.xlu1 %1382  ;;  %v7873_v32 = vpop.permute.xlu0 %1401  ;;  %v1586_v4 = vadd.f32 %v1545_v31, %v1544_v19  ;;  %v1312_v19 = vld [vmem:[#allocation7 + $0xc0] sm:$0xff] }
 0x703   :  { %v1484_v13 = vadd.f32 %v1383_v8, %v1300_v58  ;;  %v1540_v8 = vmul.f32 %v1508_v48, %v7702_v0 }
 0x705   :  { %v1577_v56 = vadd.f32 %v1541_v25, %v1540_v8 }
 0x706   :  { %v1372_v34 = vpop.permute.xlu1 %1371  ;;  %v1334_v35 = vpop.permute.xlu0 %1333 }
 0x707   :  { %v1482_v3 = vadd.f32 %v1372_v34, %v1298_v44  ;;  %v1474_v17 = vadd.f32 %v1334_v35, %v1290_v12  ;;  %v1304_v34 = vld [vmem:[#allocation7 + $0x80] sm:$0xff]  ;;  %v1517_v35 = vmax.f32 %v1485_v39, 0.0  ;;  %v1578_v23 = vadd.f32 %v1577_v56, %v1542_v33 }
 0x708   :  { %v1308_v44 = vld [vmem:[#allocation7 + $0xa0] sm:$0xff]  ;;  %v1488_v62 = vadd.f32 %v7873_v32, %v1304_v34 }
 0x709   :  { %v1506_v5 = vmax.f32 %v1474_v17, 0.0  ;;  %v1549_v39 = vmul.f32 %v1517_v35, %v7700_v63 }
 0x70a   :  { %v1406_v60 = vpop.permute.xlu1 %1405  ;;  %v1391_v9 = vpop.permute.xlu0 %1390 }
 0x70b   :  { %v1486_v27 = vadd.f32 %v1391_v9, %v1302_v6  ;;  %v1514_v9 = vmax.f32 %v1482_v3, 0.0  ;;  %v1489_v54 = vadd.f32 %v1406_v60, %v1305_v21  ;;  %v1538_v8 = vmul.f32 %v1506_v5, %v7704_v1 }
 0x70d   :  { %v1518_v58 = vmax.f32 %v1486_v27, 0.0  ;;  %v1546_v20 = vmul.f32 %v1514_v9, %v7704_v1  ;;  %v1521_v3 = vmax.f32 %v1489_v54, 0.0 }
 0x70e   :  { %v1357_v29 = vpop.permute.xlu1 %1356  ;;  %v7875_v18 = vpop.permute.xlu0 %1424 }
 0x70f   :  { %v1479_v61 = vadd.f32 %v1357_v29, %v1295_v42  ;;  %v1516_v42 = vmax.f32 %v1484_v13, 0.0  ;;  %v1550_v21 = vmul.f32 %v1518_v58, %v7704_v1  ;;  %v1587_v9 = vadd.f32 %v1586_v4, %v1546_v20 }
 0x710   :  { %v1553_v54 = vmul.f32 %v1521_v3, %v7700_v63 }
 0x711   :  { %v1511_v28 = vmax.f32 %v1479_v61, 0.0  ;;  %v1537_v61 = vmul.f32 %v1505_v30, %v7700_v63  ;;  %v1548_v13 = vmul.f32 %v1516_v42, %v7702_v0  ;;  %v7108_v30 = vpop.eup %7107 }
 0x712   :  { %v1421_v11 = vpop.permute.xlu1 %1420  ;;  %v1410_v7 = vpop.permute.xlu0 %1409  ;;  %v2069_v56 = vadd.f32 1.0, %v7108_v30  ;;  %v1311_v30 = vld [vmem:[#allocation7 + $0xb8] sm:$0xff] }
 0x713   :  { %v1543_v59 = vmul.f32 %v1511_v28, %v7706_v2  ;;  %v1490_v60 = vadd.f32 %v1410_v7, %v1306_v37  ;;  %v1492_v25 = vadd.f32 %v1421_v11, %v1308_v44  ;;  %v1291_v28 = vld [vmem:[#allocation7 + $0x18] sm:$0xff]  ;;  %v1568_v17 = vadd.f32 %v1537_v61, %v1536_v43 }
 0x714   :  { %v1595_v34 = vadd.f32 %v1549_v39, %v1548_v13  ;;  %v1307_v44 = vld [vmem:[#allocation7 + $0x98] sm:$0xff]  ;;  %7109 = vrcp.f32 %v2069_v56 }
 0x715   :  { %v1579_v32 = vadd.f32 %v1578_v23, %v1543_v59  ;;  %v1524_v37 = vmax.f32 %v1492_v25, 0.0 }
 0x716   :  { %v1376_v41 = vpop.permute.xlu1 %1375  ;;  %v7879_v22 = vpop.permute.xlu0 %1443  ;;  %v1596_v35 = vadd.f32 %v1595_v34, %v1550_v21 }
 0x717   :  { %v1483_v29 = vadd.f32 %v1376_v41, %v1299_v16  ;;  %v1309_v16 = vld [vmem:[#allocation7 + $0xa8] sm:$0xff]  ;;  %v1520_v41 = vmax.f32 %v1488_v62, 0.0  ;;  %v1580_v58 = vrot.slane %v1579_v32, 4  ;;  %v1569_v62 = vadd.f32 %v1568_v17, %v1538_v8 }
 0x718   :  { %v1493_v11 = vadd.f32 %v7875_v18, %v1309_v16  ;;  %v1556_v3 = vmul.f32 %v1524_v37, %v7702_v0  ;;  %v1314_v37 = vld [vmem:[#allocation7 + $0xd0] sm:$0xff] }
 0x719   :  { %v1515_v10 = vmax.f32 %v1483_v29, 0.0  ;;  %v1522_v29 = vmax.f32 %v1490_v60, 0.0  ;;  %v1552_v61 = vmul.f32 %v1520_v41, %v7702_v0  ;;  %v1581_v25 = vadd.f32 %v1580_v58, %v1579_v32  ;;  %v1316_v32 = vld [vmem:[#allocation7 + $0xe0] sm:$0xff]  ;;  %v1315_v58 = vld [vmem:[#allocation7 + $0xd8] sm:$0xff] }
 0x71a   :  { %v1440_v6 = vpop.permute.xlu1 %1439  ;;  %v1395_v48 = vpop.permute.xlu0 %1394  ;;  %v1525_v13 = vmax.f32 %v1493_v11, 0.0 }
 0x71b   :  { %v1487_v12 = vadd.f32 %v1395_v48, %v1303_v52  ;;  %v1547_v7 = vmul.f32 %v1515_v10, %v7706_v2  ;;  %v1310_v52 = vld [vmem:[#allocation7 + $0xb0] sm:$0xff]  ;;  %v1496_v59 = vadd.f32 %v1440_v6, %v1312_v19  ;;  %v1313_v10 = vld [vmem:[#allocation7 + $0xc8] sm:$0xff]  ;;  %v1554_v60 = vmul.f32 %v1522_v29, %v7704_v1 }
 0x71c   :  { %v1604_v20 = vadd.f32 %v1553_v54, %v1552_v61  ;;  %v1497_v39 = vadd.f32 %v7879_v22, %v1313_v10 }
 0x71d   :  { %v1519_v27 = vmax.f32 %v1487_v12, 0.0  ;;  %v1588_v5 = vadd.f32 %v1587_v9, %v1547_v7  ;;  %v1528_v21 = vmax.f32 %v1496_v59, 0.0 }
 0x71e   :  { %v1338_v33 = vpop.permute.xlu1 %1337  ;;  %v7894_v42 = vpop.permute.xlu0 %1458  ;;  %v1605_v34 = vadd.f32 %v1604_v20, %v1554_v60  ;;  %v1529_v56 = vmax.f32 %v1497_v39, 0.0 }
 0x71f   :  { %v1551_v31 = vmul.f32 %v1519_v27, %v7706_v2  ;;  %v1475_v43 = vadd.f32 %v1338_v33, %v1291_v28  ;;  %v1317_v28 = vld [vmem:[#allocation7 + $0xe8] sm:$0xff]  ;;  %v1589_v17 = vrot.slane %v1588_v5, 4  ;;  %v1557_v33 = vmul.f32 %v1525_v13, %v7700_v63 }
 0x721   :  { %v1507_v18 = vmax.f32 %v1475_v43, 0.0  ;;  %v1597_v12 = vadd.f32 %v1596_v35, %v1551_v31  ;;  %v1582_v43 = vrot.slane %v1581_v25, 2  ;;  %v1560_v35 = vmul.f32 %v1528_v21, %v7702_v0 }
 0x722   :  { %v1429_v48 = vpop.permute.xlu1 %1428  ;;  %v1414_v23 = vpop.permute.xlu0 %1413  ;;  %v1590_v59 = vadd.f32 %v1589_v17, %v1588_v5  ;;  %v1561_v21 = vmul.f32 %v1529_v56, %v7700_v63 }
 0x723   :  { %v1494_v4 = vadd.f32 %v1429_v48, %v1310_v52  ;;  %v1539_v16 = vmul.f32 %v1507_v18, %v7706_v2  ;;  %v1491_v6 = vadd.f32 %v1414_v23, %v1307_v44  ;;  %v1598_v11 = vrot.slane %v1597_v12, 4  ;;  %v7914_v56 = vpop.eup %7109 }
 0x724   :  { %v1613_v52 = vadd.f32 %v1557_v33, %v1556_v3  ;;  %v1500_v23 = vadd.f32 %v7894_v42, %v1316_v32  ;;  %v1583_v39 = vadd.f32 %v1582_v43, %v1581_v25  ;;  %v1319_v25 = vld [vmem:[#allocation7 + $0xf8] sm:$0xff] }
 0x725   :  { %v1526_v27 = vmax.f32 %v1494_v4, 0.0  ;;  %v1570_v41 = vadd.f32 %v1569_v62, %v1539_v16  ;;  %v1523_v8 = vmax.f32 %v1491_v6, 0.0  ;;  %v1599_v48 = vadd.f32 %v1598_v11, %v1597_v12  ;;  %v1318_v6 = vld [vmem:[#allocation7 + $0xf0] sm:$0xff] }
 0x726   :  { %v1463_v7 = vpop.permute.xlu1 %1462  ;;  %v1433_v19 = vpop.permute.xlu0 %1432  ;;  %v1532_v42 = vmax.f32 %v1500_v23, 0.0 }
 0x727   :  { %v1558_v29 = vmul.f32 %v1526_v27, %v7704_v1  ;;  %v1571_v31 = vrot.slane %v1570_v41, 4  ;;  %v1555_v22 = vmul.f32 %v1523_v8, %v7706_v2  ;;  %v1501_v9 = vadd.f32 %v1463_v7, %v1317_v28 }
 0x728   :  { %v1495_v54 = vadd.f32 %v1433_v19, %v1311_v30  ;;  %v1591_v28 = vrot.slane %v1590_v59, 2  ;;  %v1622_v8 = vadd.f32 %v1561_v21, %v1560_v35  ;;  %v1600_v33 = vrot.slane %v1599_v48, 2 }
 0x729   :  { %v1572_v44 = vadd.f32 %v1571_v31, %v1570_v41  ;;  %v1606_v61 = vadd.f32 %v1605_v34, %v1555_v22  ;;  %v1614_v13 = vadd.f32 %v1613_v52, %v1558_v29  ;;  %v1533_v20 = vmax.f32 %v1501_v9, 0.0 }
 0x72a   :  { %v1527_v62 = vmax.f32 %v1495_v54, 0.0  ;;  %v1448_v10 = vpop.permute.xlu1 %1447  ;;  %v1452_v18 = vpop.permute.xlu0 %1451  ;;  %v1584_v54 = vrot.slane %v1583_v39, 1  ;;  %v1564_v35 = vmul.f32 %v1532_v42, %v7702_v0 }
 0x72b   :  { %v1498_v60 = vadd.f32 %v1448_v10, %v1314_v37  ;;  %v1607_v4 = vrot.slane %v1606_v61, 4  ;;  %v1499_v3 = vadd.f32 %v1452_v18, %v1315_v58  ;;  %v1573_v5 = vrot.slane %v1572_v44, 2 }
 0x72c   :  { %v1559_v16 = vmul.f32 %v1527_v62, %v7706_v2  ;;  %v1565_v11 = vmul.f32 %v1533_v20, %v7700_v63  ;;  %v1592_v37 = vadd.f32 %v1591_v28, %v1590_v59  ;;  %v1601_v10 = vadd.f32 %v1600_v33, %v1599_v48 }
 0x72d   :  { %v1530_v27 = vmax.f32 %v1498_v60, 0.0  ;;  %v1608_v30 = vadd.f32 %v1607_v4, %v1606_v61  ;;  %v1531_v41 = vmax.f32 %v1499_v3, 0.0  ;;  %v1574_v31 = vadd.f32 %v1573_v5, %v1572_v44 }
 0x72e   :  { %v1615_v17 = vadd.f32 %v1614_v13, %v1559_v16  ;;  %v1467_v12 = vpop.permute.xlu1 %1466  ;;  %v1631_v13 = vadd.f32 %v1565_v11, %v1564_v35  ;;  %v1585_v20 = vadd.f32 %v1584_v54, %v1583_v39  ;;  %v1593_v16 = vrot.slane %v1592_v37, 1  ;;  %v7266_v39 = vld [vmem:[%s8889_s7] ss:$0 sm:$0xff] }
 0x72f   :  { %v1562_v7 = vmul.f32 %v1530_v27, %v7704_v1  ;;  %v1502_v19 = vadd.f32 %v1467_v12, %v1318_v6  ;;  %v1609_v34 = vrot.slane %v1608_v30, 2  ;;  %v1563_v22 = vmul.f32 %v1531_v41, %v7706_v2 }
 0x730   :  { %v1616_v29 = vrot.slane %v1615_v17, 4  ;;  %v1575_v44 = vrot.slane %v1574_v31, 1  ;;  %v1602_v28 = vrot.slane %v1601_v10, 1  ;;  %v1641_v42 = vadd.f32 %v7266_v39, %v1585_v20 }
 0x731   :  { %v1623_v32 = vadd.f32 %v1622_v8, %v1562_v7  ;;  %v1534_v9 = vmax.f32 %v1502_v19, 0.0  ;;  %v1610_v18 = vadd.f32 %v1609_v34, %v1608_v30  ;;  %v1594_v8 = vadd.f32 %v1593_v16, %v1592_v37 }
 0x732   :  { %v1617_v43 = vadd.f32 %v1616_v29, %v1615_v17  ;;  %v1471_v52 = vpop.permute.xlu1 %1470  ;;  %v1576_v41 = vadd.f32 %v1575_v44, %v1574_v31  ;;  %v1603_v33 = vadd.f32 %v1602_v28, %v1601_v10 }
 0x733   :  { %v1624_v58 = vadd.f32 %v1623_v32, %v1563_v22  ;;  %v1566_v61 = vmul.f32 %v1534_v9, %v7704_v1  ;;  %v1503_v62 = vadd.f32 %v1471_v52, %v1319_v25  ;;  %v1611_v17 = vrot.slane %v1610_v18, 1 }
 0x734   :  { %v1618_v23 = vrot.slane %v1617_v43, 2  ;;  %v1640_v11 = vadd.f32 %v7266_v39, %v1576_v41  ;;  %v1642_v31 = vadd.f32 %v7266_v39, %v1594_v8  ;;  %v1656_v22 = vrot.slane %v1641_v42, 7 }
 0x735   :  { %v1625_v60 = vrot.slane %v1624_v58, 4  ;;  %v1535_v4 = vmax.f32 %v1503_v62, 0.0  ;;  %v1632_v21 = vadd.f32 %v1631_v13, %v1566_v61  ;;  %v1612_v34 = vadd.f32 %v1611_v17, %v1610_v18 }
 0x736   :  { %v1619_v59 = vadd.f32 %v1618_v23, %v1617_v43  ;;  %v2076_v3 = vpop.permute.xlu1 %2075  ;;  %v1643_v52 = vadd.f32 %v7266_v39, %v1603_v33  ;;  %v1658_v61 = vrot.slane %v1642_v31, 6 }
 0x737   :  { %v1626_v6 = vadd.f32 %v1625_v60, %v1624_v58  ;;  %v1567_v5 = vmul.f32 %v1535_v4, %v7706_v2  ;;  %v2078_v27 = vmul.f32 %v7914_v56, %v2076_v3  ;;  %v1644_v43 = vadd.f32 %v7266_v39, %v1612_v34 }
 0x738   :  { %v1620_v48 = vrot.slane %v1619_v59, 1  ;;  %v1657_v58 = vsel %vm692_vm2, %v1656_v22, %v1640_v11  ;;  %v1660_v13 = vrot.slane %v1643_v52, 5 }
 0x739   :  { %v1627_v30 = vrot.slane %v1626_v6, 2  ;;  %v1633_v12 = vadd.f32 %v1632_v21, %v1567_v5  ;;  %2080 = vrot.lane.b32.xlu1 %v2078_v27, %s7546_s4  ;;  %v1659_v10 = vsel %vm695_vm3, %v1658_v61, %v1657_v58  ;;  %v1662_v18 = vrot.slane %v1644_v43, 4 }
 0x73a   :  { %v1621_v29 = vadd.f32 %v1620_v48, %v1619_v59  ;;  %v1661_v16 = vsel %vm698_vm4, %v1660_v13, %v1659_v10  ;;  %v2073_v27 = vmul.f32 %v7914_v56, %v7765_v47 }
 0x73b   :  { %v1628_v7 = vadd.f32 %v1627_v30, %v1626_v6  ;;  %v1634_v19 = vrot.slane %v1633_v12, 4  ;;  %v1663_v59 = vsel %vm701_vm5, %v1662_v18, %v1661_v16 }
 0x73c   :  { %v1645_v35 = vadd.f32 %v7266_v39, %v1621_v29 }
 0x73d   :  { %v1629_v25 = vrot.slane %v1628_v7, 1  ;;  %v1635_v32 = vadd.f32 %v1634_v19, %v1633_v12 }
 0x73e   :  { %v1664_v60 = vrot.slane %v1645_v35, 3 }
 0x73f   :  { %v1630_v9 = vadd.f32 %v1629_v25, %v1628_v7  ;;  %v1636_v54 = vrot.slane %v1635_v32, 2 }
 0x740   :  { %v1665_v3 = vsel %vm704_vm6, %v1664_v60, %v1663_v59 }
 0x741   :  { %v1637_v37 = vadd.f32 %v1636_v54, %v1635_v32  ;;  %v1646_v62 = vadd.f32 %v7266_v39, %v1630_v9 }
 0x743   :  { %v1638_v23 = vrot.slane %v1637_v37, 1  ;;  %v1666_v4 = vrot.slane %v1646_v62, 2 }
 0x745   :  { %v1639_v44 = vadd.f32 %v1638_v23, %v1637_v37  ;;  %v1667_v21 = vsel %vm707_vm7, %v1666_v4, %v1665_v3 }
 0x747   :  { %v1647_v20 = vadd.f32 %v7266_v39, %v1639_v44 }
 0x749   :  { %v1668_v6 = vrot.slane %v1647_v20, 1 }
 0x74b   :  { %v1669_v5 = vsel %vm710_vm8, %v1668_v6, %v1667_v21 }
 0x74c   :  { %1671 = vmax.xlane.f32.xlu0 %v1669_v5 }
 0x7ab   :  { %v2081_v28 = vpop.permute.xlu1 %2080 }
 0x7ac   :  { %v7933_v17 = vadd.f32 %v2081_v28, %v2073_v27 }
 0x7ae   :  { %7111 = vtanh.f32 %v7933_v17 }
 0x7bb   :  { %v7112_v41 = vpop.eup %7111 }
 0x7bc   :  { %2086 = vrot.lane.b32.xlu0 %v7112_v41, %s7545_s3 }
 0x7d5   :  { %v1672_v48 = vpop.xlane.xlu0 %1671 }
 0x7d6   :  { %v1674_v30 = vrot.slane %v1672_v48, 1  ;;  %v1675_v12 = vrot.slane %v1672_v48, 2  ;;  %v1676_v8 = vrot.slane %v1672_v48, 3  ;;  %v1677_v39 = vrot.slane %v1672_v48, 4 }
 0x7d7   :  { %v1678_v7 = vrot.slane %v1672_v48, 5  ;;  %v1689_v19 = vsub.f32 %v1640_v11, %v1672_v48  ;;  %v1679_v33 = vrot.slane %v1672_v48, 6  ;;  %v1680_v34 = vrot.slane %v1672_v48, 7 }
 0x7d8   :  { %v1690_v29 = vsub.f32 %v1641_v42, %v1674_v30  ;;  %v1691_v25 = vsub.f32 %v1642_v31, %v1675_v12  ;;  %v1692_v47 = vsub.f32 %v1643_v52, %v1676_v8  ;;  %v1693_v32 = vsub.f32 %v1644_v43, %v1677_v39 }
 0x7d9   :  { %v1697_v22 = vmul.f32 1.442695, %v1689_v19  ;;  %v1694_v9 = vsub.f32 %v1645_v35, %v1678_v7  ;;  %v1695_v54 = vsub.f32 %v1646_v62, %v1679_v33  ;;  %v1696_v23 = vsub.f32 %v1647_v20, %v1680_v34  ;;  %v1763_v34 = vld [vmem:[#allocation5] sm:$0xff] }
 0x7da   :  { %v1699_v37 = vmul.f32 1.442695, %v1690_v29  ;;  %v1701_v58 = vmul.f32 1.442695, %v1691_v25  ;;  %v1703_v61 = vmul.f32 1.442695, %v1692_v47 }
 0x7db   :  { %7113 = vpow2.f32 %v1697_v22  ;;  %v1705_v10 = vmul.f32 1.442695, %v1693_v32  ;;  %v1707_v18 = vmul.f32 1.442695, %v1694_v9  ;;  %v1709_v44 = vmul.f32 1.442695, %v1695_v54 }
 0x7dc   :  { %7115 = vpow2.f32 %v1699_v37  ;;  %v1711_v11 = vmul.f32 1.442695, %v1696_v23  ;;  %v1765_v37 = vld [vmem:[#allocation5 + $0x10] sm:$0xff] }
 0x7dd   :  { %7117 = vpow2.f32 %v1701_v58 }
 0x7de   :  { %7119 = vpow2.f32 %v1703_v61 }
 0x7df   :  { %7121 = vpow2.f32 %v1705_v10 }
 0x7e0   :  { %7123 = vpow2.f32 %v1707_v18  ;;  %v1764_v18 = vld [vmem:[#allocation5 + $0x8] sm:$0xff] }
 0x7e1   :  { %7125 = vpow2.f32 %v1709_v44 }
 0x7e2   :  { %7127 = vpow2.f32 %v1711_v11 }
 0x7e8   :  { %v7114_v42 = vpop.eup %7113 }
 0x7e9   :  { %v7116_v31 = vpop.eup %7115 }
 0x7ea   :  { %v7118_v43 = vpop.eup %7117  ;;  %v1721_v52 = vrot.slane %v7116_v31, 7 }
 0x7eb   :  { %v7120_v35 = vpop.eup %7119  ;;  %v1723_v62 = vrot.slane %v7118_v43, 6 }
 0x7ec   :  { %v7122_v13 = vpop.eup %7121  ;;  %v1722_v60 = vsel %vm692_vm2, %v1721_v52, %v7114_v42  ;;  %v1725_v4 = vrot.slane %v7120_v35, 5 }
 0x7ed   :  { %v7124_v20 = vpop.eup %7123  ;;  %v1724_v16 = vsel %vm695_vm3, %v1723_v62, %v1722_v60  ;;  %v1727_v59 = vrot.slane %v7122_v13, 4 }
 0x7ee   :  { %v7126_v3 = vpop.eup %7125  ;;  %v1726_v6 = vsel %vm698_vm4, %v1725_v4, %v1724_v16  ;;  %v1729_v21 = vrot.slane %v7124_v20, 3 }
 0x7ef   :  { %v7128_v5 = vpop.eup %7127  ;;  %v1728_v27 = vsel %vm701_vm5, %v1727_v59, %v1726_v6  ;;  %v1731_v28 = vrot.slane %v7126_v3, 2 }
 0x7f0   :  { %v1730_v41 = vsel %vm704_vm6, %v1729_v21, %v1728_v27  ;;  %v1733_v48 = vrot.slane %v7128_v5, 1  ;;  %v1776_v27 = vld [vmem:[#allocation5 + $0x68] sm:$0xff] }
 0x7f1   :  { %v1732_v30 = vsel %vm707_vm7, %v1731_v28, %v1730_v41 }
 0x7f2   :  { %v1734_v12 = vsel %vm710_vm8, %v1733_v48, %v1732_v30 }
 0x7f3   :  { %1736 = vadd.xlane.f32.xlu1 %v1734_v12 }
 0x87c   :  { %v1737_v8 = vpop.xlane.xlu1 %1736 }
 0x87d   :  { %7129 = vrcp.f32 %v1737_v8  ;;  %v1767_v8 = vld [vmem:[#allocation5 + $0x20] sm:$0xff] }
 0x88a   :  { %v7130_v39 = vpop.eup %7129 }
 0x88b   :  { %v1755_v7 = vmul.f32 %v7130_v39, %v7114_v42  ;;  %v1740_v19 = vrot.slane %v7130_v39, 1  ;;  %v1744_v33 = vrot.slane %v7130_v39, 5  ;;  %v1745_v29 = vrot.slane %v7130_v39, 6 }
 0x88c   :  { %v1741_v25 = vrot.slane %v7130_v39, 2  ;;  %v1742_v47 = vrot.slane %v7130_v39, 3  ;;  %v1743_v32 = vrot.slane %v7130_v39, 4  ;;  %v1746_v11 = vrot.slane %v7130_v39, 7 }
 0x88d   :  { %v1782_v22 = vrot.slane %v1755_v7, %v7680_v46  ;;  %v1756_v9 = vmul.f32 %v7116_v31, %v1740_v19  ;;  %v1760_v54 = vmul.f32 %v7124_v20, %v1744_v33  ;;  %v1761_v44 = vmul.f32 %v7126_v3, %v1745_v29  ;;  %v1766_v20 = vld [vmem:[#allocation5 + $0x18] sm:$0xff] }
 0x88e   :  { %v1757_v58 = vmul.f32 %v7118_v43, %v1741_v25  ;;  %v1758_v42 = vmul.f32 %v7120_v35, %v1742_v47  ;;  %v1759_v52 = vmul.f32 %v7122_v13, %v1743_v32  ;;  %v1762_v59 = vmul.f32 %v7128_v5, %v1746_v11  ;;  %v1778_v33 = vld [vmem:[#allocation5 + $0x78] sm:$0xff]  ;;  %v1768_v25 = vld [vmem:[#allocation5 + $0x28] sm:$0xff]  ;;  %v1773_v11 = vld [vmem:[#allocation5 + $0x50] sm:$0xff] }
 0x88f   :  { %v1811_v61 = vmul.f32 %v1782_v22, %v1763_v34  ;;  %v1786_v23 = vrot.slane %v1756_v9, %v7680_v46  ;;  %v2044_v10 = vrot.slane %v1756_v9, 7  ;;  %v1802_v4 = vrot.slane %v1760_v54, %v7680_v46  ;;  %v1769_v9 = vld [vmem:[#allocation5 + $0x30] sm:$0xff] }
 0x890   :  { %v2046_v16 = vrot.slane %v1757_v58, 6  ;;  %v1812_v31 = vmul.f32 %v1782_v22, %v1764_v18  ;;  %v2048_v6 = vrot.slane %v1758_v42, 5  ;;  %v1806_v35 = vrot.slane %v1761_v44, %v7680_v46  ;;  %v1772_v18 = vld [vmem:[#allocation5 + $0x48] sm:$0xff] }
 0x891   :  { %1827 = vadd.xlane.f32.xlu1 %v1811_v61  ;;  %v1813_v62 = vmul.f32 %v1786_v23, %v1765_v37  ;;  %v2045_v60 = vsel %vm692_vm2, %v2044_v10, %v1755_v7  ;;  %v1822_v3 = vmul.f32 %v1802_v4, %v7793_v24  ;;  %v2050_v13 = vrot.slane %v1759_v52, 4  ;;  %v1770_v37 = vld [vmem:[#allocation5 + $0x38] sm:$0xff] }
 0x892   :  { %v2047_v43 = vsel %vm695_vm3, %v2046_v16, %v2045_v60  ;;  %v2052_v21 = vrot.slane %v1760_v54, 3  ;;  %v1814_v41 = vmul.f32 %v1786_v23, %v1766_v20  ;;  %v1790_v48 = vrot.slane %v1757_v58, %v7680_v46  ;;  %v1771_v23 = vld [vmem:[#allocation5 + $0x40] sm:$0xff]  ;;  %v1777_v16 = vld [vmem:[#allocation5 + $0x70] sm:$0xff] }
 0x893   :  { %1831 = vadd.xlane.f32.xlu0 %v1813_v62  ;;  %v2049_v28 = vsel %vm698_vm4, %v2048_v6, %v2047_v43  ;;  %v2054_v12 = vrot.slane %v1761_v44, 2  ;;  %v2056_v39 = vrot.slane %v1762_v59, 1  ;;  %v1824_v24 = vmul.f32 %v1806_v35, %v1776_v27  ;;  %v1775_v60 = vld [vmem:[#allocation5 + $0x60] sm:$0xff]  ;;  %v2087_v43 = vpop.permute.xlu0 %2086 }
 0x894   :  { %v2051_v30 = vsel %vm701_vm5, %v2050_v13, %v2049_v28  ;;  %v1810_v7 = vrot.slane %v1762_v59, %v7680_v46  ;;  %v1815_v29 = vmul.f32 %v1790_v48, %v1767_v8  ;;  %v1816_v32 = vmul.f32 %v1790_v48, %v1768_v25 }
 0x895   :  { %1829 = vadd.xlane.f32.xlu1 %v1812_v31  ;;  %v2053_v5 = vsel %vm704_vm6, %v2052_v21, %v2051_v30  ;;  %v1794_v22 = vrot.slane %v1758_v42, %v7680_v46  ;;  %v1798_v61 = vrot.slane %v1759_v52, %v7680_v46  ;;  %v1821_v62 = vmul.f32 %v1802_v4, %v1773_v11 }
 0x896   :  { %v2055_v19 = vsel %vm707_vm7, %v2054_v12, %v2053_v5  ;;  %v1826_v47 = vmul.f32 %v1810_v7, %v1778_v33  ;;  %v1823_v42 = vmul.f32 %v1806_v35, %v1775_v60  ;;  %v1825_v31 = vmul.f32 %v1810_v7, %v1777_v16 }
 0x897   :  { %1849 = vadd.xlane.f32.xlu0 %v1822_v3  ;;  %v7958_v34 = vsel %vm710_vm8, %v2056_v39, %v2055_v19  ;;  %v1817_v54 = vmul.f32 %v1794_v22, %v1769_v9  ;;  %v1818_v58 = vmul.f32 %v1794_v22, %v1770_v37  ;;  %v1819_v10 = vmul.f32 %v1798_v61, %v1771_v23 }
 0x898   :  { %8903 = vst [vmem:[#allocation21_spill] sm:$0xff] %v7958_v34  ;;  %v1820_v44 = vmul.f32 %v1798_v61, %v1772_v18  ;;  %v2089_v20 = vmul.f32 %v7914_v56, %v2087_v43 }
 0x899   :  { %1833 = vadd.xlane.f32.xlu1 %v1814_v41 }
 0x89b   :  { %1853 = vadd.xlane.f32.xlu0 %v1824_v24 }
 0x89d   :  { %1835 = vadd.xlane.f32.xlu1 %v1815_v29 }
 0x89f   :  { %1857 = vadd.xlane.f32.xlu0 %v1826_v47 }
 0x8a1   :  { %1837 = vadd.xlane.f32.xlu1 %v1816_v32 }
 0x8a5   :  { %1839 = vadd.xlane.f32.xlu1 %v1817_v54 }
 0x8a9   :  { %1841 = vadd.xlane.f32.xlu1 %v1818_v58 }
 0x8ad   :  { %1843 = vadd.xlane.f32.xlu1 %v1819_v10 }
 0x8b1   :  { %1845 = vadd.xlane.f32.xlu1 %v1820_v44 }
 0x8b5   :  { %1847 = vadd.xlane.f32.xlu1 %v1821_v62 }
 0x8b9   :  { %1851 = vadd.xlane.f32.xlu1 %v1823_v42 }
 0x8bd   :  { %1855 = vadd.xlane.f32.xlu1 %v1825_v31 }
 0x8ce   :  { %2091 = vrot.lane.b32.xlu1 %v2089_v20, %s7546_s4 }
 0x91a   :  { %v1828_v52 = vpop.xlane.xlu1 %1827 }
 0x91b   :  { %v1878_v19 = vrot.slane %v1828_v52, %v7668_v36 }
 0x91c   :  { %v1832_v27 = vpop.xlane.xlu0 %1831 }
 0x91d   :  { %v1887_v56 = vrot.slane %v1832_v27, %v7668_v36  ;;  %v7269_v27 = vld [vmem:[#allocation8 + $0x40] sm:$0xff] }
 0x91e   :  { %v1830_v59 = vpop.xlane.xlu1 %1829 }
 0x91f   :  { %v1882_v5 = vrot.slane %v1830_v59, %v7670_v38 }
 0x920   :  { %v1850_v41 = vpop.xlane.xlu0 %1849 }
 0x921   :  { %v1883_v9 = vsel %vm928_vm9, %v1882_v5, %v1878_v19  ;;  %v1927_v54 = vrot.slane %v1850_v41, %v7670_v38  ;;  %v7272_v41 = vld [vmem:[#allocation8 + $0x10] sm:$0xff]  ;;  %v7279_v5 = vld [vmem:[#allocation8 + $0x8] sm:$0xff] }
 0x922   :  { %v1834_v6 = vpop.xlane.xlu1 %1833 }
 0x923   :  { %v1891_v48 = vrot.slane %v1834_v6, %v7670_v38 }
 0x924   :  { %v1854_v30 = vpop.xlane.xlu0 %1853 }
 0x925   :  { %v1892_v33 = vsel %vm928_vm9, %v1891_v48, %v1887_v56  ;;  %v1936_v23 = vrot.slane %v1854_v30, %v7670_v38  ;;  %v7274_v48 = vld [vmem:[#allocation8 + $0x48] sm:$0xff]  ;;  %v7275_v30 = vld [vmem:[#allocation8 + $0x38] sm:$0xff] }
 0x926   :  { %v1836_v3 = vpop.xlane.xlu1 %1835  ;;  %v1947_v61 = vsel %vm692_vm2, %v1892_v33, %v1883_v9  ;;  %v7278_v56 = vld [vmem:[#allocation8 + $0x18] sm:$0xff] }
 0x927   :  { %v1896_v24 = vrot.slane %v1836_v3, %v7668_v36 }
 0x928   :  { %v1858_v10 = vpop.xlane.xlu0 %1857 }
 0x929   :  { %v1945_v16 = vrot.slane %v1858_v10, %v7670_v38 }
 0x92a   :  { %v1838_v13 = vpop.xlane.xlu1 %1837 }
 0x92b   :  { %v1900_v12 = vrot.slane %v1838_v13, %v7670_v38  ;;  %v7267_v13 = vld [vmem:[#allocation8 + $0x58] sm:$0xff] }
 0x92d   :  { %v1901_v47 = vsel %vm928_vm9, %v1900_v12, %v1896_v24  ;;  %v7276_v12 = vld [vmem:[#allocation8 + $0x30] sm:$0xff]  ;;  %v1214_v24 = vpop.f32.mrf.mxu1 }
 0x92e   :  { %v1840_v21 = vpop.xlane.xlu1 %1839  ;;  %v1948_v44 = vsel %vm695_vm3, %v1901_v47, %v1947_v61 }
 0x92f   :  { %v1905_v29 = vrot.slane %v1840_v21, %v7668_v36  ;;  %v7268_v21 = vld [vmem:[%s8890_s8 + $0x8] sm:$0xff] }
 0x932   :  { %v1842_v4 = vpop.xlane.xlu1 %1841 }
 0x933   :  { %v1909_v39 = vrot.slane %v1842_v4, %v7670_v38  ;;  %v7270_v4 = vld [vmem:[%s8890_s8] sm:$0xff] }
 0x935   :  { %v1910_v37 = vsel %vm928_vm9, %v1909_v39, %v1905_v29  ;;  %v7280_v39 = vld [vmem:[#allocation8] sm:$0xff] }
 0x936   :  { %v1844_v28 = vpop.xlane.xlu1 %1843  ;;  %v1949_v62 = vsel %vm698_vm4, %v1910_v37, %v1948_v44 }
 0x937   :  { %v1914_v32 = vrot.slane %v1844_v28, %v7668_v36  ;;  %v7271_v28 = vld [vmem:[#allocation8 + $0x28] sm:$0xff] }
 0x93a   :  { %v1846_v35 = vpop.xlane.xlu1 %1845 }
 0x93b   :  { %v1918_v7 = vrot.slane %v1846_v35, %v7670_v38  ;;  %v7273_v35 = vld [vmem:[#allocation8 + $0x50] sm:$0xff] }
 0x93d   :  { %v1919_v18 = vsel %vm928_vm9, %v1918_v7, %v1914_v32 }
 0x93e   :  { %v1848_v8 = vpop.xlane.xlu1 %1847  ;;  %v1950_v31 = vsel %vm701_vm5, %v1919_v18, %v1949_v62  ;;  %v3013_v18 = vld [vmem:[#allocation2 + $0x18] sm:$0xff] }
 0x93f   :  { %v1923_v25 = vrot.slane %v1848_v8, %v7668_v36  ;;  %v7277_v8 = vld [vmem:[#allocation8 + $0x20] sm:$0xff] }
 0x941   :  { %v1928_v11 = vsel %vm928_vm9, %v1927_v54, %v1923_v25  ;;  %v7281_v25 = vld [vmem:[%s8887_s5] ss:$0 sm:$0xff] }
 0x942   :  { %v1852_v22 = vpop.xlane.xlu1 %1851  ;;  %v1951_v20 = vsel %vm704_vm6, %v1928_v11, %v1950_v31 }
 0x943   :  { %v1932_v58 = vrot.slane %v1852_v22, %v7668_v36 }
 0x945   :  { %v1937_v60 = vsel %vm928_vm9, %v1936_v23, %v1932_v58 }
 0x946   :  { %v1856_v42 = vpop.xlane.xlu1 %1855  ;;  %v1952_v59 = vsel %vm707_vm7, %v1937_v60, %v1951_v20 }
 0x947   :  { %v1941_v43 = vrot.slane %v1856_v42, %v7668_v36 }
 0x949   :  { %v1946_v52 = vsel %vm928_vm9, %v1945_v16, %v1941_v43 }
 0x94a   :  { %v2092_v6 = vpop.permute.xlu1 %2091  ;;  %v1953_v3 = vsel %vm710_vm8, %v1946_v52, %v1952_v59 }
 0x94b   :  { %6962 = vmatmul.mubr.msk.f32.vlgmr.msra.gmra.mxu1 %vm1000_vm10, %v1953_v3  ;;  %6853 = vmatmul.mubr.msk.f32.vlgmr.msra.gmra.mxu0 %vm146_vm1, %v2092_v6 }
 0x94c   :  { %6965 = vmatpush3.msra.mxu1 %v7267_v13  ;;  %6972 = vmatprep.mubr.msk.f32.mxu1 %vm7548_vm0, %v8896_v14  ;;  %v2242_v13 = vld [vmem:[#allocation7 + $0x28] sm:$0xff] }
 0x94d   :  { %6966 = vmatprep.subr.mxu1 %v8896_v14  ;;  %6976 = vmatpush3.msra.mxu0 %v7268_v21  ;;  %v2241_v21 = vld [vmem:[#allocation7 + $0x20] sm:$0xff] }
 0x94e   :  { %6967 = vmatpush3.msra.mxu1 %v7269_v27  ;;  %6977 = vmatprep.subr.mxu0 %v8896_v14  ;;  %v2243_v27 = vld [vmem:[#allocation7 + $0x30] sm:$0xff] }
 0x94f   :  { %6968 = vmatprep.subr.mxu1 %v8896_v14  ;;  %6978 = vmatpush3.msra.mxu0 %v7270_v4 }
 0x950   :  { %6969 = vmatpush3.msra.mxu1 %v7271_v28  ;;  %6979 = vmatprep.mubr.msk.f32.mxu0 %vm7548_vm0, %v8896_v14 }
 0x951   :  { %6970 = vmatprep.subr.mxu1 %v8896_v14  ;;  %6982 = vmatprep.subr.mxu0 %v8896_v14 }
 0x952   :  { %6971 = vmatpush3.msra.mxu1 %v7272_v41 }
 0x953   :  { %6973 = vmatmul.mubr.msk.f32.vlgmr.msra.gmra.mxu1 %vm146_vm1, %v2092_v6  ;;  %3068 = vmatprep.subr.mxu1 %v7273_v35 }
 0x954   :  { %3069 = vmatpush1.msra.mxu1 %v7274_v48  ;;  %3108 = vmatprep.mubr.f32.mxu1 %v8896_v14 }
 0x955   :  { %3070 = vmatprep.subr.mxu1 %v7275_v30 }
 0x956   :  { %3071 = vmatpush1.msra.mxu1 %v7276_v12 }
 0x957   :  { %3072 = vmatprep.subr.mxu1 %v7277_v8 }
 0x958   :  { %3073 = vmatpush1.msra.mxu1 %v7278_v56 }
 0x959   :  { %3074 = vmatprep.subr.mxu1 %v7279_v5 }
 0x95a   :  { %3075 = vmatpush1.msra.mxu1 %v7280_v39  ;;  %v2245_v39 = vld [vmem:[#allocation7 + $0x40] sm:$0xff] }
 0x95b   :  { %6993 = vmatprep.subr.mxu1 %v8896_v14 }
 0xa0b   :  { %v2022_v7 = vpop.f32.mrf.mxu1  ;;  %v2161_v10 = vpop.f32.mrf.mxu0 }
 0xa0c   :  { %v8015_v19 = vadd.f32 %v2022_v7, %v1214_v24  ;;  %v3014_v44 = vadd.f32 %v3013_v18, %v2161_v10  ;;  %v7282_v24 = vld [vmem:[#allocation7 + $0x38] sm:$0xff] }
 0xa0d   :  { %v6963_v33 = vpop.f32.mrf.mxu1 }
 0xa0e   :  { %8904 = vst [vmem:[#allocation22_spill] sm:$0xff] %v8015_v19  ;;  %7131 = vtanh.f32 %v3014_v44  ;;  %v6856_v5 = vmul.f32 -1.442695, %v3014_v44  ;;  %v2246_v33 = vld [vmem:[#allocation7 + $0x48] sm:$0xff]  ;;  %v2247_v44 = vld [vmem:[#allocation7 + $0x50] sm:$0xff] }
 0xa10   :  { %7133 = vpow2.f32 %v6856_v5  ;;  %v2254_v5 = vld [vmem:[#allocation7 + $0x88] sm:$0xff] }
 0xa13   :  { %v2232_v29 = vpop.f32.mrf.mxu1 }
 0xa14   :  { %v2236_v47 = vadd.f32 %v7281_v25, %v2232_v29  ;;  %v2238_v29 = vld [vmem:[#allocation7 + $0x8] sm:$0xff]  ;;  %v2237_v25 = vld [vmem:[#allocation7] sm:$0xff] }
 0xa15   :  { %v6974_v32 = vpop.f32.mrf.mxu1 }
 0xa16   :  { %v2291_v22 = vrot.slane %v2236_v47, %v7675_v40  ;;  %v2310_v9 = vrot.slane %v2236_v47, %v7678_v45  ;;  %v2272_v54 = vrot.slane %v2236_v47, %v7680_v46  ;;  %v2329_v37 = vrot.slane %v2236_v47, %v7684_v49 }
 0xa17   :  { %v2348_v58 = vrot.slane %v2236_v47, %v7687_v51  ;;  %v2367_v61 = vrot.slane %v2236_v47, %v7690_v53  ;;  %v2386_v23 = vrot.slane %v2236_v47, %v7693_v55  ;;  %v2405_v11 = vrot.slane %v2236_v47, %v7696_v57 }
 0xa18   :  { %2297 = vbcast.lane.b32.xlu1 %v2291_v22, 264  ;;  %2293 = vbcast.lane.b32.xlu0 %v2291_v22, 256 }
 0xa1b   :  { %v7132_v62 = vpop.eup %7131 }
 0xa1c   :  { %2312 = vbcast.lane.b32.xlu1 %v2310_v9, 256  ;;  %2316 = vbcast.lane.b32.xlu0 %v2310_v9, 264 }
 0xa20   :  { %2278 = vbcast.lane.b32.xlu0 %v2272_v54, 264  ;;  %2274 = vbcast.lane.b32.xlu1 %v2272_v54, 256 }
 0xa24   :  { %2331 = vbcast.lane.b32.xlu0 %v2329_v37, 256  ;;  %2301 = vbcast.lane.b32.xlu1 %v2291_v22, 272 }
 0xa28   :  { %2320 = vbcast.lane.b32.xlu0 %v2310_v9, 272  ;;  %2335 = vbcast.lane.b32.xlu1 %v2329_v37, 264 }
 0xa2c   :  { %2354 = vbcast.lane.b32.xlu0 %v2348_v58, 264  ;;  %2350 = vbcast.lane.b32.xlu1 %v2348_v58, 256 }
 0xa30   :  { %2305 = vbcast.lane.b32.xlu0 %v2291_v22, 280  ;;  %2282 = vbcast.lane.b32.xlu1 %v2272_v54, 272 }
 0xa34   :  { %2369 = vbcast.lane.b32.xlu0 %v2367_v61, 256  ;;  %2339 = vbcast.lane.b32.xlu1 %v2329_v37, 272 }
 0xa38   :  { %2324 = vbcast.lane.b32.xlu0 %v2310_v9, 280  ;;  %2373 = vbcast.lane.b32.xlu1 %v2367_v61, 264 }
 0xa3c   :  { %2388 = vbcast.lane.b32.xlu0 %v2386_v23, 256  ;;  %2358 = vbcast.lane.b32.xlu1 %v2348_v58, 272 }
 0xa40   :  { %2286 = vbcast.lane.b32.xlu0 %v2272_v54, 280  ;;  %2392 = vbcast.lane.b32.xlu1 %v2386_v23, 264 }
 0xa44   :  { %2377 = vbcast.lane.b32.xlu0 %v2367_v61, 272  ;;  %2343 = vbcast.lane.b32.xlu1 %v2329_v37, 280 }
 0xa48   :  { %2411 = vbcast.lane.b32.xlu0 %v2405_v11, 264  ;;  %2407 = vbcast.lane.b32.xlu1 %v2405_v11, 256 }
 0xa4c   :  { %2396 = vbcast.lane.b32.xlu0 %v2386_v23, 272  ;;  %2362 = vbcast.lane.b32.xlu1 %v2348_v58, 280 }
 0xa50   :  { %2415 = vbcast.lane.b32.xlu0 %v2405_v11, 272  ;;  %2381 = vbcast.lane.b32.xlu1 %v2367_v61, 280 }
 0xa54   :  { %2419 = vbcast.lane.b32.xlu0 %v2405_v11, 280  ;;  %2400 = vbcast.lane.b32.xlu1 %v2386_v23, 280  ;;  %v2250_v11 = vld [vmem:[#allocation7 + $0x68] sm:$0xff] }
 0xa58   :  { %3024 = vrot.lane.b32.xlu0 %v7132_v62, %s7545_s3  ;;  %v2239_v62 = vld [vmem:[#allocation7 + $0x10] sm:$0xff] }
 0xa8a   :  { %v2298_v60 = vpop.permute.xlu1 %2297  ;;  %v2294_v42 = vpop.permute.xlu0 %2293 }
 0xa8b   :  { %v2426_v4 = vadd.f32 %v2298_v60, %v2242_v13  ;;  %v2425_v28 = vadd.f32 %v2294_v42, %v2241_v21 }
 0xa8d   :  { %v2458_v30 = vmax.f32 %v2426_v4, 0.0  ;;  %v2457_v12 = vmax.f32 %v2425_v28, 0.0 }
 0xa8e   :  { %v2313_v16 = vpop.permute.xlu1 %2312  ;;  %v2317_v31 = vpop.permute.xlu0 %2316 }
 0xa8f   :  { %v2490_v32 = vmul.f32 %v2458_v30, %v7700_v63  ;;  %v2489_v22 = vmul.f32 %v2457_v12, %v7702_v0  ;;  %v2429_v9 = vadd.f32 %v2313_v16, %v2245_v39  ;;  %v2430_v61 = vadd.f32 %v2317_v31, %v2246_v33  ;;  %v2253_v39 = vld [vmem:[#allocation7 + $0x80] sm:$0xff] }
 0xa91   :  { %v2526_v60 = vadd.f32 %v2490_v32, %v2489_v22  ;;  %v2461_v42 = vmax.f32 %v2429_v9, 0.0 }
 0xa92   :  { %v2279_v43 = vpop.permute.xlu0 %2278  ;;  %v2275_v20 = vpop.permute.xlu1 %2274 }
 0xa93   :  { %v2422_v23 = vadd.f32 %v2279_v43, %v2238_v29  ;;  %v2421_v10 = vadd.f32 %v2275_v20, %v2237_v25  ;;  %v2251_v20 = vld [vmem:[#allocation7 + $0x70] sm:$0xff] }
 0xa95   :  { %v2454_v4 = vmax.f32 %v2422_v23, 0.0  ;;  %v2453_v28 = vmax.f32 %v2421_v10, 0.0 }
 0xa96   :  { %v2332_v52 = vpop.permute.xlu0 %2331  ;;  %v2302_v59 = vpop.permute.xlu1 %2301 }
 0xa97   :  { %v2427_v48 = vadd.f32 %v2302_v59, %v2243_v27  ;;  %v2249_v59 = vld [vmem:[#allocation7 + $0x60] sm:$0xff]  ;;  %v2462_v27 = vmax.f32 %v2430_v61, 0.0  ;;  %v2486_v32 = vmul.f32 %v2454_v4, %v7700_v63  ;;  %v2255_v4 = vld [vmem:[#allocation7 + $0x90] sm:$0xff] }
 0xa98   :  { %v2433_v12 = vadd.f32 %v2332_v52, %v2249_v59 }
 0xa99   :  { %v2459_v47 = vmax.f32 %v2427_v48, 0.0 }
 0xa9a   :  { %v2321_v6 = vpop.permute.xlu0 %2320  ;;  %v2336_v3 = vpop.permute.xlu1 %2335  ;;  %v2465_v9 = vmax.f32 %v2433_v12, 0.0 }
 0xa9b   :  { %v2491_v18 = vmul.f32 %v2459_v47, %v7704_v1  ;;  %v2431_v30 = vadd.f32 %v2321_v6, %v2247_v44  ;;  %v2434_v31 = vadd.f32 %v2336_v3, %v2250_v11  ;;  %v2494_v47 = vmul.f32 %v2462_v27, %v7700_v63 }
 0xa9c   :  { %v2485_v6 = vmul.f32 %v2453_v28, %v7702_v0  ;;  %v7284_v28 = vld [vmem:[#allocation7 + $0x18] sm:$0xff] }
 0xa9d   :  { %v2527_v48 = vadd.f32 %v2526_v60, %v2491_v18  ;;  %v2466_v22 = vmax.f32 %v2434_v31, 0.0  ;;  %v2258_v18 = vld [vmem:[#allocation7 + $0xa8] sm:$0xff] }
 0xa9e   :  { %v2355_v41 = vpop.permute.xlu0 %2354  ;;  %v2351_v35 = vpop.permute.xlu1 %2350  ;;  %v2517_v60 = vadd.f32 %v2486_v32, %v2485_v6 }
 0xa9f   :  { %v2437_v61 = vadd.f32 %v2351_v35, %v2253_v39  ;;  %v2252_v35 = vld [vmem:[#allocation7 + $0x78] sm:$0xff] }
 0xaa1   :  { %v2469_v31 = vmax.f32 %v2437_v61, 0.0 }
 0xaa2   :  { %v2306_v8 = vpop.permute.xlu0 %2305  ;;  %v2283_v56 = vpop.permute.xlu1 %2282 }
 0xaa3   :  { %v2428_v7 = vadd.f32 %v7282_v24, %v2306_v8  ;;  %v2423_v43 = vadd.f32 %v2283_v56, %v2239_v62  ;;  %v2493_v8 = vmul.f32 %v2461_v42, %v7702_v0  ;;  %v2463_v56 = vmax.f32 %v2431_v30, 0.0  ;;  %v2257_v42 = vld [vmem:[#allocation7 + $0xa0] sm:$0xff] }
 0xaa5   :  { %v2460_v54 = vmax.f32 %v2428_v7, 0.0  ;;  %v7283_v7 = vld [vmem:[#allocation7 + $0x58] sm:$0xff]  ;;  %v2455_v52 = vmax.f32 %v2423_v43, 0.0  ;;  %v2535_v62 = vadd.f32 %v2494_v47, %v2493_v8 }
 0xaa6   :  { %v8031_v37 = vpop.permute.xlu0 %2369  ;;  %v2340_v58 = vpop.permute.xlu1 %2339 }
 0xaa7   :  { %v2492_v13 = vmul.f32 %v2460_v54, %v7706_v2  ;;  %v2435_v3 = vadd.f32 %v2340_v58, %v2251_v20  ;;  %v2438_v54 = vadd.f32 %v2355_v41, %v2254_v5  ;;  %v2498_v58 = vmul.f32 %v2466_v22, %v7700_v63 }
 0xaa8   :  { %v2487_v27 = vmul.f32 %v2455_v52, %v7704_v1  ;;  %v2441_v12 = vadd.f32 %v8031_v37, %v2257_v42  ;;  %v2265_v42 = vld [vmem:[#allocation7 + $0xe0] sm:$0xff] }
 0xaa9   :  { %v2528_v24 = vadd.f32 %v2527_v48, %v2492_v13  ;;  %v2467_v59 = vmax.f32 %v2435_v3, 0.0  ;;  %v7134_v13 = vpop.eup %7133  ;;  %v2497_v48 = vmul.f32 %v2465_v9, %v7702_v0  ;;  %v2470_v30 = vmax.f32 %v2438_v54, 0.0 }
 0xaaa   :  { %v2325_v21 = vpop.permute.xlu0 %2324  ;;  %v2374_v16 = vpop.permute.xlu1 %2373  ;;  %v2518_v22 = vadd.f32 %v2517_v60, %v2487_v27  ;;  %v2473_v61 = vmax.f32 %v2441_v12, 0.0  ;;  %v7285_v60 = vld [vmem:[#allocation7 + $0xb0] sm:$0xff] }
 0xaab   :  { %v2432_v33 = vadd.f32 %v7283_v7, %v2325_v21  ;;  %v2529_v23 = vrot.slane %v2528_v24, 4  ;;  %v2495_v21 = vmul.f32 %v2463_v56, %v7704_v1  ;;  %v2442_v43 = vadd.f32 %v2374_v16, %v2258_v18 }
 0xaac   :  { %v2499_v47 = vmul.f32 %v2467_v59, %v7704_v1  ;;  %v2544_v56 = vadd.f32 %v2498_v58, %v2497_v48  ;;  %v2502_v16 = vmul.f32 %v2470_v30, %v7700_v63 }
 0xaad   :  { %v2464_v10 = vmax.f32 %v2432_v33, 0.0  ;;  %v2530_v20 = vadd.f32 %v2529_v23, %v2528_v24  ;;  %v3018_v33 = vadd.f32 1.0, %v7134_v13  ;;  %v2536_v3 = vadd.f32 %v2535_v62, %v2495_v21  ;;  %v2262_v13 = vld [vmem:[#allocation7 + $0xc8] sm:$0xff] }
 0xaae   :  { %v8036_v29 = vpop.permute.xlu0 %2388  ;;  %v2359_v25 = vpop.permute.xlu1 %2358  ;;  %v2501_v24 = vmul.f32 %v2469_v31, %v7702_v0  ;;  %v2474_v37 = vmax.f32 %v2442_v43, 0.0  ;;  %v2545_v59 = vadd.f32 %v2544_v56, %v2499_v47  ;;  %v2256_v31 = vld [vmem:[#allocation7 + $0x98] sm:$0xff]  ;;  %v2505_v47 = vmul.f32 %v2473_v61, %v7702_v0 }
 0xaaf   :  { %v2496_v8 = vmul.f32 %v2464_v10, %v7706_v2  ;;  %v2439_v32 = vadd.f32 %v2359_v25, %v2255_v4  ;;  %v2531_v54 = vrot.slane %v2530_v20, 2  ;;  %v2261_v10 = vld [vmem:[#allocation7 + $0xc0] sm:$0xff]  ;;  %7135 = vrcp.f32 %v3018_v33  ;;  %v7286_v4 = vld [vmem:[#allocation7 + $0xe8] sm:$0xff] }
 0xab0   :  { %v2553_v43 = vadd.f32 %v2502_v16, %v2501_v24 }
 0xab1   :  { %v2537_v23 = vadd.f32 %v2536_v3, %v2496_v8  ;;  %v2471_v62 = vmax.f32 %v2439_v32, 0.0  ;;  %v8054_v12 = vadd.f32 %v2531_v54, %v2530_v20 }
 0xab2   :  { %v2287_v44 = vpop.permute.xlu0 %2286  ;;  %v2393_v11 = vpop.permute.xlu1 %2392 }
 0xab3   :  { %v2424_v41 = vadd.f32 %v7284_v28, %v2287_v44  ;;  %v2538_v8 = vrot.slane %v2537_v23, 4  ;;  %v2503_v33 = vmul.f32 %v2471_v62, %v7704_v1 }
 0xab5   :  { %v2456_v5 = vmax.f32 %v2424_v41, 0.0  ;;  %v2506_v41 = vmul.f32 %v2474_v37, %v7700_v63  ;;  %v2260_v37 = vld [vmem:[#allocation7 + $0xb8] sm:$0xff]  ;;  %v2539_v54 = vadd.f32 %v2538_v8, %v2537_v23 }
 0xab6   :  { %v2378_v39 = vpop.permute.xlu0 %2377  ;;  %v2344_v7 = vpop.permute.xlu1 %2343 }
 0xab7   :  { %v2436_v6 = vadd.f32 %v2344_v7, %v2252_v35  ;;  %v2488_v52 = vmul.f32 %v2456_v5, %v7706_v2  ;;  %v2443_v21 = vadd.f32 %v7285_v60, %v2378_v39  ;;  %v2445_v35 = vadd.f32 %v8036_v29, %v2261_v10 }
 0xab8   :  { %v2446_v5 = vadd.f32 %v2393_v11, %v2262_v13  ;;  %v2533_v11 = vrot.slane %v8054_v12, 1 }
 0xab9   :  { %v2468_v9 = vmax.f32 %v2436_v6, 0.0  ;;  %v2519_v18 = vadd.f32 %v2518_v22, %v2488_v52  ;;  %v2475_v32 = vmax.f32 %v2443_v21, 0.0  ;;  %v7287_v22 = vld [vmem:[#allocation7 + $0xd0] sm:$0xff]  ;;  %v2477_v16 = vmax.f32 %v2445_v35, 0.0  ;;  %v2264_v35 = vld [vmem:[#allocation7 + $0xd8] sm:$0xff] }
 0xaba   :  { %v2412_v44 = vpop.permute.xlu0 %2411  ;;  %v2408_v25 = vpop.permute.xlu1 %2407  ;;  %v2478_v10 = vmax.f32 %v2446_v5, 0.0 }
 0xabb   :  { %v2500_v58 = vmul.f32 %v2468_v9, %v7706_v2  ;;  %v2520_v27 = vrot.slane %v2519_v18, 4  ;;  %v2450_v28 = vadd.f32 %v7286_v4, %v2412_v44  ;;  %v2449_v30 = vadd.f32 %v2408_v25, %v2265_v42 }
 0xabc   :  { %v2562_v9 = vadd.f32 %v2506_v41, %v2505_v47  ;;  %v2554_v25 = vadd.f32 %v2553_v43, %v2503_v33  ;;  %v7289_v33 = vld [vmem:[#allocation7 + $0xf8] sm:$0xff] }
 0xabd   :  { %v2546_v48 = vadd.f32 %v2545_v59, %v2500_v58  ;;  %v2521_v3 = vadd.f32 %v2520_v27, %v2519_v18  ;;  %v2482_v56 = vmax.f32 %v2450_v28, 0.0  ;;  %v2481_v24 = vmax.f32 %v2449_v30, 0.0  ;;  %v7288_v18 = vld [vmem:[#allocation7 + $0xf0] sm:$0xff] }
 0xabe   :  { %v2397_v7 = vpop.permute.xlu0 %2396  ;;  %v2363_v39 = vpop.permute.xlu1 %2362  ;;  %v2507_v59 = vmul.f32 %v2475_v32, %v7704_v1  ;;  %v2509_v30 = vmul.f32 %v2477_v16, %v7702_v0 }
 0xabf   :  { %v2547_v6 = vrot.slane %v2546_v48, 4  ;;  %v2447_v29 = vadd.f32 %v7287_v22, %v2397_v7  ;;  %v2440_v52 = vadd.f32 %v2363_v39, %v2256_v31  ;;  %v2522_v60 = vrot.slane %v2521_v3, 2 }
 0xac0   :  { %v2514_v21 = vmul.f32 %v2482_v56, %v7700_v63  ;;  %v2513_v28 = vmul.f32 %v2481_v24, %v7702_v0  ;;  %v2510_v31 = vmul.f32 %v2478_v10, %v7700_v63  ;;  %v2563_v7 = vadd.f32 %v2562_v9, %v2507_v59 }
 0xac1   :  { %v2548_v20 = vadd.f32 %v2547_v6, %v2546_v48  ;;  %v2472_v44 = vmax.f32 %v2440_v52, 0.0  ;;  %v2479_v58 = vmax.f32 %v2447_v29, 0.0  ;;  %v2540_v48 = vrot.slane %v2539_v54, 2  ;;  %v8068_v52 = vpop.eup %7135 }
 0xac2   :  { %v2416_v61 = vpop.permute.xlu0 %2415  ;;  %v2382_v42 = vpop.permute.xlu1 %2381  ;;  %v2523_v6 = vadd.f32 %v2522_v60, %v2521_v3  ;;  %v2580_v16 = vadd.f32 %v2514_v21, %v2513_v28 }
 0xac3   :  { %v2451_v62 = vadd.f32 %v7288_v18, %v2416_v61  ;;  %v2444_v13 = vadd.f32 %v2382_v42, %v2260_v37  ;;  %v2504_v27 = vmul.f32 %v2472_v44, %v7706_v2  ;;  %v2549_v4 = vrot.slane %v2548_v20, 2 }
 0xac4   :  { %v2511_v56 = vmul.f32 %v2479_v58, %v7704_v1  ;;  %v2541_v44 = vadd.f32 %v2540_v48, %v2539_v54  ;;  %v2571_v61 = vadd.f32 %v2510_v31, %v2509_v30 }
 0xac5   :  { %v2483_v23 = vmax.f32 %v2451_v62, 0.0  ;;  %v2476_v41 = vmax.f32 %v2444_v13, 0.0  ;;  %v2555_v43 = vadd.f32 %v2554_v25, %v2504_v27  ;;  %v2550_v37 = vadd.f32 %v2549_v4, %v2548_v20 }
 0xac6   :  { %v2420_v8 = vpop.permute.xlu0 %2419  ;;  %v2401_v5 = vpop.permute.xlu1 %2400  ;;  %v2572_v13 = vadd.f32 %v2571_v61, %v2511_v56  ;;  %v2524_v27 = vrot.slane %v2523_v6, 1  ;;  %v2542_v54 = vrot.slane %v2541_v44, 1 }
 0xac7   :  { %v2515_v39 = vmul.f32 %v2483_v23, %v7704_v1  ;;  %v2508_v47 = vmul.f32 %v2476_v41, %v7706_v2  ;;  %v2452_v32 = vadd.f32 %v7289_v33, %v2420_v8  ;;  %v2556_v22 = vrot.slane %v2555_v43, 4 }
 0xac8   :  { %v2448_v29 = vadd.f32 %v2401_v5, %v2264_v35  ;;  %v2551_v20 = vrot.slane %v2550_v37, 1  ;;  %v2534_v41 = vadd.f32 %v2533_v11, %v8054_v12 }
 0xac9   :  { %v2564_v24 = vadd.f32 %v2563_v7, %v2508_v47  ;;  %v2484_v10 = vmax.f32 %v2452_v32, 0.0  ;;  %v2557_v9 = vadd.f32 %v2556_v22, %v2555_v43  ;;  %v2581_v59 = vadd.f32 %v2580_v16, %v2515_v39  ;;  %v7290_v32 = vld [vmem:[%s8889_s7] ss:$0 sm:$0xff] }
 0xaca   :  { %v2480_v42 = vmax.f32 %v2448_v29, 0.0  ;;  %v3025_v25 = vpop.permute.xlu0 %3024  ;;  %v2525_v43 = vadd.f32 %v2524_v27, %v2523_v6  ;;  %v2552_v8 = vadd.f32 %v2551_v20, %v2550_v37  ;;  %v2543_v39 = vadd.f32 %v2542_v54, %v2541_v44 }
 0xacb   :  { %v2565_v18 = vrot.slane %v2564_v24, 4  ;;  %v2516_v62 = vmul.f32 %v2484_v10, %v7706_v2  ;;  %v3027_v3 = vmul.f32 %v8068_v52, %v3025_v25  ;;  %v2558_v60 = vrot.slane %v2557_v9, 2 }
 0xacc   :  { %v2512_v58 = vmul.f32 %v2480_v42, %v7706_v2  ;;  %v2590_v56 = vadd.f32 %v7290_v32, %v2534_v41  ;;  %v2589_v12 = vadd.f32 %v7290_v32, %v2525_v43  ;;  %v2592_v11 = vadd.f32 %v7290_v32, %v2552_v8 }
 0xacd   :  { %v2566_v21 = vadd.f32 %v2565_v18, %v2564_v24  ;;  %v2582_v4 = vadd.f32 %v2581_v59, %v2516_v62  ;;  %3029 = vrot.lane.b32.xlu0 %v3027_v3, %s7546_s4  ;;  %v2559_v28 = vadd.f32 %v2558_v60, %v2557_v9  ;;  %v2591_v61 = vadd.f32 %v7290_v32, %v2543_v39 }
 0xace   :  { %v2573_v23 = vadd.f32 %v2572_v13, %v2512_v58  ;;  %v2605_v9 = vrot.slane %v2590_v56, 7  ;;  %v2609_v62 = vrot.slane %v2592_v11, 5 }
 0xacf   :  { %v2567_v35 = vrot.slane %v2566_v21, 2  ;;  %v2583_v48 = vrot.slane %v2582_v4, 4  ;;  %v2560_v30 = vrot.slane %v2559_v28, 1  ;;  %v2607_v3 = vrot.slane %v2591_v61, 6 }
 0xad0   :  { %v2574_v31 = vrot.slane %v2573_v23, 4  ;;  %v2606_v18 = vsel %vm692_vm2, %v2605_v9, %v2589_v12 }
 0xad1   :  { %v2568_v5 = vadd.f32 %v2567_v35, %v2566_v21  ;;  %v2584_v7 = vadd.f32 %v2583_v48, %v2582_v4  ;;  %v2561_v47 = vadd.f32 %v2560_v30, %v2559_v28  ;;  %v2608_v21 = vsel %vm695_vm3, %v2607_v3, %v2606_v18 }
 0xad2   :  { %v2575_v33 = vadd.f32 %v2574_v31, %v2573_v23  ;;  %v2610_v4 = vsel %vm698_vm4, %v2609_v62, %v2608_v21  ;;  %v3022_v30 = vmul.f32 %v8068_v52, %v7933_v17 }
 0xad3   :  { %v2569_v22 = vrot.slane %v2568_v5, 1  ;;  %v2585_v29 = vrot.slane %v2584_v7, 2  ;;  %v2593_v6 = vadd.f32 %v7290_v32, %v2561_v47 }
 0xad4   :  { %v2576_v16 = vrot.slane %v2575_v33, 2 }
 0xad5   :  { %v2570_v24 = vadd.f32 %v2569_v22, %v2568_v5  ;;  %v2586_v10 = vadd.f32 %v2585_v29, %v2584_v7  ;;  %v2611_v60 = vrot.slane %v2593_v6, 4 }
 0xad6   :  { %v2577_v37 = vadd.f32 %v2576_v16, %v2575_v33 }
 0xad7   :  { %v2587_v42 = vrot.slane %v2586_v10, 1  ;;  %v2594_v44 = vadd.f32 %v7290_v32, %v2570_v24  ;;  %v2612_v28 = vsel %vm701_vm5, %v2611_v60, %v2610_v4 }
 0xad8   :  { %v2578_v25 = vrot.slane %v2577_v37, 1 }
 0xad9   :  { %v2588_v59 = vadd.f32 %v2587_v42, %v2586_v10  ;;  %v2613_v27 = vrot.slane %v2594_v44, 3 }
 0xada   :  { %v2579_v13 = vadd.f32 %v2578_v25, %v2577_v37 }
 0xadb   :  { %v2596_v58 = vadd.f32 %v7290_v32, %v2588_v59  ;;  %v2614_v41 = vsel %vm704_vm6, %v2613_v27, %v2612_v28 }
 0xadc   :  { %v2595_v20 = vadd.f32 %v7290_v32, %v2579_v13 }
 0xadd   :  { %v2617_v54 = vrot.slane %v2596_v58, 1 }
 0xade   :  { %v2615_v23 = vrot.slane %v2595_v20, 2 }
 0xae0   :  { %v2616_v35 = vsel %vm707_vm7, %v2615_v23, %v2614_v41 }
 0xae1   :  { %v2618_v48 = vsel %vm710_vm8, %v2617_v54, %v2616_v35 }
 0xae2   :  { %2620 = vmax.xlane.f32.xlu1 %v2618_v48 }
 0xb3f   :  { %v3030_v31 = vpop.permute.xlu0 %3029 }
 0xb40   :  { %v8087_v43 = vadd.f32 %v3030_v31, %v3022_v30 }
 0xb42   :  { %7137 = vtanh.f32 %v8087_v43 }
 0xb4f   :  { %v7138_v8 = vpop.eup %7137 }
 0xb50   :  { %3035 = vrot.lane.b32.xlu1 %v7138_v8, %s7545_s3 }
 0xb6b   :  { %v2621_v5 = vpop.xlane.xlu1 %2620 }
 0xb6c   :  { %v2623_v7 = vrot.slane %v2621_v5, 1  ;;  %v2624_v39 = vrot.slane %v2621_v5, 2  ;;  %v2625_v47 = vrot.slane %v2621_v5, 3  ;;  %v2626_v33 = vrot.slane %v2621_v5, 4 }
 0xb6d   :  { %v2627_v32 = vrot.slane %v2621_v5, 5  ;;  %v2628_v22 = vrot.slane %v2621_v5, 6  ;;  %v2638_v29 = vsub.f32 %v2589_v12, %v2621_v5  ;;  %v2629_v16 = vrot.slane %v2621_v5, 7 }
 0xb6e   :  { %v2639_v24 = vsub.f32 %v2590_v56, %v2623_v7  ;;  %v2640_v10 = vsub.f32 %v2591_v61, %v2624_v39  ;;  %v2641_v17 = vsub.f32 %v2592_v11, %v2625_v47  ;;  %v2642_v37 = vsub.f32 %v2593_v6, %v2626_v33 }
 0xb6f   :  { %v2646_v9 = vmul.f32 1.442695, %v2638_v29  ;;  %v2643_v42 = vsub.f32 %v2594_v44, %v2627_v32  ;;  %v2644_v25 = vsub.f32 %v2595_v20, %v2628_v22  ;;  %v2645_v3 = vsub.f32 %v2596_v58, %v2629_v16 }
 0xb70   :  { %v2648_v59 = vmul.f32 1.442695, %v2639_v24  ;;  %v2650_v18 = vmul.f32 1.442695, %v2640_v10  ;;  %v2652_v62 = vmul.f32 1.442695, %v2641_v17 }
 0xb71   :  { %7139 = vpow2.f32 %v2646_v9  ;;  %v2654_v13 = vmul.f32 1.442695, %v2642_v37  ;;  %v2656_v60 = vmul.f32 1.442695, %v2643_v42  ;;  %v2658_v27 = vmul.f32 1.442695, %v2644_v25 }
 0xb72   :  { %7141 = vpow2.f32 %v2648_v59  ;;  %v2660_v12 = vmul.f32 1.442695, %v2645_v3  ;;  %v2712_v24 = vld [vmem:[#allocation5] sm:$0xff] }
 0xb73   :  { %7143 = vpow2.f32 %v2650_v18 }
 0xb74   :  { %7145 = vpow2.f32 %v2652_v62 }
 0xb75   :  { %7147 = vpow2.f32 %v2654_v13 }
 0xb76   :  { %7149 = vpow2.f32 %v2656_v60 }
 0xb77   :  { %7151 = vpow2.f32 %v2658_v27  ;;  %v2713_v27 = vld [vmem:[#allocation5 + $0x8] sm:$0xff] }
 0xb78   :  { %7153 = vpow2.f32 %v2660_v12 }
 0xb7e   :  { %v7140_v56 = vpop.eup %7139 }
 0xb7f   :  { %v7142_v11 = vpop.eup %7141 }
 0xb80   :  { %v7144_v61 = vpop.eup %7143  ;;  %v2670_v6 = vrot.slane %v7142_v11, 7 }
 0xb81   :  { %v7146_v44 = vpop.eup %7145  ;;  %v2672_v20 = vrot.slane %v7144_v61, 6 }
 0xb82   :  { %v7148_v21 = vpop.eup %7147  ;;  %v2671_v58 = vsel %vm692_vm2, %v2670_v6, %v7140_v56  ;;  %v2674_v4 = vrot.slane %v7146_v44, 5 }
 0xb83   :  { %v7150_v54 = vpop.eup %7149  ;;  %v2673_v28 = vsel %vm695_vm3, %v2672_v20, %v2671_v58  ;;  %v2676_v23 = vrot.slane %v7148_v21, 4  ;;  %v7291_v20 = vld [vmem:[#allocation5 + $0x18] sm:$0xff] }
 0xb84   :  { %v7152_v41 = vpop.eup %7151  ;;  %v2675_v35 = vsel %vm698_vm4, %v2674_v4, %v2673_v28  ;;  %v2678_v48 = vrot.slane %v7150_v54, 3 }
 0xb85   :  { %v7154_v30 = vpop.eup %7153  ;;  %v2677_v31 = vsel %vm701_vm5, %v2676_v23, %v2675_v35  ;;  %v2680_v8 = vrot.slane %v7152_v41, 2  ;;  %v2714_v35 = vld [vmem:[#allocation5 + $0x10] sm:$0xff] }
 0xb86   :  { %v2679_v5 = vsel %vm704_vm6, %v2678_v48, %v2677_v31  ;;  %v2682_v7 = vrot.slane %v7154_v30, 1 }
 0xb87   :  { %v2681_v39 = vsel %vm707_vm7, %v2680_v8, %v2679_v5 }
 0xb88   :  { %v2683_v47 = vsel %vm710_vm8, %v2682_v7, %v2681_v39 }
 0xb89   :  { %2685 = vadd.xlane.f32.xlu0 %v2683_v47 }
 0xc12   :  { %v2686_v33 = vpop.xlane.xlu0 %2685 }
 0xc13   :  { %7155 = vrcp.f32 %v2686_v33  ;;  %v2716_v33 = vld [vmem:[#allocation5 + $0x20] sm:$0xff] }
 0xc20   :  { %v7156_v32 = vpop.eup %7155 }
 0xc21   :  { %v2704_v22 = vmul.f32 %v7156_v32, %v7140_v56  ;;  %v2689_v29 = vrot.slane %v7156_v32, 1  ;;  %v2694_v16 = vrot.slane %v7156_v32, 6  ;;  %v2695_v10 = vrot.slane %v7156_v32, 7 }
 0xc22   :  { %v2690_v17 = vrot.slane %v7156_v32, 2  ;;  %v2691_v37 = vrot.slane %v7156_v32, 3  ;;  %v2692_v9 = vrot.slane %v7156_v32, 4  ;;  %v2693_v62 = vrot.slane %v7156_v32, 5 }
 0xc23   :  { %v2731_v42 = vrot.slane %v2704_v22, %v7680_v46  ;;  %v2705_v25 = vmul.f32 %v7142_v11, %v2689_v29  ;;  %v2710_v59 = vmul.f32 %v7152_v41, %v2694_v16  ;;  %v2711_v12 = vmul.f32 %v7154_v30, %v2695_v10  ;;  %v2725_v11 = vld [vmem:[#allocation5 + $0x68] sm:$0xff]  ;;  %v7292_v29 = vld [vmem:[#allocation5 + $0x78] sm:$0xff] }
 0xc24   :  { %v2706_v18 = vmul.f32 %v7144_v61, %v2690_v17  ;;  %v2707_v56 = vmul.f32 %v7146_v44, %v2691_v37  ;;  %v2708_v6 = vmul.f32 %v7148_v21, %v2692_v9  ;;  %v2709_v41 = vmul.f32 %v7150_v54, %v2693_v62  ;;  %v2717_v37 = vld [vmem:[#allocation5 + $0x28] sm:$0xff] }
 0xc25   :  { %v2760_v3 = vmul.f32 %v2731_v42, %v2712_v24  ;;  %v2735_v13 = vrot.slane %v2705_v25, %v7680_v46  ;;  %v2993_v60 = vrot.slane %v2705_v25, 7  ;;  %v2755_v28 = vrot.slane %v2710_v59, %v7680_v46  ;;  %v2718_v25 = vld [vmem:[#allocation5 + $0x30] sm:$0xff] }
 0xc26   :  { %v2995_v23 = vrot.slane %v2706_v18, 6  ;;  %v2761_v61 = vmul.f32 %v2731_v42, %v2713_v27  ;;  %v2997_v48 = vrot.slane %v2707_v56, 5  ;;  %v2759_v30 = vrot.slane %v2711_v12, %v7680_v46  ;;  %v2721_v27 = vld [vmem:[#allocation5 + $0x48] sm:$0xff] }
 0xc27   :  { %2776 = vadd.xlane.f32.xlu0 %v2760_v3  ;;  %v2763_v58 = vmul.f32 %v7291_v20, %v2735_v13  ;;  %v2994_v4 = vsel %vm692_vm2, %v2993_v60, %v2704_v22  ;;  %v2773_v31 = vmul.f32 %v2755_v28, %v2725_v11  ;;  %v2999_v44 = vrot.slane %v2708_v6, 4  ;;  %v2724_v11 = vld [vmem:[#allocation5 + $0x60] sm:$0xff] }
 0xc28   :  { %v2996_v21 = vsel %vm695_vm3, %v2995_v23, %v2994_v4  ;;  %v3001_v8 = vrot.slane %v2709_v41, 3  ;;  %v2762_v7 = vmul.f32 %v2735_v13, %v2714_v35  ;;  %v2739_v39 = vrot.slane %v2706_v18, %v7680_v46  ;;  %v2719_v18 = vld [vmem:[#allocation5 + $0x38] sm:$0xff]  ;;  %v2720_v13 = vld [vmem:[#allocation5 + $0x40] sm:$0xff] }
 0xc29   :  { %2782 = vadd.xlane.f32.xlu1 %v2763_v58  ;;  %v2998_v5 = vsel %vm698_vm4, %v2997_v48, %v2996_v21  ;;  %v3003_v47 = vrot.slane %v2710_v59, 2  ;;  %v3005_v22 = vrot.slane %v2711_v12, 1  ;;  %v2775_v16 = vmul.f32 %v7292_v29, %v2759_v30  ;;  %v2722_v58 = vld [vmem:[#allocation5 + $0x50] sm:$0xff]  ;;  %v3036_v48 = vpop.permute.xlu1 %3035 }
 0xc2a   :  { %v3000_v54 = vsel %vm701_vm5, %v2999_v44, %v2998_v5  ;;  %v2764_v17 = vmul.f32 %v2739_v39, %v2716_v33  ;;  %v2765_v9 = vmul.f32 %v2739_v39, %v2717_v37  ;;  %v2743_v42 = vrot.slane %v2707_v56, %v7680_v46  ;;  %v8115_v56 = vld [vmem:[#allocation5 + $0x58] sm:$0xff] }
 0xc2b   :  { %2778 = vadd.xlane.f32.xlu0 %v2761_v61  ;;  %v3002_v32 = vsel %vm704_vm6, %v3001_v8, %v3000_v54  ;;  %v2747_v3 = vrot.slane %v2708_v6, %v7680_v46  ;;  %v2751_v20 = vrot.slane %v2709_v41, %v7680_v46  ;;  %v2772_v61 = vmul.f32 %v2755_v28, %v2724_v11  ;;  %v2726_v6 = vld [vmem:[#allocation5 + $0x70] sm:$0xff] }
 0xc2c   :  { %v3004_v24 = vsel %vm707_vm7, %v3003_v47, %v3002_v32  ;;  %v2766_v59 = vmul.f32 %v2743_v42, %v2718_v25  ;;  %v2767_v62 = vmul.f32 %v2743_v42, %v2719_v18  ;;  %v2774_v35 = vmul.f32 %v2759_v30, %v2726_v6 }
 0xc2d   :  { %2802 = vadd.xlane.f32.xlu1 %v2773_v31  ;;  %v8110_v10 = vsel %vm710_vm8, %v3005_v22, %v3004_v24  ;;  %v2768_v60 = vmul.f32 %v2747_v3, %v2720_v13  ;;  %v2769_v12 = vmul.f32 %v2747_v3, %v2721_v27  ;;  %v2770_v4 = vmul.f32 %v2751_v20, %v2722_v58 }
 0xc2e   :  { %8905 = vst [vmem:[#allocation23_spill] sm:$0xff] %v8110_v10  ;;  %v2771_v23 = vmul.f32 %v2751_v20, %v8115_v56  ;;  %v3038_v31 = vmul.f32 %v8068_v52, %v3036_v48 }
 0xc2f   :  { %2780 = vadd.xlane.f32.xlu0 %v2762_v7 }
 0xc31   :  { %2806 = vadd.xlane.f32.xlu1 %v2775_v16 }
 0xc33   :  { %2784 = vadd.xlane.f32.xlu0 %v2764_v17 }
 0xc37   :  { %2786 = vadd.xlane.f32.xlu0 %v2765_v9 }
 0xc3b   :  { %2788 = vadd.xlane.f32.xlu0 %v2766_v59 }
 0xc3f   :  { %2790 = vadd.xlane.f32.xlu0 %v2767_v62 }
 0xc43   :  { %2792 = vadd.xlane.f32.xlu0 %v2768_v60 }
 0xc47   :  { %2794 = vadd.xlane.f32.xlu0 %v2769_v12 }
 0xc4b   :  { %2796 = vadd.xlane.f32.xlu0 %v2770_v4 }
 0xc4f   :  { %2798 = vadd.xlane.f32.xlu0 %v2771_v23 }
 0xc53   :  { %2800 = vadd.xlane.f32.xlu0 %v2772_v61 }
 0xc57   :  { %2804 = vadd.xlane.f32.xlu0 %v2774_v35 }
 0xc6d   :  { %3040 = vrot.lane.b32.xlu0 %v3038_v31, %s7546_s4 }
 0xcb0   :  { %v2777_v41 = vpop.xlane.xlu0 %2776 }
 0xcb1   :  { %v2827_v9 = vrot.slane %v2777_v41, %v7668_v36 }
 0xcb2   :  { %v2783_v33 = vpop.xlane.xlu1 %2782 }
 0xcb3   :  { %v2840_v52 = vrot.slane %v2783_v33, %v7670_v38  ;;  %v7295_v33 = vld [vmem:[#allocation8 + $0x40] sm:$0xff] }
 0xcb4   :  { %v2779_v44 = vpop.xlane.xlu0 %2778 }
 0xcb5   :  { %v2831_v16 = vrot.slane %v2779_v44, %v7670_v38 }
 0xcb6   :  { %v2803_v30 = vpop.xlane.xlu1 %2802 }
 0xcb7   :  { %v2832_v13 = vsel %vm928_vm9, %v2831_v16, %v2827_v9  ;;  %v2885_v20 = vrot.slane %v2803_v30, %v7670_v38  ;;  %v7298_v30 = vld [vmem:[#allocation8 + $0x10] sm:$0xff]  ;;  %v7306_v9 = vld [vmem:[#allocation8] sm:$0xff] }
 0xcb8   :  { %v2781_v21 = vpop.xlane.xlu0 %2780  ;;  %v7302_v16 = vld [vmem:[#allocation8 + $0x30] sm:$0xff] }
 0xcb9   :  { %v2836_v32 = vrot.slane %v2781_v21, %v7668_v36 }
 0xcba   :  { %v2807_v4 = vpop.xlane.xlu1 %2806 }
 0xcbb   :  { %v2841_v42 = vsel %vm928_vm9, %v2840_v52, %v2836_v32  ;;  %v2894_v31 = vrot.slane %v2807_v4, %v7670_v38  ;;  %v7297_v32 = vld [vmem:[#allocation8 + $0x28] sm:$0xff]  ;;  %v7301_v52 = vld [vmem:[#allocation8 + $0x38] sm:$0xff] }
 0xcbc   :  { %v2785_v8 = vpop.xlane.xlu0 %2784  ;;  %v2896_v58 = vsel %vm692_vm2, %v2841_v42, %v2832_v13  ;;  %v2163_v42 = vpop.f32.mrf.mxu0 }
 0xcbd   :  { %v2845_v17 = vrot.slane %v2785_v8, %v7668_v36 }
 0xcc0   :  { %v2787_v5 = vpop.xlane.xlu0 %2786 }
 0xcc1   :  { %v2849_v22 = vrot.slane %v2787_v5, %v7670_v38 }
 0xcc3   :  { %v2850_v18 = vsel %vm928_vm9, %v2849_v22, %v2845_v17  ;;  %v7299_v22 = vld [vmem:[#allocation8 + $0x50] sm:$0xff]  ;;  %v7304_v17 = vld [vmem:[#allocation8 + $0x18] sm:$0xff] }
 0xcc4   :  { %v2789_v7 = vpop.xlane.xlu0 %2788  ;;  %v2897_v11 = vsel %vm695_vm3, %v2850_v18, %v2896_v58 }
 0xcc5   :  { %v2854_v25 = vrot.slane %v2789_v7, %v7668_v36 }
 0xcc8   :  { %v2791_v39 = vpop.xlane.xlu0 %2790 }
 0xcc9   :  { %v2858_v24 = vrot.slane %v2791_v39, %v7670_v38 }
 0xccb   :  { %v2859_v60 = vsel %vm928_vm9, %v2858_v24, %v2854_v25  ;;  %v7303_v24 = vld [vmem:[#allocation8 + $0x20] sm:$0xff] }
 0xccc   :  { %v2793_v54 = vpop.xlane.xlu0 %2792  ;;  %v2898_v6 = vsel %vm698_vm4, %v2859_v60, %v2897_v11 }
 0xccd   :  { %v2863_v62 = vrot.slane %v2793_v54, %v7668_v36  ;;  %v7293_v54 = vld [vmem:[#allocation8 + $0x58] sm:$0xff] }
 0xcd0   :  { %v2795_v47 = vpop.xlane.xlu0 %2794 }
 0xcd1   :  { %v2867_v37 = vrot.slane %v2795_v47, %v7670_v38  ;;  %v7294_v47 = vld [vmem:[%s8890_s8 + $0x8] sm:$0xff] }
 0xcd3   :  { %v2868_v23 = vsel %vm928_vm9, %v2867_v37, %v2863_v62  ;;  %v7305_v37 = vld [vmem:[#allocation8 + $0x8] sm:$0xff] }
 0xcd4   :  { %v2797_v28 = vpop.xlane.xlu0 %2796  ;;  %v2899_v41 = vsel %vm701_vm5, %v2868_v23, %v2898_v6 }
 0xcd5   :  { %v2872_v27 = vrot.slane %v2797_v28, %v7668_v36  ;;  %v7296_v28 = vld [vmem:[%s8890_s8] sm:$0xff] }
 0xcd8   :  { %v2799_v29 = vpop.xlane.xlu0 %2798 }
 0xcd9   :  { %v2876_v59 = vrot.slane %v2799_v29, %v7670_v38  ;;  %v7300_v29 = vld [vmem:[#allocation8 + $0x48] sm:$0xff] }
 0xcdb   :  { %v2877_v61 = vsel %vm928_vm9, %v2876_v59, %v2872_v27 }
 0xcdc   :  { %v2801_v3 = vpop.xlane.xlu0 %2800  ;;  %v2900_v21 = vsel %vm704_vm6, %v2877_v61, %v2899_v41 }
 0xcdd   :  { %v2881_v12 = vrot.slane %v2801_v3, %v7668_v36  ;;  %v7307_v3 = vld [vmem:[%s8887_s5] ss:$0 sm:$0xff] }
 0xcdf   :  { %v2886_v35 = vsel %vm928_vm9, %v2885_v20, %v2881_v12 }
 0xce0   :  { %v2805_v48 = vpop.xlane.xlu0 %2804  ;;  %v2901_v5 = vsel %vm707_vm7, %v2886_v35, %v2900_v21  ;;  %v3962_v35 = vld [vmem:[#allocation2 + $0x20] sm:$0xff] }
 0xce1   :  { %v2890_v44 = vrot.slane %v2805_v48, %v7668_v36 }
 0xce3   :  { %v2895_v8 = vsel %vm928_vm9, %v2894_v31, %v2890_v44 }
 0xce4   :  { %v3041_v7 = vpop.permute.xlu0 %3040  ;;  %v2902_v39 = vsel %vm710_vm8, %v2895_v8, %v2901_v5 }
 0xce5   :  { %6980 = vmatmul.mubr.msk.f32.vlgmr.msra.gmra.mxu0 %vm1000_vm10, %v2902_v39  ;;  %6857 = vmatmul.mubr.msk.f32.vlgmr.msra.gmra.mxu1 %vm146_vm1, %v3041_v7 }
 0xce6   :  { %6983 = vmatpush3.msra.mxu0 %v7293_v54  ;;  %6990 = vmatprep.mubr.msk.f32.mxu0 %vm7548_vm0, %v8896_v14 }
 0xce7   :  { %6984 = vmatprep.subr.mxu0 %v8896_v14  ;;  %6994 = vmatpush3.msra.mxu1 %v7294_v47 }
 0xce8   :  { %6985 = vmatpush3.msra.mxu0 %v7295_v33  ;;  %6995 = vmatprep.subr.mxu1 %v8896_v14 }
 0xce9   :  { %6986 = vmatprep.subr.mxu0 %v8896_v14  ;;  %6996 = vmatpush3.msra.mxu1 %v7296_v28 }
 0xcea   :  { %6987 = vmatpush3.msra.mxu0 %v7297_v32  ;;  %6997 = vmatprep.mubr.msk.f32.mxu1 %vm7548_vm0, %v8896_v14 }
 0xceb   :  { %6988 = vmatprep.subr.mxu0 %v8896_v14  ;;  %7000 = vmatprep.subr.mxu1 %v8896_v14 }
 0xcec   :  { %6989 = vmatpush3.msra.mxu0 %v7298_v30  ;;  %v3191_v30 = vld [vmem:[#allocation7 + $0x28] sm:$0xff] }
 0xced   :  { %6991 = vmatmul.mubr.msk.f32.vlgmr.msra.gmra.mxu0 %vm146_vm1, %v3041_v7  ;;  %4017 = vmatprep.subr.mxu0 %v7299_v22 }
 0xcee   :  { %4018 = vmatpush1.msra.mxu0 %v7300_v29  ;;  %4057 = vmatprep.mubr.f32.mxu0 %v8896_v14 }
 0xcef   :  { %4019 = vmatprep.subr.mxu0 %v7301_v52  ;;  %v3190_v52 = vld [vmem:[#allocation7 + $0x20] sm:$0xff] }
 0xcf0   :  { %4020 = vmatpush1.msra.mxu0 %v7302_v16 }
 0xcf1   :  { %4021 = vmatprep.subr.mxu0 %v7303_v24 }
 0xcf2   :  { %4022 = vmatpush1.msra.mxu0 %v7304_v17  ;;  %v3195_v17 = vld [vmem:[#allocation7 + $0x48] sm:$0xff] }
 0xcf3   :  { %4023 = vmatprep.subr.mxu0 %v7305_v37  ;;  %v7308_v37 = vld [vmem:[#allocation7 + $0x40] sm:$0xff] }
 0xcf4   :  { %4024 = vmatpush1.msra.mxu0 %v7306_v9 }
 0xcf5   :  { %7011 = vmatprep.subr.mxu0 %v8896_v14 }
 0xda5   :  { %v2971_v25 = vpop.f32.mrf.mxu0  ;;  %v3110_v6 = vpop.f32.mrf.mxu1 }
 0xda6   :  { %v8171_v59 = vadd.f32 %v2971_v25, %v2163_v42  ;;  %v3963_v48 = vadd.f32 %v3962_v35, %v3110_v6  ;;  %v3193_v42 = vld [vmem:[#allocation7 + $0x38] sm:$0xff] }
 0xda7   :  { %v6981_v18 = vpop.f32.mrf.mxu0 }
 0xda8   :  { %8906 = vst [vmem:[#allocation24_spill] sm:$0xff] %v8171_v59  ;;  %7157 = vtanh.f32 %v3963_v48  ;;  %v6860_v16 = vmul.f32 -1.442695, %v3963_v48  ;;  %v7401_v59 = vld [vmem:[#allocation7 + $0x58] sm:$0xff] }
 0xdaa   :  { %7159 = vpow2.f32 %v6860_v16  ;;  %v7312_v16 = vld [vmem:[#allocation7 + $0x70] sm:$0xff] }
 0xdad   :  { %v3181_v62 = vpop.f32.mrf.mxu0 }
 0xdae   :  { %v3185_v13 = vadd.f32 %v7307_v3, %v3181_v62  ;;  %v7309_v3 = vld [vmem:[#allocation7 + $0x30] sm:$0xff] }
 0xdaf   :  { %v6992_v60 = vpop.f32.mrf.mxu0 }
 0xdb0   :  { %v3259_v27 = vrot.slane %v3185_v13, %v7678_v45  ;;  %v3240_v12 = vrot.slane %v3185_v13, %v7675_v40  ;;  %v3221_v20 = vrot.slane %v3185_v13, %v7680_v46  ;;  %v3278_v58 = vrot.slane %v3185_v13, %v7684_v49  ;;  %v3187_v60 = vld [vmem:[#allocation7 + $0x8] sm:$0xff] }
 0xdb1   :  { %v3297_v4 = vrot.slane %v3185_v13, %v7687_v51  ;;  %v3316_v23 = vrot.slane %v3185_v13, %v7690_v53  ;;  %v3335_v11 = vrot.slane %v3185_v13, %v7693_v55  ;;  %v3354_v61 = vrot.slane %v3185_v13, %v7696_v57 }
 0xdb2   :  { %3261 = vbcast.lane.b32.xlu0 %v3259_v27, 256  ;;  %3242 = vbcast.lane.b32.xlu1 %v3240_v12, 256 }
 0xdb5   :  { %v7158_v31 = vpop.eup %7157 }
 0xdb6   :  { %3246 = vbcast.lane.b32.xlu1 %v3240_v12, 264  ;;  %3223 = vbcast.lane.b32.xlu0 %v3221_v20, 256 }
 0xdba   :  { %3265 = vbcast.lane.b32.xlu1 %v3259_v27, 264  ;;  %3250 = vbcast.lane.b32.xlu0 %v3240_v12, 272 }
 0xdbe   :  { %3227 = vbcast.lane.b32.xlu1 %v3221_v20, 264  ;;  %3284 = vbcast.lane.b32.xlu0 %v3278_v58, 264 }
 0xdc2   :  { %3280 = vbcast.lane.b32.xlu1 %v3278_v58, 256  ;;  %3299 = vbcast.lane.b32.xlu0 %v3297_v4, 256 }
 0xdc6   :  { %3269 = vbcast.lane.b32.xlu1 %v3259_v27, 272  ;;  %3231 = vbcast.lane.b32.xlu0 %v3221_v20, 272 }
 0xdca   :  { %3303 = vbcast.lane.b32.xlu1 %v3297_v4, 264  ;;  %3288 = vbcast.lane.b32.xlu0 %v3278_v58, 272 }
 0xdce   :  { %3254 = vbcast.lane.b32.xlu1 %v3240_v12, 280  ;;  %3322 = vbcast.lane.b32.xlu0 %v3316_v23, 264 }
 0xdd2   :  { %3318 = vbcast.lane.b32.xlu1 %v3316_v23, 256  ;;  %3307 = vbcast.lane.b32.xlu0 %v3297_v4, 272 }
 0xdd6   :  { %3273 = vbcast.lane.b32.xlu1 %v3259_v27, 280  ;;  %3341 = vbcast.lane.b32.xlu0 %v3335_v11, 264  ;;  %v7310_v27 = vld [vmem:[#allocation7] sm:$0xff] }
 0xdda   :  { %3337 = vbcast.lane.b32.xlu1 %v3335_v11, 256  ;;  %3292 = vbcast.lane.b32.xlu0 %v3278_v58, 280  ;;  %v3198_v58 = vld [vmem:[#allocation7 + $0x60] sm:$0xff] }
 0xdde   :  { %3235 = vbcast.lane.b32.xlu1 %v3221_v20, 280  ;;  %3356 = vbcast.lane.b32.xlu0 %v3354_v61, 256 }
 0xde2   :  { %3326 = vbcast.lane.b32.xlu1 %v3316_v23, 272  ;;  %3311 = vbcast.lane.b32.xlu0 %v3297_v4, 280 }
 0xde6   :  { %3360 = vbcast.lane.b32.xlu1 %v3354_v61, 264  ;;  %3330 = vbcast.lane.b32.xlu0 %v3316_v23, 280  ;;  %v3196_v23 = vld [vmem:[#allocation7 + $0x50] sm:$0xff] }
 0xdea   :  { %3345 = vbcast.lane.b32.xlu1 %v3335_v11, 272  ;;  %3349 = vbcast.lane.b32.xlu0 %v3335_v11, 280 }
 0xdee   :  { %3364 = vbcast.lane.b32.xlu1 %v3354_v61, 272 }
 0xdf2   :  { %3368 = vbcast.lane.b32.xlu1 %v3354_v61, 280 }
 0xdf6   :  { %3973 = vrot.lane.b32.xlu1 %v7158_v31, %s7545_s3 }
 0xe24   :  { %v3262_v41 = vpop.permute.xlu0 %3261  ;;  %v3243_v44 = vpop.permute.xlu1 %3242 }
 0xe25   :  { %v3378_v9 = vadd.f32 %v7308_v37, %v3262_v41  ;;  %v3374_v62 = vadd.f32 %v3243_v44, %v3190_v52 }
 0xe27   :  { %v3410_v61 = vmax.f32 %v3378_v9, 0.0  ;;  %v3406_v31 = vmax.f32 %v3374_v62, 0.0 }
 0xe28   :  { %v3247_v21 = vpop.permute.xlu1 %3246  ;;  %v3224_v8 = vpop.permute.xlu0 %3223 }
 0xe29   :  { %v3375_v24 = vadd.f32 %v3247_v21, %v3191_v30  ;;  %v3370_v12 = vadd.f32 %v7310_v27, %v3224_v8  ;;  %v7311_v8 = vld [vmem:[#allocation7 + $0x68] sm:$0xff]  ;;  %v3442_v9 = vmul.f32 %v3410_v61, %v7702_v0 }
 0xe2b   :  { %v3407_v4 = vmax.f32 %v3375_v24, 0.0  ;;  %v3402_v30 = vmax.f32 %v3370_v12, 0.0 }
 0xe2c   :  { %v3266_v5 = vpop.permute.xlu1 %3265  ;;  %v3251_v7 = vpop.permute.xlu0 %3250 }
 0xe2d   :  { %v3376_v13 = vadd.f32 %v7309_v3, %v3251_v7  ;;  %v3379_v20 = vadd.f32 %v3266_v5, %v3195_v17  ;;  %v3197_v7 = vld [vmem:[#allocation7 + $0x58] sm:$0xff]  ;;  %v3439_v37 = vmul.f32 %v3407_v4, %v7700_v63  ;;  %v3203_v17 = vld [vmem:[#allocation7 + $0x88] sm:$0xff] }
 0xe2f   :  { %v3408_v41 = vmax.f32 %v3376_v13, 0.0  ;;  %v3411_v44 = vmax.f32 %v3379_v20, 0.0 }
 0xe30   :  { %v3228_v39 = vpop.permute.xlu1 %3227  ;;  %v3285_v54 = vpop.permute.xlu0 %3284 }
 0xe31   :  { %v3371_v6 = vadd.f32 %v3228_v39, %v3187_v60  ;;  %v3383_v5 = vadd.f32 %v7311_v8, %v3285_v54  ;;  %v3434_v54 = vmul.f32 %v3402_v30, %v7702_v0  ;;  %v3443_v12 = vmul.f32 %v3411_v44, %v7700_v63 }
 0xe33   :  { %v3403_v39 = vmax.f32 %v3371_v6, 0.0  ;;  %v3415_v4 = vmax.f32 %v3383_v5, 0.0  ;;  %v7314_v6 = vld [vmem:[#allocation7 + $0x80] sm:$0xff] }
 0xe34   :  { %v3281_v47 = vpop.permute.xlu1 %3280  ;;  %v8185_v33 = vpop.permute.xlu0 %3299 }
 0xe35   :  { %v3382_v21 = vadd.f32 %v3281_v47, %v3198_v58  ;;  %v3438_v47 = vmul.f32 %v3406_v31, %v7702_v0  ;;  %v3435_v61 = vmul.f32 %v3403_v39, %v7700_v63  ;;  %v3386_v31 = vadd.f32 %v7314_v6, %v8185_v33  ;;  %v3208_v6 = vld [vmem:[#allocation7 + $0xb0] sm:$0xff] }
 0xe36   :  { %v3447_v39 = vmul.f32 %v3415_v4, %v7700_v63 }
 0xe37   :  { %v3414_v60 = vmax.f32 %v3382_v21, 0.0  ;;  %v3475_v58 = vadd.f32 %v3439_v37, %v3438_v47  ;;  %v7316_v37 = vld [vmem:[#allocation7 + $0x78] sm:$0xff]  ;;  %v7160_v47 = vpop.eup %7159 }
 0xe38   :  { %v3270_v28 = vpop.permute.xlu1 %3269  ;;  %v3232_v32 = vpop.permute.xlu0 %3231 }
 0xe39   :  { %v3380_v52 = vadd.f32 %v3270_v28, %v3196_v23  ;;  %v3440_v28 = vmul.f32 %v3408_v41, %v7704_v1  ;;  %v3446_v44 = vmul.f32 %v3414_v60, %v7702_v0 }
 0xe3b   :  { %v3476_v30 = vadd.f32 %v3475_v58, %v3440_v28  ;;  %v3466_v28 = vadd.f32 %v3435_v61, %v3434_v54  ;;  %v3210_v58 = vld [vmem:[#allocation7 + $0xc0] sm:$0xff] }
 0xe3c   :  { %v3304_v22 = vpop.permute.xlu1 %3303  ;;  %v3289_v29 = vpop.permute.xlu0 %3288 }
 0xe3d   :  { %v3384_v24 = vadd.f32 %v7312_v16, %v3289_v29  ;;  %v3412_v29 = vmax.f32 %v3380_v52, 0.0  ;;  %v3387_v20 = vadd.f32 %v3304_v22, %v3203_v17  ;;  %v7315_v52 = vld [vmem:[#allocation7 + $0x90] sm:$0xff]  ;;  %v3484_v17 = vadd.f32 %v3443_v12, %v3442_v9 }
 0xe3f   :  { %v3416_v23 = vmax.f32 %v3384_v24, 0.0  ;;  %v3444_v16 = vmul.f32 %v3412_v29, %v7704_v1  ;;  %v3419_v24 = vmax.f32 %v3387_v20, 0.0  ;;  %v3493_v29 = vadd.f32 %v3447_v39, %v3446_v44 }
 0xe40   :  { %v3255_v25 = vpop.permute.xlu1 %3254  ;;  %v8187_v18 = vpop.permute.xlu0 %3322 }
 0xe41   :  { %v3377_v11 = vadd.f32 %v3255_v25, %v3193_v42  ;;  %v7313_v42 = vld [vmem:[#allocation7 + $0x10] sm:$0xff]  ;;  %v3448_v33 = vmul.f32 %v3416_v23, %v7704_v1 }
 0xe42   :  { %v3372_v25 = vadd.f32 %v7313_v42, %v3232_v32 }
 0xe43   :  { %v3409_v3 = vmax.f32 %v3377_v11, 0.0  ;;  %v3206_v11 = vld [vmem:[#allocation7 + $0xa0] sm:$0xff] }
 0xe44   :  { %v3319_v35 = vpop.permute.xlu1 %3318  ;;  %v3308_v48 = vpop.permute.xlu0 %3307  ;;  %v3404_v41 = vmax.f32 %v3372_v25, 0.0 }
 0xe45   :  { %v3441_v32 = vmul.f32 %v3409_v3, %v7706_v2  ;;  %v3388_v22 = vadd.f32 %v7315_v52, %v3308_v48  ;;  %v3390_v3 = vadd.f32 %v3319_v35, %v3206_v11  ;;  %v7317_v35 = vld [vmem:[#allocation7 + $0xa8] sm:$0xff]  ;;  %v3451_v11 = vmul.f32 %v3419_v24, %v7700_v63 }
 0xe46   :  { %v3436_v60 = vmul.f32 %v3404_v41, %v7704_v1  ;;  %v3391_v20 = vadd.f32 %v7317_v35, %v8187_v18  ;;  %v3494_v41 = vadd.f32 %v3493_v29, %v3448_v33  ;;  %v7318_v33 = vld [vmem:[#allocation7 + $0x98] sm:$0xff] }
 0xe47   :  { %v3477_v42 = vadd.f32 %v3476_v30, %v3441_v32  ;;  %v3420_v4 = vmax.f32 %v3388_v22, 0.0  ;;  %v3485_v32 = vadd.f32 %v3484_v17, %v3444_v16  ;;  %v3422_v54 = vmax.f32 %v3390_v3, 0.0 }
 0xe48   :  { %v3274_v62 = vpop.permute.xlu1 %3273  ;;  %v8191_v13 = vpop.permute.xlu0 %3341  ;;  %v3467_v52 = vadd.f32 %v3466_v28, %v3436_v60  ;;  %v3423_v22 = vmax.f32 %v3391_v20, 0.0 }
 0xe49   :  { %v3381_v27 = vadd.f32 %v3274_v62, %v3197_v7  ;;  %v3189_v62 = vld [vmem:[#allocation7 + $0x18] sm:$0xff]  ;;  %v3452_v39 = vmul.f32 %v3420_v4, %v7704_v1  ;;  %v3454_v3 = vmul.f32 %v3422_v54, %v7702_v0 }
 0xe4a   :  { %v3455_v4 = vmul.f32 %v3423_v22, %v7700_v63 }
 0xe4b   :  { %v3413_v21 = vmax.f32 %v3381_v27, 0.0  ;;  %v3418_v27 = vmax.f32 %v3386_v31, 0.0  ;;  %v3967_v31 = vadd.f32 1.0, %v7160_v47  ;;  %v7319_v47 = vld [vmem:[#allocation7 + $0xc8] sm:$0xff] }
 0xe4c   :  { %v3338_v7 = vpop.permute.xlu1 %3337  ;;  %v3293_v8 = vpop.permute.xlu0 %3292  ;;  %v3395_v28 = vadd.f32 %v7319_v47, %v8191_v13  ;;  %v7320_v13 = vld [vmem:[#allocation7 + $0xb8] sm:$0xff] }
 0xe4d   :  { %v3385_v5 = vadd.f32 %v7316_v37, %v3293_v8  ;;  %v3445_v48 = vmul.f32 %v3413_v21, %v7706_v2  ;;  %v3478_v21 = vrot.slane %v3477_v42, 4  ;;  %v3394_v8 = vadd.f32 %v3338_v7, %v3210_v58 }
 0xe4e   :  { %v3450_v30 = vmul.f32 %v3418_v27, %v7702_v0  ;;  %7161 = vrcp.f32 %v3967_v31  ;;  %v3511_v31 = vadd.f32 %v3455_v4, %v3454_v3  ;;  %v7322_v3 = vld [vmem:[#allocation7 + $0xd8] sm:$0xff] }
 0xe4f   :  { %v3417_v25 = vmax.f32 %v3385_v5, 0.0  ;;  %v3486_v44 = vadd.f32 %v3485_v32, %v3445_v48  ;;  %v3479_v7 = vadd.f32 %v3478_v21, %v3477_v42  ;;  %v3426_v27 = vmax.f32 %v3394_v8, 0.0  ;;  %v3215_v48 = vld [vmem:[#allocation7 + $0xe8] sm:$0xff] }
 0xe50   :  { %v3236_v9 = vpop.permute.xlu1 %3235  ;;  %v8206_v12 = vpop.permute.xlu0 %3356  ;;  %v3502_v24 = vadd.f32 %v3451_v11, %v3450_v30  ;;  %v3427_v8 = vmax.f32 %v3395_v28, 0.0 }
 0xe51   :  { %v3449_v23 = vmul.f32 %v3417_v25, %v7706_v2  ;;  %v3373_v61 = vadd.f32 %v3236_v9, %v3189_v62  ;;  %v3487_v58 = vrot.slane %v3486_v44, 4  ;;  %v3480_v21 = vrot.slane %v3479_v7, 2 }
 0xe52   :  { %v3458_v30 = vmul.f32 %v3426_v27, %v7702_v0 }
 0xe53   :  { %v3405_v37 = vmax.f32 %v3373_v61, 0.0  ;;  %v3495_v17 = vadd.f32 %v3494_v41, %v3449_v23  ;;  %v3503_v23 = vadd.f32 %v3502_v24, %v3452_v39  ;;  %v3212_v41 = vld [vmem:[#allocation7 + $0xd0] sm:$0xff]  ;;  %v7321_v24 = vld [vmem:[#allocation7 + $0xe0] sm:$0xff]  ;;  %v3481_v27 = vadd.f32 %v3480_v21, %v3479_v7  ;;  %v3217_v7 = vld [vmem:[#allocation7 + $0xf8] sm:$0xff] }
 0xe54   :  { %v3327_v5 = vpop.permute.xlu1 %3326  ;;  %v3312_v18 = vpop.permute.xlu0 %3311 }
 0xe55   :  { %v3392_v16 = vadd.f32 %v3327_v5, %v3208_v6  ;;  %v3437_v25 = vmul.f32 %v3405_v37, %v7706_v2  ;;  %v3389_v62 = vadd.f32 %v7318_v33, %v3312_v18  ;;  %v3496_v32 = vrot.slane %v3495_v17, 4 }
 0xe57   :  { %v3424_v60 = vmax.f32 %v3392_v16, 0.0  ;;  %v3468_v9 = vadd.f32 %v3467_v52, %v3437_v25  ;;  %v3421_v29 = vmax.f32 %v3389_v62, 0.0  ;;  %v3488_v52 = vadd.f32 %v3487_v58, %v3486_v44 }
 0xe58   :  { %v3361_v35 = vpop.permute.xlu1 %3360  ;;  %v3331_v20 = vpop.permute.xlu0 %3330  ;;  %v3497_v16 = vadd.f32 %v3496_v32, %v3495_v17  ;;  %v3398_v25 = vadd.f32 %v7321_v24, %v8206_v12  ;;  %v3459_v44 = vmul.f32 %v3427_v8, %v7700_v63 }
 0xe59   :  { %v3456_v11 = vmul.f32 %v3424_v60, %v7704_v1  ;;  %v3469_v54 = vrot.slane %v3468_v9, 4  ;;  %v3453_v42 = vmul.f32 %v3421_v29, %v7706_v2  ;;  %v3399_v61 = vadd.f32 %v3361_v35, %v3215_v48  ;;  %v3216_v29 = vld [vmem:[#allocation7 + $0xf0] sm:$0xff] }
 0xe5a   :  { %v3393_v6 = vadd.f32 %v7320_v13, %v3331_v20  ;;  %v3489_v35 = vrot.slane %v3488_v52, 2  ;;  %v3520_v12 = vadd.f32 %v3459_v44, %v3458_v30  ;;  %v3430_v32 = vmax.f32 %v3398_v25, 0.0 }
 0xe5b   :  { %v3470_v37 = vadd.f32 %v3469_v54, %v3468_v9  ;;  %v3504_v5 = vadd.f32 %v3503_v23, %v3453_v42  ;;  %v3512_v33 = vadd.f32 %v3511_v31, %v3456_v11  ;;  %v3431_v60 = vmax.f32 %v3399_v61, 0.0  ;;  %v8226_v30 = vpop.eup %7161 }
 0xe5c   :  { %v3425_v18 = vmax.f32 %v3393_v6, 0.0  ;;  %v3346_v22 = vpop.permute.xlu1 %3345  ;;  %v3350_v39 = vpop.permute.xlu0 %3349  ;;  %v3498_v42 = vrot.slane %v3497_v16, 2  ;;  %v3462_v24 = vmul.f32 %v3430_v32, %v7702_v0 }
 0xe5d   :  { %v3396_v62 = vadd.f32 %v3346_v22, %v3212_v41  ;;  %v3505_v47 = vrot.slane %v3504_v5, 4  ;;  %v3397_v28 = vadd.f32 %v7322_v3, %v3350_v39  ;;  %v3471_v58 = vrot.slane %v3470_v37, 2 }
 0xe5e   :  { %v3457_v48 = vmul.f32 %v3425_v18, %v7706_v2  ;;  %v3463_v13 = vmul.f32 %v3431_v60, %v7700_v63  ;;  %v3490_v18 = vadd.f32 %v3489_v35, %v3488_v52 }
 0xe5f   :  { %v3428_v9 = vmax.f32 %v3396_v62, 0.0  ;;  %v3506_v20 = vadd.f32 %v3505_v47, %v3504_v5  ;;  %v3429_v4 = vmax.f32 %v3397_v28, 0.0  ;;  %v3472_v41 = vadd.f32 %v3471_v58, %v3470_v37 }
 0xe60   :  { %v3513_v17 = vadd.f32 %v3512_v33, %v3457_v48  ;;  %v3365_v23 = vpop.permute.xlu1 %3364  ;;  %v3482_v5 = vrot.slane %v3481_v27, 1  ;;  %v3499_v47 = vadd.f32 %v3498_v42, %v3497_v16  ;;  %v3529_v3 = vadd.f32 %v3463_v13, %v3462_v24 }
 0xe61   :  { %v3460_v11 = vmul.f32 %v3428_v9, %v7704_v1  ;;  %v3400_v54 = vadd.f32 %v3365_v23, %v3216_v29  ;;  %v3507_v61 = vrot.slane %v3506_v20, 2  ;;  %v3461_v31 = vmul.f32 %v3429_v4, %v7706_v2 }
 0xe62   :  { %v3514_v6 = vrot.slane %v3513_v17, 4  ;;  %v3473_v37 = vrot.slane %v3472_v41, 1  ;;  %v3483_v44 = vadd.f32 %v3482_v5, %v3481_v27  ;;  %v3491_v58 = vrot.slane %v3490_v18, 1  ;;  %v7323_v27 = vld [vmem:[%s8889_s7] ss:$0 sm:$0xff] }
 0xe63   :  { %v3521_v21 = vadd.f32 %v3520_v12, %v3460_v11  ;;  %v3432_v8 = vmax.f32 %v3400_v54, 0.0  ;;  %v3508_v60 = vadd.f32 %v3507_v61, %v3506_v20  ;;  %v3500_v12 = vrot.slane %v3499_v47, 1 }
 0xe64   :  { %v3515_v22 = vadd.f32 %v3514_v6, %v3513_v17  ;;  %v3369_v39 = vpop.permute.xlu1 %3368  ;;  %v3474_v11 = vadd.f32 %v3473_v37, %v3472_v41  ;;  %v3492_v42 = vadd.f32 %v3491_v58, %v3490_v18  ;;  %v3539_v61 = vadd.f32 %v7323_v27, %v3483_v44 }
 0xe65   :  { %v3522_v25 = vadd.f32 %v3521_v21, %v3461_v31  ;;  %v3464_v33 = vmul.f32 %v3432_v8, %v7704_v1  ;;  %v3401_v62 = vadd.f32 %v3369_v39, %v3217_v7  ;;  %v3509_v32 = vrot.slane %v3508_v60, 1 }
 0xe66   :  { %v3516_v48 = vrot.slane %v3515_v22, 2  ;;  %v3501_v7 = vadd.f32 %v3500_v12, %v3499_v47  ;;  %v3538_v31 = vadd.f32 %v7323_v27, %v3474_v11  ;;  %v3540_v41 = vadd.f32 %v7323_v27, %v3492_v42 }
 0xe67   :  { %v3523_v28 = vrot.slane %v3522_v25, 4  ;;  %v3433_v29 = vmax.f32 %v3401_v62, 0.0  ;;  %v3530_v17 = vadd.f32 %v3529_v3, %v3464_v33  ;;  %v3510_v21 = vadd.f32 %v3509_v32, %v3508_v60 }
 0xe68   :  { %v3517_v52 = vadd.f32 %v3516_v48, %v3515_v22  ;;  %v3974_v9 = vpop.permute.xlu1 %3973  ;;  %v3554_v39 = vrot.slane %v3539_v61, 7  ;;  %v3541_v62 = vadd.f32 %v7323_v27, %v3501_v7  ;;  %v3556_v3 = vrot.slane %v3540_v41, 6 }
 0xe69   :  { %v3524_v35 = vadd.f32 %v3523_v28, %v3522_v25  ;;  %v3465_v4 = vmul.f32 %v3433_v29, %v7706_v2  ;;  %v3976_v23 = vmul.f32 %v8226_v30, %v3974_v9  ;;  %v3542_v33 = vadd.f32 %v7323_v27, %v3510_v21 }
 0xe6a   :  { %v3518_v16 = vrot.slane %v3517_v52, 1  ;;  %v3555_v37 = vsel %vm692_vm2, %v3554_v39, %v3538_v31  ;;  %v3558_v58 = vrot.slane %v3541_v62, 5 }
 0xe6b   :  { %v3525_v20 = vrot.slane %v3524_v35, 2  ;;  %v3531_v54 = vadd.f32 %v3530_v17, %v3465_v4  ;;  %3978 = vrot.lane.b32.xlu1 %v3976_v23, %s7546_s4  ;;  %v3557_v47 = vsel %vm695_vm3, %v3556_v3, %v3555_v37  ;;  %v3560_v60 = vrot.slane %v3542_v33, 4 }
 0xe6c   :  { %v3519_v8 = vadd.f32 %v3518_v16, %v3517_v52  ;;  %v3559_v17 = vsel %vm698_vm4, %v3558_v58, %v3557_v47  ;;  %v3971_v16 = vmul.f32 %v8226_v30, %v8087_v43 }
 0xe6d   :  { %v3526_v13 = vadd.f32 %v3525_v20, %v3524_v35  ;;  %v3532_v6 = vrot.slane %v3531_v54, 4  ;;  %v3561_v4 = vsel %vm701_vm5, %v3560_v60, %v3559_v17 }
 0xe6e   :  { %v3543_v48 = vadd.f32 %v7323_v27, %v3519_v8 }
 0xe6f   :  { %v3527_v5 = vrot.slane %v3526_v13, 1  ;;  %v3533_v22 = vadd.f32 %v3532_v6, %v3531_v54 }
 0xe70   :  { %v3562_v52 = vrot.slane %v3543_v48, 3 }
 0xe71   :  { %v3528_v24 = vadd.f32 %v3527_v5, %v3526_v13  ;;  %v3534_v25 = vrot.slane %v3533_v22, 2 }
 0xe72   :  { %v3563_v23 = vsel %vm704_vm6, %v3562_v52, %v3561_v4 }
 0xe73   :  { %v3535_v18 = vadd.f32 %v3534_v25, %v3533_v22  ;;  %v3544_v28 = vadd.f32 %v7323_v27, %v3528_v24 }
 0xe75   :  { %v3536_v29 = vrot.slane %v3535_v18, 1  ;;  %v3564_v9 = vrot.slane %v3544_v28, 2 }
 0xe77   :  { %v3537_v44 = vadd.f32 %v3536_v29, %v3535_v18  ;;  %v3565_v32 = vsel %vm707_vm7, %v3564_v9, %v3563_v23 }
 0xe79   :  { %v3545_v35 = vadd.f32 %v7323_v27, %v3537_v44 }
 0xe7b   :  { %v3566_v12 = vrot.slane %v3545_v35, 1 }
 0xe7d   :  { %v3567_v11 = vsel %vm710_vm8, %v3566_v12, %v3565_v32 }
 0xe7e   :  { %3569 = vmax.xlane.f32.xlu0 %v3567_v11 }
 0xedd   :  { %v3979_v20 = vpop.permute.xlu1 %3978 }
 0xede   :  { %v8245_v54 = vadd.f32 %v3979_v20, %v3971_v16 }
 0xee0   :  { %7163 = vtanh.f32 %v8245_v54 }
 0xeed   :  { %v7164_v42 = vpop.eup %7163 }
 0xeee   :  { %3984 = vrot.lane.b32.xlu0 %v7164_v42, %s7545_s3 }
 0xf07   :  { %v3570_v27 = vpop.xlane.xlu0 %3569 }
 0xf08   :  { %v3572_v13 = vrot.slane %v3570_v27, 1  ;;  %v3573_v6 = vrot.slane %v3570_v27, 2  ;;  %v3574_v7 = vrot.slane %v3570_v27, 3  ;;  %v3575_v21 = vrot.slane %v3570_v27, 4 }
 0xf09   :  { %v3576_v8 = vrot.slane %v3570_v27, 5  ;;  %v3577_v5 = vrot.slane %v3570_v27, 6  ;;  %v3587_v22 = vsub.f32 %v3538_v31, %v3570_v27  ;;  %v3578_v39 = vrot.slane %v3570_v27, 7 }
 0xf0a   :  { %v3588_v24 = vsub.f32 %v3539_v61, %v3572_v13  ;;  %v3589_v25 = vsub.f32 %v3540_v41, %v3573_v6  ;;  %v3590_v43 = vsub.f32 %v3541_v62, %v3574_v7  ;;  %v3591_v18 = vsub.f32 %v3542_v33, %v3575_v21 }
 0xf0b   :  { %v3595_v37 = vmul.f32 1.442695, %v3587_v22  ;;  %v3592_v3 = vsub.f32 %v3543_v48, %v3576_v8  ;;  %v3593_v29 = vsub.f32 %v3544_v28, %v3577_v5  ;;  %v3594_v58 = vsub.f32 %v3545_v35, %v3578_v39 }
 0xf0c   :  { %v3597_v47 = vmul.f32 1.442695, %v3588_v24  ;;  %v3599_v60 = vmul.f32 1.442695, %v3589_v25  ;;  %v3601_v44 = vmul.f32 1.442695, %v3590_v43 }
 0xf0d   :  { %7165 = vpow2.f32 %v3595_v37  ;;  %v3603_v52 = vmul.f32 1.442695, %v3591_v18  ;;  %v3605_v9 = vmul.f32 1.442695, %v3592_v3  ;;  %v3607_v17 = vmul.f32 1.442695, %v3593_v29 }
 0xf0e   :  { %7167 = vpow2.f32 %v3597_v47  ;;  %v3609_v31 = vmul.f32 1.442695, %v3594_v58  ;;  %v3661_v18 = vld [vmem:[#allocation5] sm:$0xff] }
 0xf0f   :  { %7169 = vpow2.f32 %v3599_v60 }
 0xf10   :  { %7171 = vpow2.f32 %v3601_v44 }
 0xf11   :  { %7173 = vpow2.f32 %v3603_v52 }
 0xf12   :  { %7175 = vpow2.f32 %v3605_v9 }
 0xf13   :  { %7177 = vpow2.f32 %v3607_v17 }
 0xf14   :  { %7179 = vpow2.f32 %v3609_v31 }
 0xf1a   :  { %v7166_v61 = vpop.eup %7165 }
 0xf1b   :  { %v7168_v41 = vpop.eup %7167 }
 0xf1c   :  { %v7170_v33 = vpop.eup %7169  ;;  %v3619_v62 = vrot.slane %v7168_v41, 7 }
 0xf1d   :  { %v7172_v48 = vpop.eup %7171  ;;  %v3621_v28 = vrot.slane %v7170_v33, 6 }
 0xf1e   :  { %v7174_v4 = vpop.eup %7173  ;;  %v3620_v35 = vsel %vm692_vm2, %v3619_v62, %v7166_v61  ;;  %v3623_v23 = vrot.slane %v7172_v48, 5  ;;  %v3662_v62 = vld [vmem:[#allocation5 + $0x8] sm:$0xff] }
 0xf1f   :  { %v7176_v12 = vpop.eup %7175  ;;  %v3622_v32 = vsel %vm695_vm3, %v3621_v28, %v3620_v35  ;;  %v3625_v11 = vrot.slane %v7174_v4, 4 }
 0xf20   :  { %v7178_v16 = vpop.eup %7177  ;;  %v3624_v20 = vsel %vm698_vm4, %v3623_v23, %v3622_v32  ;;  %v3627_v42 = vrot.slane %v7176_v12, 3 }
 0xf21   :  { %v7180_v27 = vpop.eup %7179  ;;  %v3626_v13 = vsel %vm701_vm5, %v3625_v11, %v3624_v20  ;;  %v3629_v6 = vrot.slane %v7178_v16, 2 }
 0xf22   :  { %v3628_v7 = vsel %vm704_vm6, %v3627_v42, %v3626_v13  ;;  %v3631_v21 = vrot.slane %v7180_v27, 1  ;;  %v3664_v42 = vld [vmem:[#allocation5 + $0x18] sm:$0xff] }
 0xf23   :  { %v3630_v8 = vsel %vm707_vm7, %v3629_v6, %v3628_v7 }
 0xf24   :  { %v3632_v5 = vsel %vm710_vm8, %v3631_v21, %v3630_v8  ;;  %v3674_v21 = vld [vmem:[#allocation5 + $0x68] sm:$0xff] }
 0xf25   :  { %3634 = vadd.xlane.f32.xlu1 %v3632_v5 }
 0xfae   :  { %v3635_v22 = vpop.xlane.xlu1 %3634 }
 0xfaf   :  { %7181 = vrcp.f32 %v3635_v22 }
 0xfbc   :  { %v7182_v39 = vpop.eup %7181 }
 0xfbd   :  { %v3653_v24 = vmul.f32 %v7182_v39, %v7166_v61  ;;  %v3638_v25 = vrot.slane %v7182_v39, 1  ;;  %v3642_v43 = vrot.slane %v7182_v39, 5  ;;  %v3643_v37 = vrot.slane %v7182_v39, 6  ;;  %v7324_v61 = vld [vmem:[#allocation5 + $0x10] sm:$0xff] }
 0xfbe   :  { %v3639_v3 = vrot.slane %v7182_v39, 2  ;;  %v3640_v44 = vrot.slane %v7182_v39, 3  ;;  %v3641_v52 = vrot.slane %v7182_v39, 4  ;;  %v3644_v35 = vrot.slane %v7182_v39, 7 }
 0xfbf   :  { %v3680_v29 = vrot.slane %v3653_v24, %v7680_v46  ;;  %v3654_v47 = vmul.f32 %v7168_v41, %v3638_v25  ;;  %v3658_v60 = vmul.f32 %v7176_v12, %v3642_v43  ;;  %v3659_v28 = vmul.f32 %v7178_v16, %v3643_v37 }
 0xfc0   :  { %v3655_v58 = vmul.f32 %v7170_v33, %v3639_v3  ;;  %v3656_v20 = vmul.f32 %v7172_v48, %v3640_v44  ;;  %v3657_v12 = vmul.f32 %v7174_v4, %v3641_v52  ;;  %v3660_v16 = vmul.f32 %v7180_v27, %v3644_v35  ;;  %v3676_v3 = vld [vmem:[#allocation5 + $0x78] sm:$0xff]  ;;  %v3666_v44 = vld [vmem:[#allocation5 + $0x28] sm:$0xff] }
 0xfc1   :  { %v3709_v9 = vmul.f32 %v3680_v29, %v3661_v18  ;;  %v3684_v17 = vrot.slane %v3654_v47, %v7680_v46  ;;  %v3942_v31 = vrot.slane %v3654_v47, 7  ;;  %v3700_v11 = vrot.slane %v3658_v60, %v7680_v46 }
 0xfc2   :  { %v3944_v41 = vrot.slane %v3655_v58, 6  ;;  %v3710_v33 = vmul.f32 %v3680_v29, %v3662_v62  ;;  %v3704_v6 = vrot.slane %v3659_v28, %v7680_v46  ;;  %v3946_v7 = vrot.slane %v3656_v20, 5  ;;  %v3668_v62 = vld [vmem:[#allocation5 + $0x38] sm:$0xff] }
 0xfc3   :  { %3725 = vadd.xlane.f32.xlu1 %v3709_v9  ;;  %v3711_v23 = vmul.f32 %v7324_v61, %v3684_v17  ;;  %v3943_v32 = vsel %vm692_vm2, %v3942_v31, %v3653_v24  ;;  %v3720_v13 = vmul.f32 %v3700_v11, %v8115_v56  ;;  %v3948_v8 = vrot.slane %v3657_v12, 4  ;;  %v3665_v24 = vld [vmem:[#allocation5 + $0x20] sm:$0xff] }
 0xfc4   :  { %v3945_v5 = vsel %vm695_vm3, %v3944_v41, %v3943_v32  ;;  %v3950_v22 = vrot.slane %v3658_v60, 3  ;;  %v3712_v39 = vmul.f32 %v3684_v17, %v3664_v42  ;;  %v3688_v48 = vrot.slane %v3655_v58, %v7680_v46  ;;  %v3667_v17 = vld [vmem:[#allocation5 + $0x30] sm:$0xff]  ;;  %v3669_v61 = vld [vmem:[#allocation5 + $0x40] sm:$0xff]  ;;  %v3670_v32 = vld [vmem:[#allocation5 + $0x48] sm:$0xff] }
 0xfc5   :  { %3729 = vadd.xlane.f32.xlu0 %v3711_v23  ;;  %v3947_v4 = vsel %vm698_vm4, %v3946_v7, %v3945_v5  ;;  %v3952_v43 = vrot.slane %v3659_v28, 2  ;;  %v3722_v56 = vmul.f32 %v3704_v6, %v3674_v21  ;;  %v3708_v27 = vrot.slane %v3660_v16, %v7680_v46  ;;  %v3985_v21 = vpop.permute.xlu0 %3984 }
 0xfc6   :  { %v3949_v25 = vsel %vm701_vm5, %v3948_v8, %v3947_v4  ;;  %v3954_v37 = vrot.slane %v3660_v16, 1  ;;  %v3713_v47 = vmul.f32 %v3688_v48, %v3665_v24  ;;  %v3714_v52 = vmul.f32 %v3688_v48, %v3666_v44  ;;  %v3675_v16 = vld [vmem:[#allocation5 + $0x70] sm:$0xff] }
 0xfc7   :  { %3727 = vadd.xlane.f32.xlu1 %v3710_v33  ;;  %v3951_v18 = vsel %vm704_vm6, %v3950_v22, %v3949_v25  ;;  %v3724_v58 = vmul.f32 %v3708_v27, %v3676_v3  ;;  %v3692_v9 = vrot.slane %v3656_v20, %v7680_v46  ;;  %v3696_v35 = vrot.slane %v3657_v12, %v7680_v46  ;;  %v3671_v33 = vld [vmem:[#allocation5 + $0x50] sm:$0xff] }
 0xfc8   :  { %v3953_v29 = vsel %vm707_vm7, %v3952_v43, %v3951_v18  ;;  %v3719_v42 = vmul.f32 %v3700_v11, %v3671_v33  ;;  %v3723_v7 = vmul.f32 %v3708_v27, %v3675_v16  ;;  %v3987_v8 = vmul.f32 %v8226_v30, %v3985_v21 }
 0xfc9   :  { %3747 = vadd.xlane.f32.xlu0 %v3720_v13  ;;  %v8270_v60 = vsel %vm710_vm8, %v3954_v37, %v3953_v29  ;;  %v3715_v31 = vmul.f32 %v3692_v9, %v3667_v17  ;;  %v3716_v28 = vmul.f32 %v3692_v9, %v3668_v62  ;;  %v3717_v23 = vmul.f32 %v3696_v35, %v3669_v61  ;;  %v3673_v13 = vld [vmem:[#allocation5 + $0x60] sm:$0xff] }
 0xfca   :  { %8907 = vst [vmem:[#allocation25_spill] sm:$0xff] %v8270_v60  ;;  %v3718_v41 = vmul.f32 %v3696_v35, %v3670_v32  ;;  %v3721_v20 = vmul.f32 %v3704_v6, %v3673_v13 }
 0xfcb   :  { %3731 = vadd.xlane.f32.xlu1 %v3712_v39 }
 0xfcd   :  { %3751 = vadd.xlane.f32.xlu0 %v3722_v56 }
 0xfcf   :  { %3733 = vadd.xlane.f32.xlu1 %v3713_v47 }
 0xfd1   :  { %3755 = vadd.xlane.f32.xlu0 %v3724_v58 }
 0xfd3   :  { %3735 = vadd.xlane.f32.xlu1 %v3714_v52 }
 0xfd7   :  { %3737 = vadd.xlane.f32.xlu1 %v3715_v31 }
 0xfdb   :  { %3739 = vadd.xlane.f32.xlu1 %v3716_v28 }
 0xfdf   :  { %3741 = vadd.xlane.f32.xlu1 %v3717_v23 }
 0xfe3   :  { %3743 = vadd.xlane.f32.xlu1 %v3718_v41 }
 0xfe7   :  { %3745 = vadd.xlane.f32.xlu1 %v3719_v42 }
 0xfeb   :  { %3749 = vadd.xlane.f32.xlu1 %v3721_v20 }
 0xfef   :  { %3753 = vadd.xlane.f32.xlu1 %v3723_v7 }
0x1000   :  { %3989 = vrot.lane.b32.xlu1 %v3987_v8, %s7546_s4 }
0x104c   :  { %v3726_v12 = vpop.xlane.xlu1 %3725 }
0x104d   :  { %v3776_v58 = vrot.slane %v3726_v12, %v7668_v36 }
0x104e   :  { %v3730_v24 = vpop.xlane.xlu0 %3729 }
0x104f   :  { %v3785_v30 = vrot.slane %v3730_v24, %v7668_v36 }
0x1050   :  { %v3728_v5 = vpop.xlane.xlu1 %3727 }
0x1051   :  { %v3780_v3 = vrot.slane %v3728_v5, %v7670_v38 }
0x1052   :  { %v3748_v43 = vpop.xlane.xlu0 %3747 }
0x1053   :  { %v3781_v35 = vsel %vm928_vm9, %v3780_v3, %v3776_v58  ;;  %v3825_v61 = vrot.slane %v3748_v43, %v7670_v38  ;;  %v7326_v43 = vld [vmem:[%s8890_s8 + $0x8] sm:$0xff]  ;;  %v7333_v3 = vld [vmem:[#allocation8 + $0x38] sm:$0xff]  ;;  %v7337_v58 = vld [vmem:[#allocation8 + $0x8] sm:$0xff] }
0x1054   :  { %v3732_v22 = vpop.xlane.xlu1 %3731 }
0x1055   :  { %v3789_v56 = vrot.slane %v3732_v22, %v7670_v38 }
0x1056   :  { %v3752_v27 = vpop.xlane.xlu0 %3751 }
0x1057   :  { %v3790_v52 = vsel %vm928_vm9, %v3789_v56, %v3785_v30  ;;  %v3834_v33 = vrot.slane %v3752_v27, %v7670_v38  ;;  %v7328_v56 = vld [vmem:[%s8890_s8] sm:$0xff] }
0x1058   :  { %v3734_v39 = vpop.xlane.xlu1 %3733  ;;  %v3845_v41 = vsel %vm692_vm2, %v3790_v52, %v3781_v35  ;;  %v7329_v27 = vld [vmem:[#allocation8 + $0x28] sm:$0xff]  ;;  %v7338_v52 = vld [vmem:[#allocation8] sm:$0xff] }
0x1059   :  { %v3794_v47 = vrot.slane %v3734_v39, %v7668_v36  ;;  %v7332_v30 = vld [vmem:[#allocation8 + $0x48] sm:$0xff] }
0x105a   :  { %v3756_v42 = vpop.xlane.xlu0 %3755  ;;  %v7339_v35 = vld [vmem:[%s8887_s5] ss:$0 sm:$0xff] }
0x105b   :  { %v3843_v12 = vrot.slane %v3756_v42, %v7670_v38 }
0x105c   :  { %v3736_v48 = vpop.xlane.xlu1 %3735 }
0x105d   :  { %v3798_v18 = vrot.slane %v3736_v48, %v7670_v38 }
0x105f   :  { %v3799_v31 = vsel %vm928_vm9, %v3798_v18, %v3794_v47  ;;  %v7330_v18 = vld [vmem:[#allocation8 + $0x10] sm:$0xff]  ;;  %v7335_v47 = vld [vmem:[#allocation8 + $0x20] sm:$0xff] }
0x1060   :  { %v3738_v4 = vpop.xlane.xlu1 %3737  ;;  %v3846_v20 = vsel %vm695_vm3, %v3799_v31, %v3845_v41 }
0x1061   :  { %v3803_v9 = vrot.slane %v3738_v4, %v7668_v36 }
0x1064   :  { %v3740_v11 = vpop.xlane.xlu1 %3739 }
0x1065   :  { %v3807_v29 = vrot.slane %v3740_v11, %v7670_v38 }
0x1067   :  { %v3808_v23 = vsel %vm928_vm9, %v3807_v29, %v3803_v9  ;;  %v7334_v29 = vld [vmem:[#allocation8 + $0x30] sm:$0xff]  ;;  %v3112_v9 = vpop.f32.mrf.mxu1 }
0x1068   :  { %v3742_v25 = vpop.xlane.xlu1 %3741  ;;  %v3847_v7 = vsel %vm698_vm4, %v3808_v23, %v3846_v20 }
0x1069   :  { %v3812_v62 = vrot.slane %v3742_v25, %v7668_v36  ;;  %v7325_v25 = vld [vmem:[#allocation8 + $0x58] sm:$0xff] }
0x106c   :  { %v3744_v6 = vpop.xlane.xlu1 %3743 }
0x106d   :  { %v3816_v44 = vrot.slane %v3744_v6, %v7670_v38  ;;  %v7327_v6 = vld [vmem:[#allocation8 + $0x40] sm:$0xff] }
0x106f   :  { %v3817_v13 = vsel %vm928_vm9, %v3816_v44, %v3812_v62  ;;  %v7336_v44 = vld [vmem:[#allocation8 + $0x18] sm:$0xff] }
0x1070   :  { %v3746_v37 = vpop.xlane.xlu1 %3745  ;;  %v3848_v5 = vsel %vm701_vm5, %v3817_v13, %v3847_v7 }
0x1071   :  { %v3821_v17 = vrot.slane %v3746_v37, %v7668_v36  ;;  %v7331_v37 = vld [vmem:[#allocation8 + $0x50] sm:$0xff] }
0x1073   :  { %v3826_v16 = vsel %vm928_vm9, %v3825_v61, %v3821_v17 }
0x1074   :  { %v3750_v28 = vpop.xlane.xlu1 %3749  ;;  %v3849_v39 = vsel %vm704_vm6, %v3826_v16, %v3848_v5 }
0x1075   :  { %v3830_v32 = vrot.slane %v3750_v28, %v7668_v36 }
0x1077   :  { %v3835_v21 = vsel %vm928_vm9, %v3834_v33, %v3830_v32 }
0x1078   :  { %v3754_v8 = vpop.xlane.xlu1 %3753  ;;  %v3850_v4 = vsel %vm707_vm7, %v3835_v21, %v3849_v39  ;;  %v4911_v21 = vld [vmem:[#allocation2 + $0x28] sm:$0xff] }
0x1079   :  { %v3839_v22 = vrot.slane %v3754_v8, %v7668_v36 }
0x107b   :  { %v3844_v48 = vsel %vm928_vm9, %v3843_v12, %v3839_v22 }
0x107c   :  { %v3990_v24 = vpop.permute.xlu1 %3989  ;;  %v3851_v11 = vsel %vm710_vm8, %v3844_v48, %v3850_v4 }
0x107d   :  { %6998 = vmatmul.mubr.msk.f32.vlgmr.msra.gmra.mxu1 %vm1000_vm10, %v3851_v11  ;;  %6861 = vmatmul.mubr.msk.f32.vlgmr.msra.gmra.mxu0 %vm146_vm1, %v3990_v24 }
0x107e   :  { %7001 = vmatpush3.msra.mxu1 %v7325_v25  ;;  %7008 = vmatprep.mubr.msk.f32.mxu1 %vm7548_vm0, %v8896_v14 }
0x107f   :  { %7002 = vmatprep.subr.mxu1 %v8896_v14  ;;  %7012 = vmatpush3.msra.mxu0 %v7326_v43 }
0x1080   :  { %7003 = vmatpush3.msra.mxu1 %v7327_v6  ;;  %7013 = vmatprep.subr.mxu0 %v8896_v14 }
0x1081   :  { %7004 = vmatprep.subr.mxu1 %v8896_v14  ;;  %7014 = vmatpush3.msra.mxu0 %v7328_v56 }
0x1082   :  { %7005 = vmatpush3.msra.mxu1 %v7329_v27  ;;  %7015 = vmatprep.mubr.msk.f32.mxu0 %vm7548_vm0, %v8896_v14  ;;  %v4140_v27 = vld [vmem:[#allocation7 + $0x28] sm:$0xff] }
0x1083   :  { %7006 = vmatprep.subr.mxu1 %v8896_v14  ;;  %7018 = vmatprep.subr.mxu0 %v8896_v14 }
0x1084   :  { %7007 = vmatpush3.msra.mxu1 %v7330_v18  ;;  %v4139_v18 = vld [vmem:[#allocation7 + $0x20] sm:$0xff] }
0x1085   :  { %7009 = vmatmul.mubr.msk.f32.vlgmr.msra.gmra.mxu1 %vm146_vm1, %v3990_v24  ;;  %4966 = vmatprep.subr.mxu1 %v7331_v37  ;;  %v4141_v37 = vld [vmem:[#allocation7 + $0x30] sm:$0xff] }
0x1086   :  { %4967 = vmatpush1.msra.mxu1 %v7332_v30  ;;  %5006 = vmatprep.mubr.f32.mxu1 %v8896_v14 }
0x1087   :  { %4968 = vmatprep.subr.mxu1 %v7333_v3 }
0x1088   :  { %4969 = vmatpush1.msra.mxu1 %v7334_v29 }
0x1089   :  { %4970 = vmatprep.subr.mxu1 %v7335_v47 }
0x108a   :  { %4971 = vmatpush1.msra.mxu1 %v7336_v44 }
0x108b   :  { %4972 = vmatprep.subr.mxu1 %v7337_v58 }
0x108c   :  { %4973 = vmatpush1.msra.mxu1 %v7338_v52 }
0x108d   :  { %7029 = vmatprep.subr.mxu1 %v8896_v14 }
0x113d   :  { %v3920_v17 = vpop.f32.mrf.mxu1  ;;  %v4059_v7 = vpop.f32.mrf.mxu0 }
0x113e   :  { %v8327_v31 = vadd.f32 %v3920_v17, %v3112_v9  ;;  %v4912_v8 = vadd.f32 %v4911_v21, %v4059_v7 }
0x113f   :  { %v6999_v62 = vpop.f32.mrf.mxu1 }
0x1140   :  { %8908 = vst [vmem:[#allocation26_spill] sm:$0xff] %v8327_v31  ;;  %7183 = vtanh.f32 %v4912_v8  ;;  %v6864_v62 = vmul.f32 -1.442695, %v4912_v8 }
0x1142   :  { %7185 = vpow2.f32 %v6864_v62 }
0x1145   :  { %v4130_v28 = vpop.f32.mrf.mxu1 }
0x1146   :  { %v4134_v61 = vadd.f32 %v7339_v35, %v4130_v28  ;;  %v4143_v28 = vld [vmem:[#allocation7 + $0x40] sm:$0xff]  ;;  %v7340_v35 = vld [vmem:[#allocation7 + $0x38] sm:$0xff] }
0x1147   :  { %v7010_v23 = vpop.f32.mrf.mxu1 }
0x1148   :  { %v4189_v32 = vrot.slane %v4134_v61, %v7675_v40  ;;  %v4208_v41 = vrot.slane %v4134_v61, %v7678_v45  ;;  %v4170_v33 = vrot.slane %v4134_v61, %v7680_v46  ;;  %v4227_v42 = vrot.slane %v4134_v61, %v7684_v49  ;;  %v4144_v23 = vld [vmem:[#allocation7 + $0x48] sm:$0xff] }
0x1149   :  { %v4246_v13 = vrot.slane %v4134_v61, %v7687_v51  ;;  %v4265_v20 = vrot.slane %v4134_v61, %v7690_v53  ;;  %v4284_v16 = vrot.slane %v4134_v61, %v7693_v55  ;;  %v4303_v12 = vrot.slane %v4134_v61, %v7696_v57 }
0x114a   :  { %4195 = vbcast.lane.b32.xlu1 %v4189_v32, 264  ;;  %4191 = vbcast.lane.b32.xlu0 %v4189_v32, 256 }
0x114d   :  { %v7184_v5 = vpop.eup %7183 }
0x114e   :  { %4210 = vbcast.lane.b32.xlu1 %v4208_v41, 256  ;;  %4214 = vbcast.lane.b32.xlu0 %v4208_v41, 264 }
0x1152   :  { %4176 = vbcast.lane.b32.xlu0 %v4170_v33, 264  ;;  %4172 = vbcast.lane.b32.xlu1 %v4170_v33, 256 }
0x1156   :  { %4229 = vbcast.lane.b32.xlu0 %v4227_v42, 256  ;;  %4199 = vbcast.lane.b32.xlu1 %v4189_v32, 272 }
0x115a   :  { %4218 = vbcast.lane.b32.xlu0 %v4208_v41, 272  ;;  %4233 = vbcast.lane.b32.xlu1 %v4227_v42, 264 }
0x115e   :  { %4252 = vbcast.lane.b32.xlu0 %v4246_v13, 264  ;;  %4248 = vbcast.lane.b32.xlu1 %v4246_v13, 256 }
0x1162   :  { %4203 = vbcast.lane.b32.xlu0 %v4189_v32, 280  ;;  %4180 = vbcast.lane.b32.xlu1 %v4170_v33, 272  ;;  %v4135_v32 = vld [vmem:[#allocation7] sm:$0xff] }
0x1166   :  { %4267 = vbcast.lane.b32.xlu0 %v4265_v20, 256  ;;  %4237 = vbcast.lane.b32.xlu1 %v4227_v42, 272 }
0x116a   :  { %4222 = vbcast.lane.b32.xlu0 %v4208_v41, 280  ;;  %4271 = vbcast.lane.b32.xlu1 %v4265_v20, 264 }
0x116e   :  { %4286 = vbcast.lane.b32.xlu0 %v4284_v16, 256  ;;  %4256 = vbcast.lane.b32.xlu1 %v4246_v13, 272 }
0x1172   :  { %4184 = vbcast.lane.b32.xlu0 %v4170_v33, 280  ;;  %4290 = vbcast.lane.b32.xlu1 %v4284_v16, 264 }
0x1176   :  { %4275 = vbcast.lane.b32.xlu0 %v4265_v20, 272  ;;  %4241 = vbcast.lane.b32.xlu1 %v4227_v42, 280 }
0x117a   :  { %4309 = vbcast.lane.b32.xlu0 %v4303_v12, 264  ;;  %4305 = vbcast.lane.b32.xlu1 %v4303_v12, 256 }
0x117e   :  { %4294 = vbcast.lane.b32.xlu0 %v4284_v16, 272  ;;  %4260 = vbcast.lane.b32.xlu1 %v4246_v13, 280 }
0x1182   :  { %4313 = vbcast.lane.b32.xlu0 %v4303_v12, 272  ;;  %4279 = vbcast.lane.b32.xlu1 %v4265_v20, 280 }
0x1186   :  { %4317 = vbcast.lane.b32.xlu0 %v4303_v12, 280  ;;  %4298 = vbcast.lane.b32.xlu1 %v4284_v16, 280  ;;  %v7341_v12 = vld [vmem:[#allocation7 + $0x8] sm:$0xff] }
0x118a   :  { %4922 = vrot.lane.b32.xlu0 %v7184_v5, %s7545_s3 }
0x11bc   :  { %v4196_v22 = vpop.permute.xlu1 %4195  ;;  %v4192_v39 = vpop.permute.xlu0 %4191 }
0x11bd   :  { %v4324_v30 = vadd.f32 %v4196_v22, %v4140_v27  ;;  %v4323_v3 = vadd.f32 %v4192_v39, %v4139_v18  ;;  %v4148_v39 = vld [vmem:[#allocation7 + $0x68] sm:$0xff] }
0x11bf   :  { %v4356_v58 = vmax.f32 %v4324_v30, 0.0  ;;  %v4355_v52 = vmax.f32 %v4323_v3, 0.0 }
0x11c0   :  { %v4211_v48 = vpop.permute.xlu1 %4210  ;;  %v4215_v4 = vpop.permute.xlu0 %4214 }
0x11c1   :  { %v4388_v33 = vmul.f32 %v4356_v58, %v7700_v63  ;;  %v4387_v42 = vmul.f32 %v4355_v52, %v7702_v0  ;;  %v4327_v13 = vadd.f32 %v4211_v48, %v4143_v28  ;;  %v4328_v21 = vadd.f32 %v4215_v4, %v4144_v23  ;;  %v4151_v23 = vld [vmem:[#allocation7 + $0x80] sm:$0xff] }
0x11c3   :  { %v4424_v27 = vadd.f32 %v4388_v33, %v4387_v42  ;;  %v4359_v18 = vmax.f32 %v4327_v13, 0.0  ;;  %v4360_v48 = vmax.f32 %v4328_v21, 0.0 }
0x11c4   :  { %v4177_v24 = vpop.permute.xlu0 %4176  ;;  %v4173_v11 = vpop.permute.xlu1 %4172 }
0x11c5   :  { %v4320_v5 = vadd.f32 %v7341_v12, %v4177_v24  ;;  %v4319_v8 = vadd.f32 %v4173_v11, %v4135_v32  ;;  %v4149_v24 = vld [vmem:[#allocation7 + $0x70] sm:$0xff]  ;;  %v7343_v11 = vld [vmem:[#allocation7 + $0x60] sm:$0xff] }
0x11c7   :  { %v4351_v58 = vmax.f32 %v4319_v8, 0.0  ;;  %v7345_v8 = vld [vmem:[#allocation7 + $0x88] sm:$0xff] }
0x11c8   :  { %v4230_v25 = vpop.permute.xlu0 %4229  ;;  %v4200_v43 = vpop.permute.xlu1 %4199 }
0x11c9   :  { %v4325_v44 = vadd.f32 %v4200_v43, %v4141_v37  ;;  %v4137_v43 = vld [vmem:[#allocation7 + $0x10] sm:$0xff] }
0x11cb   :  { %v4357_v41 = vmax.f32 %v4325_v44, 0.0  ;;  %v4352_v44 = vmax.f32 %v4320_v5, 0.0 }
0x11cc   :  { %v4219_v6 = vpop.permute.xlu0 %4218  ;;  %v4234_v56 = vpop.permute.xlu1 %4233 }
0x11cd   :  { %v4389_v22 = vmul.f32 %v4357_v41, %v7704_v1  ;;  %v4332_v4 = vadd.f32 %v4234_v56, %v4148_v39  ;;  %v7344_v41 = vld [vmem:[#allocation7 + $0x58] sm:$0xff]  ;;  %v4384_v21 = vmul.f32 %v4352_v44, %v7700_v63 }
0x11cf   :  { %v4425_v52 = vadd.f32 %v4424_v27, %v4389_v22  ;;  %v4364_v12 = vmax.f32 %v4332_v4, 0.0  ;;  %v7346_v4 = vld [vmem:[#allocation7 + $0x18] sm:$0xff] }
0x11d0   :  { %v4253_v29 = vpop.permute.xlu0 %4252  ;;  %v4249_v47 = vpop.permute.xlu1 %4248 }
0x11d1   :  { %v4336_v22 = vadd.f32 %v7345_v8, %v4253_v29  ;;  %v4335_v39 = vadd.f32 %v4249_v47, %v4151_v23  ;;  %v4150_v29 = vld [vmem:[#allocation7 + $0x78] sm:$0xff] }
0x11d4   :  { %v4204_v9 = vpop.permute.xlu0 %4203  ;;  %v4181_v17 = vpop.permute.xlu1 %4180 }
0x11d5   :  { %v4326_v61 = vadd.f32 %v7340_v35, %v4204_v9  ;;  %v7342_v9 = vld [vmem:[#allocation7 + $0x50] sm:$0xff]  ;;  %v4321_v28 = vadd.f32 %v4181_v17, %v4137_v43  ;;  %v4331_v35 = vadd.f32 %v7343_v11, %v4230_v25  ;;  %v7186_v11 = vpop.eup %7185 }
0x11d6   :  { %v4329_v62 = vadd.f32 %v7342_v9, %v4219_v6  ;;  %v4383_v6 = vmul.f32 %v4351_v58, %v7702_v0 }
0x11d7   :  { %v4358_v20 = vmax.f32 %v4326_v61, 0.0  ;;  %v4391_v61 = vmul.f32 %v4359_v18, %v7702_v0  ;;  %v4353_v5 = vmax.f32 %v4321_v28, 0.0  ;;  %v4363_v25 = vmax.f32 %v4331_v35, 0.0  ;;  %v4156_v18 = vld [vmem:[#allocation7 + $0xa8] sm:$0xff] }
0x11d8   :  { %v8343_v16 = vpop.permute.xlu0 %4267  ;;  %v4238_v7 = vpop.permute.xlu1 %4237  ;;  %v4361_v17 = vmax.f32 %v4329_v62, 0.0  ;;  %v4415_v9 = vadd.f32 %v4384_v21, %v4383_v6  ;;  %v4153_v62 = vld [vmem:[#allocation7 + $0x90] sm:$0xff]  ;;  %v4367_v35 = vmax.f32 %v4335_v39, 0.0 }
0x11d9   :  { %v4390_v37 = vmul.f32 %v4358_v20, %v7706_v2  ;;  %v4392_v20 = vmul.f32 %v4360_v48, %v7700_v63  ;;  %v4333_v56 = vadd.f32 %v4238_v7, %v4149_v24  ;;  %v4396_v7 = vmul.f32 %v4364_v12, %v7700_v63 }
0x11da   :  { %v4393_v44 = vmul.f32 %v4361_v17, %v7704_v1  ;;  %v4385_v58 = vmul.f32 %v4353_v5, %v7704_v1  ;;  %v4395_v47 = vmul.f32 %v4363_v25, %v7702_v0  ;;  %v4368_v24 = vmax.f32 %v4336_v22, 0.0 }
0x11db   :  { %v4426_v32 = vadd.f32 %v4425_v52, %v4390_v37  ;;  %v4433_v52 = vadd.f32 %v4392_v20, %v4391_v61  ;;  %v4365_v48 = vmax.f32 %v4333_v56, 0.0  ;;  %v7347_v61 = vld [vmem:[#allocation7 + $0xa0] sm:$0xff]  ;;  %v4916_v17 = vadd.f32 1.0, %v7186_v11 }
0x11dc   :  { %v4223_v30 = vpop.permute.xlu0 %4222  ;;  %v4272_v3 = vpop.permute.xlu1 %4271  ;;  %v4416_v25 = vadd.f32 %v4415_v9, %v4385_v58 }
0x11dd   :  { %v4330_v33 = vadd.f32 %v7344_v41, %v4223_v30  ;;  %v4427_v43 = vrot.slane %v4426_v32, 4  ;;  %v4340_v23 = vadd.f32 %v4272_v3, %v4156_v18  ;;  %v4397_v12 = vmul.f32 %v4365_v48, %v7704_v1 }
0x11de   :  { %v4400_v3 = vmul.f32 %v4368_v24, %v7700_v63  ;;  %7187 = vrcp.f32 %v4916_v17 }
0x11df   :  { %v4362_v27 = vmax.f32 %v4330_v33, 0.0  ;;  %v4428_v41 = vadd.f32 %v4427_v43, %v4426_v32  ;;  %v4339_v33 = vadd.f32 %v7347_v61, %v8343_v16  ;;  %v4399_v32 = vmul.f32 %v4367_v35, %v7702_v0  ;;  %v4163_v61 = vld [vmem:[#allocation7 + $0xe0] sm:$0xff] }
0x11e0   :  { %v8348_v42 = vpop.permute.xlu0 %4286  ;;  %v4257_v13 = vpop.permute.xlu1 %4256  ;;  %v4372_v16 = vmax.f32 %v4340_v23, 0.0  ;;  %v7350_v35 = vld [vmem:[#allocation7 + $0xc0] sm:$0xff] }
0x11e1   :  { %v4394_v20 = vmul.f32 %v4362_v27, %v7706_v2  ;;  %v4337_v5 = vadd.f32 %v4257_v13, %v4153_v62  ;;  %v4429_v43 = vrot.slane %v4428_v41, 2  ;;  %v4371_v27 = vmax.f32 %v4339_v33, 0.0 }
0x11e2   :  { %v4404_v24 = vmul.f32 %v4372_v16, %v7700_v63  ;;  %v4343_v23 = vadd.f32 %v7350_v35, %v8348_v42 }
0x11e3   :  { %v4369_v62 = vmax.f32 %v4337_v5, 0.0  ;;  %v4403_v17 = vmul.f32 %v4371_v27, %v7702_v0 }
0x11e4   :  { %v4185_v37 = vpop.permute.xlu0 %4184  ;;  %v4291_v30 = vpop.permute.xlu1 %4290 }
0x11e5   :  { %v4322_v28 = vadd.f32 %v7346_v4, %v4185_v37  ;;  %v4434_v37 = vadd.f32 %v4433_v52, %v4393_v44  ;;  %v4442_v4 = vadd.f32 %v4396_v7, %v4395_v47  ;;  %v4160_v52 = vld [vmem:[#allocation7 + $0xc8] sm:$0xff]  ;;  %v7348_v44 = vld [vmem:[#allocation7 + $0xb0] sm:$0xff] }
0x11e7   :  { %v4354_v21 = vmax.f32 %v4322_v28, 0.0  ;;  %v4435_v18 = vadd.f32 %v4434_v37, %v4394_v20  ;;  %v4443_v13 = vadd.f32 %v4442_v4, %v4397_v12  ;;  %v8366_v12 = vadd.f32 %v4429_v43, %v4428_v41 }
0x11e8   :  { %v4276_v6 = vpop.permute.xlu0 %4275  ;;  %v4242_v56 = vpop.permute.xlu1 %4241  ;;  %v4401_v4 = vmul.f32 %v4369_v62, %v7704_v1 }
0x11e9   :  { %v4334_v8 = vadd.f32 %v4242_v56, %v4150_v29  ;;  %v4386_v22 = vmul.f32 %v4354_v21, %v7706_v2  ;;  %v4341_v9 = vadd.f32 %v7348_v44, %v4276_v6  ;;  %v7349_v29 = vld [vmem:[#allocation7 + $0xe8] sm:$0xff]  ;;  %v4154_v21 = vld [vmem:[#allocation7 + $0x98] sm:$0xff]  ;;  %v4451_v56 = vadd.f32 %v4400_v3, %v4399_v32 }
0x11ea   :  { %v4436_v5 = vrot.slane %v4435_v18, 4  ;;  %v4375_v3 = vmax.f32 %v4343_v23, 0.0 }
0x11eb   :  { %v4366_v39 = vmax.f32 %v4334_v8, 0.0  ;;  %v4417_v28 = vadd.f32 %v4416_v25, %v4386_v22  ;;  %v4344_v8 = vadd.f32 %v4291_v30, %v4160_v52  ;;  %v4373_v25 = vmax.f32 %v4341_v9, 0.0 }
0x11ec   :  { %v4310_v11 = vpop.permute.xlu0 %4309  ;;  %v4306_v48 = vpop.permute.xlu1 %4305  ;;  %v4431_v30 = vrot.slane %v8366_v12, 1  ;;  %v4437_v43 = vadd.f32 %v4436_v5, %v4435_v18  ;;  %v4452_v62 = vadd.f32 %v4451_v56, %v4401_v4  ;;  %v4162_v5 = vld [vmem:[#allocation7 + $0xd8] sm:$0xff]  ;;  %v4407_v56 = vmul.f32 %v4375_v3, %v7702_v0 }
0x11ed   :  { %v4398_v7 = vmul.f32 %v4366_v39, %v7706_v2  ;;  %v4418_v58 = vrot.slane %v4417_v28, 4  ;;  %v4348_v47 = vadd.f32 %v7349_v29, %v4310_v11  ;;  %v4347_v20 = vadd.f32 %v4306_v48, %v4163_v61  ;;  %v7351_v11 = vld [vmem:[#allocation7 + $0xd0] sm:$0xff]  ;;  %v4158_v61 = vld [vmem:[#allocation7 + $0xb8] sm:$0xff] }
0x11ee   :  { %v4460_v48 = vadd.f32 %v4404_v24, %v4403_v17  ;;  %v4376_v52 = vmax.f32 %v4344_v8, 0.0  ;;  %v4405_v9 = vmul.f32 %v4373_v25, %v7704_v1  ;;  %v4438_v8 = vrot.slane %v4437_v43, 2 }
0x11ef   :  { %v4444_v33 = vadd.f32 %v4443_v13, %v4398_v7  ;;  %v4419_v16 = vadd.f32 %v4418_v58, %v4417_v28  ;;  %v4380_v39 = vmax.f32 %v4348_v47, 0.0  ;;  %v4379_v32 = vmax.f32 %v4347_v20, 0.0  ;;  %v7352_v28 = vld [vmem:[#allocation7 + $0xf0] sm:$0xff] }
0x11f0   :  { %v4295_v6 = vpop.permute.xlu0 %4294  ;;  %v4261_v37 = vpop.permute.xlu1 %4260  ;;  %v4461_v25 = vadd.f32 %v4460_v48, %v4405_v9 }
0x11f1   :  { %v4445_v22 = vrot.slane %v4444_v33, 4  ;;  %v4345_v42 = vadd.f32 %v7351_v11, %v4295_v6  ;;  %v4338_v13 = vadd.f32 %v4261_v37, %v4154_v21  ;;  %v4420_v47 = vrot.slane %v4419_v16, 2  ;;  %v7353_v11 = vld [vmem:[#allocation7 + $0xf8] sm:$0xff] }
0x11f2   :  { %v4412_v35 = vmul.f32 %v4380_v39, %v7700_v63  ;;  %v4411_v20 = vmul.f32 %v4379_v32, %v7702_v0  ;;  %v4408_v6 = vmul.f32 %v4376_v52, %v7700_v63 }
0x11f3   :  { %v4446_v41 = vadd.f32 %v4445_v22, %v4444_v33  ;;  %v4370_v44 = vmax.f32 %v4338_v13, 0.0  ;;  %v4377_v24 = vmax.f32 %v4345_v42, 0.0  ;;  %v4421_v13 = vadd.f32 %v4420_v47, %v4419_v16 }
0x11f4   :  { %v4314_v27 = vpop.permute.xlu0 %4313  ;;  %v4280_v7 = vpop.permute.xlu1 %4279 }
0x11f5   :  { %v4349_v58 = vadd.f32 %v7352_v28, %v4314_v27  ;;  %v4342_v29 = vadd.f32 %v4280_v7, %v4158_v61  ;;  %v4402_v23 = vmul.f32 %v4370_v44, %v7706_v2  ;;  %v4447_v33 = vrot.slane %v4446_v41, 2  ;;  %v8380_v27 = vpop.eup %7187 }
0x11f6   :  { %v4409_v61 = vmul.f32 %v4377_v24, %v7704_v1  ;;  %v4478_v7 = vadd.f32 %v4412_v35, %v4411_v20  ;;  %v4439_v28 = vadd.f32 %v4438_v8, %v4437_v43 }
0x11f7   :  { %v4381_v18 = vmax.f32 %v4349_v58, 0.0  ;;  %v4374_v21 = vmax.f32 %v4342_v29, 0.0  ;;  %v4453_v37 = vadd.f32 %v4452_v62, %v4402_v23  ;;  %v4448_v3 = vadd.f32 %v4447_v33, %v4446_v41 }
0x11f8   :  { %v4318_v17 = vpop.permute.xlu0 %4317  ;;  %v4299_v4 = vpop.permute.xlu1 %4298  ;;  %v4469_v58 = vadd.f32 %v4408_v6, %v4407_v56  ;;  %v4440_v43 = vrot.slane %v4439_v28, 1  ;;  %v4432_v56 = vadd.f32 %v4431_v30, %v8366_v12 }
0x11f9   :  { %v4413_v22 = vmul.f32 %v4381_v18, %v7704_v1  ;;  %v4406_v39 = vmul.f32 %v4374_v21, %v7706_v2  ;;  %v4350_v42 = vadd.f32 %v7353_v11, %v4318_v17  ;;  %v4454_v32 = vrot.slane %v4453_v37, 4 }
0x11fa   :  { %v4346_v44 = vadd.f32 %v4299_v4, %v4162_v5  ;;  %v4470_v47 = vadd.f32 %v4469_v58, %v4409_v61  ;;  %v4422_v17 = vrot.slane %v4421_v13, 1  ;;  %v4449_v41 = vrot.slane %v4448_v3, 1 }
0x11fb   :  { %v4462_v52 = vadd.f32 %v4461_v25, %v4406_v39  ;;  %v4382_v62 = vmax.f32 %v4350_v42, 0.0  ;;  %v4455_v48 = vadd.f32 %v4454_v32, %v4453_v37  ;;  %v4479_v23 = vadd.f32 %v4478_v7, %v4413_v22  ;;  %v7354_v7 = vld [vmem:[%s8889_s7] ss:$0 sm:$0xff] }
0x11fc   :  { %v4378_v9 = vmax.f32 %v4346_v44, 0.0  ;;  %v4923_v29 = vpop.permute.xlu0 %4922  ;;  %v4423_v22 = vadd.f32 %v4422_v17, %v4421_v13  ;;  %v4450_v39 = vadd.f32 %v4449_v41, %v4448_v3  ;;  %v4441_v61 = vadd.f32 %v4440_v43, %v4439_v28 }
0x11fd   :  { %v4463_v18 = vrot.slane %v4462_v52, 4  ;;  %v4414_v21 = vmul.f32 %v4382_v62, %v7706_v2  ;;  %v4925_v16 = vmul.f32 %v8380_v27, %v4923_v29  ;;  %v4456_v24 = vrot.slane %v4455_v48, 2 }
0x11fe   :  { %v4410_v5 = vmul.f32 %v4378_v9, %v7706_v2  ;;  %v4487_v12 = vadd.f32 %v7354_v7, %v4423_v22  ;;  %v4490_v30 = vadd.f32 %v7354_v7, %v4450_v39 }
0x11ff   :  { %v4464_v35 = vadd.f32 %v4463_v18, %v4462_v52  ;;  %v4480_v33 = vadd.f32 %v4479_v23, %v4414_v21  ;;  %4927 = vrot.lane.b32.xlu0 %v4925_v16, %s7546_s4  ;;  %v4457_v20 = vadd.f32 %v4456_v24, %v4455_v48  ;;  %v4488_v52 = vadd.f32 %v7354_v7, %v4432_v56 }
0x1200   :  { %v4471_v8 = vadd.f32 %v4470_v47, %v4410_v5  ;;  %v4489_v23 = vadd.f32 %v7354_v7, %v4441_v61  ;;  %v4507_v5 = vrot.slane %v4490_v30, 5 }
0x1201   :  { %v4465_v6 = vrot.slane %v4464_v35, 2  ;;  %v4481_v37 = vrot.slane %v4480_v33, 4  ;;  %v4458_v4 = vrot.slane %v4457_v20, 1  ;;  %v4503_v18 = vrot.slane %v4488_v52, 7 }
0x1202   :  { %v4472_v25 = vrot.slane %v4471_v8, 4  ;;  %v4505_v17 = vrot.slane %v4489_v23, 6 }
0x1203   :  { %v4466_v11 = vadd.f32 %v4465_v6, %v4464_v35  ;;  %v4482_v42 = vadd.f32 %v4481_v37, %v4480_v33  ;;  %v4459_v32 = vadd.f32 %v4458_v4, %v4457_v20  ;;  %v4504_v24 = vsel %vm692_vm2, %v4503_v18, %v4487_v12 }
0x1204   :  { %v4473_v44 = vadd.f32 %v4472_v25, %v4471_v8  ;;  %v4506_v8 = vsel %vm695_vm3, %v4505_v17, %v4504_v24 }
0x1205   :  { %v4467_v62 = vrot.slane %v4466_v11, 1  ;;  %v4483_v58 = vrot.slane %v4482_v42, 2  ;;  %v4491_v13 = vadd.f32 %v7354_v7, %v4459_v32  ;;  %v4508_v56 = vsel %vm698_vm4, %v4507_v5, %v4506_v8 }
0x1206   :  { %v4474_v48 = vrot.slane %v4473_v44, 2 }
0x1207   :  { %v4468_v9 = vadd.f32 %v4467_v62, %v4466_v11  ;;  %v4484_v29 = vadd.f32 %v4483_v58, %v4482_v42  ;;  %v4509_v35 = vrot.slane %v4491_v13, 4  ;;  %v4920_v11 = vmul.f32 %v8380_v27, %v8245_v54 }
0x1208   :  { %v4475_v3 = vadd.f32 %v4474_v48, %v4473_v44 }
0x1209   :  { %v4485_v21 = vrot.slane %v4484_v29, 1  ;;  %v4492_v28 = vadd.f32 %v7354_v7, %v4468_v9  ;;  %v4510_v37 = vsel %vm701_vm5, %v4509_v35, %v4508_v56 }
0x120a   :  { %v4476_v16 = vrot.slane %v4475_v3, 1 }
0x120b   :  { %v4486_v47 = vadd.f32 %v4485_v21, %v4484_v29  ;;  %v4511_v43 = vrot.slane %v4492_v28, 3 }
0x120c   :  { %v4477_v41 = vadd.f32 %v4476_v16, %v4475_v3 }
0x120d   :  { %v4494_v33 = vadd.f32 %v7354_v7, %v4486_v47  ;;  %v4512_v25 = vsel %vm704_vm6, %v4511_v43, %v4510_v37 }
0x120e   :  { %v4493_v20 = vadd.f32 %v7354_v7, %v4477_v41 }
0x120f   :  { %v4515_v6 = vrot.slane %v4494_v33, 1 }
0x1210   :  { %v4513_v4 = vrot.slane %v4493_v20, 2 }
0x1212   :  { %v4514_v22 = vsel %vm707_vm7, %v4513_v4, %v4512_v25 }
0x1213   :  { %v4516_v39 = vsel %vm710_vm8, %v4515_v6, %v4514_v22 }
0x1214   :  { %4518 = vmax.xlane.f32.xlu1 %v4516_v39 }
0x1271   :  { %v4928_v42 = vpop.permute.xlu0 %4927 }
0x1272   :  { %v8399_v61 = vadd.f32 %v4928_v42, %v4920_v11 }
0x1274   :  { %7189 = vtanh.f32 %v8399_v61 }
0x1281   :  { %v7190_v32 = vpop.eup %7189 }
0x1282   :  { %4933 = vrot.lane.b32.xlu1 %v7190_v32, %s7545_s3 }
0x129d   :  { %v4519_v44 = vpop.xlane.xlu1 %4518 }
0x129e   :  { %v4521_v7 = vrot.slane %v4519_v44, 1  ;;  %v4522_v62 = vrot.slane %v4519_v44, 2  ;;  %v4523_v58 = vrot.slane %v4519_v44, 3  ;;  %v4524_v48 = vrot.slane %v4519_v44, 4 }
0x129f   :  { %v4525_v9 = vrot.slane %v4519_v44, 5  ;;  %v4526_v29 = vrot.slane %v4519_v44, 6  ;;  %v4536_v3 = vsub.f32 %v4487_v12, %v4519_v44  ;;  %v4527_v18 = vrot.slane %v4519_v44, 7 }
0x12a0   :  { %v4537_v21 = vsub.f32 %v4488_v52, %v4521_v7  ;;  %v4538_v16 = vsub.f32 %v4489_v23, %v4522_v62  ;;  %v4539_v54 = vsub.f32 %v4490_v30, %v4523_v58  ;;  %v4540_v47 = vsub.f32 %v4491_v13, %v4524_v48 }
0x12a1   :  { %v4544_v24 = vmul.f32 1.442695, %v4536_v3  ;;  %v4541_v5 = vsub.f32 %v4492_v28, %v4525_v9  ;;  %v4542_v17 = vsub.f32 %v4493_v20, %v4526_v29  ;;  %v4543_v8 = vsub.f32 %v4494_v33, %v4527_v18 }
0x12a2   :  { %v4546_v41 = vmul.f32 1.442695, %v4537_v21  ;;  %v4548_v35 = vmul.f32 1.442695, %v4538_v16  ;;  %v4550_v43 = vmul.f32 1.442695, %v4539_v54 }
0x12a3   :  { %7191 = vpow2.f32 %v4544_v24  ;;  %v4552_v56 = vmul.f32 1.442695, %v4540_v47  ;;  %v4554_v6 = vmul.f32 1.442695, %v4541_v5  ;;  %v4556_v37 = vmul.f32 1.442695, %v4542_v17 }
0x12a4   :  { %7193 = vpow2.f32 %v4546_v41  ;;  %v4558_v12 = vmul.f32 1.442695, %v4543_v8  ;;  %v4610_v24 = vld [vmem:[#allocation5] sm:$0xff] }
0x12a5   :  { %7195 = vpow2.f32 %v4548_v35 }
0x12a6   :  { %7197 = vpow2.f32 %v4550_v43 }
0x12a7   :  { %7199 = vpow2.f32 %v4552_v56 }
0x12a8   :  { %7201 = vpow2.f32 %v4554_v6 }
0x12a9   :  { %7203 = vpow2.f32 %v4556_v37 }
0x12aa   :  { %7205 = vpow2.f32 %v4558_v12 }
0x12b0   :  { %v7192_v52 = vpop.eup %7191 }
0x12b1   :  { %v7194_v30 = vpop.eup %7193 }
0x12b2   :  { %v7196_v23 = vpop.eup %7195  ;;  %v4568_v13 = vrot.slane %v7194_v30, 7 }
0x12b3   :  { %v7198_v28 = vpop.eup %7197  ;;  %v4570_v20 = vrot.slane %v7196_v23, 6 }
0x12b4   :  { %v7200_v4 = vpop.eup %7199  ;;  %v4569_v33 = vsel %vm692_vm2, %v4568_v13, %v7192_v52  ;;  %v4572_v25 = vrot.slane %v7198_v28, 5 }
0x12b5   :  { %v7202_v22 = vpop.eup %7201  ;;  %v4571_v39 = vsel %vm695_vm3, %v4570_v20, %v4569_v33  ;;  %v4574_v11 = vrot.slane %v7200_v4, 4  ;;  %v4611_v33 = vld [vmem:[#allocation5 + $0x8] sm:$0xff] }
0x12b6   :  { %v7204_v42 = vpop.eup %7203  ;;  %v4573_v32 = vsel %vm698_vm4, %v4572_v25, %v4571_v39  ;;  %v4576_v44 = vrot.slane %v7202_v22, 3 }
0x12b7   :  { %v7206_v7 = vpop.eup %7205  ;;  %v4575_v62 = vsel %vm701_vm5, %v4574_v11, %v4573_v32  ;;  %v4578_v58 = vrot.slane %v7204_v42, 2  ;;  %v7355_v11 = vld [vmem:[#allocation5 + $0x18] sm:$0xff] }
0x12b8   :  { %v4577_v48 = vsel %vm704_vm6, %v4576_v44, %v4575_v62  ;;  %v4580_v9 = vrot.slane %v7206_v7, 1 }
0x12b9   :  { %v4579_v29 = vsel %vm707_vm7, %v4578_v58, %v4577_v48  ;;  %v4612_v48 = vld [vmem:[#allocation5 + $0x10] sm:$0xff] }
0x12ba   :  { %v4581_v3 = vsel %vm710_vm8, %v4580_v9, %v4579_v29 }
0x12bb   :  { %4583 = vadd.xlane.f32.xlu0 %v4581_v3 }
0x1344   :  { %v4584_v18 = vpop.xlane.xlu0 %4583 }
0x1345   :  { %7207 = vrcp.f32 %v4584_v18 }
0x1352   :  { %v7208_v21 = vpop.eup %7207 }
0x1353   :  { %v4602_v16 = vmul.f32 %v7208_v21, %v7192_v52  ;;  %v4587_v54 = vrot.slane %v7208_v21, 1  ;;  %v4592_v47 = vrot.slane %v7208_v21, 6  ;;  %v4593_v5 = vrot.slane %v7208_v21, 7 }
0x1354   :  { %v4588_v17 = vrot.slane %v7208_v21, 2  ;;  %v4589_v41 = vrot.slane %v7208_v21, 3  ;;  %v4590_v35 = vrot.slane %v7208_v21, 4  ;;  %v4591_v37 = vrot.slane %v7208_v21, 5 }
0x1355   :  { %v4629_v43 = vrot.slane %v4602_v16, %v7680_v46  ;;  %v4603_v8 = vmul.f32 %v7194_v30, %v4587_v54  ;;  %v4608_v56 = vmul.f32 %v7204_v42, %v4592_v47  ;;  %v4609_v25 = vmul.f32 %v7206_v7, %v4593_v5  ;;  %v4623_v30 = vld [vmem:[#allocation5 + $0x68] sm:$0xff]  ;;  %v4614_v47 = vld [vmem:[#allocation5 + $0x20] sm:$0xff] }
0x1356   :  { %v4604_v6 = vmul.f32 %v7196_v23, %v4588_v17  ;;  %v4605_v52 = vmul.f32 %v7198_v28, %v4589_v41  ;;  %v4606_v39 = vmul.f32 %v7200_v4, %v4590_v35  ;;  %v4607_v42 = vmul.f32 %v7202_v22, %v4591_v37  ;;  %v7356_v17 = vld [vmem:[#allocation5 + $0x78] sm:$0xff]  ;;  %v4615_v37 = vld [vmem:[#allocation5 + $0x28] sm:$0xff] }
0x1357   :  { %v4658_v12 = vmul.f32 %v4629_v43, %v4610_v24  ;;  %v4633_v13 = vrot.slane %v4603_v8, %v7680_v46  ;;  %v4891_v20 = vrot.slane %v4603_v8, 7  ;;  %v4653_v62 = vrot.slane %v4608_v56, %v7680_v46 }
0x1358   :  { %v4893_v58 = vrot.slane %v4604_v6, 6  ;;  %v4659_v23 = vmul.f32 %v4629_v43, %v4611_v33  ;;  %v4895_v9 = vrot.slane %v4605_v52, 5  ;;  %v4657_v7 = vrot.slane %v4609_v25, %v7680_v46 }
0x1359   :  { %4674 = vadd.xlane.f32.xlu0 %v4658_v12  ;;  %v4661_v32 = vmul.f32 %v7355_v11, %v4633_v13  ;;  %v4892_v44 = vsel %vm692_vm2, %v4891_v20, %v4602_v16  ;;  %v4671_v29 = vmul.f32 %v4653_v62, %v4623_v30  ;;  %v4897_v28 = vrot.slane %v4606_v39, 4  ;;  %v4617_v20 = vld [vmem:[#allocation5 + $0x38] sm:$0xff]  ;;  %v4618_v11 = vld [vmem:[#allocation5 + $0x40] sm:$0xff] }
0x135a   :  { %v4894_v4 = vsel %vm695_vm3, %v4893_v58, %v4892_v44  ;;  %v4899_v3 = vrot.slane %v4607_v42, 3  ;;  %v4660_v21 = vmul.f32 %v4633_v13, %v4612_v48  ;;  %v4637_v16 = vrot.slane %v4604_v6, %v7680_v46  ;;  %v4619_v44 = vld [vmem:[#allocation5 + $0x48] sm:$0xff] }
0x135b   :  { %4680 = vadd.xlane.f32.xlu1 %v4661_v32  ;;  %v4896_v18 = vsel %vm698_vm4, %v4895_v9, %v4894_v4  ;;  %v4901_v54 = vrot.slane %v4608_v56, 2  ;;  %v4903_v5 = vrot.slane %v4609_v25, 1  ;;  %v4673_v41 = vmul.f32 %v7356_v17, %v4657_v7  ;;  %v4616_v56 = vld [vmem:[#allocation5 + $0x30] sm:$0xff] }
0x135c   :  { %v4898_v22 = vsel %vm701_vm5, %v4897_v28, %v4896_v18  ;;  %v4662_v8 = vmul.f32 %v4637_v16, %v4614_v47  ;;  %v4663_v6 = vmul.f32 %v4637_v16, %v4615_v37  ;;  %v4641_v12 = vrot.slane %v4605_v52, %v7680_v46  ;;  %v8427_v52 = vld [vmem:[#allocation5 + $0x58] sm:$0xff] }
0x135d   :  { %4676 = vadd.xlane.f32.xlu0 %v4659_v23  ;;  %v4900_v24 = vsel %vm704_vm6, %v4899_v3, %v4898_v22  ;;  %v4645_v25 = vrot.slane %v4606_v39, %v7680_v46  ;;  %v4649_v30 = vrot.slane %v4607_v42, %v7680_v46  ;;  %v4620_v23 = vld [vmem:[#allocation5 + $0x50] sm:$0xff]  ;;  %v4934_v3 = vpop.permute.xlu1 %4933 }
0x135e   :  { %v4902_v35 = vsel %vm707_vm7, %v4901_v54, %v4900_v24  ;;  %v4664_v13 = vmul.f32 %v4641_v12, %v4616_v56  ;;  %v4665_v33 = vmul.f32 %v4641_v12, %v4617_v20  ;;  %v4624_v39 = vld [vmem:[#allocation5 + $0x70] sm:$0xff]  ;;  %v4936_v18 = vmul.f32 %v8380_v27, %v4934_v3 }
0x135f   :  { %4700 = vadd.xlane.f32.xlu1 %v4671_v29  ;;  %v8422_v43 = vsel %vm710_vm8, %v4903_v5, %v4902_v35  ;;  %v4666_v32 = vmul.f32 %v4645_v25, %v4618_v11  ;;  %v4667_v58 = vmul.f32 %v4645_v25, %v4619_v44  ;;  %v4668_v48 = vmul.f32 %v4649_v30, %v4620_v23  ;;  %v4622_v29 = vld [vmem:[#allocation5 + $0x60] sm:$0xff] }
0x1360   :  { %8909 = vst [vmem:[#allocation27_spill] sm:$0xff] %v8422_v43  ;;  %v4669_v9 = vmul.f32 %v4649_v30, %v8427_v52  ;;  %v4670_v28 = vmul.f32 %v4653_v62, %v4622_v29  ;;  %v4672_v4 = vmul.f32 %v4657_v7, %v4624_v39 }
0x1361   :  { %4678 = vadd.xlane.f32.xlu0 %v4660_v21 }
0x1363   :  { %4704 = vadd.xlane.f32.xlu1 %v4673_v41 }
0x1365   :  { %4682 = vadd.xlane.f32.xlu0 %v4662_v8 }
0x1369   :  { %4684 = vadd.xlane.f32.xlu0 %v4663_v6 }
0x136d   :  { %4686 = vadd.xlane.f32.xlu0 %v4664_v13 }
0x1371   :  { %4688 = vadd.xlane.f32.xlu0 %v4665_v33 }
0x1375   :  { %4690 = vadd.xlane.f32.xlu0 %v4666_v32 }
0x1379   :  { %4692 = vadd.xlane.f32.xlu0 %v4667_v58 }
0x137d   :  { %4694 = vadd.xlane.f32.xlu0 %v4668_v48 }
0x1381   :  { %4696 = vadd.xlane.f32.xlu0 %v4669_v9 }
0x1385   :  { %4698 = vadd.xlane.f32.xlu0 %v4670_v28 }
0x1389   :  { %4702 = vadd.xlane.f32.xlu0 %v4672_v4 }
0x139f   :  { %4938 = vrot.lane.b32.xlu0 %v4936_v18, %s7546_s4 }
0x13e2   :  { %v4675_v42 = vpop.xlane.xlu0 %4674 }
0x13e3   :  { %v4725_v20 = vrot.slane %v4675_v42, %v7668_v36 }
0x13e4   :  { %v4681_v41 = vpop.xlane.xlu1 %4680 }
0x13e5   :  { %v4738_v27 = vrot.slane %v4681_v41, %v7670_v38 }
0x13e6   :  { %v4677_v21 = vpop.xlane.xlu0 %4676 }
0x13e7   :  { %v4729_v6 = vrot.slane %v4677_v21, %v7670_v38 }
0x13e8   :  { %v4701_v7 = vpop.xlane.xlu1 %4700 }
0x13e9   :  { %v4730_v30 = vsel %vm928_vm9, %v4729_v6, %v4725_v20  ;;  %v4783_v29 = vrot.slane %v4701_v7, %v7670_v38  ;;  %v7358_v7 = vld [vmem:[%s8890_s8 + $0x8] sm:$0xff] }
0x13ea   :  { %v4679_v16 = vpop.xlane.xlu0 %4678  ;;  %v7362_v6 = vld [vmem:[#allocation8 + $0x10] sm:$0xff] }
0x13eb   :  { %v4734_v35 = vrot.slane %v4679_v16, %v7668_v36  ;;  %v7366_v20 = vld [vmem:[#allocation8 + $0x30] sm:$0xff] }
0x13ec   :  { %v4705_v39 = vpop.xlane.xlu1 %4704 }
0x13ed   :  { %v4739_v33 = vsel %vm928_vm9, %v4738_v27, %v4734_v35  ;;  %v7357_v35 = vld [vmem:[#allocation8 + $0x58] sm:$0xff]  ;;  %v7361_v27 = vld [vmem:[#allocation8 + $0x28] sm:$0xff] }
0x13ee   :  { %v4683_v22 = vpop.xlane.xlu0 %4682  ;;  %v4794_v28 = vsel %vm692_vm2, %v4739_v33, %v4730_v30  ;;  %v7367_v33 = vld [vmem:[#allocation8 + $0x20] sm:$0xff] }
0x13ef   :  { %v4743_v56 = vrot.slane %v4683_v22, %v7668_v36  ;;  %v4792_v22 = vrot.slane %v4705_v39, %v7670_v38 }
0x13f2   :  { %v4685_v54 = vpop.xlane.xlu0 %4684 }
0x13f3   :  { %v4747_v8 = vrot.slane %v4685_v54, %v7670_v38 }
0x13f5   :  { %v4748_v32 = vsel %vm928_vm9, %v4747_v8, %v4743_v56  ;;  %v7359_v8 = vld [vmem:[#allocation8 + $0x40] sm:$0xff]  ;;  %v7364_v56 = vld [vmem:[#allocation8 + $0x48] sm:$0xff] }
0x13f6   :  { %v4687_v47 = vpop.xlane.xlu0 %4686  ;;  %v4795_v3 = vsel %vm695_vm3, %v4748_v32, %v4794_v28  ;;  %v7370_v32 = vld [vmem:[#allocation8] sm:$0xff] }
0x13f7   :  { %v4752_v25 = vrot.slane %v4687_v47, %v7668_v36 }
0x13fa   :  { %v4689_v24 = vpop.xlane.xlu0 %4688 }
0x13fb   :  { %v4756_v12 = vrot.slane %v4689_v24, %v7670_v38 }
0x13fd   :  { %v4757_v23 = vsel %vm928_vm9, %v4756_v12, %v4752_v25  ;;  %v7363_v12 = vld [vmem:[#allocation8 + $0x50] sm:$0xff]  ;;  %v7368_v25 = vld [vmem:[#allocation8 + $0x18] sm:$0xff] }
0x13fe   :  { %v4691_v5 = vpop.xlane.xlu0 %4690  ;;  %v4796_v42 = vsel %vm698_vm4, %v4757_v23, %v4795_v3 }
0x13ff   :  { %v4761_v44 = vrot.slane %v4691_v5, %v7668_v36 }
0x1402   :  { %v4693_v17 = vpop.xlane.xlu0 %4692 }
0x1403   :  { %v4765_v13 = vrot.slane %v4693_v17, %v7670_v38 }
0x1405   :  { %v4766_v4 = vsel %vm928_vm9, %v4765_v13, %v4761_v44  ;;  %v7365_v13 = vld [vmem:[#allocation8 + $0x38] sm:$0xff]  ;;  %v4061_v44 = vpop.f32.mrf.mxu0 }
0x1406   :  { %v4695_v62 = vpop.xlane.xlu0 %4694  ;;  %v4797_v54 = vsel %vm701_vm5, %v4766_v4, %v4796_v42 }
0x1407   :  { %v4770_v48 = vrot.slane %v4695_v62, %v7668_v36 }
0x140a   :  { %v4697_v37 = vpop.xlane.xlu0 %4696 }
0x140b   :  { %v4774_v11 = vrot.slane %v4697_v37, %v7670_v38  ;;  %v7360_v37 = vld [vmem:[%s8890_s8] sm:$0xff] }
0x140d   :  { %v4775_v18 = vsel %vm928_vm9, %v4774_v11, %v4770_v48  ;;  %v7369_v11 = vld [vmem:[#allocation8 + $0x8] sm:$0xff] }
0x140e   :  { %v4699_v58 = vpop.xlane.xlu0 %4698  ;;  %v4798_v24 = vsel %vm704_vm6, %v4775_v18, %v4797_v54 }
0x140f   :  { %v4779_v9 = vrot.slane %v4699_v58, %v7668_v36 }
0x1411   :  { %v4784_v21 = vsel %vm928_vm9, %v4783_v29, %v4779_v9  ;;  %v7371_v9 = vld [vmem:[%s8887_s5] ss:$0 sm:$0xff] }
0x1412   :  { %v4703_v16 = vpop.xlane.xlu0 %4702  ;;  %v4799_v17 = vsel %vm707_vm7, %v4784_v21, %v4798_v24 }
0x1413   :  { %v4788_v47 = vrot.slane %v4703_v16, %v7668_v36 }
0x1415   :  { %v4793_v5 = vsel %vm928_vm9, %v4792_v22, %v4788_v47  ;;  %v5860_v47 = vld [vmem:[#allocation2 + $0x30] sm:$0xff] }
0x1416   :  { %v4939_v41 = vpop.permute.xlu0 %4938  ;;  %v4800_v62 = vsel %vm710_vm8, %v4793_v5, %v4799_v17 }
0x1417   :  { %7016 = vmatmul.mubr.msk.f32.vlgmr.msra.gmra.mxu0 %vm1000_vm10, %v4800_v62  ;;  %6865 = vmatmul.mubr.msk.f32.vlgmr.msra.gmra.mxu1 %vm146_vm1, %v4939_v41 }
0x1418   :  { %7019 = vmatpush3.msra.mxu0 %v7357_v35  ;;  %7026 = vmatprep.mubr.msk.f32.mxu0 %vm7548_vm0, %v8896_v14 }
0x1419   :  { %7020 = vmatprep.subr.mxu0 %v8896_v14  ;;  %7030 = vmatpush3.msra.mxu1 %v7358_v7 }
0x141a   :  { %7021 = vmatpush3.msra.mxu0 %v7359_v8  ;;  %7031 = vmatprep.subr.mxu1 %v8896_v14 }
0x141b   :  { %7022 = vmatprep.subr.mxu0 %v8896_v14  ;;  %7032 = vmatpush3.msra.mxu1 %v7360_v37 }
0x141c   :  { %7023 = vmatpush3.msra.mxu0 %v7361_v27  ;;  %7033 = vmatprep.mubr.msk.f32.mxu1 %vm7548_vm0, %v8896_v14 }
0x141d   :  { %7024 = vmatprep.subr.mxu0 %v8896_v14  ;;  %7036 = vmatprep.subr.mxu1 %v8896_v14 }
0x141e   :  { %7025 = vmatpush3.msra.mxu0 %v7362_v6 }
0x141f   :  { %7027 = vmatmul.mubr.msk.f32.vlgmr.msra.gmra.mxu0 %vm146_vm1, %v4939_v41  ;;  %5915 = vmatprep.subr.mxu0 %v7363_v12 }
0x1420   :  { %5916 = vmatpush1.msra.mxu0 %v7364_v56  ;;  %5955 = vmatprep.mubr.f32.mxu0 %v8896_v14 }
0x1421   :  { %5917 = vmatprep.subr.mxu0 %v7365_v13 }
0x1422   :  { %5918 = vmatpush1.msra.mxu0 %v7366_v20  ;;  %v5089_v20 = vld [vmem:[#allocation7 + $0x28] sm:$0xff] }
0x1423   :  { %5919 = vmatprep.subr.mxu0 %v7367_v33 }
0x1424   :  { %5920 = vmatpush1.msra.mxu0 %v7368_v25 }
0x1425   :  { %5921 = vmatprep.subr.mxu0 %v7369_v11  ;;  %v5088_v11 = vld [vmem:[#allocation7 + $0x20] sm:$0xff] }
0x1426   :  { %5922 = vmatpush1.msra.mxu0 %v7370_v32 }
0x1427   :  { %7047 = vmatprep.subr.mxu0 %v8896_v14 }
0x14d7   :  { %v4869_v58 = vpop.f32.mrf.mxu0  ;;  %v5008_v54 = vpop.f32.mrf.mxu1 }
0x14d8   :  { %v8483_v30 = vadd.f32 %v4869_v58, %v4061_v44  ;;  %v5861_v24 = vadd.f32 %v5860_v47, %v5008_v54  ;;  %v5093_v58 = vld [vmem:[#allocation7 + $0x48] sm:$0xff]  ;;  %v5094_v47 = vld [vmem:[#allocation7 + $0x50] sm:$0xff] }
0x14d9   :  { %v7017_v23 = vpop.f32.mrf.mxu0 }
0x14da   :  { %8910 = vst [vmem:[#allocation28_spill] sm:$0xff] %v8483_v30  ;;  %7209 = vtanh.f32 %v5861_v24  ;;  %v6868_v32 = vmul.f32 -1.442695, %v5861_v24  ;;  %v7372_v23 = vld [vmem:[#allocation7 + $0x40] sm:$0xff]  ;;  %v7398_v30 = vld [vmem:[#allocation7 + $0x8] sm:$0xff] }
0x14dc   :  { %7211 = vpow2.f32 %v6868_v32  ;;  %v7376_v32 = vld [vmem:[#allocation7 + $0x70] sm:$0xff] }
0x14df   :  { %v5079_v48 = vpop.f32.mrf.mxu0 }
0x14e0   :  { %v5083_v29 = vadd.f32 %v7371_v9, %v5079_v48  ;;  %v5091_v9 = vld [vmem:[#allocation7 + $0x38] sm:$0xff] }
0x14e1   :  { %v7028_v28 = vpop.f32.mrf.mxu0 }
0x14e2   :  { %v5157_v39 = vrot.slane %v5083_v29, %v7678_v45  ;;  %v5138_v4 = vrot.slane %v5083_v29, %v7675_v40  ;;  %v5119_v3 = vrot.slane %v5083_v29, %v7680_v46  ;;  %v5176_v18 = vrot.slane %v5083_v29, %v7684_v49 }
0x14e3   :  { %v5195_v42 = vrot.slane %v5083_v29, %v7687_v51  ;;  %v5214_v21 = vrot.slane %v5083_v29, %v7690_v53  ;;  %v5233_v16 = vrot.slane %v5083_v29, %v7693_v55  ;;  %v5252_v22 = vrot.slane %v5083_v29, %v7696_v57 }
0x14e4   :  { %5159 = vbcast.lane.b32.xlu0 %v5157_v39, 256  ;;  %5140 = vbcast.lane.b32.xlu1 %v5138_v4, 256 }
0x14e7   :  { %v7210_v5 = vpop.eup %7209 }
0x14e8   :  { %5144 = vbcast.lane.b32.xlu1 %v5138_v4, 264  ;;  %5121 = vbcast.lane.b32.xlu0 %v5119_v3, 256 }
0x14ec   :  { %5163 = vbcast.lane.b32.xlu1 %v5157_v39, 264  ;;  %5148 = vbcast.lane.b32.xlu0 %v5138_v4, 272 }
0x14f0   :  { %5125 = vbcast.lane.b32.xlu1 %v5119_v3, 264  ;;  %5182 = vbcast.lane.b32.xlu0 %v5176_v18, 264 }
0x14f4   :  { %5178 = vbcast.lane.b32.xlu1 %v5176_v18, 256  ;;  %5197 = vbcast.lane.b32.xlu0 %v5195_v42, 256 }
0x14f8   :  { %5167 = vbcast.lane.b32.xlu1 %v5157_v39, 272  ;;  %5129 = vbcast.lane.b32.xlu0 %v5119_v3, 272 }
0x14fc   :  { %5201 = vbcast.lane.b32.xlu1 %v5195_v42, 264  ;;  %5186 = vbcast.lane.b32.xlu0 %v5176_v18, 272 }
0x1500   :  { %5152 = vbcast.lane.b32.xlu1 %v5138_v4, 280  ;;  %5220 = vbcast.lane.b32.xlu0 %v5214_v21, 264  ;;  %v7373_v4 = vld [vmem:[#allocation7 + $0x30] sm:$0xff] }
0x1504   :  { %5216 = vbcast.lane.b32.xlu1 %v5214_v21, 256  ;;  %5205 = vbcast.lane.b32.xlu0 %v5195_v42, 272 }
0x1508   :  { %5171 = vbcast.lane.b32.xlu1 %v5157_v39, 280  ;;  %5239 = vbcast.lane.b32.xlu0 %v5233_v16, 264 }
0x150c   :  { %5235 = vbcast.lane.b32.xlu1 %v5233_v16, 256  ;;  %5190 = vbcast.lane.b32.xlu0 %v5176_v18, 280  ;;  %v5085_v18 = vld [vmem:[#allocation7 + $0x8] sm:$0xff] }
0x1510   :  { %5133 = vbcast.lane.b32.xlu1 %v5119_v3, 280  ;;  %5254 = vbcast.lane.b32.xlu0 %v5252_v22, 256 }
0x1514   :  { %5224 = vbcast.lane.b32.xlu1 %v5214_v21, 272  ;;  %5209 = vbcast.lane.b32.xlu0 %v5195_v42, 280  ;;  %v7374_v42 = vld [vmem:[#allocation7] sm:$0xff] }
0x1518   :  { %5258 = vbcast.lane.b32.xlu1 %v5252_v22, 264  ;;  %5228 = vbcast.lane.b32.xlu0 %v5214_v21, 280 }
0x151c   :  { %5243 = vbcast.lane.b32.xlu1 %v5233_v16, 272  ;;  %5247 = vbcast.lane.b32.xlu0 %v5233_v16, 280 }
0x1520   :  { %5262 = vbcast.lane.b32.xlu1 %v5252_v22, 272 }
0x1524   :  { %5266 = vbcast.lane.b32.xlu1 %v5252_v22, 280  ;;  %v5096_v22 = vld [vmem:[#allocation7 + $0x60] sm:$0xff] }
0x1528   :  { %5871 = vrot.lane.b32.xlu1 %v7210_v5, %s7545_s3 }
0x1556   :  { %v5160_v17 = vpop.permute.xlu0 %5159  ;;  %v5141_v41 = vpop.permute.xlu1 %5140 }
0x1557   :  { %v5276_v48 = vadd.f32 %v7372_v23, %v5160_v17  ;;  %v5272_v39 = vadd.f32 %v5141_v41, %v5088_v11 }
0x1559   :  { %v5308_v5 = vmax.f32 %v5276_v48, 0.0  ;;  %v5304_v23 = vmax.f32 %v5272_v39, 0.0 }
0x155a   :  { %v5145_v62 = vpop.permute.xlu1 %5144  ;;  %v5122_v35 = vpop.permute.xlu0 %5121 }
0x155b   :  { %v5273_v44 = vadd.f32 %v5145_v62, %v5089_v20  ;;  %v5268_v21 = vadd.f32 %v7374_v42, %v5122_v35  ;;  %v7375_v35 = vld [vmem:[#allocation7 + $0x68] sm:$0xff]  ;;  %v5340_v48 = vmul.f32 %v5308_v5, %v7702_v0  ;;  %v5104_v5 = vld [vmem:[#allocation7 + $0xa0] sm:$0xff] }
0x155d   :  { %v5305_v54 = vmax.f32 %v5273_v44, 0.0  ;;  %v5300_v60 = vmax.f32 %v5268_v21, 0.0 }
0x155e   :  { %v5164_v7 = vpop.permute.xlu1 %5163  ;;  %v5149_v8 = vpop.permute.xlu0 %5148 }
0x155f   :  { %v5274_v3 = vadd.f32 %v7373_v4, %v5149_v8  ;;  %v5277_v16 = vadd.f32 %v5164_v7, %v5093_v58  ;;  %v5095_v8 = vld [vmem:[#allocation7 + $0x58] sm:$0xff]  ;;  %v5337_v4 = vmul.f32 %v5305_v54, %v7700_v63  ;;  %v5101_v58 = vld [vmem:[#allocation7 + $0x88] sm:$0xff] }
0x1561   :  { %v5306_v26 = vmax.f32 %v5274_v3, 0.0  ;;  %v5309_v41 = vmax.f32 %v5277_v16, 0.0 }
0x1562   :  { %v5126_v37 = vpop.permute.xlu1 %5125  ;;  %v5183_v27 = vpop.permute.xlu0 %5182 }
0x1563   :  { %v5269_v62 = vadd.f32 %v5126_v37, %v5085_v18  ;;  %v5281_v7 = vadd.f32 %v7375_v35, %v5183_v27  ;;  %v5332_v27 = vmul.f32 %v5300_v60, %v7702_v0  ;;  %v5341_v16 = vmul.f32 %v5309_v41, %v7700_v63  ;;  %v7378_v35 = vld [vmem:[#allocation7 + $0x80] sm:$0xff] }
0x1565   :  { %v5301_v37 = vmax.f32 %v5269_v62, 0.0 }
0x1566   :  { %v5179_v6 = vpop.permute.xlu1 %5178  ;;  %v8497_v12 = vpop.permute.xlu0 %5197 }
0x1567   :  { %v5280_v14 = vadd.f32 %v5179_v6, %v5096_v22  ;;  %v5336_v6 = vmul.f32 %v5304_v23, %v7702_v0  ;;  %v5333_v62 = vmul.f32 %v5301_v37, %v7700_v63  ;;  %v5284_v23 = vadd.f32 %v7378_v35, %v8497_v12 }
0x1569   :  { %v5312_v18 = vmax.f32 %v5280_v14, 0.0  ;;  %v5373_v54 = vadd.f32 %v5337_v4, %v5336_v6  ;;  %v7380_v4 = vld [vmem:[#allocation7 + $0x78] sm:$0xff] }
0x156a   :  { %v5168_v56 = vpop.permute.xlu1 %5167  ;;  %v5130_v13 = vpop.permute.xlu0 %5129  ;;  %v8516_v6 = vld [vmem:[#allocation7 + $0x18] sm:$0xff] }
0x156b   :  { %v5278_v11 = vadd.f32 %v5168_v56, %v5094_v47  ;;  %v5338_v56 = vmul.f32 %v5306_v26, %v7704_v1  ;;  %v5313_v47 = vmax.f32 %v5281_v7, 0.0  ;;  %v5344_v41 = vmul.f32 %v5312_v18, %v7702_v0 }
0x156c   :  { %v5316_v18 = vmax.f32 %v5284_v23, 0.0  ;;  %v5106_v23 = vld [vmem:[#allocation7 + $0xb0] sm:$0xff] }
0x156d   :  { %v5374_v60 = vadd.f32 %v5373_v54, %v5338_v56  ;;  %v5345_v37 = vmul.f32 %v5313_v47, %v7700_v63  ;;  %v7212_v56 = vpop.eup %7211 }
0x156e   :  { %v5202_v33 = vpop.permute.xlu1 %5201  ;;  %v5187_v25 = vpop.permute.xlu0 %5186 }
0x156f   :  { %v5282_v44 = vadd.f32 %v7376_v32, %v5187_v25  ;;  %v5310_v25 = vmax.f32 %v5278_v11, 0.0  ;;  %v5285_v22 = vadd.f32 %v5202_v33, %v5101_v58  ;;  %v7379_v11 = vld [vmem:[#allocation7 + $0x90] sm:$0xff]  ;;  %v5382_v58 = vadd.f32 %v5341_v16, %v5340_v48  ;;  %v5108_v48 = vld [vmem:[#allocation7 + $0xc0] sm:$0xff] }
0x1572   :  { %v5153_v29 = vpop.permute.xlu1 %5152  ;;  %v8499_v28 = vpop.permute.xlu0 %5220 }
0x1573   :  { %v5275_v24 = vadd.f32 %v5153_v29, %v5091_v9  ;;  %v7377_v9 = vld [vmem:[#allocation7 + $0x10] sm:$0xff] }
0x1574   :  { %v5270_v29 = vadd.f32 %v7377_v9, %v5130_v13 }
0x1575   :  { %v5307_v42 = vmax.f32 %v5275_v24, 0.0  ;;  %v5314_v24 = vmax.f32 %v5282_v44, 0.0  ;;  %v5342_v44 = vmul.f32 %v5310_v25, %v7704_v1 }
0x1576   :  { %v5217_v20 = vpop.permute.xlu1 %5216  ;;  %v5206_v17 = vpop.permute.xlu0 %5205  ;;  %v5302_v26 = vmax.f32 %v5270_v29, 0.0 }
0x1577   :  { %v5339_v13 = vmul.f32 %v5307_v42, %v7706_v2  ;;  %v5286_v33 = vadd.f32 %v7379_v11, %v5206_v17  ;;  %v5317_v42 = vmax.f32 %v5285_v22, 0.0  ;;  %v5288_v9 = vadd.f32 %v5217_v20, %v5104_v5  ;;  %v7381_v22 = vld [vmem:[#allocation7 + $0xa8] sm:$0xff] }
0x1578   :  { %v5346_v12 = vmul.f32 %v5314_v24, %v7704_v1  ;;  %v5334_v17 = vmul.f32 %v5302_v26, %v7704_v1  ;;  %v5391_v20 = vadd.f32 %v5345_v37, %v5344_v41  ;;  %v5289_v47 = vadd.f32 %v7381_v22, %v8499_v28 }
0x1579   :  { %v5375_v29 = vadd.f32 %v5374_v60, %v5339_v13  ;;  %v5318_v24 = vmax.f32 %v5286_v33, 0.0  ;;  %v5383_v5 = vadd.f32 %v5382_v58, %v5342_v44  ;;  %v5349_v35 = vmul.f32 %v5317_v42, %v7700_v63 }
0x157a   :  { %v5172_v39 = vpop.permute.xlu1 %5171  ;;  %v8503_v3 = vpop.permute.xlu0 %5239  ;;  %v5865_v26 = vadd.f32 1.0, %v7212_v56  ;;  %v5348_v11 = vmul.f32 %v5316_v18, %v7702_v0  ;;  %v5321_v37 = vmax.f32 %v5289_v47, 0.0 }
0x157b   :  { %v5279_v21 = vadd.f32 %v5172_v39, %v5095_v8  ;;  %v5350_v58 = vmul.f32 %v5318_v24, %v7704_v1 }
0x157c   :  { %7213 = vrcp.f32 %v5865_v26  ;;  %v8537_v26 = vld [vmem:[#allocation7 + $0xd0] sm:$0xff] }
0x157d   :  { %v5311_v14 = vmax.f32 %v5279_v21, 0.0  ;;  %v5364_v21 = vadd.f32 %v5333_v62, %v5332_v27  ;;  %v5320_v27 = vmax.f32 %v5288_v9, 0.0  ;;  %v5400_v9 = vadd.f32 %v5349_v35, %v5348_v11 }
0x157e   :  { %v5236_v8 = vpop.permute.xlu1 %5235  ;;  %v5191_v32 = vpop.permute.xlu0 %5190 }
0x157f   :  { %v5283_v7 = vadd.f32 %v7380_v4, %v5191_v32  ;;  %v5343_v54 = vmul.f32 %v5311_v14, %v7706_v2  ;;  %v5392_v14 = vadd.f32 %v5391_v20, %v5346_v12  ;;  %v5376_v32 = vrot.slane %v5375_v29, 4  ;;  %v7382_v12 = vld [vmem:[#allocation7 + $0x98] sm:$0xff] }
0x1580   :  { %v5292_v60 = vadd.f32 %v5236_v8, %v5108_v48  ;;  %v5365_v41 = vadd.f32 %v5364_v21, %v5334_v17  ;;  %v7383_v48 = vld [vmem:[#allocation7 + $0xc8] sm:$0xff]  ;;  %v5401_v35 = vadd.f32 %v5400_v9, %v5350_v58 }
0x1581   :  { %v5315_v39 = vmax.f32 %v5283_v7, 0.0  ;;  %v5384_v4 = vadd.f32 %v5383_v5, %v5343_v54  ;;  %v5377_v8 = vadd.f32 %v5376_v32, %v5375_v29  ;;  %v5293_v21 = vadd.f32 %v7383_v48, %v8503_v3  ;;  %v8531_v54 = vld [vmem:[#allocation7 + $0xe8] sm:$0xff]  ;;  %v7384_v32 = vld [vmem:[#allocation7 + $0xb8] sm:$0xff] }
0x1582   :  { %v5134_v16 = vpop.permute.xlu1 %5133  ;;  %v8520_v25 = vpop.permute.xlu0 %5254  ;;  %v5324_v18 = vmax.f32 %v5292_v60, 0.0  ;;  %v5353_v5 = vmul.f32 %v5321_v37, %v7700_v63 }
0x1583   :  { %v5347_v13 = vmul.f32 %v5315_v39, %v7706_v2  ;;  %v5271_v62 = vadd.f32 %v5134_v16, %v8516_v6  ;;  %v5352_v39 = vmul.f32 %v5320_v27, %v7702_v0  ;;  %v5385_v20 = vrot.slane %v5384_v4, 4 }
0x1584   :  { %v5378_v11 = vrot.slane %v5377_v8, 2 }
0x1585   :  { %v5303_v7 = vmax.f32 %v5271_v62, 0.0  ;;  %v5393_v44 = vadd.f32 %v5392_v14, %v5347_v13 }
0x1586   :  { %v5225_v28 = vpop.permute.xlu1 %5224  ;;  %v5210_v33 = vpop.permute.xlu0 %5209 }
0x1587   :  { %v5290_v42 = vadd.f32 %v5225_v28, %v5106_v23  ;;  %v5335_v56 = vmul.f32 %v5303_v7, %v7706_v2  ;;  %v5287_v16 = vadd.f32 %v7382_v12, %v5210_v33  ;;  %v5394_v27 = vrot.slane %v5393_v44, 4  ;;  %v5112_v23 = vld [vmem:[#allocation7 + $0xe0] sm:$0xff] }
0x1588   :  { %v5325_v7 = vmax.f32 %v5293_v21, 0.0  ;;  %v5356_v28 = vmul.f32 %v5324_v18, %v7702_v0  ;;  %v5386_v33 = vadd.f32 %v5385_v20, %v5384_v4  ;;  %v5379_v4 = vadd.f32 %v5378_v11, %v5377_v8  ;;  %v8549_v11 = vld [vmem:[#allocation7 + $0xf8] sm:$0xff] }
0x1589   :  { %v5322_v17 = vmax.f32 %v5290_v42, 0.0  ;;  %v5366_v22 = vadd.f32 %v5365_v41, %v5335_v56  ;;  %v5319_v47 = vmax.f32 %v5287_v16, 0.0  ;;  %v5409_v41 = vadd.f32 %v5353_v5, %v5352_v39  ;;  %v7385_v39 = vld [vmem:[#allocation7 + $0xd8] sm:$0xff]  ;;  %v8543_v5 = vld [vmem:[#allocation7 + $0xf0] sm:$0xff] }
0x158a   :  { %v5259_v24 = vpop.permute.xlu1 %5258  ;;  %v5229_v13 = vpop.permute.xlu0 %5228  ;;  %v5395_v12 = vadd.f32 %v5394_v27, %v5393_v44  ;;  %v5296_v16 = vadd.f32 %v8520_v25, %v5112_v23  ;;  %v5357_v18 = vmul.f32 %v5325_v7, %v7700_v63 }
0x158b   :  { %v5354_v62 = vmul.f32 %v5322_v17, %v7704_v1  ;;  %v5367_v29 = vrot.slane %v5366_v22, 4  ;;  %v5351_v3 = vmul.f32 %v5319_v47, %v7706_v2  ;;  %v5297_v14 = vadd.f32 %v5259_v24, %v8531_v54 }
0x158c   :  { %v5291_v60 = vadd.f32 %v7384_v32, %v5229_v13  ;;  %v5328_v23 = vmax.f32 %v5296_v16, 0.0  ;;  %v5396_v32 = vrot.slane %v5395_v12, 2 }
0x158d   :  { %v5368_v37 = vadd.f32 %v5367_v29, %v5366_v22  ;;  %v5402_v58 = vadd.f32 %v5401_v35, %v5351_v3  ;;  %v5410_v48 = vadd.f32 %v5409_v41, %v5354_v62  ;;  %v5329_v24 = vmax.f32 %v5297_v14, 0.0 }
0x158e   :  { %v5323_v42 = vmax.f32 %v5291_v60, 0.0  ;;  %v5244_v9 = vpop.permute.xlu1 %5243  ;;  %v5248_v56 = vpop.permute.xlu0 %5247  ;;  %v5387_v35 = vrot.slane %v5386_v33, 2  ;;  %v5418_v29 = vadd.f32 %v5357_v18, %v5356_v28 }
0x158f   :  { %v5294_v17 = vadd.f32 %v5244_v9, %v8537_v26  ;;  %v5403_v47 = vrot.slane %v5402_v58, 4  ;;  %v5295_v21 = vadd.f32 %v7385_v39, %v5248_v56  ;;  %v5369_v20 = vrot.slane %v5368_v37, 2 }
0x1590   :  { %v5355_v13 = vmul.f32 %v5323_v42, %v7706_v2  ;;  %v5361_v41 = vmul.f32 %v5329_v24, %v7700_v63  ;;  %v5380_v56 = vrot.slane %v5379_v4, 1 }
0x1591   :  { %v5326_v22 = vmax.f32 %v5294_v17, 0.0  ;;  %v5404_v44 = vadd.f32 %v5403_v47, %v5402_v58  ;;  %v5327_v25 = vmax.f32 %v5295_v21, 0.0  ;;  %v5370_v7 = vadd.f32 %v5369_v20, %v5368_v37  ;;  %v8552_v17 = vpop.eup %7213 }
0x1592   :  { %v5411_v27 = vadd.f32 %v5410_v48, %v5355_v13  ;;  %v5263_v62 = vpop.permute.xlu1 %5262  ;;  %v5388_v48 = vadd.f32 %v5387_v35, %v5386_v33  ;;  %v5360_v47 = vmul.f32 %v5328_v23, %v7702_v0  ;;  %v5397_v21 = vadd.f32 %v5396_v32, %v5395_v12 }
0x1593   :  { %v5358_v3 = vmul.f32 %v5326_v22, %v7704_v1  ;;  %v5298_v14 = vadd.f32 %v5263_v62, %v8543_v5  ;;  %v5405_v60 = vrot.slane %v5404_v44, 2  ;;  %v5359_v58 = vmul.f32 %v5327_v25, %v7706_v2 }
0x1594   :  { %v5412_v8 = vrot.slane %v5411_v27, 4  ;;  %v5371_v20 = vrot.slane %v5370_v7, 1  ;;  %v5427_v22 = vadd.f32 %v5361_v41, %v5360_v47  ;;  %v5389_v33 = vrot.slane %v5388_v48, 1 }
0x1595   :  { %v5419_v42 = vadd.f32 %v5418_v29, %v5358_v3  ;;  %v5330_v9 = vmax.f32 %v5298_v14, 0.0  ;;  %v5406_v18 = vadd.f32 %v5405_v60, %v5404_v44  ;;  %v5381_v29 = vadd.f32 %v5380_v56, %v5379_v4  ;;  %v8563_v4 = vld [vmem:[%s8889_s7] ss:$0 sm:$0xff] }
0x1596   :  { %v5413_v28 = vadd.f32 %v5412_v8, %v5411_v27  ;;  %v5267_v16 = vpop.permute.xlu1 %5266  ;;  %v5390_v60 = vadd.f32 %v5389_v33, %v5388_v48 }
0x1597   :  { %v5420_v13 = vadd.f32 %v5419_v42, %v5359_v58  ;;  %v5362_v39 = vmul.f32 %v5330_v9, %v7704_v1  ;;  %v5299_v24 = vadd.f32 %v5267_v16, %v8549_v11  ;;  %v5398_v42 = vrot.slane %v5397_v21, 1 }
0x1598   :  { %v5414_v37 = vrot.slane %v5413_v28, 2  ;;  %v5407_v58 = vrot.slane %v5406_v18, 1  ;;  %v5372_v9 = vadd.f32 %v5371_v20, %v5370_v7  ;;  %v5437_v41 = vadd.f32 %v8563_v4, %v5381_v29 }
0x1599   :  { %v5421_v25 = vrot.slane %v5420_v13, 4  ;;  %v5331_v62 = vmax.f32 %v5299_v24, 0.0  ;;  %v5428_v14 = vadd.f32 %v5427_v22, %v5362_v39  ;;  %v5399_v16 = vadd.f32 %v5398_v42, %v5397_v21 }
0x159a   :  { %v5415_v35 = vadd.f32 %v5414_v37, %v5413_v28  ;;  %v5872_v27 = vpop.permute.xlu1 %5871  ;;  %v5408_v47 = vadd.f32 %v5407_v58, %v5406_v18  ;;  %v5438_v37 = vadd.f32 %v8563_v4, %v5390_v60  ;;  %v5452_v20 = vrot.slane %v5437_v41, 7 }
0x159b   :  { %v5422_v3 = vadd.f32 %v5421_v25, %v5420_v13  ;;  %v5363_v23 = vmul.f32 %v5331_v62, %v7706_v2  ;;  %v5874_v8 = vmul.f32 %v8552_v17, %v5872_v27  ;;  %v5436_v13 = vadd.f32 %v8563_v4, %v5372_v9 }
0x159c   :  { %v5416_v12 = vrot.slane %v5415_v35, 1  ;;  %v5440_v25 = vadd.f32 %v8563_v4, %v5408_v47  ;;  %v5439_v62 = vadd.f32 %v8563_v4, %v5399_v16  ;;  %v5454_v18 = vrot.slane %v5438_v37, 6 }
0x159d   :  { %v5423_v44 = vrot.slane %v5422_v3, 2  ;;  %v5429_v32 = vadd.f32 %v5428_v14, %v5363_v23  ;;  %5876 = vrot.lane.b32.xlu1 %v5874_v8, %s7546_s4  ;;  %v5453_v21 = vsel %vm692_vm2, %v5452_v20, %v5436_v13  ;;  %v5869_v16 = vmul.f32 %v8552_v17, %v8399_v61 }
0x159e   :  { %v5417_v7 = vadd.f32 %v5416_v12, %v5415_v35  ;;  %v5458_v14 = vrot.slane %v5440_v25, 4  ;;  %v5456_v23 = vrot.slane %v5439_v62, 5 }
0x159f   :  { %v5424_v56 = vadd.f32 %v5423_v44, %v5422_v3  ;;  %v5430_v28 = vrot.slane %v5429_v32, 4  ;;  %v5455_v3 = vsel %vm695_vm3, %v5454_v18, %v5453_v21 }
0x15a0   :  { %v5441_v29 = vadd.f32 %v8563_v4, %v5417_v7  ;;  %v5457_v12 = vsel %vm698_vm4, %v5456_v23, %v5455_v3 }
0x15a1   :  { %v5425_v39 = vrot.slane %v5424_v56, 1  ;;  %v5431_v24 = vadd.f32 %v5430_v28, %v5429_v32  ;;  %v5459_v44 = vsel %vm701_vm5, %v5458_v14, %v5457_v12 }
0x15a2   :  { %v5460_v42 = vrot.slane %v5441_v29, 3 }
0x15a3   :  { %v5426_v48 = vadd.f32 %v5425_v39, %v5424_v56  ;;  %v5432_v22 = vrot.slane %v5431_v24, 2 }
0x15a4   :  { %v5461_v32 = vsel %vm704_vm6, %v5460_v42, %v5459_v44 }
0x15a5   :  { %v5433_v33 = vadd.f32 %v5432_v22, %v5431_v24  ;;  %v5442_v27 = vadd.f32 %v8563_v4, %v5426_v48 }
0x15a7   :  { %v5434_v35 = vrot.slane %v5433_v33, 1  ;;  %v5462_v58 = vrot.slane %v5442_v27, 2 }
0x15a9   :  { %v5435_v8 = vadd.f32 %v5434_v35, %v5433_v33  ;;  %v5463_v56 = vsel %vm707_vm7, %v5462_v58, %v5461_v32 }
0x15ab   :  { %v5443_v9 = vadd.f32 %v8563_v4, %v5435_v8 }
0x15ad   :  { %v5464_v60 = vrot.slane %v5443_v9, 1 }
0x15af   :  { %v5465_v28 = vsel %vm710_vm8, %v5464_v60, %v5463_v56 }
0x15b0   :  { %5467 = vmax.xlane.f32.xlu0 %v5465_v28 }
0x160f   :  { %v5877_v47 = vpop.permute.xlu1 %5876 }
0x1610   :  { %v5879_v7 = vadd.f32 %v5877_v47, %v5869_v16 }
0x1612   :  { %7215 = vtanh.f32 %v5879_v7 }
0x161f   :  { %v7216_v39 = vpop.eup %7215 }
0x1620   :  { %5882 = vrot.lane.b32.xlu0 %v7216_v39, %s7545_s3 }
0x1639   :  { %v5468_v24 = vpop.xlane.xlu0 %5467 }
0x163a   :  { %v5470_v20 = vrot.slane %v5468_v24, 1  ;;  %v5471_v48 = vrot.slane %v5468_v24, 2  ;;  %v5472_v22 = vrot.slane %v5468_v24, 3  ;;  %v5473_v33 = vrot.slane %v5468_v24, 4 }
0x163b   :  { %v5474_v21 = vrot.slane %v5468_v24, 5  ;;  %v5475_v18 = vrot.slane %v5468_v24, 6  ;;  %v5476_v35 = vrot.slane %v5468_v24, 7  ;;  %v5485_v3 = vsub.f32 %v5436_v13, %v5468_v24 }
0x163c   :  { %v5486_v14 = vsub.f32 %v5437_v41, %v5470_v20  ;;  %v5487_v23 = vsub.f32 %v5438_v37, %v5471_v48  ;;  %v5488_v8 = vsub.f32 %v5439_v62, %v5472_v22  ;;  %v5489_v42 = vsub.f32 %v5440_v25, %v5473_v33 }
0x163d   :  { %v5490_v61 = vsub.f32 %v5441_v29, %v5474_v21  ;;  %v5491_v58 = vsub.f32 %v5442_v27, %v5475_v18  ;;  %v5493_v12 = vmul.f32 1.442695, %v5485_v3  ;;  %v5492_v56 = vsub.f32 %v5443_v9, %v5476_v35 }
0x163e   :  { %v5495_v44 = vmul.f32 1.442695, %v5486_v14  ;;  %v5497_v32 = vmul.f32 1.442695, %v5487_v23  ;;  %v5499_v60 = vmul.f32 1.442695, %v5488_v8 }
0x163f   :  { %7217 = vpow2.f32 %v5493_v12  ;;  %v5501_v28 = vmul.f32 1.442695, %v5489_v42  ;;  %v5503_v16 = vmul.f32 1.442695, %v5490_v61  ;;  %v5505_v47 = vmul.f32 1.442695, %v5491_v58 }
0x1640   :  { %7219 = vpow2.f32 %v5495_v44  ;;  %v5507_v7 = vmul.f32 1.442695, %v5492_v56 }
0x1641   :  { %7221 = vpow2.f32 %v5497_v32 }
0x1642   :  { %7223 = vpow2.f32 %v5499_v60  ;;  %v8590_v60 = vld [vmem:[#allocation5] sm:$0xff] }
0x1643   :  { %7225 = vpow2.f32 %v5501_v28 }
0x1644   :  { %7227 = vpow2.f32 %v5503_v16 }
0x1645   :  { %7229 = vpow2.f32 %v5505_v47 }
0x1646   :  { %7231 = vpow2.f32 %v5507_v7 }
0x164c   :  { %v7218_v41 = vpop.eup %7217 }
0x164d   :  { %v7220_v13 = vpop.eup %7219 }
0x164e   :  { %v7222_v37 = vpop.eup %7221  ;;  %v5517_v25 = vrot.slane %v7220_v13, 7 }
0x164f   :  { %v7224_v62 = vpop.eup %7223  ;;  %v5519_v29 = vrot.slane %v7222_v37, 6 }
0x1650   :  { %v7226_v27 = vpop.eup %7225  ;;  %v5518_v9 = vsel %vm692_vm2, %v5517_v25, %v7218_v41  ;;  %v5521_v39 = vrot.slane %v7224_v62, 5 }
0x1651   :  { %v7228_v24 = vpop.eup %7227  ;;  %v5520_v20 = vsel %vm695_vm3, %v5519_v29, %v5518_v9  ;;  %v5523_v48 = vrot.slane %v7226_v27, 4 }
0x1652   :  { %v7230_v22 = vpop.eup %7229  ;;  %v5522_v33 = vsel %vm698_vm4, %v5521_v39, %v5520_v20  ;;  %v5525_v21 = vrot.slane %v7228_v24, 3 }
0x1653   :  { %v7232_v18 = vpop.eup %7231  ;;  %v5524_v35 = vsel %vm701_vm5, %v5523_v48, %v5522_v33  ;;  %v5527_v3 = vrot.slane %v7230_v22, 2  ;;  %v8595_v33 = vld [vmem:[#allocation5 + $0x8] sm:$0xff] }
0x1654   :  { %v5526_v14 = vsel %vm704_vm6, %v5525_v21, %v5524_v35  ;;  %v5529_v23 = vrot.slane %v7232_v18, 1  ;;  %v7387_v35 = vld [vmem:[#allocation5 + $0x10] sm:$0xff] }
0x1655   :  { %v5528_v8 = vsel %vm707_vm7, %v5527_v3, %v5526_v14 }
0x1656   :  { %v5530_v42 = vsel %vm710_vm8, %v5529_v23, %v5528_v8 }
0x1657   :  { %5532 = vadd.xlane.f32.xlu1 %v5530_v42  ;;  %v8600_v42 = vld [vmem:[#allocation5 + $0x18] sm:$0xff] }
0x16e0   :  { %v5533_v61 = vpop.xlane.xlu1 %5532 }
0x16e1   :  { %7233 = vrcp.f32 %v5533_v61 }
0x16ee   :  { %v7234_v58 = vpop.eup %7233 }
0x16ef   :  { %v5551_v12 = vmul.f32 %v7234_v58, %v7218_v41  ;;  %v5536_v44 = vrot.slane %v7234_v58, 1  ;;  %v5540_v32 = vrot.slane %v7234_v58, 5  ;;  %v5541_v56 = vrot.slane %v7234_v58, 6 }
0x16f0   :  { %v5537_v28 = vrot.slane %v7234_v58, 2  ;;  %v5538_v25 = vrot.slane %v7234_v58, 3  ;;  %v5539_v9 = vrot.slane %v7234_v58, 4  ;;  %v5542_v21 = vrot.slane %v7234_v58, 7 }
0x16f1   :  { %v5578_v16 = vrot.slane %v5551_v12, %v7680_v46  ;;  %v5552_v47 = vmul.f32 %v7220_v13, %v5536_v44  ;;  %v5556_v7 = vmul.f32 %v7228_v24, %v5540_v32  ;;  %v5557_v41 = vmul.f32 %v7230_v22, %v5541_v56  ;;  %v5572_v32 = vld [vmem:[#allocation5 + $0x68] sm:$0xff] }
0x16f2   :  { %v5553_v29 = vmul.f32 %v7222_v37, %v5537_v28  ;;  %v5554_v24 = vmul.f32 %v7224_v62, %v5538_v25  ;;  %v5555_v37 = vmul.f32 %v7226_v27, %v5539_v9  ;;  %v5558_v58 = vmul.f32 %v7232_v18, %v5542_v21 }
0x16f3   :  { %v5607_v39 = vmul.f32 %v5578_v16, %v8590_v60  ;;  %v5582_v20 = vrot.slane %v5552_v47, %v7680_v46  ;;  %v5840_v48 = vrot.slane %v5552_v47, 7  ;;  %v5598_v13 = vrot.slane %v5556_v7, %v7680_v46  ;;  %v8608_v47 = vld [vmem:[#allocation5 + $0x20] sm:$0xff] }
0x16f4   :  { %v5842_v23 = vrot.slane %v5553_v29, 6  ;;  %v5608_v8 = vmul.f32 %v5578_v16, %v8595_v33  ;;  %v5602_v22 = vrot.slane %v5557_v41, %v7680_v46  ;;  %v5844_v44 = vrot.slane %v5554_v24, 5 }
0x16f5   :  { %5623 = vadd.xlane.f32.xlu1 %v5607_v39  ;;  %v5609_v3 = vmul.f32 %v7387_v35, %v5582_v20  ;;  %v5841_v14 = vsel %vm692_vm2, %v5840_v48, %v5551_v12  ;;  %v5618_v61 = vmul.f32 %v5598_v13, %v8427_v52  ;;  %v5846_v56 = vrot.slane %v5555_v37, 4  ;;  %v8618_v35 = vld [vmem:[#allocation5 + $0x28] sm:$0xff] }
0x16f6   :  { %v5843_v12 = vsel %vm695_vm3, %v5842_v23, %v5841_v14  ;;  %v5848_v28 = vrot.slane %v5556_v7, 3  ;;  %v5610_v62 = vmul.f32 %v5582_v20, %v8600_v42  ;;  %v5586_v27 = vrot.slane %v5553_v29, %v7680_v46  ;;  %v5574_v7 = vld [vmem:[#allocation5 + $0x78] sm:$0xff]  ;;  %v8622_v23 = vld [vmem:[#allocation5 + $0x30] sm:$0xff] }
0x16f7   :  { %5627 = vadd.xlane.f32.xlu0 %v5609_v3  ;;  %v5845_v16 = vsel %vm698_vm4, %v5844_v44, %v5843_v12  ;;  %v5850_v25 = vrot.slane %v5557_v41, 2  ;;  %v5620_v18 = vmul.f32 %v5602_v22, %v5572_v32  ;;  %v5606_v9 = vrot.slane %v5558_v58, %v7680_v46  ;;  %v8629_v32 = vld [vmem:[#allocation5 + $0x40] sm:$0xff]  ;;  %v8632_v12 = vld [vmem:[#allocation5 + $0x48] sm:$0xff] }
0x16f8   :  { %v5847_v52 = vsel %vm701_vm5, %v5846_v56, %v5845_v16  ;;  %v5852_v48 = vrot.slane %v5558_v58, 1  ;;  %v5611_v29 = vmul.f32 %v5586_v27, %v8608_v47  ;;  %v5612_v3 = vmul.f32 %v5586_v27, %v8618_v35  ;;  %v8638_v27 = vld [vmem:[#allocation5 + $0x60] sm:$0xff]  ;;  %v8641_v16 = vld [vmem:[#allocation5 + $0x70] sm:$0xff] }
0x16f9   :  { %5625 = vadd.xlane.f32.xlu1 %v5608_v8  ;;  %v5849_v39 = vsel %vm704_vm6, %v5848_v28, %v5847_v52  ;;  %v5622_v41 = vmul.f32 %v5606_v9, %v5574_v7  ;;  %v5590_v14 = vrot.slane %v5554_v24, %v7680_v46  ;;  %v5594_v44 = vrot.slane %v5555_v37, %v7680_v46  ;;  %v8635_v28 = vld [vmem:[#allocation5 + $0x50] sm:$0xff] }
0x16fa   :  { %v5851_v21 = vsel %vm707_vm7, %v5850_v25, %v5849_v39  ;;  %v5619_v37 = vmul.f32 %v5602_v22, %v8638_v27  ;;  %v5621_v52 = vmul.f32 %v5606_v9, %v8641_v16  ;;  %v5883_v25 = vpop.permute.xlu0 %5882 }
0x16fb   :  { %5645 = vadd.xlane.f32.xlu0 %v5618_v61  ;;  %v8616_v20 = vsel %vm710_vm8, %v5852_v48, %v5851_v21  ;;  %v5613_v8 = vmul.f32 %v5590_v14, %v8622_v23  ;;  %v8625_v61 = vld [vmem:[#allocation5 + $0x38] sm:$0xff]  ;;  %v5615_v56 = vmul.f32 %v5594_v44, %v8629_v32  ;;  %v5616_v24 = vmul.f32 %v5594_v44, %v8632_v12 }
0x16fc   :  { %8911 = vst [vmem:[#allocation29_spill] sm:$0xff] %v8616_v20  ;;  %v5614_v58 = vmul.f32 %v5590_v14, %v8625_v61 }
0x16fd   :  { %5629 = vadd.xlane.f32.xlu1 %v5610_v62  ;;  %v5617_v62 = vmul.f32 %v5598_v13, %v8635_v28 }
0x16ff   :  { %5649 = vadd.xlane.f32.xlu0 %v5620_v18  ;;  %v5885_v18 = vmul.f32 %v8552_v17, %v5883_v25 }
0x1701   :  { %5631 = vadd.xlane.f32.xlu1 %v5611_v29 }
0x1703   :  { %5653 = vadd.xlane.f32.xlu0 %v5622_v41 }
0x1705   :  { %5633 = vadd.xlane.f32.xlu1 %v5612_v3 }
0x1709   :  { %5635 = vadd.xlane.f32.xlu1 %v5613_v8 }
0x170d   :  { %5637 = vadd.xlane.f32.xlu1 %v5614_v58 }
0x1711   :  { %5639 = vadd.xlane.f32.xlu1 %v5615_v56 }
0x1715   :  { %5641 = vadd.xlane.f32.xlu1 %v5616_v24 }
0x1719   :  { %5643 = vadd.xlane.f32.xlu1 %v5617_v62 }
0x171d   :  { %5647 = vadd.xlane.f32.xlu1 %v5619_v37 }
0x1721   :  { %5651 = vadd.xlane.f32.xlu1 %v5621_v52 }
0x1732   :  { %5887 = vrot.lane.b32.xlu1 %v5885_v18, %s7546_s4 }
0x177e   :  { %v5624_v39 = vpop.xlane.xlu1 %5623 }
0x177f   :  { %v5674_v25 = vrot.slane %v5624_v39, %v7668_v36 }
0x1780   :  { %v5628_v41 = vpop.xlane.xlu0 %5627 }
0x1781   :  { %v5683_v17 = vrot.slane %v5628_v41, %v7668_v36 }
0x1782   :  { %v5626_v48 = vpop.xlane.xlu1 %5625 }
0x1783   :  { %v5678_v24 = vrot.slane %v5626_v48, %v7670_v38 }
0x1784   :  { %v5646_v14 = vpop.xlane.xlu0 %5645 }
0x1785   :  { %v5679_v48 = vsel %vm928_vm9, %v5678_v24, %v5674_v25 }
0x1786   :  { %v5630_v7 = vpop.xlane.xlu1 %5629 }
0x1787   :  { %v5687_v58 = vrot.slane %v5630_v7, %v7670_v38 }
0x1788   :  { %v5650_v9 = vpop.xlane.xlu0 %5649 }
0x1789   :  { %v5688_v18 = vsel %vm928_vm9, %v5687_v58, %v5683_v17  ;;  %v5732_v58 = vrot.slane %v5650_v9, %v7670_v38 }
0x178a   :  { %v5632_v13 = vpop.xlane.xlu1 %5631  ;;  %v5743_v39 = vsel %vm692_vm2, %v5688_v18, %v5679_v48  ;;  %v7390_v48 = vld [vmem:[#allocation8 + $0x40] sm:$0xff] }
0x178b   :  { %v5692_v37 = vrot.slane %v5632_v13, %v7668_v36 }
0x178e   :  { %v5634_v21 = vpop.xlane.xlu1 %5633 }
0x178f   :  { %v5696_v44 = vrot.slane %v5634_v21, %v7670_v38 }
0x1791   :  { %v5697_v21 = vsel %vm928_vm9, %v5696_v44, %v5692_v37 }
0x1792   :  { %v5636_v29 = vpop.xlane.xlu1 %5635  ;;  %v5744_v44 = vsel %vm695_vm3, %v5697_v21, %v5743_v39  ;;  %v8912_v21 = vmov 0.0   ;;  %v5010_v39 = vpop.f32.mrf.mxu1 }
0x1793   :  { %v5701_v7 = vrot.slane %v5636_v29, %v7668_v36  ;;  %v5654_v29 = vpop.xlane.xlu0 %5653 }
0x1796   :  { %v5638_v3 = vpop.xlane.xlu1 %5637 }
0x1797   :  { %v5705_v62 = vrot.slane %v5638_v3, %v7670_v38  ;;  %v5723_v3 = vrot.slane %v5646_v14, %v7670_v38 }
0x1799   :  { %v5706_v13 = vsel %vm928_vm9, %v5705_v62, %v5701_v7  ;;  %v5741_v62 = vrot.slane %v5654_v29, %v7670_v38  ;;  %v7388_v7 = vld [vmem:[#allocation8 + $0x58] sm:$0xff] }
0x179a   :  { %v5640_v22 = vpop.xlane.xlu1 %5639  ;;  %v5745_v17 = vsel %vm698_vm4, %v5706_v13, %v5744_v44  ;;  %v7392_v13 = vld [vmem:[#allocation8 + $0x28] sm:$0xff] }
0x179b   :  { %v5710_v41 = vrot.slane %v5640_v22, %v7668_v36 }
0x179e   :  { %v5642_v8 = vpop.xlane.xlu1 %5641 }
0x179f   :  { %v5714_v52 = vrot.slane %v5642_v8, %v7670_v38 }
0x17a2   :  { %v5644_v56 = vpop.xlane.xlu1 %5643 }
0x17a3   :  { %v5719_v20 = vrot.slane %v5644_v56, %v7668_v36  ;;  %v5715_v56 = vsel %vm928_vm9, %v5714_v52, %v5710_v41  ;;  %v7389_v41 = vld [vmem:[%s8890_s8 + $0x8] sm:$0xff] }
0x17a5   :  { %v5724_v22 = vsel %vm928_vm9, %v5723_v3, %v5719_v20  ;;  %v7391_v3 = vld [vmem:[%s8890_s8] sm:$0xff] }
0x17a6   :  { %v5648_v43 = vpop.xlane.xlu1 %5647 }
0x17a7   :  { %v5728_v8 = vrot.slane %v5648_v43, %v7668_v36  ;;  %v5746_v43 = vsel %vm701_vm5, %v5715_v56, %v5745_v17  ;;  %v7394_v17 = vld [vmem:[%s8887_s5] ss:$0 sm:$0xff] }
0x17a8   :  { %v5747_v9 = vsel %vm704_vm6, %v5724_v22, %v5746_v43 }
0x17a9   :  { %v5733_v24 = vsel %vm928_vm9, %v5732_v58, %v5728_v8  ;;  %v7393_v8 = vld [vmem:[#allocation8 + $0x10] sm:$0xff] }
0x17aa   :  { %v5652_v14 = vpop.xlane.xlu1 %5651  ;;  %v5748_v25 = vsel %vm707_vm7, %v5733_v24, %v5747_v9 }
0x17ab   :  { %v5737_v37 = vrot.slane %v5652_v14, %v7668_v36  ;;  %v6053_v36 = vld [vmem:[#allocation7 + $0xa8] sm:$0xff] }
0x17ad   :  { %v5742_v52 = vsel %vm928_vm9, %v5741_v62, %v5737_v37 }
0x17ae   :  { %v5888_v18 = vpop.permute.xlu1 %5887  ;;  %v5749_v20 = vsel %vm710_vm8, %v5742_v52, %v5748_v25 }
0x17af   :  { %7034 = vmatmul.mubr.msk.f32.vlgmr.msra.gmra.mxu1 %vm1000_vm10, %v5749_v20  ;;  %6869 = vmatmul.mubr.msk.f32.vlgmr.msra.gmra.mxu0 %vm146_vm1, %v5888_v18 }
0x17b0   :  { %7037 = vmatpush3.msra.mxu1 %v7388_v7  ;;  %7044 = vmatprep.mubr.msk.f32.mxu1 %vm7548_vm0, %v8912_v21 }
0x17b1   :  { %7038 = vmatprep.subr.mxu1 %v8912_v21  ;;  %7048 = vmatpush3.msra.mxu0 %v7389_v41 }
0x17b2   :  { %7039 = vmatpush3.msra.mxu1 %v7390_v48  ;;  %7049 = vmatprep.subr.mxu0 %v8912_v21 }
0x17b3   :  { %7040 = vmatprep.subr.mxu1 %v8912_v21  ;;  %7050 = vmatpush3.msra.mxu0 %v7391_v3  ;;  %v6036_v3 = vld [vmem:[#allocation7 + $0x20] sm:$0xff] }
0x17b4   :  { %7041 = vmatpush3.msra.mxu1 %v7392_v13  ;;  %7051 = vmatprep.mubr.msk.f32.mxu0 %vm7548_vm0, %v8912_v21 }
0x17b5   :  { %7042 = vmatprep.subr.mxu1 %v8912_v21 }
0x17b6   :  { %7043 = vmatpush3.msra.mxu1 %v7393_v8  ;;  %v6038_v8 = vld [vmem:[#allocation7 + $0x30] sm:$0xff] }
0x17b7   :  { %7045 = vmatmul.mubr.msk.f32.vlgmr.msra.gmra.mxu1 %vm146_vm1, %v5888_v18 }
0x186f   :  { %v5818_v58 = vpop.f32.mrf.mxu1  ;;  %v5957_v29 = vpop.f32.mrf.mxu0 }
0x1870   :  { %v8694_v56 = vadd.f32 %v5818_v58, %v5010_v39  ;;  %v7395_v39 = vld [vmem:[#allocation7 + $0x28] sm:$0xff] }
0x1871   :  { %v7035_v44 = vpop.f32.mrf.mxu1 }
0x1872   :  { %8913 = vst [vmem:[#allocation30_spill] sm:$0xff] %v8694_v56 }
0x1877   :  { %v6027_v22 = vpop.f32.mrf.mxu1 }
0x1878   :  { %v6031_v24 = vadd.f32 %v7394_v17, %v6027_v22  ;;  %v6040_v17 = vld [vmem:[#allocation7 + $0x40] sm:$0xff] }
0x1879   :  { %v7046_v14 = vpop.f32.mrf.mxu1 }
0x187a   :  { %v6086_v62 = vrot.slane %v6031_v24, %v7675_v40  ;;  %v6105_v43 = vrot.slane %v6031_v24, %v7678_v45  ;;  %v6067_v37 = vrot.slane %v6031_v24, %v7680_v46  ;;  %v6124_v9 = vrot.slane %v6031_v24, %v7684_v49  ;;  %v6032_v14 = vld [vmem:[#allocation7] sm:$0xff] }
0x187b   :  { %v6143_v25 = vrot.slane %v6031_v24, %v7687_v51  ;;  %v6162_v40 = vrot.slane %v6031_v24, %v7690_v53  ;;  %v6181_v45 = vrot.slane %v6031_v24, %v7693_v55  ;;  %v6200_v49 = vrot.slane %v6031_v24, %v7696_v57 }
0x187c   :  { %6092 = vbcast.lane.b32.xlu1 %v6086_v62, 264  ;;  %6088 = vbcast.lane.b32.xlu0 %v6086_v62, 256 }
0x1880   :  { %6107 = vbcast.lane.b32.xlu1 %v6105_v43, 256  ;;  %6111 = vbcast.lane.b32.xlu0 %v6105_v43, 264 }
0x1884   :  { %6073 = vbcast.lane.b32.xlu0 %v6067_v37, 264  ;;  %6069 = vbcast.lane.b32.xlu1 %v6067_v37, 256 }
0x1888   :  { %6126 = vbcast.lane.b32.xlu0 %v6124_v9, 256  ;;  %6096 = vbcast.lane.b32.xlu1 %v6086_v62, 272 }
0x188c   :  { %6115 = vbcast.lane.b32.xlu0 %v6105_v43, 272  ;;  %6130 = vbcast.lane.b32.xlu1 %v6124_v9, 264 }
0x1890   :  { %6149 = vbcast.lane.b32.xlu0 %v6143_v25, 264  ;;  %6145 = vbcast.lane.b32.xlu1 %v6143_v25, 256 }
0x1894   :  { %6100 = vbcast.lane.b32.xlu0 %v6086_v62, 280  ;;  %6077 = vbcast.lane.b32.xlu1 %v6067_v37, 272 }
0x1898   :  { %6164 = vbcast.lane.b32.xlu0 %v6162_v40, 256  ;;  %6134 = vbcast.lane.b32.xlu1 %v6124_v9, 272 }
0x189c   :  { %6119 = vbcast.lane.b32.xlu0 %v6105_v43, 280  ;;  %6168 = vbcast.lane.b32.xlu1 %v6162_v40, 264 }
0x18a0   :  { %6183 = vbcast.lane.b32.xlu0 %v6181_v45, 256  ;;  %6153 = vbcast.lane.b32.xlu1 %v6143_v25, 272 }
0x18a4   :  { %6081 = vbcast.lane.b32.xlu0 %v6067_v37, 280  ;;  %6187 = vbcast.lane.b32.xlu1 %v6181_v45, 264  ;;  %v7396_v37 = vld [vmem:[#allocation7 + $0x38] sm:$0xff] }
0x18a8   :  { %6172 = vbcast.lane.b32.xlu0 %v6162_v40, 272  ;;  %6138 = vbcast.lane.b32.xlu1 %v6124_v9, 280 }
0x18ac   :  { %6206 = vbcast.lane.b32.xlu0 %v6200_v49, 264  ;;  %6202 = vbcast.lane.b32.xlu1 %v6200_v49, 256 }
0x18b0   :  { %6191 = vbcast.lane.b32.xlu0 %v6181_v45, 272  ;;  %6157 = vbcast.lane.b32.xlu1 %v6143_v25, 280 }
0x18b4   :  { %6210 = vbcast.lane.b32.xlu0 %v6200_v49, 272  ;;  %6176 = vbcast.lane.b32.xlu1 %v6162_v40, 280  ;;  %v7397_v40 = vld [vmem:[#allocation7 + $0x48] sm:$0xff] }
0x18b8   :  { %6214 = vbcast.lane.b32.xlu0 %v6200_v49, 280  ;;  %6195 = vbcast.lane.b32.xlu1 %v6181_v45, 280 }
0x18ee   :  { %v6093_v51 = vpop.permute.xlu1 %6092  ;;  %v6089_v53 = vpop.permute.xlu0 %6088 }
0x18ef   :  { %v6221_v58 = vadd.f32 %v7395_v39, %v6093_v51  ;;  %v6220_v29 = vadd.f32 %v6089_v53, %v6036_v3  ;;  %v6034_v39 = vld [vmem:[#allocation7 + $0x10] sm:$0xff] }
0x18f1   :  { %v6253_v62 = vmax.f32 %v6221_v58, 0.0  ;;  %v6252_v43 = vmax.f32 %v6220_v29, 0.0 }
0x18f2   :  { %v6108_v52 = vpop.permute.xlu1 %6107  ;;  %v6112_v55 = vpop.permute.xlu0 %6111 }
0x18f3   :  { %v6224_v25 = vadd.f32 %v6108_v52, %v6040_v17  ;;  %v6225_v45 = vadd.f32 %v7397_v40, %v6112_v55  ;;  %v6285_v53 = vmul.f32 %v6253_v62, %v7700_v63  ;;  %v6284_v3 = vmul.f32 %v6252_v43, %v7702_v0  ;;  %v7399_v40 = vld [vmem:[#allocation7 + $0x50] sm:$0xff] }
0x18f5   :  { %v6256_v58 = vmax.f32 %v6224_v25, 0.0  ;;  %v6257_v29 = vmax.f32 %v6225_v45, 0.0  ;;  %v6048_v45 = vld [vmem:[#allocation7 + $0x80] sm:$0xff] }
0x18f6   :  { %v6074_v18 = vpop.permute.xlu0 %6073  ;;  %v6070_v20 = vpop.permute.xlu1 %6069 }
0x18f7   :  { %v6217_v31 = vadd.f32 %v7398_v30, %v6074_v18  ;;  %v6216_v15 = vadd.f32 %v6070_v20, %v6032_v14  ;;  %v6046_v20 = vld [vmem:[#allocation7 + $0x70] sm:$0xff]  ;;  %v7400_v14 = vld [vmem:[#allocation7 + $0x60] sm:$0xff]  ;;  %v6289_v25 = vmul.f32 %v6257_v29, %v7700_v63 }
0x18f9   :  { %v6249_v17 = vmax.f32 %v6217_v31, 0.0  ;;  %v6248_v55 = vmax.f32 %v6216_v15, 0.0 }
0x18fa   :  { %v6127_v7 = vpop.permute.xlu0 %6126  ;;  %v6097_v21 = vpop.permute.xlu1 %6096 }
0x18fb   :  { %v6222_v24 = vadd.f32 %v6097_v21, %v6038_v8  ;;  %v6045_v21 = vld [vmem:[#allocation7 + $0x68] sm:$0xff]  ;;  %v6228_v62 = vadd.f32 %v7400_v14, %v6127_v7 }
0x18fd   :  { %v6254_v51 = vmax.f32 %v6222_v24, 0.0  ;;  %v6321_v24 = vadd.f32 %v6285_v53, %v6284_v3 }
0x18fe   :  { %v6116_v41 = vpop.permute.xlu0 %6115  ;;  %v6131_v48 = vpop.permute.xlu1 %6130 }
0x18ff   :  { %v6226_v10 = vadd.f32 %v7399_v40, %v6116_v41  ;;  %v6229_v30 = vadd.f32 %v6131_v48, %v6045_v21  ;;  %v6281_v41 = vmul.f32 %v6249_v17, %v7700_v63  ;;  %v6280_v48 = vmul.f32 %v6248_v55, %v7702_v0 }
0x1901   :  { %v6258_v3 = vmax.f32 %v6226_v10, 0.0  ;;  %v6261_v7 = vmax.f32 %v6229_v30, 0.0  ;;  %v6312_v34 = vadd.f32 %v6281_v41, %v6280_v48  ;;  %v6047_v30 = vld [vmem:[#allocation7 + $0x78] sm:$0xff] }
0x1902   :  { %v6150_v57 = vpop.permute.xlu0 %6149  ;;  %v6146_v13 = vpop.permute.xlu1 %6145 }
0x1903   :  { %v6232_v40 = vadd.f32 %v6146_v13, %v6048_v45  ;;  %v6290_v17 = vmul.f32 %v6258_v3, %v7704_v1  ;;  %v6293_v55 = vmul.f32 %v6261_v7, %v7700_v63 }
0x1906   :  { %v6101_v44 = vpop.permute.xlu0 %6100  ;;  %v6078_v22 = vpop.permute.xlu1 %6077 }
0x1907   :  { %v6223_v9 = vadd.f32 %v7396_v37, %v6101_v44  ;;  %v6286_v37 = vmul.f32 %v6254_v51, %v7704_v1  ;;  %v6218_v18 = vadd.f32 %v6078_v22, %v6034_v39  ;;  %v7402_v39 = vld [vmem:[#allocation7 + $0x88] sm:$0xff] }
0x1909   :  { %v6255_v8 = vmax.f32 %v6223_v9, 0.0  ;;  %v6288_v9 = vmul.f32 %v6256_v58, %v7702_v0  ;;  %v6322_v22 = vadd.f32 %v6321_v24, %v6286_v37  ;;  %v6250_v21 = vmax.f32 %v6218_v18, 0.0  ;;  %v7403_v24 = vld [vmem:[#allocation7 + $0xa0] sm:$0xff] }
0x190a   :  { %v8707_v49 = vpop.permute.xlu0 %6164  ;;  %v6135_v56 = vpop.permute.xlu1 %6134  ;;  %v6233_v58 = vadd.f32 %v7402_v39, %v6150_v57  ;;  %v6264_v18 = vmax.f32 %v6232_v40, 0.0 }
0x190b   :  { %v6287_v43 = vmul.f32 %v6255_v8, %v7706_v2  ;;  %v6230_v53 = vadd.f32 %v6135_v56, %v6046_v20  ;;  %v6260_v8 = vmax.f32 %v6228_v62, 0.0  ;;  %v6282_v10 = vmul.f32 %v6250_v21, %v7704_v1  ;;  %v6050_v56 = vld [vmem:[#allocation7 + $0x90] sm:$0xff] }
0x190c   :  { %v6265_v13 = vmax.f32 %v6233_v58, 0.0  ;;  %v6236_v62 = vadd.f32 %v7403_v24, %v8707_v49  ;;  %v6296_v21 = vmul.f32 %v6264_v18, %v7702_v0 }
0x190d   :  { %v6323_v29 = vadd.f32 %v6322_v22, %v6287_v43  ;;  %v6262_v19 = vmax.f32 %v6230_v53, 0.0  ;;  %v6292_v57 = vmul.f32 %v6260_v8, %v7702_v0  ;;  %v6313_v53 = vadd.f32 %v6312_v34, %v6282_v10 }
0x190e   :  { %v6120_v44 = vpop.permute.xlu0 %6119  ;;  %v6169_v52 = vpop.permute.xlu1 %6168  ;;  %v6297_v7 = vmul.f32 %v6265_v13, %v7700_v63  ;;  %v6268_v39 = vmax.f32 %v6236_v62, 0.0 }
0x190f   :  { %v6227_v31 = vadd.f32 %v7401_v59, %v6120_v44  ;;  %v6330_v44 = vadd.f32 %v6289_v25, %v6288_v9  ;;  %v6324_v20 = vrot.slane %v6323_v29, 4  ;;  %v6237_v9 = vadd.f32 %v6169_v52, %v6053_v36 }
0x1910   :  { %v6294_v41 = vmul.f32 %v6262_v19, %v7704_v1  ;;  %v6348_v24 = vadd.f32 %v6297_v7, %v6296_v21 }
0x1911   :  { %v6259_v14 = vmax.f32 %v6227_v31, 0.0  ;;  %v6325_v49 = vadd.f32 %v6324_v20, %v6323_v29  ;;  %v6269_v52 = vmax.f32 %v6237_v9, 0.0  ;;  %v7405_v29 = vld [vmem:[#allocation7 + $0xc0] sm:$0xff]  ;;  %v6051_v20 = vld [vmem:[#allocation7 + $0x98] sm:$0xff] }
0x1912   :  { %v8715_v15 = vpop.permute.xlu0 %6183  ;;  %v6154_v51 = vpop.permute.xlu1 %6153 }
0x1913   :  { %v6291_v43 = vmul.f32 %v6259_v14, %v7706_v2  ;;  %v6234_v48 = vadd.f32 %v6154_v51, %v6050_v56  ;;  %v6060_v14 = vld [vmem:[#allocation7 + $0xe0] sm:$0xff] }
0x1915   :  { %v6266_v56 = vmax.f32 %v6234_v48, 0.0 }
0x1916   :  { %v6082_v50 = vpop.permute.xlu0 %6081  ;;  %v6188_v59 = vpop.permute.xlu1 %6187 }
0x1917   :  { %v6219_v37 = vadd.f32 %v6082_v50, %v8516_v6  ;;  %v6331_v50 = vadd.f32 %v6330_v44, %v6290_v17  ;;  %v6339_v6 = vadd.f32 %v6293_v55, %v6292_v57  ;;  %v6057_v44 = vld [vmem:[#allocation7 + $0xc8] sm:$0xff]  ;;  %v7404_v17 = vld [vmem:[#allocation7 + $0xb0] sm:$0xff]  ;;  %v6240_v57 = vadd.f32 %v7405_v29, %v8715_v15 }
0x1918   :  { %v6241_v9 = vadd.f32 %v6188_v59, %v6057_v44 }
0x1919   :  { %v6251_v25 = vmax.f32 %v6219_v37, 0.0  ;;  %v6332_v36 = vadd.f32 %v6331_v50, %v6291_v43  ;;  %v6340_v51 = vadd.f32 %v6339_v6, %v6294_v41  ;;  %v6301_v43 = vmul.f32 %v6269_v52, %v7700_v63 }
0x191a   :  { %v6173_v45 = vpop.permute.xlu0 %6172  ;;  %v6139_v31 = vpop.permute.xlu1 %6138  ;;  %v6298_v41 = vmul.f32 %v6266_v56, %v7704_v1  ;;  %v6272_v7 = vmax.f32 %v6240_v57, 0.0 }
0x191b   :  { %v6231_v22 = vadd.f32 %v6139_v31, %v6047_v30  ;;  %v6283_v3 = vmul.f32 %v6251_v25, %v7706_v2  ;;  %v6238_v34 = vadd.f32 %v7404_v17, %v6173_v45  ;;  %v6326_v30 = vrot.slane %v6325_v49, 2 }
0x191c   :  { %v6333_v62 = vrot.slane %v6332_v36, 4  ;;  %v6300_v45 = vmul.f32 %v6268_v39, %v7702_v0  ;;  %v6304_v57 = vmul.f32 %v6272_v7, %v7702_v0 }
0x191d   :  { %v6263_v8 = vmax.f32 %v6231_v22, 0.0  ;;  %v6314_v58 = vadd.f32 %v6313_v53, %v6283_v3  ;;  %v6270_v48 = vmax.f32 %v6238_v34, 0.0  ;;  %v6055_v53 = vld [vmem:[#allocation7 + $0xb8] sm:$0xff]  ;;  %v6327_v3 = vadd.f32 %v6326_v30, %v6325_v49 }
0x191e   :  { %v6207_v40 = vpop.permute.xlu0 %6206  ;;  %v6203_v19 = vpop.permute.xlu1 %6202  ;;  %v6334_v52 = vadd.f32 %v6333_v62, %v6332_v36  ;;  %v6357_v59 = vadd.f32 %v6301_v43, %v6300_v45  ;;  %v6059_v30 = vld [vmem:[#allocation7 + $0xd8] sm:$0xff] }
0x191f   :  { %v6295_v55 = vmul.f32 %v6263_v8, %v7706_v2  ;;  %v6315_v10 = vrot.slane %v6314_v58, 4  ;;  %v6245_v37 = vadd.f32 %v6207_v40, %v8531_v54  ;;  %v6244_v18 = vadd.f32 %v6203_v19, %v6060_v14 }
0x1920   :  { %v6273_v40 = vmax.f32 %v6241_v9, 0.0  ;;  %v6302_v56 = vmul.f32 %v6270_v48, %v7704_v1  ;;  %v6335_v29 = vrot.slane %v6334_v52, 2  ;;  %v6328_v7 = vrot.slane %v6327_v3, 1 }
0x1921   :  { %v6341_v13 = vadd.f32 %v6340_v51, %v6295_v55  ;;  %v6316_v22 = vadd.f32 %v6315_v10, %v6314_v58  ;;  %v6277_v50 = vmax.f32 %v6245_v37, 0.0  ;;  %v6276_v8 = vmax.f32 %v6244_v18, 0.0 }
0x1922   :  { %v6192_v25 = vpop.permute.xlu0 %6191  ;;  %v6158_v31 = vpop.permute.xlu1 %6157  ;;  %v6349_v51 = vadd.f32 %v6348_v24, %v6298_v41  ;;  %v6358_v24 = vadd.f32 %v6357_v59, %v6302_v56 }
0x1923   :  { %v6342_v54 = vrot.slane %v6341_v13, 4  ;;  %v6242_v15 = vadd.f32 %v6192_v25, %v8537_v26  ;;  %v6235_v6 = vadd.f32 %v6158_v31, %v6051_v20  ;;  %v6317_v17 = vrot.slane %v6316_v22, 2 }
0x1924   :  { %v6309_v26 = vmul.f32 %v6277_v50, %v7700_v63  ;;  %v6308_v36 = vmul.f32 %v6276_v8, %v7702_v0 }
0x1925   :  { %v6343_v21 = vadd.f32 %v6342_v54, %v6341_v13  ;;  %v6267_v14 = vmax.f32 %v6235_v6, 0.0  ;;  %v6274_v34 = vmax.f32 %v6242_v15, 0.0  ;;  %v6305_v13 = vmul.f32 %v6273_v40, %v7700_v63 }
0x1926   :  { %v6211_v19 = vpop.permute.xlu0 %6210  ;;  %v6177_v39 = vpop.permute.xlu1 %6176  ;;  %v6318_v25 = vadd.f32 %v6317_v17, %v6316_v22  ;;  %v6375_v54 = vadd.f32 %v6309_v26, %v6308_v36  ;;  %v6336_v63 = vadd.f32 %v6335_v29, %v6334_v52  ;;  %v6329_v52 = vadd.f32 %v6328_v7, %v6327_v3 }
0x1927   :  { %v6246_v58 = vadd.f32 %v6211_v19, %v8543_v5  ;;  %v6239_v44 = vadd.f32 %v6177_v39, %v6055_v53  ;;  %v6299_v49 = vmul.f32 %v6267_v14, %v7706_v2  ;;  %v6344_v55 = vrot.slane %v6343_v21, 2 }
0x1928   :  { %v6306_v31 = vmul.f32 %v6274_v34, %v7704_v1  ;;  %v6366_v15 = vadd.f32 %v6305_v13, %v6304_v57 }
0x1929   :  { %v6278_v10 = vmax.f32 %v6246_v58, 0.0  ;;  %v6271_v37 = vmax.f32 %v6239_v44, 0.0  ;;  %v6350_v18 = vadd.f32 %v6349_v51, %v6299_v49  ;;  %v6345_v48 = vadd.f32 %v6344_v55, %v6343_v21 }
0x192a   :  { %v6215_v5 = vpop.permute.xlu0 %6214  ;;  %v6196_v20 = vpop.permute.xlu1 %6195  ;;  %v6367_v14 = vadd.f32 %v6366_v15, %v6306_v31  ;;  %v6337_v51 = vrot.slane %v6336_v63, 1 }
0x192b   :  { %v6310_v62 = vmul.f32 %v6278_v10, %v7704_v1  ;;  %v6303_v43 = vmul.f32 %v6271_v37, %v7706_v2  ;;  %v6247_v9 = vadd.f32 %v6215_v5, %v8549_v11  ;;  %v6351_v45 = vrot.slane %v6350_v18, 4 }
0x192c   :  { %v6243_v41 = vadd.f32 %v6196_v20, %v6059_v30  ;;  %v6319_v1 = vrot.slane %v6318_v25, 1  ;;  %v6346_v19 = vrot.slane %v6345_v48, 1  ;;  %v6338_v37 = vadd.f32 %v6337_v51, %v6336_v63 }
0x192d   :  { %v6359_v0 = vadd.f32 %v6358_v24, %v6303_v43  ;;  %v6279_v50 = vmax.f32 %v6247_v9, 0.0  ;;  %v6352_v6 = vadd.f32 %v6351_v45, %v6350_v18  ;;  %v6376_v8 = vadd.f32 %v6375_v54, %v6310_v62  ;;  %v7406_v45 = vld [vmem:[%s8889_s7] ss:$0 sm:$0xff] }
0x192e   :  { %v6275_v53 = vmax.f32 %v6243_v41, 0.0  ;;  %v6320_v49 = vadd.f32 %v6319_v1, %v6318_v25  ;;  %v6347_v55 = vadd.f32 %v6346_v19, %v6345_v48  ;;  %v6386_v62 = vadd.f32 %v8563_v4, %v6338_v37 }
0x192f   :  { %v6360_v59 = vrot.slane %v6359_v0, 4  ;;  %v6311_v40 = vmul.f32 %v6279_v50, %v7706_v2  ;;  %v6353_v11 = vrot.slane %v6352_v6, 2 }
0x1930   :  { %v6307_v22 = vmul.f32 %v6275_v53, %v7706_v2  ;;  %v6385_v2 = vadd.f32 %v8563_v4, %v6329_v52  ;;  %v6384_v5 = vadd.f32 %v8563_v4, %v6320_v49  ;;  %v6387_v3 = vadd.f32 %v8563_v4, %v6347_v55 }
0x1931   :  { %v6361_v39 = vadd.f32 %v6360_v59, %v6359_v0  ;;  %v6377_v21 = vadd.f32 %v6376_v8, %v6311_v40  ;;  %v6354_v56 = vadd.f32 %v6353_v11, %v6352_v6  ;;  %v6402_v63 = vrot.slane %v6386_v62, 6 }
0x1932   :  { %v6368_v58 = vadd.f32 %v6367_v14, %v6307_v22  ;;  %v6400_v25 = vrot.slane %v6385_v2, 7  ;;  %v6404_v54 = vrot.slane %v6387_v3, 5 }
0x1933   :  { %v6362_v44 = vrot.slane %v6361_v39, 2  ;;  %v6378_v17 = vrot.slane %v6377_v21, 4  ;;  %v6355_v26 = vrot.slane %v6354_v56, 1 }
0x1934   :  { %v6369_v34 = vrot.slane %v6368_v58, 4  ;;  %v6401_v50 = vsel %vm692_vm2, %v6400_v25, %v6384_v5 }
0x1935   :  { %v6363_v36 = vadd.f32 %v6362_v44, %v6361_v39  ;;  %v6379_v10 = vadd.f32 %v6378_v17, %v6377_v21  ;;  %v6356_v30 = vadd.f32 %v6355_v26, %v6354_v56 }
0x1936   :  { %v6370_v29 = vadd.f32 %v6369_v34, %v6368_v58 }
0x1937   :  { %v6364_v57 = vrot.slane %v6363_v36, 1  ;;  %v6380_v13 = vrot.slane %v6379_v10, 2  ;;  %v6388_v43 = vadd.f32 %v8563_v4, %v6356_v30  ;;  %v6403_v4 = vsel %vm695_vm3, %v6402_v63, %v6401_v50 }
0x1938   :  { %v6371_v18 = vrot.slane %v6370_v29, 2  ;;  %v6405_v59 = vsel %vm698_vm4, %v6404_v54, %v6403_v4 }
0x1939   :  { %v6365_v20 = vadd.f32 %v6364_v57, %v6363_v36  ;;  %v6381_v24 = vadd.f32 %v6380_v13, %v6379_v10  ;;  %v6406_v6 = vrot.slane %v6388_v43, 4 }
0x193a   :  { %v6372_v9 = vadd.f32 %v6371_v18, %v6370_v29 }
0x193b   :  { %v6382_v31 = vrot.slane %v6381_v24, 1  ;;  %v6389_v41 = vadd.f32 %v7406_v45, %v6365_v20  ;;  %v6407_v14 = vsel %vm701_vm5, %v6406_v6, %v6405_v59 }
0x193c   :  { %v6373_v48 = vrot.slane %v6372_v9, 1 }
0x193d   :  { %v6383_v0 = vadd.f32 %v6382_v31, %v6381_v24  ;;  %v6408_v7 = vrot.slane %v6389_v41, 3 }
0x193e   :  { %v6374_v15 = vadd.f32 %v6373_v48, %v6372_v9 }
0x193f   :  { %v6391_v53 = vadd.f32 %v7406_v45, %v6383_v0  ;;  %v6409_v22 = vsel %vm704_vm6, %v6408_v7, %v6407_v14 }
0x1940   :  { %v6390_v8 = vadd.f32 %v7406_v45, %v6374_v15 }
0x1941   :  { %v6412_v40 = vrot.slane %v6391_v53, 1 }
0x1942   :  { %v6410_v11 = vrot.slane %v6390_v8, 2 }
0x1944   :  { %v6411_v1 = vsel %vm707_vm7, %v6410_v11, %v6409_v22 }
0x1945   :  { %v6413_v19 = vsel %vm710_vm8, %v6412_v40, %v6411_v1 }
0x1946   :  { %6415 = vmax.xlane.f32.xlu1 %v6413_v19 }
0x19cf   :  { %v6416_v39 = vpop.xlane.xlu1 %6415 }
0x19d0   :  { %v6418_v21 = vrot.slane %v6416_v39, 1  ;;  %v6419_v51 = vrot.slane %v6416_v39, 2  ;;  %v6420_v56 = vrot.slane %v6416_v39, 3  ;;  %v6421_v58 = vrot.slane %v6416_v39, 4 }
0x19d1   :  { %v6422_v52 = vrot.slane %v6416_v39, 5  ;;  %v6423_v44 = vrot.slane %v6416_v39, 6  ;;  %v6424_v17 = vrot.slane %v6416_v39, 7  ;;  %v6433_v26 = vsub.f32 %v6384_v5, %v6416_v39 }
0x19d2   :  { %v6434_v34 = vsub.f32 %v6385_v2, %v6418_v21  ;;  %v6435_v49 = vsub.f32 %v6386_v62, %v6419_v51  ;;  %v6436_v55 = vsub.f32 %v6387_v3, %v6420_v56  ;;  %v6437_v36 = vsub.f32 %v6388_v43, %v6421_v58 }
0x19d3   :  { %v6438_v10 = vsub.f32 %v6389_v41, %v6422_v52  ;;  %v6439_v37 = vsub.f32 %v6390_v8, %v6423_v44  ;;  %v6441_v30 = vmul.f32 1.442695, %v6433_v26  ;;  %v6440_v18 = vsub.f32 %v6391_v53, %v6424_v17 }
0x19d4   :  { %v6443_v29 = vmul.f32 1.442695, %v6434_v34  ;;  %v6445_v57 = vmul.f32 1.442695, %v6435_v49  ;;  %v6447_v13 = vmul.f32 1.442695, %v6436_v55 }
0x19d5   :  { %7235 = vpow2.f32 %v6441_v30  ;;  %v6449_v20 = vmul.f32 1.442695, %v6437_v36  ;;  %v6451_v24 = vmul.f32 1.442695, %v6438_v10  ;;  %v6453_v9 = vmul.f32 1.442695, %v6439_v37 }
0x19d6   :  { %7237 = vpow2.f32 %v6443_v29  ;;  %v6455_v25 = vmul.f32 1.442695, %v6440_v18  ;;  %v6509_v55 = vld [vmem:[#allocation5 + $0x10] sm:$0xff] }
0x19d7   :  { %7239 = vpow2.f32 %v6445_v57 }
0x19d8   :  { %7241 = vpow2.f32 %v6447_v13 }
0x19d9   :  { %7243 = vpow2.f32 %v6449_v20 }
0x19da   :  { %7245 = vpow2.f32 %v6451_v24 }
0x19db   :  { %7247 = vpow2.f32 %v6453_v9 }
0x19dc   :  { %7249 = vpow2.f32 %v6455_v25 }
0x19e2   :  { %v7236_v2 = vpop.eup %7235 }
0x19e3   :  { %v7238_v5 = vpop.eup %7237 }
0x19e4   :  { %v7240_v3 = vpop.eup %7239  ;;  %v6465_v62 = vrot.slane %v7238_v5, 7 }
0x19e5   :  { %v7242_v43 = vpop.eup %7241  ;;  %v6467_v31 = vrot.slane %v7240_v3, 6 }
0x19e6   :  { %v7244_v45 = vpop.eup %7243  ;;  %v6466_v41 = vsel %vm692_vm2, %v6465_v62, %v7236_v2  ;;  %v6469_v48 = vrot.slane %v7242_v43, 5 }
0x19e7   :  { %v7246_v54 = vpop.eup %7245  ;;  %v6468_v0 = vsel %vm695_vm3, %v6467_v31, %v6466_v41  ;;  %v6471_v50 = vrot.slane %v7244_v45, 4 }
0x19e8   :  { %v7248_v63 = vpop.eup %7247  ;;  %v6470_v15 = vsel %vm698_vm4, %v6469_v48, %v6468_v0  ;;  %v6473_v6 = vrot.slane %v7246_v54, 3 }
0x19e9   :  { %v7250_v53 = vpop.eup %7249  ;;  %v6472_v7 = vsel %vm701_vm5, %v6471_v50, %v6470_v15  ;;  %v6475_v8 = vrot.slane %v7248_v63, 2 }
0x19ea   :  { %v6474_v4 = vsel %vm704_vm6, %v6473_v6, %v6472_v7  ;;  %v6477_v59 = vrot.slane %v7250_v53, 1 }
0x19eb   :  { %v6476_v40 = vsel %vm707_vm7, %v6475_v8, %v6474_v4  ;;  %v6520_v8 = vld [vmem:[#allocation5 + $0x68] sm:$0xff] }
0x19ec   :  { %v6478_v14 = vsel %vm710_vm8, %v6477_v59, %v6476_v40  ;;  %v6522_v40 = vld [vmem:[#allocation5 + $0x78] sm:$0xff] }
0x19ed   :  { %6480 = vadd.xlane.f32.xlu0 %v6478_v14 }
0x1a76   :  { %v6481_v11 = vpop.xlane.xlu0 %6480 }
0x1a77   :  { %7251 = vrcp.f32 %v6481_v11  ;;  %v8914_v11 = vmov 0  }
0x1a84   :  { %v7252_v22 = vpop.eup %7251 }
0x1a85   :  { %v6499_v1 = vmul.f32 %v7252_v22, %v7236_v2  ;;  %v6484_v19 = vrot.slane %v7252_v22, 1  ;;  %v6485_v39 = vrot.slane %v7252_v22, 2  ;;  %v6486_v58 = vrot.slane %v7252_v22, 3 }
0x1a86   :  { %v6487_v52 = vrot.slane %v7252_v22, 4  ;;  %v6488_v44 = vrot.slane %v7252_v22, 5  ;;  %v6489_v10 = vrot.slane %v7252_v22, 6  ;;  %v6490_v29 = vrot.slane %v7252_v22, 7 }
0x1a87   :  { %v6526_v21 = vrot.slane %v6499_v1, %v7680_v46  ;;  %v6500_v51 = vmul.f32 %v7238_v5, %v6484_v19  ;;  %v6501_v56 = vmul.f32 %v7240_v3, %v6485_v39  ;;  %v6502_v30 = vmul.f32 %v7242_v43, %v6486_v58 }
0x1a88   :  { %v6503_v57 = vmul.f32 %v7244_v45, %v6487_v52  ;;  %v6504_v20 = vmul.f32 %v7246_v54, %v6488_v44  ;;  %v6506_v25 = vmul.f32 %v7250_v53, %v6490_v29  ;;  %v6518_v53 = vld [vmem:[#allocation5 + $0x58] sm:$0xff] }
0x1a89   :  { %v6556_v17 = vmul.f32 %v6526_v21, %v8595_v33  ;;  %v6555_v26 = vmul.f32 %v6526_v21, %v8590_v60  ;;  %v6530_v34 = vrot.slane %v6500_v51, %v7680_v46  ;;  %v6788_v49 = vrot.slane %v6500_v51, 7 }
0x1a8a   :  { %v6790_v36 = vrot.slane %v6501_v56, 6  ;;  %v6534_v33 = vrot.slane %v6501_v56, %v7680_v46  ;;  %v6505_v60 = vmul.f32 %v7248_v63, %v6489_v10  ;;  %v6792_v9 = vrot.slane %v6502_v30, 5 }
0x1a8b   :  { %6573 = vadd.xlane.f32.xlu1 %v6556_v17  ;;  %6571 = vadd.xlane.f32.xlu0 %v6555_v26  ;;  %v6789_v37 = vsel %vm692_vm2, %v6788_v49, %v6499_v1  ;;  %v6558_v13 = vmul.f32 %v6530_v34, %v8600_v42  ;;  %v6557_v18 = vmul.f32 %v6530_v34, %v6509_v55  ;;  %v6794_v5 = vrot.slane %v6503_v57, 4 }
0x1a8c   :  { %v6791_v24 = vsel %vm695_vm3, %v6790_v36, %v6789_v37  ;;  %v6538_v2 = vrot.slane %v6502_v30, %v7680_v46  ;;  %v6560_v3 = vmul.f32 %v6534_v33, %v8618_v35  ;;  %v6559_v62 = vmul.f32 %v6534_v33, %v8608_v47  ;;  %v8915_v36 = vld [vmem:[#allocation18_spill] sm:$0xff] }
0x1a8d   :  { %v6796_v43 = vrot.slane %v6504_v20, 3  ;;  %v6793_v42 = vsel %vm698_vm4, %v6792_v9, %v6791_v24  ;;  %v6798_v45 = vrot.slane %v6505_v60, 2  ;;  %v6800_v48 = vrot.slane %v6506_v25, 1 }
0x1a8e   :  { %v6795_v31 = vsel %vm701_vm5, %v6794_v5, %v6793_v42  ;;  %v6562_v0 = vmul.f32 %v6538_v2, %v8625_v61  ;;  %v6561_v50 = vmul.f32 %v6538_v2, %v8622_v23  ;;  %v6542_v35 = vrot.slane %v6503_v57, %v7680_v46 }
0x1a8f   :  { %6577 = vadd.xlane.f32.xlu1 %v6558_v13  ;;  %6575 = vadd.xlane.f32.xlu0 %v6557_v18  ;;  %v6797_v41 = vsel %vm704_vm6, %v6796_v43, %v6795_v31  ;;  %v6546_v6 = vrot.slane %v6504_v20, %v7680_v46  ;;  %v6550_v23 = vrot.slane %v6505_v60, %v7680_v46 }
0x1a90   :  { %v6799_v54 = vsel %vm707_vm7, %v6798_v45, %v6797_v41  ;;  %v6564_v63 = vmul.f32 %v6542_v35, %v8632_v12  ;;  %v6563_v15 = vmul.f32 %v6542_v35, %v8629_v32  ;;  %v6554_v12 = vrot.slane %v6506_v25, %v7680_v46 }
0x1a91   :  { %v8791_v47 = vsel %vm710_vm8, %v6800_v48, %v6799_v54  ;;  %v6566_v7 = vmul.f32 %v6546_v6, %v6518_v53  ;;  %v6565_v61 = vmul.f32 %v6546_v6, %v8635_v28  ;;  %v6568_v4 = vmul.f32 %v6550_v23, %v6520_v8  ;;  %v94_v28 = vld [vmem:[%s8882_s0] sm:$0xff] }
0x1a92   :  { %v6567_v59 = vmul.f32 %v6550_v23, %v8638_v27  ;;  %v6570_v32 = vmul.f32 %v6554_v12, %v6522_v40  ;;  %v6569_v14 = vmul.f32 %v6554_v12, %v8641_v16  ;;  %vm1113_vm11 = vcmp.gt.s32.totalorder %v94_v28, 1  ;;  %v8842_v23 = vld [vmem:[%s8891_s9] ss:$0 sm:$0xff]  ;;  %s7550_s9 = smov [#allocation11]  }
0x1a93   :  { %6581 = vadd.xlane.f32.xlu1 %v6560_v3  ;;  %6579 = vadd.xlane.f32.xlu0 %v6559_v62  ;;  %v2028_v22 = vsel %vm1113_vm11, 1, %v8914_v11  ;;  %vm2062_vm12 = vcmp.gt.s32.totalorder %v94_v28, 2  ;;  %vm116_vm13 = vcmp.gt.s32.totalorder %v94_v28, 0  ;;  %vm3960_vm14 = vcmp.gt.s32.totalorder %v94_v28, 4  ;;  %s6823_s18 = sshll.u32 %s7550_s9, 4  ;;  %s6824_s18 = int_to_ptr.vmem [resolvable:$true] %s6823_s18 }
0x1a94   :  { %v2977_v46 = vsel %vm2062_vm12, 1, %v8914_v11  ;;  %v1081_v27 = vsel %vm116_vm13, 1, %v8914_v11  ;;  %vm3011_vm15 = vcmp.gt.s32.totalorder %v94_v28, 3  ;;  %v4875_v16 = vsel %vm3960_vm14, 1, %v8914_v11  ;;  %s7487_s19 = scalar_lea.vmem %s6824_s18, 896  ;;  %p7492_p7 = scmp.lt.s32.totalorder %s6824_s18, %s6824_s18 }
0x1a95   :  { %v3926_v1 = vsel %vm3011_vm15, 1, %v8914_v11  ;;  %vm5858_vm0 = vcmp.gt.s32.totalorder %v94_v28, 6  ;;  %vm4909_vm1 = vcmp.gt.s32.totalorder %v94_v28, 5  ;;  %p7488_p6 = scmp.ne.s32.totalorder %s6824_s18, %s7487_s19  ;;  %p7493_p8 = scmp.lt.s32.totalorder %s7487_s19, %s7487_s19 }
0x1a96   :  { %v6772_v19 = vsel %vm5858_vm0, 1, %v8914_v11  ;;  %v5824_v39 = vsel %vm4909_vm1, 1, %v8914_v11  ;;  %v8918_v11 = vld [vmem:[#allocation20_spill] sm:$0xff] }
0x1a97   :  { %6585 = vadd.xlane.f32.xlu1 %v6562_v0  ;;  %6583 = vadd.xlane.f32.xlu0 %v6561_v50  ;;  %p7494_p9 = por %p7493_p8, %p7492_p7 }
0x1a99   :  { %p7495_p10 = pnand %p7494_p9, %p7488_p6 }
0x1a9b   :  { %6589 = vadd.xlane.f32.xlu1 %v6564_v63  ;;  %6587 = vadd.xlane.f32.xlu0 %v6563_v15 }
0x1a9f   :  { %6593 = vadd.xlane.f32.xlu1 %v6566_v7  ;;  %6591 = vadd.xlane.f32.xlu0 %v6565_v61 }
0x1aa3   :  { %6597 = vadd.xlane.f32.xlu1 %v6568_v4  ;;  %6595 = vadd.xlane.f32.xlu0 %v6567_v59  ;;  %v8916_v59 = vld [vmem:[#allocation22_spill] sm:$0xff] }
0x1aa4   :  { %v2027_v12 = vadd.f32 %v8842_v23, %v8916_v59 }
0x1aa7   :  { %6601 = vadd.xlane.f32.xlu1 %v6570_v32  ;;  %6599 = vadd.xlane.f32.xlu0 %v6569_v14  ;;  %v8917_v14 = vld [vmem:[#allocation21_spill] sm:$0xff] }
0x1ab8   :  { %2030 = vperm.xlu1 %7070, %v2028_v22   ;;  %v1080_v22 = vadd.f32 %v8842_v23, %v8918_v11 }
0x1abc   :  { %2979 = vperm.xlu1 %7070, %v2977_v46   ;;  %v8919_v46 = vld [vmem:[#allocation24_spill] sm:$0xff] }
0x1abd   :  { %1083 = vperm.xlu0 %7069, %v1081_v27   ;;  %v2976_v27 = vadd.f32 %v8842_v23, %v8919_v46 }
0x1ac0   :  { %4877 = vperm.xlu1 %7070, %v4875_v16  }
0x1ac1   :  { %3928 = vperm.xlu0 %7069, %v3926_v1  }
0x1ac4   :  { %6774 = vperm.xlu1 %7070, %v6772_v19  }
0x1ac5   :  { %5826 = vperm.xlu0 %7069, %v5824_v39   ;;  %v8920_v39 = vld [vmem:[#allocation23_spill] sm:$0xff] }
0x1b14   :  { %v6574_v21 = vpop.xlane.xlu1 %6573  ;;  %v6572_v51 = vpop.xlane.xlu0 %6571 }
0x1b15   :  { %v6626_v13 = vrot.slane %v6574_v21, %v7670_v38  ;;  %v6622_v18 = vrot.slane %v6572_v51, %v8915_v36 }
0x1b17   :  { %v6627_v43 = vsel %vm928_vm9, %v6626_v13, %v6622_v18 }
0x1b18   :  { %v6578_v56 = vpop.xlane.xlu1 %6577  ;;  %v6576_v58 = vpop.xlane.xlu0 %6575 }
0x1b19   :  { %v6635_v55 = vrot.slane %v6578_v56, %v7670_v38  ;;  %v6631_v10 = vrot.slane %v6576_v58, %v8915_v36  ;;  %v8921_v56 = vld [vmem:[#allocation19_spill] sm:$0xff] }
0x1b1b   :  { %v6636_v9 = vsel %vm928_vm9, %v6635_v55, %v6631_v10 }
0x1b1c   :  { %v6582_v52 = vpop.xlane.xlu1 %6581  ;;  %v6580_v44 = vpop.xlane.xlu0 %6579  ;;  %v6691_v41 = vsel %vm692_vm2, %v6636_v9, %v6627_v43 }
0x1b1d   :  { %v6644_v37 = vrot.slane %v6582_v52, %v7670_v38  ;;  %v6640_v30 = vrot.slane %v6580_v44, %v8915_v36  ;;  %v8922_v52 = vld [vmem:[#allocation26_spill] sm:$0xff] }
0x1b1e   :  { %v3925_v44 = vadd.f32 %v8842_v23, %v8922_v52 }
0x1b1f   :  { %v6645_v5 = vsel %vm928_vm9, %v6644_v37, %v6640_v30  ;;  %v8925_v30 = vld [vmem:[#allocation25_spill] sm:$0xff] }
0x1b20   :  { %v6586_v17 = vpop.xlane.xlu1 %6585  ;;  %v6584_v26 = vpop.xlane.xlu0 %6583  ;;  %v6692_v54 = vsel %vm695_vm3, %v6645_v5, %v6691_v41 }
0x1b21   :  { %v6653_v33 = vrot.slane %v6586_v17, %v7670_v38  ;;  %v6649_v20 = vrot.slane %v6584_v26, %v8915_v36  ;;  %v8923_v17 = vld [vmem:[#allocation28_spill] sm:$0xff] }
0x1b22   :  { %v4874_v26 = vadd.f32 %v8842_v23, %v8923_v17 }
0x1b23   :  { %v6654_v42 = vsel %vm928_vm9, %v6653_v33, %v6649_v20 }
0x1b24   :  { %v6590_v34 = vpop.xlane.xlu1 %6589  ;;  %v6588_v49 = vpop.xlane.xlu0 %6587  ;;  %v6693_v50 = vsel %vm698_vm4, %v6654_v42, %v6692_v54 }
0x1b25   :  { %v6662_v60 = vrot.slane %v6590_v34, %v7670_v38  ;;  %v6658_v24 = vrot.slane %v6588_v49, %v8915_v36 }
0x1b27   :  { %v6663_v48 = vsel %vm928_vm9, %v6662_v60, %v6658_v24  ;;  %v8927_v24 = vld [vmem:[#allocation29_spill] sm:$0xff] }
0x1b28   :  { %v6594_v29 = vpop.xlane.xlu1 %6593  ;;  %v6592_v57 = vpop.xlane.xlu0 %6591  ;;  %v6694_v6 = vsel %vm701_vm5, %v6663_v48, %v6693_v50 }
0x1b29   :  { %v6671_v25 = vrot.slane %v6594_v29, %v7670_v38  ;;  %v6667_v2 = vrot.slane %v6592_v57, %v8915_v36  ;;  %v8926_v57 = vld [vmem:[#allocation30_spill] sm:$0xff] }
0x1b2a   :  { %v5823_v13 = vadd.f32 %v8842_v23, %v8926_v57 }
0x1b2b   :  { %v6672_v0 = vsel %vm928_vm9, %v6671_v25, %v6667_v2 }
0x1b2c   :  { %v6598_v3 = vpop.xlane.xlu1 %6597  ;;  %v6596_v62 = vpop.xlane.xlu0 %6595  ;;  %v6695_v61 = vsel %vm704_vm6, %v6672_v0, %v6694_v6 }
0x1b2d   :  { %v6680_v31 = vrot.slane %v6598_v3, %v7670_v38  ;;  %v6676_v45 = vrot.slane %v6596_v62, %v8915_v36 }
0x1b2f   :  { %v6681_v35 = vsel %vm928_vm9, %v6680_v31, %v6676_v45 }
0x1b30   :  { %v6602_v63 = vpop.xlane.xlu1 %6601  ;;  %v6600_v15 = vpop.xlane.xlu0 %6599  ;;  %v6696_v8 = vsel %vm707_vm7, %v6681_v35, %v6695_v61 }
0x1b31   :  { %v6689_v53 = vrot.slane %v6602_v63, %v7670_v38  ;;  %v6685_v7 = vrot.slane %v6600_v15, %v8915_v36  ;;  %v8924_v36 = vld [vmem:[#allocation27_spill] sm:$0xff] }
0x1b33   :  { %v6690_v4 = vsel %vm928_vm9, %v6689_v53, %v6685_v7 }
0x1b34   :  { %v2031_v40 = vpop.permute.xlu1 %2030  ;;  %v6697_v32 = vsel %vm710_vm8, %v6690_v4, %v6696_v8 }
0x1b35   :  { %vm2032_vm2 = vcmp.eq.s32.totalorder %v2031_v40, 1  ;;  %7052 = vmatmul.mubr.msk.f32.vlgmr.msra.gmra.mxu0 %vm1000_vm10, %v6697_v32 }
0x1b36   :  { %v2033_v38 = vsel %vm2032_vm2, %v2027_v12, 0.0  ;;  %v2059_v28 = vsel %vm2032_vm2, %v8917_v14, 0.0 }
0x1b37   :  { %2035 = vst [vmem:[#allocation10 + $0x8] sm:$0xff] %v2033_v38  ;;  %2061 = vst [vmem:[#allocation11 + $0x8] sm:$0xff] %v2059_v28 }
0x1b38   :  { %v2980_v16 = vpop.permute.xlu1 %2979  ;;  %v1084_v1 = vpop.permute.xlu0 %1083 }
0x1b39   :  { %vm2981_vm3 = vcmp.eq.s32.totalorder %v2980_v16, 1  ;;  %vm1085_vm4 = vcmp.eq.s32.totalorder %v1084_v1, 1 }
0x1b3a   :  { %v2982_v19 = vsel %vm2981_vm3, %v2976_v27, 0.0  ;;  %v3008_v21 = vsel %vm2981_vm3, %v8920_v39, 0.0  ;;  %v1086_v51 = vsel %vm1085_vm4, %v1080_v22, 0.0  ;;  %v1111_v58 = vsel %vm1085_vm4, %v8921_v56, 0.0 }
0x1b3b   :  { %2984 = vst [vmem:[#allocation10 + $0x10] sm:$0xff] %v2982_v19  ;;  %3010 = vst [vmem:[#allocation11 + $0x10] sm:$0xff] %v3008_v21 }
0x1b3c   :  { %1087 = vst [vmem:[#allocation10] sm:$0xff] %v1086_v51  ;;  %1112 = vst [vmem:[#allocation11] sm:$0xff] %v1111_v58  ;;  %v4878_v34 = vpop.permute.xlu1 %4877  ;;  %v3929_v49 = vpop.permute.xlu0 %3928 }
0x1b3d   :  { %vm4879_vm5 = vcmp.eq.s32.totalorder %v4878_v34, 1  ;;  %vm3930_vm6 = vcmp.eq.s32.totalorder %v3929_v49, 1 }
0x1b3e   :  { %v4880_v55 = vsel %vm4879_vm5, %v4874_v26, 0.0  ;;  %v4906_v10 = vsel %vm4879_vm5, %v8924_v36, 0.0  ;;  %v3931_v37 = vsel %vm3930_vm6, %v3925_v44, 0.0  ;;  %v3957_v29 = vsel %vm3930_vm6, %v8925_v30, 0.0 }
0x1b3f   :  { %4882 = vst [vmem:[#allocation10 + $0x20] sm:$0xff] %v4880_v55  ;;  %4908 = vst [vmem:[#allocation11 + $0x20] sm:$0xff] %v4906_v10 }
0x1b40   :  { %3933 = vst [vmem:[#allocation10 + $0x18] sm:$0xff] %v3931_v37  ;;  %3959 = vst [vmem:[#allocation11 + $0x18] sm:$0xff] %v3957_v29  ;;  %v6775_v18 = vpop.permute.xlu1 %6774  ;;  %v5827_v33 = vpop.permute.xlu0 %5826 }
0x1b41   :  { %vm6776_vm7 = vcmp.eq.s32.totalorder %v6775_v18, 1  ;;  %vm5828_vm8 = vcmp.eq.s32.totalorder %v5827_v33, 1 }
0x1b42   :  { %v6803_v20 = vsel %vm6776_vm7, %v8791_v47, 0.0  ;;  %v5829_v60 = vsel %vm5828_vm8, %v5823_v13, 0.0  ;;  %v5855_v9 = vsel %vm5828_vm8, %v8927_v24, 0.0 }
0x1b43   :  { %6805 = vst [vmem:[#allocation11 + $0x30] sm:$0xff] %v6803_v20  ;;  %5831 = vst [vmem:[#allocation10 + $0x28] sm:$0xff] %v5829_v60 }
0x1b44   :  { %5857 = vst [vmem:[#allocation11 + $0x28] sm:$0xff] %v5855_v9 }
0x1b45   :  { %7498 = shalt.err (!%p7495_p10)
}
0x1b46   :  { %6829 = dma.vmem_to_hbm [thread:$0]  %s6824_s18, 896, %s8893_s11, [#allocation12], %s7539_s22, %s7539_s22, %s7540_s23   ;;  %v5958_v47 = vpop.f32.mrf.mxu0 }
0x1b47   :  { %s7551_s24 = smov [#allocation10]  }
0x1b48   :  { %s6811_s25 = sshll.u32 %s7551_s24, 4  ;;  %s6812_s25 = int_to_ptr.vmem [resolvable:$true] %s6811_s25 }
0x1b49   :  { %s7507_s26 = scalar_lea.vmem %s6812_s25, 896  ;;  %p7512_p12 = scmp.lt.s32.totalorder %s6812_s25, %s6812_s25 }
0x1b4a   :  { %p7508_p11 = scmp.ne.s32.totalorder %s6812_s25, %s7507_s26  ;;  %p7513_p13 = scmp.lt.s32.totalorder %s7507_s26, %s7507_s26 }
0x1b4c   :  { %p7514_p0 = por %p7513_p13, %p7512_p12 }
0x1b4e   :  { %p7515_p1 = pnand %p7514_p0, %p7508_p11 }
0x1bf5   :  { %v6766_v25 = vpop.f32.mrf.mxu0 }
0x1bf6   :  { %v6770_v2 = vadd.f32 %v6766_v25, %v5958_v47 }
0x1bf7   :  { %v7053_v5 = vpop.f32.mrf.mxu0 }
0x1bf8   :  { %v6771_v3 = vadd.f32 %v8842_v23, %v6770_v2 }
0x1bfa   :  { %v6777_v62 = vsel %vm6776_vm7, %v6771_v3, 0.0 }
0x1bfb   :  { %6779 = vst [vmem:[#allocation10 + $0x30] sm:$0xff] %v6777_v62 }
0x1bfc   :  { %7518 = shalt.err (!%p7515_p1)
}
0x1bfd   :  { %6817 = dma.vmem_to_hbm [thread:$0]  %s6812_s25, 896, %s8892_s10, [#allocation4], %s7539_s22, %s7539_s22, %s7540_s23  }
0x1bfe   :  { %7533 = dma.done.wait [#allocation4], 896  }
0x1bff   :  { %7534 = vsyncadd [#allocation4], 4294966400 }
0x1c00   :  { %7535 = dma.done.wait [#allocation12], 896  }
0x1c01   :  { %7536 = vsyncadd [#allocation12], 4294966400 }
0x1c02   :  { %6836 = vsyncpa [#allocation3], 1 }
0x1c03   :  { %6837 = vsyncpa [#allocation6], 1 }
0x1c04   :  { %6838 = vsyncpa [#allocation9], 1 }
0x1c05   :  { %6839 = vsyncpa [#allocation4], 1 }
0x1c06   :  { %6840 = vsyncpa [#allocation12], 1 }

</bundles_post_ra>
